<compile_context>
chip_gen: v5e
topology: v5e:2x2
jax: 0.10.0
libtpu: 0.0.40
codegen_flags: <defaults>
</compile_context>

<pallas_src>
import numpy as np
import jax
import jax.numpy as jnp
from jax.experimental import pallas as pl
from jax.experimental.pallas import tpu as pltpu


def _pos2d_expand_kernel(embed_ref, cy_ref, cx_ref, phase_ref, o_ref):
    """Expand flattened y/x embeds into interleaved sine/cosine positional features.

    embed_ref : (1, 2, t_hw)  f32   row 0 = y_embed (flattened h*W+w), row 1 = x_embed
    cy_ref    : (tf, 1)       f32   1/dim_t for pos_y channels, 0 for pos_x channels
    cx_ref    : (tf, 1)       f32   1/dim_t for pos_x channels, 0 for pos_y channels
    phase_ref : (tf, 1)       f32   0 (-> sin) for even feature idx, pi/2 (-> cos) for odd
    o_ref     : (1, tf, t_hw) f32   NCHW-flattened output tile
    """
    y = embed_ref[0, 0:1, :]                       # (1, t_hw)
    x = embed_ref[0, 1:2, :]                       # (1, t_hw)
    # (1,t_hw) x (tf,1) -> (tf,t_hw); channel selection is exact because the "other"
    # coefficient is exactly 0.0.
    arg = y * cy_ref[...] + x * cx_ref[...] + phase_ref[...]
    o_ref[0] = jnp.sin(arg)                        # single transcendental per element


def _choose_tiles(two_f, hw, budget_bytes=8 * 1024 * 1024):
    """Pick (feature_tile, spatial_tile) so one f32 output block fits the VMEM budget.

    feature_tile divides 2F and is a multiple of 8 (or equals 2F);
    spatial_tile divides H*W and is a multiple of 128 (or equals H*W)."""
    feat_cands = [two_f] + [d for d in range(8, two_f, 8) if two_f % d == 0]

    def best_feat(t_hw):
        fitting = [d for d in feat_cands if d * t_hw * 4 <= budget_bytes]
        return max(fitting) if fitting else None

    tf = best_feat(hw)
    if tf is not None:
        return tf, hw
    if hw % 128 == 0:
        # Even tf = 8 overflows with full H*W: shrink the spatial tile instead.
        for t_hw in sorted({d for d in range(128, hw, 128) if hw % d == 0}, reverse=True):
            tf = best_feat(t_hw)
            if tf is not None:
                return tf, t_hw
    # Last resort (H*W not tileable to 128-multiples): smallest feature tile, full spatial.
    return min(feat_cands), hw


def positional_encoding_2d(x, mask=None, *, num_pos_feats=64, temperature=10000,
                           normalize=False, scale=None, feat_block=None,
                           spatial_block=None):
    """JAX/Pallas equivalent of PositionalEncoding2D.forward.

    x    : (N, C, H, W) array (only its shape is used, as in the torch module)
    mask : optional (N, H, W) boolean mask; None -> all-False mask (torch default path)
    returns (N, 2*num_pos_feats, H, W) float32 (NCHW, matching the torch output)
    """
    if scale is not None and normalize is False:
        raise ValueError("normalize should be True if scale is passed")
    if scale is None:
        scale = 2 * np.pi
    scale = float(scale)

    n, c, h, w = x.shape
    f = int(num_pos_feats)
    two_f = 2 * f
    hw = h * w
    eps = 1e-6

    # ---- per-image y/x embeds, flattened to (.., 2, H*W) -------------------------------
    # TODO(synk): the masked-path cumsum/normalize below is O(N*H*W) plain-JAX glue in the
    # wrapper (the kernel handles the O(N*2F*H*W) expansion, which dominates by 2F x).
    if mask is None:
        # Fast path: cumsum of ones is just iota+1; identical for every batch element.
        y2d = jnp.broadcast_to(jnp.arange(1, h + 1, dtype=jnp.float32)[:, None], (h, w))
        x2d = jnp.broadcast_to(jnp.arange(1, w + 1, dtype=jnp.float32)[None, :], (h, w))
        if normalize:
            y2d = (y2d - 0.5) / (float(h) + eps) * scale
            x2d = (x2d - 0.5) / (float(w) + eps) * scale
        embed = jnp.stack([y2d.reshape(hw), x2d.reshape(hw)], axis=0)[None]       # (1,2,HW)
        embed_index_map = lambda b, j, s: (0, 0, s)       # shared across batch
    else:
        not_mask = 1.0 - mask.astype(jnp.float32)                                 # (N,H,W)
        y_embed = jnp.cumsum(not_mask, axis=1)
        x_embed = jnp.cumsum(not_mask, axis=2)
        if normalize:
            y_embed = (y_embed - 0.5) / (y_embed[:, -1:, :] + eps) * scale
            x_embed = (x_embed - 0.5) / (x_embed[:, :, -1:] + eps) * scale
        embed = jnp.stack([y_embed.reshape(n, hw), x_embed.reshape(n, hw)], axis=1)  # (N,2,HW)
        embed_index_map = lambda b, j, s: (b, 0, s)

    # ---- per-channel coefficients (compile-time constants) -----------------------------
    # dim_t = temperature ** (2 * (i // 2) / num_pos_feats);  fold reciprocal + cos->sin phase.
    i = np.arange(f, dtype=np.float64)
    dim_t = np.power(float(temperature), 2.0 * np.floor(i / 2.0) / float(f))
    inv = (1.0 / dim_t).astype(np.float32)                                        # (F,)
    phase_f = np.where((np.arange(f) % 2) == 0, 0.0, np.pi / 2.0).astype(np.float32)
    zeros_f = np.zeros((f,), np.float32)
    cy = jnp.asarray(np.concatenate([inv, zeros_f])[:, None])                     # (2F,1) pos_y first
    cx = jnp.asarray(np.concatenate([zeros_f, inv])[:, None])                     # (2F,1)
    ph = jnp.asarray(np.concatenate([phase_f, phase_f])[:, None])                 # (2F,1)

    # ---- tiling -------------------------------------------------------------------------
    auto_tf, auto_hw = _choose_tiles(two_f, hw)
    tf = feat_block if feat_block is not None else auto_tf
    t_hw = spatial_block if spatial_block is not None else auto_hw
    if two_f % tf != 0 or not (tf % 8 == 0 or tf == two_f):
        raise ValueError(f"feat_block={tf} must divide 2*num_pos_feats={two_f} "
                         f"and be a multiple of 8 (or equal to 2*num_pos_feats)")
    if hw % t_hw != 0 or not (t_hw % 128 == 0 or t_hw == hw):
        raise ValueError(f"spatial_block={t_hw} must divide H*W={hw} "
                         f"and be a multiple of 128 (or equal to H*W)")
    n_ft = two_f // tf
    n_sp = hw // t_hw

    out_flat = pl.pallas_call(
        _pos2d_expand_kernel,
        out_shape=jax.ShapeDtypeStruct((n, two_f, hw), jnp.float32),
        grid_spec=pltpu.PrefetchScalarGridSpec(
            num_scalar_prefetch=0,
            grid=(n, n_ft, n_sp),
            in_specs=[
                pl.BlockSpec((1, 2, t_hw), embed_index_map),
                pl.BlockSpec((tf, 1), lambda b, j, s: (j, 0)),
                pl.BlockSpec((tf, 1), lambda b, j, s: (j, 0)),
                pl.BlockSpec((tf, 1), lambda b, j, s: (j, 0)),
            ],
            out_specs=pl.BlockSpec((1, tf, t_hw), lambda b, j, s: (b, j, s)),
        ),
        compiler_params=pltpu.CompilerParams(
            dimension_semantics=("parallel", "parallel", "parallel")),
    )(embed, cy, cx, ph)

    # Contiguous minor-dim split (N, 2F, H*W) -> (N, 2F, H, W): layout-preserving,
    # no transpose / no extra HBM pass over the dominant output tensor.
    return out_flat.reshape(n, two_f, h, w)


def _reference(x, mask, num_pos_feats, temperature, normalize, scale):
    """Pure-JAX mirror of the torch forward (all paths)."""
    n, c, h, w = x.shape
    if mask is None:
        mask = jnp.zeros((n, h, w), bool)
    not_mask = (~mask).astype(jnp.float32)
    y_embed = jnp.cumsum(not_mask, axis=1)
    x_embed = jnp.cumsum(not_mask, axis=2)
    if normalize:
        eps = 1e-6
        y_embed = (y_embed - 0.5) / (y_embed[:, -1:, :] + eps) * scale
        x_embed = (x_embed - 0.5) / (x_embed[:, :, -1:] + eps) * scale
    i = jnp.arange(num_pos_feats, dtype=jnp.float32)
    dim_t = jnp.power(jnp.float32(temperature), 2.0 * jnp.floor(i / 2.0) / num_pos_feats)
    pos_x = x_embed[:, :, :, None] / dim_t
    pos_y = y_embed[:, :, :, None] / dim_t
    pos_x = jnp.stack((jnp.sin(pos_x[..., 0::2]), jnp.cos(pos_x[..., 1::2])), axis=4).reshape(n, h, w, -1)
    pos_y = jnp.stack((jnp.sin(pos_y[..., 0::2]), jnp.cos(pos_y[..., 1::2])), axis=4).reshape(n, h, w, -1)
    pos = jnp.concatenate((pos_y, pos_x), axis=3)
    return jnp.transpose(pos, (0, 3, 1, 2))


if __name__ == "__main__":
    key = jax.random.PRNGKey(0)
    N, C, H, W = 2, 4, 16, 16
    NUM_POS_FEATS = 64          # module default is 160; small value for the example
    x = jax.random.normal(key, (N, C, H, W), dtype=jnp.float32)

    # Path 1: torch default path (mask=None, normalize=False)
    pos = positional_encoding_2d(x, mask=None, num_pos_feats=NUM_POS_FEATS)
    pos = jax.block_until_ready(pos)
    assert pos.shape == (N, 2 * NUM_POS_FEATS, H, W), pos.shape
    assert pos.dtype == jnp.float32
    ref = jax.block_until_ready(_reference(x, None, NUM_POS_FEATS, 10000, False, 2 * np.pi))
    np.testing.assert_allclose(np.asarray(pos), np.asarray(ref), rtol=2e-3, atol=2e-3)

    # Path 2: explicit boolean mask + normalize=True
    mask = jax.random.bernoulli(jax.random.PRNGKey(1), 0.3, (N, H, W))
    pos2 = jax.block_until_ready(
        positional_encoding_2d(x, mask=mask, num_pos_feats=NUM_POS_FEATS, normalize=True))
    ref2 = jax.block_until_ready(
        _reference(x, mask, NUM_POS_FEATS, 10000, True, 2 * np.pi))
    np.testing.assert_allclose(np.asarray(pos2), np.asarray(ref2), rtol=2e-3, atol=2e-3)

    # Path 3: forced feature + spatial tiling (exercises the multi-block grid path)
    pos3 = jax.block_until_ready(
        positional_encoding_2d(x, mask=None, num_pos_feats=NUM_POS_FEATS,
                               feat_block=16, spatial_block=128))
    np.testing.assert_allclose(np.asarray(pos3), np.asarray(ref), rtol=2e-3, atol=2e-3)

    print("KERNEL_OK")
</pallas_src>

<mosaic_0001>
module attributes {stable_mosaic.version = 11 : i64} {
  func.func @_pos2d_expand_kernel(%arg0: i32, %arg1: i32, %arg2: i32, %arg3: memref<1x2x256xf32, #tpu.memory_space<vmem>>, %arg4: memref<128x1xf32, #tpu.memory_space<vmem>>, %arg5: memref<128x1xf32, #tpu.memory_space<vmem>>, %arg6: memref<128x1xf32, #tpu.memory_space<vmem>>, %arg7: memref<1x128x256xf32, #tpu.memory_space<vmem>>) attributes {dimension_semantics = [#tpu.dimension_semantics<parallel>, #tpu.dimension_semantics<parallel>, #tpu.dimension_semantics<parallel>], iteration_bounds = array<i64: 2, 1, 1>, scalar_prefetch = 0 : i64, scratch_operands = 0 : i64, tpu.core_type = #tpu.core_type<tc>, window_params = [{transform_indices = @transform_0, window_bounds = array<i64: 1, 2, 256>}, {transform_indices = @transform_1, window_bounds = array<i64: 128, 1>}, {transform_indices = @transform_2, window_bounds = array<i64: 128, 1>}, {transform_indices = @transform_3, window_bounds = array<i64: 128, 1>}, {transform_indices = @transform_4, window_bounds = array<i64: 1, 128, 256>}]} {
    %c0 = arith.constant 0 : index
    %c0_0 = arith.constant 0 : index
    %c0_1 = arith.constant 0 : index
    %0 = vector.load %arg3[%c0, %c0_0, %c0_1] : memref<1x2x256xf32, #tpu.memory_space<vmem>>, vector<1x1x256xf32>
    %1 = vector.shape_cast %0 : vector<1x1x256xf32> to vector<1x256xf32>
    %c0_2 = arith.constant 0 : index
    %c1 = arith.constant 1 : index
    %c0_3 = arith.constant 0 : index
    %2 = vector.load %arg3[%c0_2, %c1, %c0_3] : memref<1x2x256xf32, #tpu.memory_space<vmem>>, vector<1x1x256xf32>
    %3 = vector.shape_cast %2 : vector<1x1x256xf32> to vector<1x256xf32>
    %c0_4 = arith.constant 0 : index
    %c0_5 = arith.constant 0 : index
    %4 = vector.load %arg4[%c0_4, %c0_5] : memref<128x1xf32, #tpu.memory_space<vmem>>, vector<128x1xf32>
    %5 = vector.broadcast %1 : vector<1x256xf32> to vector<128x256xf32>
    %6 = vector.broadcast %4 : vector<128x1xf32> to vector<128x256xf32>
    %7 = arith.mulf %5, %6 : vector<128x256xf32>
    %c0_6 = arith.constant 0 : index
    %c0_7 = arith.constant 0 : index
    %8 = vector.load %arg5[%c0_6, %c0_7] : memref<128x1xf32, #tpu.memory_space<vmem>>, vector<128x1xf32>
    %9 = vector.broadcast %3 : vector<1x256xf32> to vector<128x256xf32>
    %10 = vector.broadcast %8 : vector<128x1xf32> to vector<128x256xf32>
    %11 = arith.mulf %9, %10 : vector<128x256xf32>
    %12 = arith.addf %7, %11 : vector<128x256xf32>
    %c0_8 = arith.constant 0 : index
    %c0_9 = arith.constant 0 : index
    %13 = vector.load %arg6[%c0_8, %c0_9] : memref<128x1xf32, #tpu.memory_space<vmem>>, vector<128x1xf32>
    %14 = vector.broadcast %13 : vector<128x1xf32> to vector<128x256xf32>
    %15 = arith.addf %12, %14 : vector<128x256xf32>
    %16 = math.sin %15 : vector<128x256xf32>
    %c0_10 = arith.constant 0 : index
    %c0_11 = arith.constant 0 : index
    %c0_12 = arith.constant 0 : index
    %17 = vector.load %arg7[%c0_10, %c0_11, %c0_12] : memref<1x128x256xf32, #tpu.memory_space<vmem>>, vector<1x128x256xf32>
    %18 = vector.shape_cast %17 : vector<1x128x256xf32> to vector<128x256xf32>
    %19 = vector.shape_cast %16 : vector<128x256xf32> to vector<1x128x256xf32>
    tpu.vector_store %arg7[%c0_10, %c0_11, %c0_12], %19 {strides = array<i32>} : memref<1x128x256xf32, #tpu.memory_space<vmem>>, vector<1x128x256xf32>,
    return
  }
  func.func @transform_0(%arg0: i32, %arg1: i32, %arg2: i32) -> (i32, i32, i32) {
    %c0_i32 = arith.constant 0 : i32
    %c0_i32_0 = arith.constant 0 : i32
    %c0_i32_1 = arith.constant 0 : i32
    return %c0_i32, %c0_i32_0, %arg2 : i32, i32, i32
  }
  func.func @transform_1(%arg0: i32, %arg1: i32, %arg2: i32) -> (i32, i32) {
    %c0_i32 = arith.constant 0 : i32
    %c0_i32_0 = arith.constant 0 : i32
    return %arg1, %c0_i32 : i32, i32
  }
  func.func @transform_2(%arg0: i32, %arg1: i32, %arg2: i32) -> (i32, i32) {
    %c0_i32 = arith.constant 0 : i32
    %c0_i32_0 = arith.constant 0 : i32
    return %arg1, %c0_i32 : i32, i32
  }
  func.func @transform_3(%arg0: i32, %arg1: i32, %arg2: i32) -> (i32, i32) {
    %c0_i32 = arith.constant 0 : i32
    %c0_i32_0 = arith.constant 0 : i32
    return %arg1, %c0_i32 : i32, i32
  }
  func.func @transform_4(%arg0: i32, %arg1: i32, %arg2: i32) -> (i32, i32, i32) {
    %c0_i32 = arith.constant 0 : i32
    return %arg0, %arg1, %arg2 : i32, i32, i32
  }
}

</mosaic_0001>

<bundles_post_ra>
// kernel: tpu_custom_call.1
= control target key start
LH: loop header
LB: loop body
LE: loop exit
PB: predicated region body
PF: predicated region fallthrough
CT: control target
= control target key end

     0   :  { %9 = vsyncpa [#allocation3], 0  ;;  %s10284_s0 = inlined_call_operand.vmem [shape: f32[1,2,256], index: 0, kind: input, shape index: {}]   ;;  %s10285_s1 = inlined_call_operand.vmem [shape: f32[128,1], index: 1, kind: input, shape index: {}]   ;;  %s10286_s2 = inlined_call_operand.vmem [shape: f32[128,1], index: 2, kind: input, shape index: {}]   ;;  %s10287_s3 = inlined_call_operand.vmem [shape: f32[128,1], index: 3, kind: input, shape index: {}]   ;;  %s10288_s4 = inlined_call_operand.hbm [shape: f32[2,128,256], index: 4, kind: output, shape index: {}]  }
   0x1   :  { %11 = vsyncpa [#allocation3 + $0x1], 0  ;;  %s6150_s15 = smov 0   ;;  %s6152_s16 = smov 0  }
   0x2   :  { %s6154_s17 = smov 0   ;;  %s6156_s18 = smov 0  }
   0x3   :  { %s6158_s19 = smov 0   ;;  %s6160_s20 = smov 0  }
   0x4 LB: > { %s5857_s21 = sadd.s32 4294967295, %s6114_s20   ;;  %s5858_s22 = sadd.s32 4294967294, %s6114_s20   ;;  %s6114_s20 = sphi %s6160_s20, %s17_s20   ;;  %s6110_s19 = sphi %s6158_s19, %s10426_s19   ;;  %s6106_s18 = sphi %s6156_s18, %s10425_s18   ;;  %s6102_s17 = sphi %s6154_s17, %s10424_s17   ;;  %s6098_s16 = sphi %s6152_s16, %s10423_s16   ;;  %s6094_s15 = sphi %s6150_s15, %s10422_s15  }
   0x5   : > { %s36_s23 = sadd.s32 1, %s6110_s19  ;;  %s151_s24 = sadd.s32 1, %s6102_s17 }
   0x6   : > { %p38_p0 = scmp.ge.s32.totalorder %s36_s23, 2  ;;  %p161_p1 = scmp.ne.s32.totalorder %s6102_s17, %s6098_s16 }
   0x7   : > { %p162_p2 = scmp.eq.s32.totalorder %s5857_s21, 1  ;;  %p167_p3 = scmp.ne.s32.totalorder %s6098_s16, %s6094_s15 }
   0x8   : > { %s10428_s23 = smov (%p38_p0, %s36_s23), 0  ;;  %p168_p5 = scmp.eq.s32.totalorder %s5858_s22, 1 }
   0x9   : > { %p6190_p4 = por %p162_p2, %p161_p1  ;;  %s144_s26 = ssub.s32 %s6110_s19, %s10428_s23 }
   0xa   : > { %p5864_p6 = scmp.ge.s32.totalorder %s6114_s20, 1  ;;  %p149_p7 = scmp.eq.s32.totalorder %s144_s26, 0 }
   0xb   : > { %p6197_p8 = por %p168_p5, %p167_p3  ;;  %p222_p9 = scmp.lt.s32.totalorder %s6114_s20, 3 }
   0xc   : > { %s6203_s28 = scalar_select %p149_p7, %s6102_s17, %s151_s24  }
   0xd   : > { %p223_p10 = pnand %p5864_p6, %p222_p9 }
   0xf   : > { %226 = sbr.rel (%p223_p10) target bundleno = 1460 (0x5b4), region = 36 }
  0x14   : > { %v296_v0 = vld [vmem:[%s10285_s1 + $0x20] sm:$0xff]  ;;  %v294_v1 = vld [vmem:[%s10285_s1 + $0x10] sm:$0xff]  ;;  %v10302_v3 = vmov 0   ;;  %v297_v4 = vld [vmem:[%s10285_s1 + $0x28] sm:$0xff]  ;;  %s260_s7 = sand.u32 1, %s6098_s16   ;;  %s5968_s10 = sshll.u32 %s6106_s18, 8 }
  0x15   : > { %v292_v2 = vld [vmem:[%s10285_s1] sm:$0xff]  ;;  %6035 = vset.pattern.permute.xlu2 %v10302_v3  ;;  %6034 = vset.pattern.permute.xlu1 %v10302_v3  ;;  %v295_v5 = vld [vmem:[%s10285_s1 + $0x18] sm:$0xff]  ;;  %v293_v6 = vld [vmem:[%s10285_s1 + $0x8] sm:$0xff]  ;;  %s5865_s8 = sshll.u32 %s260_s7, 8  ;;  %s5727_s13 = scalar_lea.hbm %s10288_s4, %s5968_s10 }
  0x16   : > { %6033 = vset.pattern.permute.xlu0 %v10302_v3  ;;  %335 = vperm.xlu2 %6035, %v296_v0   ;;  %v300_v7 = vld [vmem:[%s10285_s1 + $0x40] sm:$0xff]  ;;  %v299_v8 = vld [vmem:[%s10285_s1 + $0x38] sm:$0xff]  ;;  %v298_v9 = vld [vmem:[%s10285_s1 + $0x30] sm:$0xff]  ;;  %s6717_s9 = scalar_lea.vmem [#allocation2], %s5865_s8  ;;  %s5730_s21 = sshll.u32 %s5727_s13, 4  ;;  %s5731_s21 = int_to_ptr.hbm [resolvable:$true] %s5730_s21 }
  0x17   : > { %325 = vperm.xlu1 %6034, %v294_v1   ;;  %315 = vperm.xlu0 %6033, %v292_v2   ;;  %v303_v10 = vld [vmem:[%s10285_s1 + $0x58] sm:$0xff]  ;;  %v302_v11 = vld [vmem:[%s10285_s1 + $0x50] sm:$0xff]  ;;  %v301_v12 = vld [vmem:[%s10285_s1 + $0x48] sm:$0xff]  ;;  %s5728_s14 = sshll.u32 %s6717_s9, 4  ;;  %s5711_s18 = scalar_lea.sflag [#allocation3], %s260_s7  ;;  %s5729_s14 = int_to_ptr.vmem [resolvable:$true] %s5728_s14 }
  0x18   : > { %v306_v13 = vld [vmem:[%s10285_s1 + $0x70] sm:$0xff]  ;;  %v305_v14 = vld [vmem:[%s10285_s1 + $0x68] sm:$0xff]  ;;  %v304_v15 = vld [vmem:[%s10285_s1 + $0x60] sm:$0xff]  ;;  %s6050_s22 = sshra.s32 %s5731_s21, 4  ;;  %s6056_s30 = scalar_lea.hbm %s10288_s4, 512  ;;  %s6051_s22 = int_to_ptr.hbm [resolvable:$true] %s6050_s22 }
  0x19   : > { %v426_v16 = vld [vmem:[%s10286_s2 + $0x8] sm:$0xff]  ;;  %v425_v17 = vld [vmem:[%s10286_s2] sm:$0xff]  ;;  %v307_v18 = vld [vmem:[%s10285_s1 + $0x78] sm:$0xff]  ;;  %s6052_s24 = scalar_lea.hbm %s6051_s22, 256  ;;  %p6057_p0 = scmp.lt.s32.totalorder %s6051_s22, %s10288_s4 }
  0x1a   : > { %v429_v19 = vld [vmem:[%s10286_s2 + $0x20] sm:$0xff]  ;;  %v428_v20 = vld [vmem:[%s10286_s2 + $0x18] sm:$0xff]  ;;  %v427_v21 = vld [vmem:[%s10286_s2 + $0x10] sm:$0xff]  ;;  %p6053_p11 = scmp.ne.s32.totalorder %s6051_s22, %s6052_s24  ;;  %p6058_p1 = scmp.lt.s32.totalorder %s6056_s30, %s6052_s24 }
  0x1b   : > { %v432_v22 = vld [vmem:[%s10286_s2 + $0x38] sm:$0xff]  ;;  %v431_v23 = vld [vmem:[%s10286_s2 + $0x30] sm:$0xff]  ;;  %v430_v24 = vld [vmem:[%s10286_s2 + $0x28] sm:$0xff] }
  0x1c   : > { %v435_v25 = vld [vmem:[%s10286_s2 + $0x50] sm:$0xff]  ;;  %v434_v26 = vld [vmem:[%s10286_s2 + $0x48] sm:$0xff]  ;;  %v433_v27 = vld [vmem:[%s10286_s2 + $0x40] sm:$0xff]  ;;  %p6054_p12 = pnand %p6053_p11, %p6190_p4  ;;  %p6059_p2 = por %p6058_p1, %p6057_p0 }
  0x1d   : > { %v438_v28 = vld [vmem:[%s10286_s2 + $0x68] sm:$0xff]  ;;  %v437_v29 = vld [vmem:[%s10286_s2 + $0x60] sm:$0xff]  ;;  %v436_v30 = vld [vmem:[%s10286_s2 + $0x58] sm:$0xff] }
  0x1e   : > { %340 = vperm.xlu2 %6035, %v297_v4   ;;  %v590_v31 = vld [vmem:[%s10287_s3] sm:$0xff]  ;;  %v440_v32 = vld [vmem:[%s10286_s2 + $0x78] sm:$0xff]  ;;  %v439_v33 = vld [vmem:[%s10286_s2 + $0x70] sm:$0xff]  ;;  %p6055_p13 = pneg %p6054_p12 }
  0x1f   : > { %330 = vperm.xlu1 %6034, %v295_v5   ;;  %320 = vperm.xlu0 %6033, %v293_v6   ;;  %v593_v34 = vld [vmem:[%s10287_s3 + $0x18] sm:$0xff]  ;;  %v592_v35 = vld [vmem:[%s10287_s3 + $0x10] sm:$0xff]  ;;  %v591_v36 = vld [vmem:[%s10287_s3 + $0x8] sm:$0xff] }
  0x20   : > { %v596_v38 = vld [vmem:[%s10287_s3 + $0x30] sm:$0xff]  ;;  %v595_v39 = vld [vmem:[%s10287_s3 + $0x28] sm:$0xff]  ;;  %v594_v40 = vld [vmem:[%s10287_s3 + $0x20] sm:$0xff]  ;;  %p6060_p3 = pnand %p6059_p2, %p6055_p13 }
  0x21   : > { %v599_v42 = vld [vmem:[%s10287_s3 + $0x48] sm:$0xff]  ;;  %v598_v43 = vld [vmem:[%s10287_s3 + $0x40] sm:$0xff]  ;;  %v597_v44 = vld [vmem:[%s10287_s3 + $0x38] sm:$0xff] }
  0x22   : > { %v602_v46 = vld [vmem:[%s10287_s3 + $0x60] sm:$0xff]  ;;  %v601_v47 = vld [vmem:[%s10287_s3 + $0x58] sm:$0xff]  ;;  %v600_v48 = vld [vmem:[%s10287_s3 + $0x50] sm:$0xff] }
  0x23   : > { %v605_v51 = vld [vmem:[%s10287_s3 + $0x78] sm:$0xff]  ;;  %v604_v52 = vld [vmem:[%s10287_s3 + $0x70] sm:$0xff]  ;;  %v603_v53 = vld [vmem:[%s10287_s3 + $0x68] sm:$0xff] }
  0x24   : > { %v289_v63 = vld [vmem:[%s10284_s0] ss:$2 sm:$0x3]  ;;  %v5866_v0 = vld [vmem:[%s10284_s0 + $0x1] ss:$2 sm:$0x3] }
  0x25   : > { %v6386_v4 = vperm.slane %v289_v63, 0  ;;  %v6388_v5 = vperm.slane %v289_v63, 1  ;;  %v6390_v6 = vperm.slane %v5866_v0, 0 }
  0x26   : > { %355 = vperm.xlu2 %6035, %v300_v7   ;;  %v6392_v7 = vperm.slane %v5866_v0, 1  ;;  %v10290_v0 = vmov 2475754826  }
  0x27   : > { %350 = vperm.xlu1 %6034, %v299_v8   ;;  %345 = vperm.xlu0 %6033, %v298_v9  }
  0x2e   : > { %370 = vperm.xlu2 %6035, %v303_v10  }
  0x2f   : > { %365 = vperm.xlu1 %6034, %v302_v11   ;;  %360 = vperm.xlu0 %6033, %v301_v12  }
  0x36   : > { %385 = vperm.xlu2 %6035, %v306_v13  }
  0x37   : > { %380 = vperm.xlu1 %6034, %v305_v14   ;;  %375 = vperm.xlu0 %6033, %v304_v15  }
  0x3e   : > { %453 = vperm.xlu2 %6035, %v426_v16  }
  0x3f   : > { %448 = vperm.xlu1 %6034, %v425_v17   ;;  %390 = vperm.xlu0 %6033, %v307_v18  }
  0x46   : > { %468 = vperm.xlu2 %6035, %v429_v19  }
  0x47   : > { %463 = vperm.xlu1 %6034, %v428_v20   ;;  %458 = vperm.xlu0 %6033, %v427_v21  }
  0x4e   : > { %483 = vperm.xlu2 %6035, %v432_v22  }
  0x4f   : > { %478 = vperm.xlu1 %6034, %v431_v23   ;;  %473 = vperm.xlu0 %6033, %v430_v24  }
  0x56   : > { %498 = vperm.xlu2 %6035, %v435_v25  }
  0x57   : > { %493 = vperm.xlu1 %6034, %v434_v26   ;;  %488 = vperm.xlu0 %6033, %v433_v27  }
  0x5e   : > { %513 = vperm.xlu2 %6035, %v438_v28  }
  0x5f   : > { %508 = vperm.xlu1 %6034, %v437_v29   ;;  %503 = vperm.xlu0 %6033, %v436_v30  }
  0x66   : > { %608 = vperm.xlu2 %6035, %v590_v31  }
  0x67   : > { %523 = vperm.xlu1 %6034, %v440_v32   ;;  %518 = vperm.xlu0 %6033, %v439_v33  }
  0x6e   : > { %623 = vperm.xlu2 %6035, %v593_v34  }
  0x6f   : > { %618 = vperm.xlu1 %6034, %v592_v35   ;;  %613 = vperm.xlu0 %6033, %v591_v36  }
  0x70   : > { %v6316_v37 = vpop.permute.xlu2 %335 }
  0x76   : > { %638 = vperm.xlu2 %6035, %v596_v38  }
  0x77   : > { %633 = vperm.xlu1 %6034, %v595_v39   ;;  %628 = vperm.xlu0 %6033, %v594_v40  }
  0x78   : > { %v6327_v41 = vpop.permute.xlu2 %340 }
  0x7e   : > { %653 = vperm.xlu2 %6035, %v599_v42  }
  0x7f   : > { %648 = vperm.xlu1 %6034, %v598_v43   ;;  %643 = vperm.xlu0 %6033, %v597_v44  }
  0x80   : > { %v6338_v45 = vpop.permute.xlu2 %355 }
  0x86   : > { %668 = vperm.xlu2 %6035, %v602_v46  }
  0x87   : > { %663 = vperm.xlu1 %6034, %v601_v47   ;;  %658 = vperm.xlu0 %6033, %v600_v48  }
  0x88   : > { %v6349_v49 = vpop.permute.xlu2 %370 }
  0x89   : > { %10324 = vst [vmem:[#allocation5_spill] sm:$0xff] %v6349_v49  ;;  %v6351_v50 = vpop.permute.xlu1 %325  ;;  %v316_v8 = vpop.permute.xlu0 %315 }
  0x8a   : > { %v393_v11 = vmul.f32 %v316_v8, %v6386_v4  ;;  %v394_v12 = vmul.f32 %v316_v8, %v6388_v5 }
  0x8e   : > { %683 = vperm.xlu2 %6035, %v605_v51  }
  0x8f   : > { %678 = vperm.xlu1 %6034, %v604_v52   ;;  %673 = vperm.xlu0 %6033, %v603_v53  }
  0x90   : > { %v6362_v54 = vpop.permute.xlu2 %385 }
  0x91   : > { %10325 = vst [vmem:[#allocation6_spill] sm:$0xff] %v6362_v54  ;;  %v331_v55 = vpop.permute.xlu1 %330 }
  0x92   : > { %v399_v33 = vmul.f32 %v331_v55, %v6386_v4  ;;  %v6416_v35 = vmul.f32 %v331_v55, %v6388_v5  ;;  %v10293_v55 = vmov 683565275  }
  0x98   : > { %v6364_v56 = vpop.permute.xlu2 %453 }
  0x99   : > { %v6366_v57 = vpop.permute.xlu1 %350 }
  0x9a   : > { %10326 = vst [vmem:[#allocation7_spill] sm:$0xff] %v6366_v57 }
  0xa0   : > { %v6368_v58 = vpop.permute.xlu2 %468 }
  0xa1   : > { %v6370_v59 = vpop.permute.xlu1 %365 }
  0xa2   : > { %10327 = vst [vmem:[#allocation8_spill] sm:$0xff] %v6370_v59 }
  0xa8   : > { %v6372_v60 = vpop.permute.xlu2 %483 }
  0xa9   : > { %10328 = vst [vmem:[#allocation9_spill] sm:$0xff] %v6372_v60  ;;  %v6374_v61 = vpop.permute.xlu1 %380 }
  0xaa   : > { %10329 = vst [vmem:[#allocation10_spill] sm:$0xff] %v6374_v61 }
  0xb0   : > { %v6376_v62 = vpop.permute.xlu2 %498 }
  0xb1   : > { %10330 = vst [vmem:[#allocation11_spill] sm:$0xff] %v6376_v62  ;;  %v449_v1 = vpop.permute.xlu1 %448 }
  0xb2   : > { %v526_v9 = vmul.f32 %v449_v1, %v6390_v6  ;;  %v527_v10 = vmul.f32 %v449_v1, %v6392_v7 }
  0xb4   : > { %v558_v13 = vadd.f32 %v526_v9, %v393_v11  ;;  %v559_v14 = vadd.f32 %v527_v10, %v394_v12  ;;  %v10297_v10 = vmov 2131351028  }
  0xb8   : > { %v6384_v2 = vpop.permute.xlu2 %513 }
  0xb9   : > { %10331 = vst [vmem:[#allocation12_spill] sm:$0xff] %v6384_v2  ;;  %v6406_v22 = vpop.permute.xlu1 %463 }
  0xba   : > { %v532_v29 = vmul.f32 %v6406_v22, %v6390_v6 }
  0xbc   : > { %v564_v42 = vadd.f32 %v532_v29, %v399_v33 }
  0xc0   : > { %v609_v15 = vpop.permute.xlu2 %608 }
  0xc1   : > { %v6398_v16 = vadd.f32 %v609_v15, %v558_v13  ;;  %v6400_v17 = vadd.f32 %v609_v15, %v559_v14  ;;  %v10306_v13 = vmov 2102212464  }
  0xc3   : > { %v10292_v18 = vand.u32 2147483647, %v6398_v16  ;;  %v721_v19 = vand.u32 2139095040, %v6398_v16  ;;  %v10289_v20 = vand.u32 2147483647, %v6400_v17  ;;  %v876_v21 = vand.u32 2139095040, %v6400_v17 }
  0xc5   : > { %v722_v23 = vshrl.u32 %v721_v19, 23  ;;  %v725_v24 = vand.u32 8388607, %v10292_v18  ;;  %v877_v25 = vshrl.u32 %v876_v21, 23  ;;  %v880_v26 = vand.u32 8388607, %v10289_v20 }
  0xc6   : > { %v10299_v19 = vmov 920167782  }
  0xc7   : > { %v5867_v27 = vadd.s32 4294967169, %v722_v23  ;;  %v726_v28 = vor.u32 8388608, %v725_v24  ;;  %v5870_v30 = vadd.s32 4294967169, %v877_v25  ;;  %v881_v31 = vor.u32 8388608, %v880_v26 }
  0xc8   : > { %v6420_v38 = vpop.permute.xlu2 %623  ;;  %v10295_v24 = vmov 1326507024  }
  0xc9   : > { %v728_v32 = vadd.s32 1, %v5867_v27  ;;  %v883_v34 = vadd.s32 1, %v5870_v30  ;;  %v6418_v36 = vshll.u32 %v726_v28, 8  ;;  %v6422_v40 = vshll.u32 %v881_v31, 8 }
  0xca   : > { %v6425_v46 = vadd.f32 %v6420_v38, %v564_v42 }
  0xcb   : > { %vm729_vm0 = vcmp.gt.s32.totalorder %v728_v32, 0  ;;  %vm884_vm1 = vcmp.gt.s32.totalorder %v883_v34, 0  ;;  %v6428_v48 = vand.u32 65535, %v6418_v36  ;;  %v6431_v51 = vshrl.u32 %v6418_v36, 16 }
  0xcc   : > { %v730_v39 = vsel %vm729_vm0, %v728_v32, 0  ;;  %v885_v44 = vsel %vm884_vm1, %v883_v34, 0  ;;  %v6440_v8 = vand.u32 65535, %v6422_v40  ;;  %vm720_vm0 = vcmp.lt.s32.totalorder %v6398_v16, 0 }
  0xcd   : > { %v732_v43 = vand.u32 31, %v730_v39  ;;  %v6433_v52 = vand.u32 31, %v885_v44  ;;  %v6435_v53 = vshrl.u32 %v730_v39, 5 }
  0xcf   : > { %v733_v47 = vsub.s32 32, %v732_v43  ;;  %v735_v63 = vshll.u32 %v10293_v55, %v732_v43  ;;  %v738_v1 = vshll.u32 %v10290_v0, %v732_v43  ;;  %v741_v12 = vshll.u32 %v10297_v10, %v732_v43 }
  0xd0   : > { %v744_v15 = vshll.u32 %v10306_v13, %v732_v43  ;;  %v747_v23 = vshll.u32 %v10299_v19, %v732_v43  ;;  %v6451_v29 = vsub.s32 32, %v6433_v52  ;;  %vm750_vm2 = vcmp.lt.s32.totalorder %v6435_v53, 1 }
  0xd1   : > { %v736_v9 = vshrl.u32 %v10290_v0, %v733_v47  ;;  %v739_v11 = vshrl.u32 %v10297_v10, %v733_v47  ;;  %v742_v14 = vshrl.u32 %v10306_v13, %v733_v47  ;;  %v745_v21 = vshrl.u32 %v10299_v19, %v733_v47 }
  0xd2   : > { %v748_v25 = vshrl.u32 %v10295_v24, %v733_v47  ;;  %vm751_vm3 = vcmp.lt.s32.totalorder %v6435_v53, 2  ;;  %v734_v32 = vshrl.u32 %v10293_v55, %v733_v47  ;;  %vm753_vm4 = vcmp.lt.s32.totalorder %v6435_v53, 4 }
  0xd3   : > { %v737_v26 = vor.u32 %v736_v9, %v735_v63  ;;  %v740_v27 = vor.u32 %v739_v11, %v738_v1  ;;  %v743_v28 = vor.u32 %v742_v14, %v741_v12  ;;  %v746_v30 = vor.u32 %v745_v21, %v744_v15 }
  0xd4   : > { %v749_v31 = vor.u32 %v748_v25, %v747_v23  ;;  %vm752_vm5 = vcmp.lt.s32.totalorder %v6435_v53, 3  ;;  %v890_v43 = vshll.u32 %v10293_v55, %v6433_v52  ;;  %v891_v9 = vshrl.u32 %v10290_v0, %v6451_v29 }
  0xd5   : > { %v758_v33 = vsel %vm750_vm2, %v737_v26, %v740_v27  ;;  %v762_v34 = vsel %vm750_vm2, %v740_v27, %v743_v28  ;;  %v759_v39 = vsel %vm753_vm4, %v746_v30, 920167782  ;;  %v755_v63 = vsel %vm753_vm4, %v743_v28, 2102212464 }
  0xd6   : > { %v763_v42 = vsel %vm753_vm4, %v749_v31, 1326507024  ;;  %v760_v1 = vsel %vm752_vm5, %v743_v28, %v759_v39  ;;  %v893_v14 = vshll.u32 %v10290_v0, %v6433_v52  ;;  %v894_v15 = vshrl.u32 %v10297_v10, %v6451_v29 }
  0xd7   : > { %v764_v47 = vsel %vm752_vm5, %v746_v30, %v763_v42  ;;  %v761_v11 = vsel %vm751_vm3, %v758_v33, %v760_v1  ;;  %v754_v30 = vsel %vm750_vm2, %v734_v32, %v737_v26  ;;  %v756_v31 = vsel %vm752_vm5, %v740_v27, %v755_v63 }
  0xd8   : > { %v765_v12 = vsel %vm751_vm3, %v762_v34, %v764_v47  ;;  %v791_v25 = vand.u32 65535, %v761_v11  ;;  %v792_v28 = vshrl.u32 %v761_v11, 16  ;;  %v6482_v33 = vshrl.u32 %v885_v44, 5 }
  0xd9   : > { %v769_v21 = vand.u32 65535, %v765_v12  ;;  %v770_v23 = vshrl.u32 %v765_v12, 16  ;;  %v6484_v39 = vor.u32 %v891_v9, %v890_v43  ;;  %v6488_v1 = vor.u32 %v894_v15, %v893_v14 }
  0xda   : > { %v897_v47 = vshrl.u32 %v10306_v13, %v6451_v29  ;;  %v794_v26 = vmul.u32 %v792_v28, %v6428_v48  ;;  %v795_v32 = vmul.u32 %v791_v25, %v6431_v51  ;;  %v896_v44 = vshll.u32 %v10297_v10, %v6433_v52 }
  0xdb   : > { %v772_v34 = vmul.u32 %v770_v23, %v6428_v48  ;;  %v773_v42 = vmul.u32 %v769_v21, %v6431_v51  ;;  %v771_v11 = vmul.u32 %v769_v21, %v6428_v48  ;;  %v774_v27 = vmul.u32 %v770_v23, %v6431_v51 }
  0xdc   : > { %v793_v63 = vmul.u32 %v791_v25, %v6428_v48  ;;  %v796_v9 = vmul.u32 %v792_v28, %v6431_v51  ;;  %v797_v20 = vshll.u32 %v794_v26, 16  ;;  %v799_v0 = vshll.u32 %v795_v32, 16 }
  0xdd   : > { %v775_v43 = vshll.u32 %v772_v34, 16  ;;  %v776_v12 = vshrl.u32 %v772_v34, 16  ;;  %v777_v14 = vshll.u32 %v773_v42, 16  ;;  %v778_v15 = vshrl.u32 %v773_v42, 16 }
  0xde   : > { %v898_v18 = vor.u32 %v897_v47, %v896_v44  ;;  %vm801_vm7 = vc.u32 %v793_v63, %v797_v20  ;;  %v803_v24 = vadd.s32 %v797_v20, %v793_v63  ;;  %v900_v23 = vshrl.u32 %v10299_v19, %v6451_v29 }
  0xdf   : > { %vm779_vm6 = vc.u32 %v771_v11, %v775_v43  ;;  %v781_v21 = vadd.s32 %v775_v43, %v771_v11  ;;  %v802_v48 = vsel %vm801_vm7, 1, %v10302_v3  ;;  %v899_v51 = vshll.u32 %v10306_v13, %v6433_v52 }
  0xe0   : > { %v780_v55 = vsel %vm779_vm6, 1, %v10302_v3  ;;  %v804_v28 = vadd.s32 %v802_v48, %v796_v9  ;;  %vm805_vm9 = vc.u32 %v803_v24, %v799_v0  ;;  %v902_v34 = vshll.u32 %v10299_v19, %v6433_v52 }
  0xe1   : > { %v782_v10 = vadd.s32 %v780_v55, %v774_v27  ;;  %vm783_vm8 = vc.u32 %v781_v21, %v777_v14  ;;  %v806_v20 = vsel %vm805_vm9, 1, %v10302_v3  ;;  %v901_v47 = vor.u32 %v900_v23, %v899_v51 }
  0xe2   : > { %v784_v25 = vsel %vm783_vm8, 1, %v10302_v3  ;;  %v10332_v11 = vmov 1326507024   ;;  %v798_v44 = vshrl.u32 %v794_v26, 16  ;;  %v800_v27 = vshrl.u32 %v795_v32, 16 }
  0xe3   : > { %v786_v42 = vadd.s32 %v784_v25, %v782_v10  ;;  %v903_v55 = vshrl.u32 %v10332_v11, %v6451_v29  ;;  %v6512_v43 = vadd.s32 %v803_v24, %v799_v0  ;;  %v808_v63 = vadd.s32 %v806_v20, %v804_v28 }
  0xe4   : > { %vm905_vm10 = vcmp.lt.s32.totalorder %v6482_v33, 1  ;;  %vm908_vm11 = vcmp.lt.s32.totalorder %v6482_v33, 4  ;;  %vm907_vm12 = vcmp.lt.s32.totalorder %v6482_v33, 3  ;;  %vm906_vm13 = vcmp.lt.s32.totalorder %v6482_v33, 2 }
  0xe5   : > { %v787_v14 = vadd.s32 %v786_v42, %v776_v12  ;;  %v904_v21 = vor.u32 %v903_v55, %v902_v34  ;;  %v809_v9 = vadd.s32 %v808_v63, %v798_v44  ;;  %v913_v52 = vsel %vm905_vm10, %v6484_v39, %v6488_v1 }
  0xe6   : > { %v914_v10 = vsel %vm908_vm11, %v901_v47, 920167782  ;;  %v917_v26 = vsel %vm905_vm10, %v6488_v1, %v898_v18  ;;  %v757_v32 = vsel %vm751_vm3, %v754_v30, %v756_v31  ;;  %v923_v51 = vshrl.u32 %v6422_v40, 16 }
  0xe7   : > { %v6523_v0 = vadd.s32 %v787_v14, %v778_v15  ;;  %v915_v24 = vsel %vm907_vm12, %v898_v18, %v914_v10  ;;  %v810_v12 = vadd.s32 %v809_v9, %v800_v27  ;;  %v918_v15 = vsel %vm908_vm11, %v904_v21, 1326507024 }
  0xe8   : > { %v916_v23 = vsel %vm906_vm13, %v913_v52, %v915_v24  ;;  %v919_v48 = vsel %vm907_vm12, %v901_v47, %v918_v15  ;;  %v1651_v31 = vand.u32 2139095040, %v6425_v46  ;;  %v6547_v34 = vmul.f32 %v6406_v22, %v6392_v7 }
  0xe9   : > { %vm813_vm14 = vc.u32 %v6523_v0, %v6512_v43  ;;  %v946_v25 = vand.u32 65535, %v916_v23  ;;  %v814_v28 = vadd.s32 1, %v810_v12  ;;  %v920_v53 = vsel %vm906_vm13, %v917_v26, %v919_v48 }
  0xea   : > { %v947_v30 = vshrl.u32 %v916_v23, 16  ;;  %v811_v42 = vmul.u32 %v6418_v36, %v757_v32  ;;  %v924_v20 = vand.u32 65535, %v920_v53  ;;  %v925_v55 = vshrl.u32 %v920_v53, 16 }
  0xeb   : > { %v815_v44 = vsel %vm813_vm14, %v814_v28, %v810_v12  ;;  %v10333_v47 = vmov 683565275   ;;  %v950_v14 = vmul.u32 %v946_v25, %v923_v51  ;;  %v910_v9 = vsel %vm908_vm11, %v898_v18, 2102212464 }
  0xec   : > { %v889_v27 = vshrl.u32 %v10333_v47, %v6451_v29  ;;  %v949_v63 = vmul.u32 %v947_v30, %v6440_v8  ;;  %v816_v21 = vadd.s32 %v815_v44, %v811_v42  ;;  %v927_v52 = vmul.u32 %v925_v55, %v6440_v8 }
  0xed   : > { %v928_v10 = vmul.u32 %v924_v20, %v923_v51  ;;  %v948_v22 = vmul.u32 %v946_v25, %v6440_v8  ;;  %v951_v24 = vmul.u32 %v947_v30, %v923_v51  ;;  %v1652_v26 = vshrl.u32 %v1651_v31, 23 }
  0xee   : > { %v952_v36 = vshll.u32 %v949_v63, 16  ;;  %v817_v32 = vadd.s32 536870912, %v816_v21  ;;  %v926_v12 = vmul.u32 %v924_v20, %v6440_v8  ;;  %v929_v23 = vmul.u32 %v925_v55, %v923_v51 }
  0xef   : > { %v930_v29 = vshll.u32 %v927_v52, 16  ;;  %v932_v15 = vshll.u32 %v928_v10, 16  ;;  %v954_v48 = vshll.u32 %v950_v14, 16  ;;  %v909_v25 = vsel %vm905_vm10, %v889_v27, %v6484_v39 }
  0xf0   : > { %vm956_vm15 = vc.u32 %v948_v22, %v952_v36  ;;  %v958_v28 = vadd.s32 %v952_v36, %v948_v22  ;;  %v818_v18 = vshrl.u32 %v817_v32, 30  ;;  %v911_v31 = vsel %vm907_vm12, %v6488_v1, %v910_v9 }
  0xf1   : > { %vm934_vm1 = vc.u32 %v926_v12, %v930_v29  ;;  %v936_v53 = vadd.s32 %v930_v29, %v926_v12  ;;  %v957_v42 = vsel %vm956_vm15, 1, %v10302_v3  ;;  %v10301_v22 = vand.u32 2147483647, %v6425_v46 }
  0xf2   : > { %v935_v30 = vsel %vm934_vm1, 1, %v10302_v3  ;;  %v959_v8 = vadd.s32 %v957_v42, %v951_v24  ;;  %vm960_vm2 = vc.u32 %v958_v28, %v954_v48  ;;  %v819_v51 = vshll.u32 %v818_v18, 30 }
  0xf3   : > { %v937_v20 = vadd.s32 %v935_v30, %v929_v23  ;;  %vm938_vm3 = vc.u32 %v936_v53, %v932_v15  ;;  %v961_v44 = vsel %vm960_vm2, 1, %v10302_v3  ;;  %v5885_v36 = vadd.s32 4294967169, %v1652_v26 }
  0xf4   : > { %v939_v55 = vsel %vm938_vm3, 1, %v10302_v3  ;;  %v820_v32 = vsub.s32 %v816_v21, %v819_v51  ;;  %v931_v39 = vshrl.u32 %v927_v52, 16  ;;  %v963_v12 = vadd.s32 %v961_v44, %v959_v8 }
  0xf5   : > { %v941_v27 = vadd.s32 %v939_v55, %v937_v20  ;;  %v842_v24 = vsub.s32 4, %v818_v18  ;;  %v912_v29 = vsel %vm906_vm13, %v909_v25, %v911_v31  ;;  %v953_v42 = vshrl.u32 %v949_v63, 16 }
  0xf6   : > { %v1658_v19 = vadd.s32 1, %v5885_v36  ;;  %vm821_vm4 = vcmp.lt.s32.totalorder %v820_v32, 0  ;;  %v822_v1 = vsub.s32 0, %v820_v32  ;;  %v933_v9 = vshrl.u32 %v928_v10, 16 }
  0xf7   : > { %v942_v23 = vadd.s32 %v941_v27, %v931_v39  ;;  %v955_v15 = vshrl.u32 %v950_v14, 16  ;;  %v6572_v53 = vadd.s32 %v958_v28, %v954_v48  ;;  %v964_v30 = vadd.s32 %v963_v12, %v953_v42 }
  0xf8   : > { %vm1659_vm5 = vcmp.gt.s32.totalorder %v1658_v19, 0  ;;  %v823_v26 = vsel %vm821_vm4, %v822_v1, %v820_v32  ;;  %v1655_v52 = vand.u32 8388607, %v10301_v22  ;;  %v843_v63 = vsel %vm720_vm0, %v842_v24, %v818_v18 }
  0xf9   : > { %v6574_v21 = vadd.s32 %v942_v23, %v933_v9  ;;  %v1660_v8 = vsel %vm1659_vm5, %v1658_v19, 0  ;;  %v824_v33 = vclz %v823_v26  ;;  %v965_v25 = vadd.s32 %v964_v30, %v955_v15 }
  0xfa   : > { %v1662_v51 = vand.u32 31, %v1660_v8  ;;  %v10334_v10 = vand.u32 2147483647, %v6398_v16  ;;  %v565_v48 = vadd.f32 %v6547_v34, %v6416_v35  ;;  %v812_v18 = vadd.s32 %v6512_v43, %v6523_v0 }
  0xfb   : > { %v5868_v28 = vadd.s32 4294967294, %v824_v33  ;;  %vm968_vm7 = vc.u32 %v6574_v21, %v6572_v53  ;;  %v969_v19 = vadd.s32 1, %v965_v25  ;;  %v966_v55 = vmul.u32 %v6422_v40, %v912_v29 }
  0xfc   : > { %vm6582_vm6 = vcmp.le.f32.partialorder %v10334_v10, 0.7853982  ;;  %v1663_v31 = vsub.s32 32, %v1662_v51  ;;  %v1656_v44 = vor.u32 8388608, %v1655_v52  ;;  %v6595_v39 = vshrl.u32 %v1660_v8, 5 }
  0xfd   : > { %v845_v20 = vsel %vm6582_vm6, 0, %v843_v63  ;;  %vm5869_vm8 = vcmp.lt.s32.totalorder %v5868_v28, 0  ;;  %v970_v36 = vsel %vm968_vm7, %v969_v19, %v965_v25  ;;  %v1665_v35 = vshll.u32 %v10333_v47, %v1662_v51 }
  0xfe   : > { %v827_v34 = vsel %vm5869_vm8, 0, %v5868_v28  ;;  %v971_v27 = vadd.s32 %v970_v36, %v966_v55  ;;  %v10337_v12 = vmov 2475754826   ;;  %v10338_v42 = vmov 2131351028  }
  0xff   : > { %v1666_v24 = vshrl.u32 %v10337_v12, %v1663_v31  ;;  %v1669_v1 = vshrl.u32 %v10338_v42, %v1663_v31  ;;  %v828_v9 = vsub.s32 32, %v827_v34  ;;  %v832_v43 = vsub.s32 4294967266, %v827_v34 }
 0x100   : > { %v1668_v0 = vshll.u32 %v10337_v12, %v1662_v51  ;;  %v1672_v23 = vshrl.u32 %v10306_v13, %v1663_v31  ;;  %v972_v40 = vadd.s32 536870912, %v971_v27  ;;  %v1671_v29 = vshll.u32 %v10338_v42, %v1662_v51 }
 0x101   : > { %v1674_v15 = vshll.u32 %v10306_v13, %v1662_v51  ;;  %v10339_v30 = vmov 920167782   ;;  %v829_v52 = vshll.u32 %v820_v32, %v827_v34  ;;  %v830_v8 = vshrl.u32 %v812_v18, %v828_v9 }
 0x102   : > { %v1675_v26 = vshrl.u32 %v10339_v30, %v1663_v31  ;;  %v833_v33 = vadd.s32 127, %v832_v43  ;;  %v1678_v63 = vshrl.u32 %v10332_v11, %v1663_v31  ;;  %v973_v25 = vshrl.u32 %v972_v40, 30 }
 0x103   : > { %v1667_v10 = vor.u32 %v1666_v24, %v1665_v35  ;;  %v6606_v28 = vor.u32 %v1669_v1, %v1668_v0  ;;  %v831_v55 = vor.u32 %v830_v8, %v829_v52  ;;  %v1673_v22 = vor.u32 %v1672_v23, %v1671_v29 }
 0x104   : > { %v1676_v19 = vor.u32 %v1675_v26, %v1674_v15  ;;  %v834_v36 = vshll.u32 %v833_v33, 23  ;;  %v1677_v3 = vshll.u32 %v10339_v30, %v1662_v51  ;;  %v862_v2 = vadd.s32 3, %v845_v20 }
 0x105   : > { %v974_v61 = vshll.u32 %v973_v25, 30  ;;  %v6610_v13 = vadd.f32 %v6420_v38, %v565_v48  ;;  %vm1680_vm9 = vcmp.lt.s32.totalorder %v6595_v39, 1  ;;  %vm1683_vm10 = vcmp.lt.s32.totalorder %v6595_v39, 4 }
 0x106   : > { %v835_v32 = vor.u32 4788187, %v834_v36  ;;  %v1679_v18 = vor.u32 %v1678_v63, %v1677_v3  ;;  %vm1682_vm11 = vcmp.lt.s32.totalorder %v6595_v39, 3  ;;  %v1688_v34 = vsel %vm1680_vm9, %v1667_v10, %v6606_v28 }
 0x107   : > { %v6614_v35 = vsub.s32 %v971_v27, %v974_v61  ;;  %v1689_v51 = vsel %vm1683_vm10, %v1676_v19, 920167782  ;;  %v838_v38 = vcvt.s32.f32 %v831_v55  ;;  %vm875_vm12 = vcmp.lt.s32.totalorder %v6400_v17, 0 }
 0x108   : > { %v836_v20 = vand.u32 2147483647, %v835_v32  ;;  %v1690_v3 = vsel %vm1682_vm11, %v1673_v22, %v1689_v51  ;;  %v6625_v48 = vshll.u32 %v1656_v44, 8  ;;  %vm1681_vm14 = vcmp.lt.s32.totalorder %v6595_v39, 2 }
 0x109   : > { %vm976_vm13 = vcmp.lt.s32.totalorder %v6614_v35, 0  ;;  %v977_v61 = vsub.s32 0, %v6614_v35  ;;  %v6633_v1 = vsel %vm1681_vm14, %v1688_v34, %v1690_v3  ;;  %v1692_v9 = vsel %vm1680_vm9, %v6606_v28, %v1673_v22 }
 0x10a   : > { %v839_v24 = vmul.f32 %v838_v38, %v836_v20  ;;  %v1693_v44 = vsel %vm1683_vm10, %v1679_v18, 1326507024  ;;  %v6640_v43 = vand.u32 3, %v862_v2  ;;  %v1664_v23 = vshrl.u32 %v10333_v47, %v1663_v31 }
 0x10b   : > { %v978_v0 = vsel %vm976_vm13, %v977_v61, %v6614_v35  ;;  %v1694_v40 = vsel %vm1682_vm11, %v1676_v19, %v1693_v44  ;;  %v997_v26 = vsub.s32 4, %v973_v25  ;;  %v1697_v8 = vand.u32 65535, %v6625_v48 }
 0x10c   : > { %v840_v29 = vxor.u32 2147483648, %v839_v24  ;;  %v979_v15 = vclz %v978_v0  ;;  %v1695_v52 = vsel %vm1681_vm14, %v1692_v9, %v1694_v40  ;;  %v1698_v33 = vshrl.u32 %v6625_v48, 16 }
 0x10d   : > { %v1699_v63 = vand.u32 65535, %v1695_v52  ;;  %v1721_v2 = vand.u32 65535, %v6633_v1  ;;  %v1700_v36 = vshrl.u32 %v1695_v52, 16  ;;  %v1722_v19 = vshrl.u32 %v6633_v1, 16 }
 0x10e   : > { %v841_v55 = vsel %vm720_vm0, %v840_v29, %v839_v24  ;;  %v5871_v31 = vadd.s32 4294967294, %v979_v15  ;;  %v967_v18 = vadd.s32 %v6572_v53, %v6574_v21  ;;  %v6663_v34 = vsel %vm1680_vm9, %v1664_v23, %v1667_v10 }
 0x10f   : > { %v6657_v32 = vsel %vm6582_vm6, %v6398_v16, %v841_v55  ;;  %v6665_v51 = vmul.u32 %v1699_v63, %v1698_v33  ;;  %v1685_v38 = vsel %vm1683_vm10, %v1673_v22, 2102212464  ;;  %v1702_v3 = vmul.u32 %v1700_v36, %v1697_v8 }
 0x110   : > { %v846_v20 = vmul.f32 %v6657_v32, %v6657_v32  ;;  %vm5872_vm15 = vcmp.lt.s32.totalorder %v5871_v31, 0  ;;  %v6673_v61 = vsel %vm875_vm12, %v997_v26, %v973_v25  ;;  %v1701_v53 = vmul.u32 %v1699_v63, %v1697_v8 }
 0x111   : > { %v982_v14 = vsel %vm5872_vm15, 0, %v5871_v31  ;;  %v1723_v21 = vmul.u32 %v1721_v2, %v1697_v8  ;;  %v1724_v9 = vmul.u32 %v1722_v19, %v1697_v8  ;;  %v1704_v0 = vmul.u32 %v1700_v36, %v1698_v33  ;;  %v479_v8 = vpop.permute.xlu1 %478 }
 0x112   : > { %v847_v24 = vmul.f32 -0.001358992, %v846_v20  ;;  %v854_v10 = vmul.f32 -0.00019511016, %v846_v20  ;;  %v983_v1 = vsub.s32 32, %v982_v14  ;;  %v987_v44 = vsub.s32 4294967266, %v982_v14 }
 0x113   : > { %v1705_v23 = vshll.u32 %v1702_v3, 16  ;;  %v1707_v40 = vshll.u32 %v6665_v51, 16  ;;  %v984_v22 = vshll.u32 %v6614_v35, %v982_v14  ;;  %v1725_v26 = vmul.u32 %v1721_v2, %v1698_v33 }
 0x114   : > { %v848_v29 = vadd.f32 0.041655596, %v847_v24  ;;  %v855_v15 = vadd.f32 0.008332121, %v854_v10  ;;  %v985_v52 = vshrl.u32 %v967_v18, %v983_v1  ;;  %v988_v55 = vadd.s32 127, %v987_v44 }
 0x115   : > { %vm1709_vm0 = vc.u32 %v1701_v53, %v1705_v23  ;;  %v1711_v25 = vadd.s32 %v1705_v23, %v1701_v53  ;;  %v10340_v27 = vand.u32 2147483647, %v6400_v17  ;;  %v10343_v36 = vmov 0  }
 0x116   : > { %v849_v63 = vmul.f32 %v848_v29, %v846_v20  ;;  %v856_v31 = vmul.f32 %v855_v15, %v846_v20  ;;  %v1710_v54 = vsel %vm1709_vm0, 1, %v10343_v36  ;;  %v1727_v62 = vshll.u32 %v1724_v9, 16 }
 0x117   : > { %vm6679_vm1 = vcmp.le.f32.partialorder %v10340_v27, 0.7853982  ;;  %v986_v24 = vor.u32 %v985_v52, %v984_v22  ;;  %v989_v10 = vshll.u32 %v988_v55, 23  ;;  %v1712_v59 = vadd.s32 %v1710_v54, %v1704_v0 }
 0x118   : > { %vm1713_vm2 = vc.u32 %v1711_v25, %v1707_v40  ;;  %v850_v35 = vadd.f32 -0.4999988, %v849_v63  ;;  %v857_v18 = vadd.f32 -0.16666654, %v856_v31  ;;  %v1706_v14 = vshrl.u32 %v1702_v3, 16 }
 0x119   : > { %v1714_v2 = vsel %vm1713_vm2, 1, %v10343_v36  ;;  %vm865_vm3 = vcmp.eq.s32.totalorder %v6640_v43, 0  ;;  %v990_v53 = vor.u32 4788187, %v989_v10  ;;  %v1726_v1 = vmul.u32 %v1722_v19, %v1698_v33 }
 0x11a   : > { %v1716_v27 = vadd.s32 %v1714_v2, %v1712_v59  ;;  %v1729_v44 = vshll.u32 %v1725_v26, 16  ;;  %v851_v23 = vmul.f32 %v850_v35, %v846_v20  ;;  %v858_v29 = vmul.f32 %v857_v18, %v846_v20  ;;  %v6694_v20 = vpop.permute.xlu0 %320 }
 0x11b   : > { %vm864_vm4 = vcmp.lt.s32.totalorder %v6640_v43, 2  ;;  %vm1731_vm5 = vc.u32 %v1723_v21, %v1727_v62  ;;  %v1733_v15 = vadd.s32 %v1727_v62, %v1723_v21  ;;  %v991_v54 = vand.u32 2147483647, %v990_v53 }
 0x11c   : > { %v993_v0 = vcvt.s32.f32 %v986_v24  ;;  %v1717_v40 = vadd.s32 %v1716_v27, %v1706_v14  ;;  %v1732_v3 = vsel %vm1731_vm5, 1, %v10343_v36  ;;  %v852_v22 = vadd.f32 1.0, %v851_v23 }
 0x11d   : > { %v859_v52 = vadd.f32 1.0, %v858_v29  ;;  %v1734_v55 = vadd.s32 %v1732_v3, %v1726_v1  ;;  %vm1735_vm6 = vc.u32 %v1733_v15, %v1729_v44  ;;  %v1686_v33 = vsel %vm1682_vm11, %v6606_v28, %v1685_v38 }
 0x11e   : > { %v994_v59 = vmul.f32 %v993_v0, %v991_v54  ;;  %v1708_v19 = vshrl.u32 %v6665_v51, 16  ;;  %v1736_v62 = vsel %vm1735_vm6, 1, %v10343_v36  ;;  %v869_v25 = vxor.u32 2147483648, %v852_v22 }
 0x11f   : > { %v860_v21 = vmul.f32 %v859_v52, %v6657_v32  ;;  %v1728_v63 = vshrl.u32 %v1724_v9, 16  ;;  %v1738_v31 = vadd.s32 %v1736_v62, %v1734_v55  ;;  %vm868_vm7 = vcmp.eq.s32.totalorder %v6640_v43, 2 }
 0x120   : > { %v995_v24 = vxor.u32 2147483648, %v994_v59  ;;  %v1000_v28 = vsel %vm6679_vm1, 0, %v6673_v61  ;;  %v1718_v38 = vadd.s32 %v1717_v40, %v1708_v19  ;;  %v1730_v10 = vshrl.u32 %v1725_v26, 16 }
 0x121   : > { %v866_v51 = vxor.u32 2147483648, %v860_v21  ;;  %v1739_v35 = vadd.s32 %v1738_v31, %v1728_v63  ;;  %v1806_v18 = vand.u32 2139095040, %v6610_v13  ;;  %v870_v14 = vsel %vm868_vm7, %v869_v25, %v860_v21 }
 0x122   : > { %v996_v32 = vsel %vm875_vm12, %v995_v24, %v994_v59  ;;  %v1687_v9 = vsel %vm1681_vm14, %v6663_v34, %v1686_v33  ;;  %v1737_v2 = vadd.s32 %v1733_v15, %v1729_v44  ;;  %vm861_vm8 = vweird.f32 %v6398_v16  ;;  %v346_v59 = vpop.permute.xlu0 %345 }
 0x123   : > { %v867_v53 = vsel %vm865_vm3, %v852_v22, %v866_v51  ;;  %v999_v61 = vsel %vm6679_vm1, %v6400_v17, %v996_v32  ;;  %v1740_v26 = vadd.s32 %v1739_v35, %v1730_v10  ;;  %v1807_v27 = vshrl.u32 %v1806_v18, 23  ;;  %v6731_v32 = vpop.permute.xlu2 %638 }
 0x124   : > { %v871_v1 = vsel %vm864_vm4, %v867_v53, %v870_v14  ;;  %v1001_v23 = vmul.f32 %v999_v61, %v999_v61  ;;  %vm1743_vm9 = vc.u32 %v1718_v38, %v1737_v2  ;;  %v1017_v39 = vadd.s32 3, %v1000_v28 }
 0x125   : > { %v872_v29 = vsel %vm861_vm8, nan, %v871_v1  ;;  %v1744_v34 = vadd.s32 1, %v1740_v26  ;;  %v5888_v44 = vadd.s32 4294967169, %v1807_v27  ;;  %v1741_v0 = vmul.u32 %v6625_v48, %v1687_v9 }
 0x126   : > { %v1002_v15 = vmul.f32 -0.001358992, %v1001_v23  ;;  %v1009_v54 = vmul.f32 -0.00019511016, %v1001_v23  ;;  %5678 = vst [vmem:[%s6717_s9] sm:$0xff] %v872_v29  ;;  %v10344_v16 = vand.u32 2147483647, %v6610_v13  ;;  %v538_v19 = vmul.f32 %v479_v8, %v6390_v6 }
 0x127   : > { %v1745_v40 = vsel %vm1743_vm9, %v1744_v34, %v1740_v26  ;;  %v1813_v3 = vadd.s32 1, %v5888_v44  ;;  %v1018_v33 = vand.u32 3, %v1017_v39  ;;  %v539_v31 = vmul.f32 %v479_v8, %v6392_v7 }
 0x128   : > { %v1810_v43 = vand.u32 8388607, %v10344_v16  ;;  %v1003_v22 = vadd.f32 0.041655596, %v1002_v15  ;;  %v1010_v52 = vadd.f32 0.008332121, %v1009_v54  ;;  %v1746_v55 = vadd.s32 %v1745_v40, %v1741_v0 }
 0x129   : > { %vm1814_vm10 = vcmp.gt.s32.totalorder %v1813_v3, 0  ;;  %v405_v28 = vmul.f32 %v346_v59, %v6386_v4  ;;  %v406_v18 = vmul.f32 %v346_v59, %v6388_v5  ;;  %vm1020_vm11 = vcmp.eq.s32.totalorder %v1018_v33, 0 }
 0x12a   : > { %v1004_v62 = vmul.f32 %v1003_v22, %v1001_v23  ;;  %v1011_v21 = vmul.f32 %v1010_v52, %v1001_v23  ;;  %v1747_v25 = vadd.s32 536870912, %v1746_v55  ;;  %v1815_v63 = vsel %vm1814_vm10, %v1813_v3, 0 }
 0x12b   : > { %v1811_v48 = vor.u32 8388608, %v1810_v43  ;;  %v1817_v24 = vand.u32 31, %v1815_v63  ;;  %vm1019_vm12 = vcmp.lt.s32.totalorder %v1018_v33, 2  ;;  %v570_v27 = vadd.f32 %v538_v19, %v405_v28 }
 0x12c   : > { %v1005_v51 = vadd.f32 -0.4999988, %v1004_v62  ;;  %v1012_v10 = vadd.f32 -0.16666654, %v1011_v21  ;;  %v6726_v35 = vshrl.u32 %v1747_v25, 30  ;;  %vm1016_vm13 = vweird.f32 %v6400_v17 }
 0x12d   : > { %v6729_v14 = vsub.s32 32, %v1817_v24  ;;  %vm1023_vm14 = vcmp.eq.s32.totalorder %v1018_v33, 2  ;;  %v1742_v1 = vadd.s32 %v1737_v2, %v1718_v38  ;;  %v6735_v29 = vshll.u32 %v1811_v48, 8 }
 0x12e   : > { %v1006_v9 = vmul.f32 %v1005_v51, %v1001_v23  ;;  %v1013_v53 = vmul.f32 %v1012_v10, %v1001_v23  ;;  %v1749_v26 = vshll.u32 %v6726_v35, 30  ;;  %v6737_v39 = vadd.f32 %v539_v31, %v406_v18 }
 0x12f   : > { %v6740_v54 = vadd.f32 %v6731_v32, %v570_v27  ;;  %v6742_v8 = vshrl.u32 %v1815_v63, 5  ;;  %v1821_v23 = vshrl.u32 %v10337_v12, %v6729_v14  ;;  %v1824_v0 = vshrl.u32 %v10338_v42, %v6729_v14 }
 0x130   : > { %v1007_v34 = vadd.f32 1.0, %v1006_v9  ;;  %v1014_v44 = vadd.f32 1.0, %v1013_v53  ;;  %v1750_v15 = vsub.s32 %v1746_v55, %v1749_v26  ;;  %v10345_v38 = vmov 2102212464  }
 0x131   : > { %v1827_v2 = vshrl.u32 %v10345_v38, %v6729_v14  ;;  %v1820_v3 = vshll.u32 %v10333_v47, %v1817_v24  ;;  %v1823_v22 = vshll.u32 %v10337_v12, %v1817_v24  ;;  %v1829_v52 = vshll.u32 %v10345_v38, %v1817_v24 }
 0x132   : > { %v1015_v40 = vmul.f32 %v1014_v44, %v999_v61  ;;  %v1024_v16 = vxor.u32 2147483648, %v1007_v34  ;;  %vm1751_vm15 = vcmp.lt.s32.totalorder %v1750_v15, 0  ;;  %v1752_v43 = vsub.s32 0, %v1750_v15 }
 0x133   : > { %v1830_v55 = vshrl.u32 %v10339_v30, %v6729_v14  ;;  %v1826_v62 = vshll.u32 %v10338_v42, %v1817_v24  ;;  %v1833_v21 = vshrl.u32 %v10332_v11, %v6729_v14  ;;  %v1822_v25 = vor.u32 %v1821_v23, %v1820_v3 }
 0x134   : > { %v1021_v59 = vxor.u32 2147483648, %v1015_v40  ;;  %v1753_v19 = vsel %vm1751_vm15, %v1752_v43, %v1750_v15  ;;  %v1825_v63 = vor.u32 %v1824_v0, %v1823_v22  ;;  %v1025_v28 = vsel %vm1023_vm14, %v1024_v16, %v1015_v40 }
 0x135   : > { %v1754_v61 = vclz %v1753_v19  ;;  %v1831_v31 = vor.u32 %v1830_v55, %v1829_v52  ;;  %v1828_v51 = vor.u32 %v1827_v2, %v1826_v62  ;;  %v1832_v10 = vshll.u32 %v10339_v30, %v1817_v24 }
 0x136   : > { %v1022_v48 = vsel %vm1020_vm11, %v1007_v34, %v1021_v59  ;;  %vm1650_vm0 = vcmp.lt.s32.totalorder %v6425_v46, 0  ;;  %v1852_v53 = vand.u32 65535, %v6735_v29  ;;  %v1853_v26 = vshrl.u32 %v6735_v29, 16 }
 0x137   : > { %v1026_v18 = vsel %vm1019_vm12, %v1022_v48, %v1025_v28  ;;  %v5886_v9 = vadd.s32 4294967294, %v1754_v61  ;;  %v1834_v44 = vor.u32 %v1833_v21, %v1832_v10  ;;  %vm1835_vm1 = vcmp.lt.s32.totalorder %v6742_v8, 1 }
 0x138   : > { %v1027_v27 = vsel %vm1016_vm13, nan, %v1026_v18  ;;  %vm1838_vm2 = vcmp.lt.s32.totalorder %v6742_v8, 4  ;;  %vm1837_vm4 = vcmp.lt.s32.totalorder %v6742_v8, 3  ;;  %v1843_v33 = vsel %vm1835_vm1, %v1822_v25, %v1825_v63 }
 0x139   : > { %5679 = vst [vmem:[%s6717_s9 + $0x8] sm:$0xff] %v1027_v27  ;;  %vm5887_vm3 = vcmp.lt.s32.totalorder %v5886_v9, 0  ;;  %v1844_v24 = vsel %vm1838_vm2, %v1831_v31, 920167782  ;;  %v10312_v23 = vand.u32 2147483647, %v6740_v54  ;;  %v1847_v16 = vsel %vm1835_vm1, %v1825_v63, %v1828_v51 }
 0x13a   : > { %v1757_v34 = vsel %vm5887_vm3, 0, %v5886_v9  ;;  %v1845_v17 = vsel %vm1837_vm4, %v1828_v51, %v1844_v24  ;;  %v2581_v0 = vand.u32 2139095040, %v6740_v54  ;;  %vm1836_vm5 = vcmp.lt.s32.totalorder %v6742_v8, 2 }
 0x13b   : > { %v1758_v2 = vsub.s32 32, %v1757_v34  ;;  %v1762_v40 = vsub.s32 4294967266, %v1757_v34  ;;  %v1759_v43 = vshll.u32 %v1750_v15, %v1757_v34  ;;  %v1772_v3 = vsub.s32 4, %v6726_v35 }
 0x13c   : > { %v1846_v22 = vsel %vm1836_vm5, %v1843_v33, %v1845_v17  ;;  %v1848_v52 = vsel %vm1838_vm2, %v1834_v44, 1326507024  ;;  %v10346_v21 = vand.u32 2147483647, %v6425_v46  ;;  %v1819_v15 = vshrl.u32 %v10333_v47, %v6729_v14 }
 0x13d   : > { %v1760_v55 = vshrl.u32 %v1742_v1, %v1758_v2  ;;  %v1763_v59 = vadd.s32 127, %v1762_v40  ;;  %v1849_v19 = vsel %vm1837_vm4, %v1831_v31, %v1848_v52  ;;  %v1876_v62 = vand.u32 65535, %v1846_v22 }
 0x13e   : > { %vm6791_vm6 = vcmp.le.f32.partialorder %v10346_v21, 0.7853982  ;;  %v1840_v48 = vsel %vm1838_vm2, %v1828_v51, 2102212464  ;;  %v1850_v1 = vsel %vm1836_vm5, %v1847_v16, %v1849_v19  ;;  %v1877_v28 = vshrl.u32 %v1846_v22, 16 }
 0x13f   : > { %v1761_v10 = vor.u32 %v1760_v55, %v1759_v43  ;;  %v1764_v18 = vshll.u32 %v1763_v59, 23  ;;  %v1854_v31 = vand.u32 65535, %v1850_v1  ;;  %v1855_v9 = vshrl.u32 %v1850_v1, 16 }
 0x140   : > { %v1773_v27 = vsel %vm1650_vm0, %v1772_v3, %v6726_v35  ;;  %v1839_v44 = vsel %vm1835_vm1, %v1819_v15, %v1822_v25  ;;  %v1879_v33 = vmul.u32 %v1877_v28, %v1852_v53  ;;  %v1880_v14 = vmul.u32 %v1876_v62, %v1853_v26 }
 0x141   : > { %v1765_v24 = vor.u32 4788187, %v1764_v18  ;;  %v1841_v51 = vsel %vm1837_vm4, %v1825_v63, %v1840_v48  ;;  %v1857_v34 = vmul.u32 %v1855_v9, %v1852_v53  ;;  %v2582_v17 = vshrl.u32 %v2581_v0, 23 }
 0x142   : > { %v1858_v2 = vmul.u32 %v1854_v31, %v1853_v26  ;;  %v1878_v40 = vmul.u32 %v1876_v62, %v1852_v53  ;;  %v1881_v16 = vmul.u32 %v1877_v28, %v1853_v26  ;;  %v1882_v43 = vshll.u32 %v1879_v33, 16 }
 0x143   : > { %v1766_v22 = vand.u32 2147483647, %v1765_v24  ;;  %v1768_v52 = vcvt.s32.f32 %v1761_v10  ;;  %v1856_v55 = vmul.u32 %v1854_v31, %v1852_v53  ;;  %v1860_v59 = vshll.u32 %v1857_v34, 16 }
 0x144   : > { %v1859_v35 = vmul.u32 %v1855_v9, %v1853_v26  ;;  %v1862_v3 = vshll.u32 %v1858_v2, 16  ;;  %v1884_v19 = vshll.u32 %v1880_v14, 16  ;;  %vm1886_vm7 = vc.u32 %v1878_v40, %v1882_v43 }
 0x145   : > { %v1769_v25 = vmul.f32 %v1768_v52, %v1766_v22  ;;  %vm1864_vm8 = vc.u32 %v1856_v55, %v1860_v59  ;;  %v1866_v21 = vadd.s32 %v1860_v59, %v1856_v55  ;;  %v1887_v15 = vsel %vm1886_vm7, 1, %v10343_v36 }
 0x146   : > { %v1865_v63 = vsel %vm1864_vm8, 1, %v10343_v36  ;;  %v1888_v0 = vadd.s32 %v1882_v43, %v1878_v40  ;;  %v1889_v48 = vadd.s32 %v1887_v15, %v1881_v16  ;;  %v5903_v62 = vadd.s32 4294967169, %v2582_v17 }
 0x147   : > { %v1770_v1 = vxor.u32 2147483648, %v1769_v25  ;;  %v1775_v28 = vsel %vm6791_vm6, 0, %v1773_v27  ;;  %v1867_v53 = vadd.s32 %v1865_v63, %v1859_v35  ;;  %vm1868_vm9 = vc.u32 %v1866_v21, %v1862_v3 }
 0x148   : > { %v1842_v26 = vsel %vm1836_vm5, %v1839_v44, %v1841_v51  ;;  %v1869_v10 = vsel %vm1868_vm9, 1, %v10343_v36  ;;  %vm1890_vm10 = vc.u32 %v1888_v0, %v1884_v19  ;;  %v2588_v18 = vadd.s32 1, %v5903_v62 }
 0x149   : > { %v1771_v31 = vsel %vm1650_vm0, %v1770_v1, %v1769_v25  ;;  %v1861_v9 = vshrl.u32 %v1857_v34, 16  ;;  %v1871_v24 = vadd.s32 %v1869_v10, %v1867_v53  ;;  %v1891_v17 = vsel %vm1890_vm10, 1, %v10343_v36 }
 0x14a   : > { %v1774_v27 = vsel %vm6791_vm6, %v6425_v46, %v1771_v31  ;;  %v1883_v40 = vshrl.u32 %v1879_v33, 16  ;;  %v1893_v16 = vadd.s32 %v1891_v17, %v1889_v48  ;;  %vm2589_vm11 = vcmp.gt.s32.totalorder %v2588_v18, 0 }
 0x14b   : > { %v1776_v8 = vmul.f32 %v1774_v27, %v1774_v27  ;;  %v1863_v44 = vshrl.u32 %v1858_v2, 16  ;;  %v1872_v51 = vadd.s32 %v1871_v24, %v1861_v9  ;;  %v2590_v43 = vsel %vm2589_vm11, %v2588_v18, 0 }
 0x14c   : > { %v1885_v22 = vshrl.u32 %v1880_v14, 16  ;;  %v1894_v52 = vadd.s32 %v1893_v16, %v1883_v40  ;;  %v2585_v55 = vand.u32 8388607, %v10312_v23  ;;  %v2592_v34 = vand.u32 31, %v2590_v43 }
 0x14d   : > { %v1777_v59 = vmul.f32 -0.001358992, %v1776_v8  ;;  %v1784_v35 = vmul.f32 -0.00019511016, %v1776_v8  ;;  %v6823_v3 = vadd.s32 %v1872_v51, %v1863_v44  ;;  %v6825_v25 = vadd.s32 %v1888_v0, %v1884_v19 }
 0x14e   : > { %v1792_v61 = vadd.s32 3, %v1775_v28  ;;  %v1895_v33 = vadd.s32 %v1894_v52, %v1885_v22  ;;  %v6829_v21 = vadd.f32 %v6731_v32, %v6737_v39  ;;  %v6831_v2 = vsub.s32 32, %v2592_v34 }
 0x14f   : > { %v1778_v14 = vadd.f32 0.041655596, %v1777_v59  ;;  %v1785_v15 = vadd.f32 0.008332121, %v1784_v35  ;;  %v1896_v63 = vmul.u32 %v6735_v29, %v1842_v26  ;;  %vm1898_vm12 = vc.u32 %v6823_v3, %v6825_v25 }
 0x150   : > { %v1899_v48 = vadd.s32 1, %v1895_v33  ;;  %v2586_v62 = vor.u32 8388608, %v2585_v55  ;;  %v6836_v1 = vshrl.u32 %v2590_v43, 5  ;;  %v2596_v19 = vshrl.u32 %v10337_v12, %v6831_v2 }
 0x151   : > { %v1779_v0 = vmul.f32 %v1778_v14, %v1776_v8  ;;  %v1786_v28 = vmul.f32 %v1785_v15, %v1776_v8  ;;  %v2595_v32 = vshll.u32 %v10333_v47, %v2592_v34  ;;  %v2599_v39 = vshrl.u32 %v10338_v42, %v6831_v2 }
 0x152   : > { %v1900_v53 = vsel %vm1898_vm12, %v1899_v48, %v1895_v33  ;;  %v2598_v29 = vshll.u32 %v10337_v12, %v2592_v34  ;;  %v2601_v26 = vshll.u32 %v10338_v42, %v2592_v34  ;;  %v2602_v10 = vshrl.u32 %v10345_v38, %v6831_v2 }
 0x153   : > { %v1780_v18 = vadd.f32 -0.4999988, %v1779_v0  ;;  %v1787_v31 = vadd.f32 -0.16666654, %v1786_v28  ;;  %v1901_v9 = vadd.s32 %v1900_v53, %v1896_v63  ;;  %v2597_v24 = vor.u32 %v2596_v19, %v2595_v32 }
 0x154   : > { %v2604_v17 = vshll.u32 %v10345_v38, %v2592_v34  ;;  %v2605_v40 = vshrl.u32 %v10339_v30, %v6831_v2  ;;  %v2607_v16 = vshll.u32 %v10339_v30, %v2592_v34  ;;  %v2608_v44 = vshrl.u32 %v10332_v11, %v6831_v2 }
 0x155   : > { %v1781_v51 = vmul.f32 %v1780_v18, %v1776_v8  ;;  %v1788_v43 = vmul.f32 %v1787_v31, %v1776_v8  ;;  %v1902_v22 = vadd.s32 536870912, %v1901_v9  ;;  %v6853_v52 = vor.u32 %v2599_v39, %v2598_v29 }
 0x156   : > { %vm1791_vm13 = vweird.f32 %v6425_v46  ;;  %v1793_v55 = vand.u32 3, %v1792_v61  ;;  %v2603_v59 = vor.u32 %v2602_v10, %v2601_v26  ;;  %v2606_v35 = vor.u32 %v2605_v40, %v2604_v17 }
 0x157   : > { %v2609_v33 = vor.u32 %v2608_v44, %v2607_v16  ;;  %v1782_v14 = vadd.f32 1.0, %v1781_v51  ;;  %v1789_v15 = vadd.f32 1.0, %v1788_v43  ;;  %v6856_v63 = vshrl.u32 %v1902_v22, 30 }
 0x158   : > { %vm2613_vm14 = vcmp.lt.s32.totalorder %v6836_v1, 4  ;;  %vm2610_vm15 = vcmp.lt.s32.totalorder %v6836_v1, 1  ;;  %vm2612_vm0 = vcmp.lt.s32.totalorder %v6836_v1, 3  ;;  %v6863_v34 = vshll.u32 %v2586_v62, 8 }
 0x159   : > { %v2619_v8 = vsel %vm2613_vm14, %v2606_v35, 920167782  ;;  %v1790_v48 = vmul.f32 %v1789_v15, %v1774_v27  ;;  %v1799_v61 = vxor.u32 2147483648, %v1782_v14  ;;  %v1904_v19 = vshll.u32 %v6856_v63, 30 }
 0x15a   : > { %v2618_v0 = vsel %vm2610_vm15, %v2597_v24, %v6853_v52  ;;  %vm1794_vm1 = vcmp.lt.s32.totalorder %v1793_v55, 2  ;;  %vm1795_vm2 = vcmp.eq.s32.totalorder %v1793_v55, 0  ;;  %v2620_v28 = vsel %vm2612_vm0, %v2603_v59, %v2619_v8 }
 0x15b   : > { %v2623_v32 = vsel %vm2613_vm14, %v2609_v33, 1326507024  ;;  %v1796_v39 = vxor.u32 2147483648, %v1790_v48  ;;  %v1905_v53 = vsub.s32 %v1901_v9, %v1904_v19  ;;  %vm2611_vm3 = vcmp.lt.s32.totalorder %v6836_v1, 2 }
 0x15c   : > { %v2622_v27 = vsel %vm2610_vm15, %v6853_v52, %v2603_v59  ;;  %vm1798_vm4 = vcmp.eq.s32.totalorder %v1793_v55, 2  ;;  %v2621_v62 = vsel %vm2611_vm3, %v2618_v0, %v2620_v28  ;;  %v2624_v29 = vsel %vm2612_vm0, %v2606_v35, %v2623_v32 }
 0x15d   : > { %v2627_v26 = vand.u32 65535, %v6863_v34  ;;  %v1797_v10 = vsel %vm1795_vm2, %v1782_v14, %v1796_v39  ;;  %v1800_v18 = vsel %vm1798_vm4, %v1799_v61, %v1790_v48  ;;  %vm1906_vm5 = vcmp.lt.s32.totalorder %v1905_v53, 0 }
 0x15e   : > { %v1907_v31 = vsub.s32 0, %v1905_v53  ;;  %v1801_v9 = vsel %vm1794_vm1, %v1797_v10, %v1800_v18  ;;  %v2625_v17 = vsel %vm2611_vm3, %v2622_v27, %v2624_v29  ;;  %v2628_v40 = vshrl.u32 %v6863_v34, 16 }
 0x15f   : > { %v2652_v16 = vshrl.u32 %v2621_v62, 16  ;;  %v1802_v44 = vsel %vm1791_vm13, nan, %v1801_v9  ;;  %v2629_v43 = vand.u32 65535, %v2625_v17  ;;  %v2651_v22 = vand.u32 65535, %v2621_v62 }
 0x160   : > { %v1908_v51 = vsel %vm1906_vm5, %v1907_v31, %v1905_v53  ;;  %5684 = vst [vmem:[%s6717_s9 + $0x30] sm:$0xff] %v1802_v44  ;;  %v2594_v33 = vshrl.u32 %v10333_v47, %v6831_v2  ;;  %v2630_v14 = vshrl.u32 %v2625_v17, 16  ;;  %v1897_v15 = vadd.s32 %v6825_v25, %v6823_v3 }
 0x161   : > { %v1909_v35 = vclz %v1908_v51  ;;  %v2654_v55 = vmul.u32 %v2652_v16, %v2627_v26  ;;  %v10311_v8 = vand.u32 2147483647, %v6829_v21  ;;  %v2633_v19 = vmul.u32 %v2629_v43, %v2628_v40 }
 0x162   : > { %v2614_v46 = vsel %vm2610_vm15, %v2594_v33, %v2597_v24  ;;  %v2632_v61 = vmul.u32 %v2630_v14, %v2627_v26  ;;  %v2615_v0 = vsel %vm2613_vm14, %v2603_v59, 2102212464  ;;  %v2653_v28 = vmul.u32 %v2651_v22, %v2627_v26 }
 0x163   : > { %v5889_v48 = vadd.s32 4294967294, %v1909_v35  ;;  %v2655_v32 = vmul.u32 %v2651_v22, %v2628_v40  ;;  %v2657_v39 = vshll.u32 %v2654_v55, 16  ;;  %v2631_v2 = vmul.u32 %v2629_v43, %v2627_v26 }
 0x164   : > { %v2634_v27 = vmul.u32 %v2630_v14, %v2628_v40  ;;  %v2635_v62 = vshll.u32 %v2632_v61, 16  ;;  %v2637_v3 = vshll.u32 %v2633_v19, 16  ;;  %v2656_v25 = vmul.u32 %v2652_v16, %v2628_v40 }
 0x165   : > { %vm5890_vm6 = vcmp.lt.s32.totalorder %v5889_v48, 0  ;;  %v2659_v10 = vshll.u32 %v2655_v32, 16  ;;  %vm2661_vm8 = vc.u32 %v2653_v28, %v2657_v39  ;;  %v2663_v59 = vadd.s32 %v2657_v39, %v2653_v28 }
 0x166   : > { %v1912_v29 = vsel %vm5890_vm6, 0, %v5889_v48  ;;  %vm2639_vm7 = vc.u32 %v2631_v2, %v2635_v62  ;;  %v2641_v17 = vadd.s32 %v2635_v62, %v2631_v2  ;;  %v2662_v26 = vsel %vm2661_vm8, 1, %v10343_v36 }
 0x167   : > { %v1913_v18 = vsub.s32 32, %v1912_v29  ;;  %v1914_v31 = vshll.u32 %v1905_v53, %v1912_v29  ;;  %v1917_v9 = vsub.s32 4294967266, %v1912_v29  ;;  %v2640_v24 = vsel %vm2639_vm7, 1, %v10343_v36 }
 0x168   : > { %v2642_v22 = vadd.s32 %v2640_v24, %v2634_v27  ;;  %v2616_v43 = vsel %vm2612_vm0, %v6853_v52, %v2615_v0  ;;  %vm2643_vm9 = vc.u32 %v2641_v17, %v2637_v3  ;;  %v2664_v40 = vadd.s32 %v2662_v26, %v2656_v25 }
 0x169   : > { %v1915_v44 = vshrl.u32 %v1897_v15, %v1913_v18  ;;  %v1918_v51 = vadd.s32 127, %v1917_v9  ;;  %vm2665_vm10 = vc.u32 %v2663_v59, %v2659_v10  ;;  %v2644_v35 = vsel %vm2643_vm9, 1, %v10343_v36 }
 0x16a   : > { %v2666_v33 = vsel %vm2665_vm10, 1, %v10343_v36  ;;  %v2636_v14 = vshrl.u32 %v2632_v61, 16  ;;  %v2646_v48 = vadd.s32 %v2644_v35, %v2642_v22  ;;  %v2658_v15 = vshrl.u32 %v2654_v55, 16 }
 0x16b   : > { %v1916_v53 = vor.u32 %v1915_v44, %v1914_v31  ;;  %v1919_v16 = vshll.u32 %v1918_v51, 23  ;;  %v2668_v28 = vadd.s32 %v2666_v33, %v2664_v40  ;;  %vm1805_vm11 = vcmp.lt.s32.totalorder %v6610_v13, 0 }
 0x16c   : > { %v1927_v2 = vsub.s32 4, %v6856_v63  ;;  %v2736_v52 = vand.u32 2139095040, %v6829_v21  ;;  %v2638_v0 = vshrl.u32 %v2633_v19, 16  ;;  %v2647_v27 = vadd.s32 %v2646_v48, %v2636_v14 }
 0x16d   : > { %v1920_v39 = vor.u32 4788187, %v1919_v16  ;;  %v2660_v62 = vshrl.u32 %v2655_v32, 16  ;;  %v2669_v29 = vadd.s32 %v2668_v28, %v2658_v15  ;;  %v1923_v25 = vcvt.s32.f32 %v1916_v53 }
 0x16e   : > { %v2617_v18 = vsel %vm2611_vm3, %v2614_v46, %v2616_v43  ;;  %v2737_v61 = vshrl.u32 %v2736_v52, 23  ;;  %v2648_v31 = vadd.s32 %v2647_v27, %v2638_v0  ;;  %v2667_v55 = vadd.s32 %v2663_v59, %v2659_v10  ;;  %v494_v10 = vpop.permute.xlu1 %493 }
 0x16f   : > { %v1921_v3 = vand.u32 2147483647, %v1920_v39  ;;  %v2670_v9 = vadd.s32 %v2669_v29, %v2660_v62  ;;  %v2740_v24 = vand.u32 8388607, %v10311_v8  ;;  %v1928_v19 = vsel %vm1805_vm11, %v1927_v2, %v6856_v63  ;;  %v6924_v63 = vpop.permute.xlu0 %360  ;;  %v6936_v62 = vpop.permute.xlu2 %653 }
 0x170   : > { %v5906_v44 = vadd.s32 4294967169, %v2737_v61  ;;  %vm2673_vm12 = vc.u32 %v2648_v31, %v2667_v55  ;;  %v10349_v51 = vand.u32 2147483647, %v6610_v13  ;;  %v2671_v59 = vmul.u32 %v6863_v34, %v2617_v18 }
 0x171   : > { %v1924_v17 = vmul.f32 %v1923_v25, %v1921_v3  ;;  %v2674_v32 = vadd.s32 1, %v2670_v9  ;;  %v2741_v40 = vor.u32 8388608, %v2740_v24  ;;  %v544_v33 = vmul.f32 %v494_v10, %v6390_v6 }
 0x172   : > { %vm6917_vm13 = vcmp.le.f32.partialorder %v10349_v51, 0.7853982  ;;  %v2743_v22 = vadd.s32 1, %v5906_v44  ;;  %v411_v39 = vmul.f32 %v6924_v63, %v6386_v4  ;;  %v6939_v29 = vmul.f32 %v494_v10, %v6392_v7 }
 0x173   : > { %v1925_v46 = vxor.u32 2147483648, %v1924_v17  ;;  %v1930_v26 = vsel %vm6917_vm13, 0, %v1928_v19  ;;  %v2675_v43 = vsel %vm2673_vm12, %v2674_v32, %v2670_v9  ;;  %v6934_v2 = vshll.u32 %v2741_v40, 8 }
 0x174   : > { %v2676_v16 = vadd.s32 %v2675_v43, %v2671_v59  ;;  %vm2744_vm14 = vcmp.gt.s32.totalorder %v2743_v22, 0  ;;  %v1947_v48 = vadd.s32 3, %v1930_v26  ;;  %v576_v25 = vadd.f32 %v544_v33, %v411_v39 }
 0x175   : > { %v1926_v53 = vsel %vm1805_vm11, %v1925_v46, %v1924_v17  ;;  %v2745_v34 = vsel %vm2744_vm14, %v2743_v22, 0  ;;  %vm2580_vm15 = vcmp.lt.s32.totalorder %v6740_v54, 0  ;;  %v6944_v17 = vadd.s32 %v2667_v55, %v2648_v31 }
 0x176   : > { %v1929_v35 = vsel %vm6917_vm13, %v6610_v13, %v1926_v53  ;;  %v2677_v15 = vadd.s32 536870912, %v2676_v16  ;;  %v2747_v28 = vand.u32 31, %v2745_v34  ;;  %v6941_v9 = vand.u32 3, %v1947_v48 }
 0x177   : > { %v1931_v14 = vmul.f32 %v1929_v35, %v1929_v35  ;;  %v6947_v19 = vand.u32 65535, %v6934_v2  ;;  %v6950_v44 = vshrl.u32 %v6934_v2, 16  ;;  %v6953_v32 = vadd.f32 %v6936_v62, %v576_v25 }
 0x178   : > { %v2678_v27 = vshrl.u32 %v2677_v15, 30  ;;  %v2748_v3 = vsub.s32 32, %v2747_v28  ;;  %v6957_v10 = vshrl.u32 %v2745_v34, 5  ;;  %v2750_v59 = vshll.u32 %v10333_v47, %v2747_v28 }
 0x179   : > { %v1932_v52 = vmul.f32 -0.001358992, %v1931_v14  ;;  %v1939_v0 = vmul.f32 -0.00019511016, %v1931_v14  ;;  %v2753_v55 = vshll.u32 %v10337_v12, %v2747_v28  ;;  %vm1953_vm0 = vcmp.eq.s32.totalorder %v6941_v9, 2 }
 0x17a   : > { %v2679_v24 = vshll.u32 %v2678_v27, 30  ;;  %v2751_v31 = vshrl.u32 %v10337_v12, %v2748_v3  ;;  %v2754_v22 = vshrl.u32 %v10338_v42, %v2748_v3  ;;  %vm1950_vm2 = vcmp.eq.s32.totalorder %v6941_v9, 0 }
 0x17b   : > { %v1933_v18 = vadd.f32 0.041655596, %v1932_v52  ;;  %v1940_v61 = vadd.f32 0.008332121, %v1939_v0  ;;  %v2702_v53 = vsub.s32 4, %v2678_v27  ;;  %v2759_v33 = vshll.u32 %v10345_v38, %v2747_v28 }
 0x17c   : > { %v6955_v46 = vsub.s32 %v2676_v16, %v2679_v24  ;;  %v2757_v16 = vshrl.u32 %v10345_v38, %v2748_v3  ;;  %v2760_v34 = vshrl.u32 %v10339_v30, %v2748_v3  ;;  %vm1949_vm3 = vcmp.lt.s32.totalorder %v6941_v9, 2 }
 0x17d   : > { %v1934_v51 = vmul.f32 %v1933_v18, %v1931_v14  ;;  %v1941_v1 = vmul.f32 %v1940_v61, %v1931_v14  ;;  %v2763_v52 = vshrl.u32 %v10332_v11, %v2748_v3  ;;  %vm1946_vm4 = vweird.f32 %v6610_v13 }
 0x17e   : > { %vm2681_vm1 = vcmp.lt.s32.totalorder %v6955_v46, 0  ;;  %v2682_v40 = vsub.s32 0, %v6955_v46  ;;  %v2752_v25 = vor.u32 %v2751_v31, %v2750_v59  ;;  %v2756_v18 = vshll.u32 %v10338_v42, %v2747_v28 }
 0x17f   : > { %v1935_v26 = vadd.f32 -0.4999988, %v1934_v51  ;;  %v1942_v43 = vadd.f32 -0.16666654, %v1941_v1  ;;  %v2761_v61 = vor.u32 %v2760_v34, %v2759_v33  ;;  %v2755_v1 = vor.u32 %v2754_v22, %v2753_v55 }
 0x180   : > { %v2683_v39 = vsel %vm2681_vm1, %v2682_v40, %v6955_v46  ;;  %v2762_v8 = vshll.u32 %v10339_v30, %v2747_v28  ;;  %v2758_v40 = vor.u32 %v2757_v16, %v2756_v18  ;;  %v10352_v59 = vand.u32 2147483647, %v6740_v54 }
 0x181   : > { %v1936_v48 = vmul.f32 %v1935_v26, %v1931_v14  ;;  %v1943_v15 = vmul.f32 %v1942_v43, %v1931_v14  ;;  %v2684_v0 = vclz %v2683_v39  ;;  %v6978_v14 = vsel %vm2580_vm15, %v2702_v53, %v2678_v27 }
 0x182   : > { %v2749_v43 = vshrl.u32 %v10333_v47, %v2748_v3  ;;  %vm6983_vm5 = vcmp.le.f32.partialorder %v10352_v59, 0.7853982  ;;  %v2764_v33 = vor.u32 %v2763_v52, %v2762_v8  ;;  %vm2768_vm6 = vcmp.lt.s32.totalorder %v6957_v10, 4 }
 0x183   : > { %v1937_v24 = vadd.f32 1.0, %v1936_v48  ;;  %v1944_v51 = vadd.f32 1.0, %v1943_v15  ;;  %v5904_v26 = vadd.s32 4294967294, %v2684_v0  ;;  %vm2765_vm8 = vcmp.lt.s32.totalorder %v6957_v10, 1 }
 0x184   : > { %vm2766_vm9 = vcmp.lt.s32.totalorder %v6957_v10, 2  ;;  %v2774_v28 = vsel %vm2768_vm6, %v2761_v61, 920167782  ;;  %vm2767_vm10 = vcmp.lt.s32.totalorder %v6957_v10, 3  ;;  %v2773_v3 = vsel %vm2765_vm8, %v2752_v25, %v2755_v1 }
 0x185   : > { %v1945_v23 = vmul.f32 %v1944_v51, %v1929_v35  ;;  %v1954_v49 = vxor.u32 2147483648, %v1937_v24  ;;  %vm5905_vm7 = vcmp.lt.s32.totalorder %v5904_v26, 0  ;;  %v2775_v34 = vsel %vm2767_vm10, %v2758_v40, %v2774_v28 }
 0x186   : > { %v2687_v35 = vsel %vm5905_vm7, 0, %v5904_v26  ;;  %v2777_v48 = vsel %vm2765_vm8, %v2755_v1, %v2758_v40  ;;  %v2778_v15 = vsel %vm2768_vm6, %v2764_v33, 1326507024  ;;  %v2770_v9 = vsel %vm2768_vm6, %v2758_v40, 2102212464 }
 0x187   : > { %v1951_v27 = vxor.u32 2147483648, %v1945_v23  ;;  %v1955_v8 = vsel %vm1953_vm0, %v1954_v49, %v1945_v23  ;;  %v2688_v55 = vsub.s32 32, %v2687_v35  ;;  %v2689_v22 = vshll.u32 %v6955_v46, %v2687_v35 }
 0x188   : > { %v2692_v53 = vsub.s32 4294967266, %v2687_v35  ;;  %v2776_v46 = vsel %vm2766_vm9, %v2773_v3, %v2775_v34  ;;  %v2779_v0 = vsel %vm2767_vm10, %v2761_v61, %v2778_v15  ;;  %v3511_v13 = vand.u32 2139095040, %v6953_v32 }
 0x189   : > { %v1952_v16 = vsel %vm1950_vm2, %v1937_v24, %v1951_v27  ;;  %v2690_v23 = vshrl.u32 %v6944_v17, %v2688_v55  ;;  %v2806_v18 = vand.u32 65535, %v2776_v46  ;;  %v2807_v24 = vshrl.u32 %v2776_v46, 16 }
 0x18a   : > { %v1956_v49 = vsel %vm1949_vm3, %v1952_v16, %v1955_v8  ;;  %v2693_v39 = vadd.s32 127, %v2692_v53  ;;  %v2780_v17 = vsel %vm2766_vm9, %v2777_v48, %v2779_v0  ;;  %v2705_v61 = vsel %vm6983_vm5, 0, %v6978_v14 }
 0x18b   : > { %v1957_v52 = vsel %vm1946_vm4, nan, %v1956_v49  ;;  %v2691_v51 = vor.u32 %v2690_v23, %v2689_v22  ;;  %v2784_v59 = vand.u32 65535, %v2780_v17  ;;  %v2785_v33 = vshrl.u32 %v2780_v17, 16 }
 0x18c   : > { %5685 = vst [vmem:[%s6717_s9 + $0x38] sm:$0xff] %v1957_v52  ;;  %v2694_v26 = vshll.u32 %v2693_v39, 23  ;;  %v2809_v28 = vmul.u32 %v2807_v24, %v6947_v19  ;;  %v2769_v35 = vsel %vm2765_vm8, %v2749_v43, %v2752_v25  ;;  %v2810_v3 = vmul.u32 %v2806_v18, %v6950_v44 }
 0x18d   : > { %v2771_v40 = vsel %vm2767_vm10, %v2755_v1, %v2770_v9  ;;  %v2787_v8 = vmul.u32 %v2785_v33, %v6947_v19  ;;  %v2788_v55 = vmul.u32 %v2784_v59, %v6950_v44  ;;  %v2808_v22 = vmul.u32 %v2806_v18, %v6947_v19 }
 0x18e   : > { %v2695_v27 = vor.u32 4788187, %v2694_v26  ;;  %v2698_v16 = vcvt.s32.f32 %v2691_v51  ;;  %v2811_v34 = vmul.u32 %v2807_v24, %v6950_v44  ;;  %v2812_v48 = vshll.u32 %v2809_v28, 16 }
 0x18f   : > { %v2786_v14 = vmul.u32 %v2784_v59, %v6947_v19  ;;  %v2789_v25 = vmul.u32 %v2785_v33, %v6950_v44  ;;  %v2790_v43 = vshll.u32 %v2787_v8, 16  ;;  %v2814_v15 = vshll.u32 %v2810_v3, 16 }
 0x190   : > { %v2696_v53 = vand.u32 2147483647, %v2695_v27  ;;  %v2792_v23 = vshll.u32 %v2788_v55, 16  ;;  %vm2816_vm11 = vc.u32 %v2808_v22, %v2812_v48  ;;  %v2818_v1 = vadd.s32 %v2812_v48, %v2808_v22 }
 0x191   : > { %vm2794_vm12 = vc.u32 %v2786_v14, %v2790_v43  ;;  %v2796_v39 = vadd.s32 %v2790_v43, %v2786_v14  ;;  %v2817_v46 = vsel %vm2816_vm11, 1, %v10343_v36  ;;  %v3512_v52 = vshrl.u32 %v3511_v13, 23 }
 0x192   : > { %v2699_v49 = vmul.f32 %v2698_v16, %v2696_v53  ;;  %v2795_v18 = vsel %vm2794_vm12, 1, %v10343_v36  ;;  %v2819_v24 = vadd.s32 %v2817_v46, %v2811_v34  ;;  %vm2820_vm13 = vc.u32 %v2818_v1, %v2814_v15 }
 0x193   : > { %v2797_v51 = vadd.s32 %v2795_v18, %v2789_v25  ;;  %vm2798_vm14 = vc.u32 %v2796_v39, %v2792_v23  ;;  %v2813_v19 = vshrl.u32 %v2809_v28, 16  ;;  %v2821_v44 = vsel %vm2820_vm13, 1, %v10343_v36 }
 0x194   : > { %v2700_v0 = vxor.u32 2147483648, %v2699_v49  ;;  %v2799_v9 = vsel %vm2798_vm14, 1, %v10343_v36  ;;  %v2823_v17 = vadd.s32 %v2821_v44, %v2819_v24  ;;  %v5921_v59 = vadd.s32 4294967169, %v3512_v52 }
 0x195   : > { %v2791_v13 = vshrl.u32 %v2787_v8, 16  ;;  %v2801_v27 = vadd.s32 %v2799_v9, %v2797_v51  ;;  %v3508_v22 = vand.u32 2147483647, %v6953_v32  ;;  %v2815_v16 = vshrl.u32 %v2810_v3, 16 }
 0x196   : > { %v2701_v26 = vsel %vm2580_vm15, %v2700_v0, %v2699_v49  ;;  %v2824_v28 = vadd.s32 %v2823_v17, %v2813_v19  ;;  %v3518_v34 = vadd.s32 1, %v5921_v59  ;;  %v2722_v48 = vadd.s32 3, %v2705_v61 }
 0x197   : > { %v2704_v33 = vsel %vm6983_vm5, %v6740_v54, %v2701_v26  ;;  %v2772_v14 = vsel %vm2766_vm9, %v2769_v35, %v2771_v40  ;;  %v2793_v25 = vshrl.u32 %v2788_v55, 16  ;;  %v2802_v43 = vadd.s32 %v2801_v27, %v2791_v13 }
 0x198   : > { %v2706_v53 = vmul.f32 %v2704_v33, %v2704_v33  ;;  %v2825_v39 = vadd.s32 %v2824_v28, %v2815_v16  ;;  %vm3519_vm15 = vcmp.gt.s32.totalorder %v3518_v34, 0  ;;  %v7050_v8 = vadd.s32 %v2818_v1, %v2814_v15 }
 0x199   : > { %v7048_v31 = vadd.s32 %v2802_v43, %v2793_v25  ;;  %v3515_v46 = vand.u32 8388607, %v3508_v22  ;;  %v3520_v3 = vsel %vm3519_vm15, %v3518_v34, 0  ;;  %v412_v61 = vmul.f32 %v6924_v63, %v6388_v5 }
 0x19a   : > { %v2707_v49 = vmul.f32 -0.001358992, %v2706_v53  ;;  %v2714_v23 = vmul.f32 -0.00019511016, %v2706_v53  ;;  %v2829_v35 = vadd.s32 1, %v2825_v39  ;;  %v2723_v40 = vand.u32 3, %v2722_v48 }
 0x19b   : > { %v2826_v55 = vmul.u32 %v6934_v2, %v2772_v14  ;;  %vm2828_vm0 = vc.u32 %v7048_v31, %v7050_v8  ;;  %v3522_v0 = vand.u32 31, %v3520_v3  ;;  %v577_v24 = vadd.f32 %v6939_v29, %v412_v61 }
 0x19c   : > { %v2708_v52 = vadd.f32 0.041655596, %v2707_v49  ;;  %v2715_v10 = vadd.f32 0.008332121, %v2714_v23  ;;  %v2830_v1 = vsel %vm2828_vm0, %v2829_v35, %v2825_v39  ;;  %vm2725_vm1 = vcmp.eq.s32.totalorder %v2723_v40, 0 }
 0x19d   : > { %v2831_v51 = vadd.s32 %v2830_v1, %v2826_v55  ;;  %v3523_v19 = vsub.s32 32, %v3522_v0  ;;  %v7061_v63 = vadd.f32 %v6936_v62, %v577_v24  ;;  %vm2728_vm2 = vcmp.eq.s32.totalorder %v2723_v40, 2 }
 0x19e   : > { %v2709_v18 = vmul.f32 %v2708_v52, %v2706_v53  ;;  %v2716_v15 = vmul.f32 %v2715_v10, %v2706_v53  ;;  %v3516_v2 = vor.u32 8388608, %v3515_v46  ;;  %vm2724_vm3 = vcmp.lt.s32.totalorder %v2723_v40, 2 }
 0x19f   : > { %v2832_v9 = vadd.s32 536870912, %v2831_v51  ;;  %v3526_v17 = vshrl.u32 %v10337_v12, %v3523_v19  ;;  %v3529_v27 = vshrl.u32 %v10338_v42, %v3523_v19  ;;  %v3535_v29 = vshrl.u32 %v10339_v30, %v3523_v19 }
 0x1a0   : > { %v2710_v44 = vadd.f32 -0.4999988, %v2709_v18  ;;  %v2717_v26 = vadd.f32 -0.16666654, %v2716_v15  ;;  %vm2721_vm4 = vweird.f32 %v6740_v54  ;;  %v7067_v28 = vshrl.u32 %v3520_v3, 5 }
 0x1a1   : > { %v2833_v16 = vshrl.u32 %v2832_v9, 30  ;;  %v3525_v62 = vshll.u32 %v10333_v47, %v3522_v0  ;;  %v3532_v34 = vshrl.u32 %v10345_v38, %v3523_v19  ;;  %vm2735_vm5 = vcmp.lt.s32.totalorder %v6829_v21, 0 }
 0x1a2   : > { %v2711_v59 = vmul.f32 %v2710_v44, %v2706_v53  ;;  %v2718_v13 = vmul.f32 %v2717_v26, %v2706_v53  ;;  %v3528_v53 = vshll.u32 %v10337_v12, %v3522_v0  ;;  %v3534_v25 = vshll.u32 %v10345_v38, %v3522_v0 }
 0x1a3   : > { %v2834_v43 = vshll.u32 %v2833_v16, 30  ;;  %v3527_v49 = vor.u32 %v3526_v17, %v3525_v62  ;;  %v3531_v23 = vshll.u32 %v10338_v42, %v3522_v0  ;;  %v3538_v39 = vshrl.u32 %v10332_v11, %v3523_v19 }
 0x1a4   : > { %v2712_v48 = vadd.f32 1.0, %v2711_v59  ;;  %v2719_v14 = vadd.f32 1.0, %v2718_v13  ;;  %v7076_v61 = vor.u32 %v3529_v27, %v3528_v53  ;;  %v3536_v52 = vor.u32 %v3535_v29, %v3534_v25 }
 0x1a5   : > { %v7078_v10 = vsub.s32 %v2831_v51, %v2834_v43  ;;  %v3533_v35 = vor.u32 %v3532_v34, %v3531_v23  ;;  %v3537_v55 = vshll.u32 %v10339_v30, %v3522_v0  ;;  %v7081_v18 = vshll.u32 %v3516_v2, 8 }
 0x1a6   : > { %v2720_v46 = vmul.f32 %v2719_v14, %v2704_v33  ;;  %v2729_v3 = vxor.u32 2147483648, %v2712_v48  ;;  %v10355_v1 = vand.u32 2147483647, %v6829_v21  ;;  %v2857_v44 = vsub.s32 4, %v2833_v16 }
 0x1a7   : > { %vm3540_vm7 = vcmp.lt.s32.totalorder %v7067_v28, 1  ;;  %vm3542_vm8 = vcmp.lt.s32.totalorder %v7067_v28, 3  ;;  %vm2836_vm9 = vcmp.lt.s32.totalorder %v7078_v10, 0  ;;  %v2837_v33 = vsub.s32 0, %v7078_v10 }
 0x1a8   : > { %v2726_v15 = vxor.u32 2147483648, %v2720_v46  ;;  %vm7085_vm6 = vcmp.le.f32.partialorder %v10355_v1, 0.7853982  ;;  %v3539_v0 = vor.u32 %v3538_v39, %v3537_v55  ;;  %vm3543_vm10 = vcmp.lt.s32.totalorder %v7067_v28, 4 }
 0x1a9   : > { %v2730_v26 = vsel %vm2728_vm2, %v2729_v3, %v2720_v46  ;;  %v3548_v9 = vsel %vm3540_vm7, %v3527_v49, %v7076_v61  ;;  %v3549_v2 = vsel %vm3543_vm10, %v3536_v52, 920167782  ;;  %v2838_v59 = vsel %vm2836_vm9, %v2837_v33, %v7078_v10 }
 0x1aa   : > { %v2727_v51 = vsel %vm2725_vm1, %v2712_v48, %v2726_v15  ;;  %vm3541_vm11 = vcmp.lt.s32.totalorder %v7067_v28, 2  ;;  %v3550_v13 = vsel %vm3542_vm8, %v3533_v35, %v3549_v2  ;;  %v2839_v29 = vclz %v2838_v59 }
 0x1ab   : > { %v2731_v17 = vsel %vm2724_vm3, %v2727_v51, %v2730_v26  ;;  %v3551_v62 = vsel %vm3541_vm11, %v3548_v9, %v3550_v13  ;;  %v3552_v34 = vsel %vm3540_vm7, %v7076_v61, %v3533_v35  ;;  %v7115_v40 = vsel %vm2735_vm5, %v2857_v44, %v2833_v16 }
 0x1ac   : > { %v2732_v27 = vsel %vm2721_vm4, nan, %v2731_v17  ;;  %v3524_v48 = vshrl.u32 %v10333_v47, %v3523_v19  ;;  %v3553_v14 = vsel %vm3543_vm10, %v3539_v0, 1326507024  ;;  %v3666_v54 = vand.u32 2139095040, %v7061_v63 }
 0x1ad   : > { %5690 = vst [vmem:[%s6717_s9 + $0x60] sm:$0xff] %v2732_v27  ;;  %v5907_v53 = vadd.s32 4294967294, %v2839_v29  ;;  %v3554_v25 = vsel %vm3542_vm8, %v3536_v52, %v3553_v14  ;;  %v3581_v43 = vand.u32 65535, %v3551_v62  ;;  %v3582_v23 = vshrl.u32 %v3551_v62, 16 }
 0x1ae   : > { %v2827_v39 = vadd.s32 %v7050_v8, %v7048_v31  ;;  %v3555_v16 = vsel %vm3541_vm11, %v3552_v34, %v3554_v25  ;;  %v3557_v46 = vand.u32 65535, %v7081_v18  ;;  %v3558_v19 = vshrl.u32 %v7081_v18, 16 }
 0x1af   : > { %vm5908_vm12 = vcmp.lt.s32.totalorder %v5907_v53, 0  ;;  %v3544_v3 = vsel %vm3540_vm7, %v3524_v48, %v3527_v49  ;;  %v3559_v55 = vand.u32 65535, %v3555_v16  ;;  %v3560_v15 = vshrl.u32 %v3555_v16, 16 }
 0x1b0   : > { %v2842_v1 = vsel %vm5908_vm12, 0, %v5907_v53  ;;  %v2860_v52 = vsel %vm7085_vm6, 0, %v7115_v40  ;;  %v3584_v44 = vmul.u32 %v3582_v23, %v3557_v46  ;;  %v3585_v31 = vmul.u32 %v3581_v43, %v3558_v19 }
 0x1b1   : > { %v2843_v8 = vsub.s32 32, %v2842_v1  ;;  %v2847_v33 = vsub.s32 4294967266, %v2842_v1  ;;  %v3545_v0 = vsel %vm3543_vm10, %v3533_v35, 2102212464  ;;  %v3667_v51 = vshrl.u32 %v3666_v54, 23 }
 0x1b2   : > { %v3562_v26 = vmul.u32 %v3560_v15, %v3557_v46  ;;  %v3563_v9 = vmul.u32 %v3559_v55, %v3558_v19  ;;  %v3583_v2 = vmul.u32 %v3581_v43, %v3557_v46  ;;  %v3587_v17 = vshll.u32 %v3584_v44, 16 }
 0x1b3   : > { %v2844_v49 = vshll.u32 %v7078_v10, %v2842_v1  ;;  %v2845_v59 = vshrl.u32 %v2827_v39, %v2843_v8  ;;  %v2848_v13 = vadd.s32 127, %v2847_v33  ;;  %v3586_v27 = vmul.u32 %v3582_v23, %v3558_v19 }
 0x1b4   : > { %v3561_v29 = vmul.u32 %v3559_v55, %v3557_v46  ;;  %v3564_v62 = vmul.u32 %v3560_v15, %v3558_v19  ;;  %v3565_v34 = vshll.u32 %v3562_v26, 16  ;;  %v3589_v40 = vshll.u32 %v3585_v31, 16 }
 0x1b5   : > { %v2846_v48 = vor.u32 %v2845_v59, %v2844_v49  ;;  %v2849_v14 = vshll.u32 %v2848_v13, 23  ;;  %v3567_v53 = vshll.u32 %v3563_v9, 16  ;;  %vm3591_vm13 = vc.u32 %v3583_v2, %v3587_v17 }
 0x1b6   : > { %vm3569_vm14 = vc.u32 %v3561_v29, %v3565_v34  ;;  %v3571_v35 = vadd.s32 %v3565_v34, %v3561_v29  ;;  %v3592_v54 = vsel %vm3591_vm13, 1, %v10343_v36  ;;  %v3593_v25 = vadd.s32 %v3587_v17, %v3583_v2 }
 0x1b7   : > { %v2850_v43 = vor.u32 4788187, %v2849_v14  ;;  %v3546_v10 = vsel %vm3542_vm8, %v7076_v61, %v3545_v0  ;;  %v3570_v23 = vsel %vm3569_vm14, 1, %v10343_v36  ;;  %v3594_v39 = vadd.s32 %v3592_v54, %v3586_v27  ;;  %v376_v14 = vpop.permute.xlu0 %375 }
 0x1b8   : > { %v2853_v16 = vcvt.s32.f32 %v2846_v48  ;;  %v3572_v46 = vadd.s32 %v3570_v23, %v3564_v62  ;;  %vm3573_vm15 = vc.u32 %v3571_v35, %v3567_v53  ;;  %vm3595_vm0 = vc.u32 %v3593_v25, %v3589_v40 }
 0x1b9   : > { %v2851_v19 = vand.u32 2147483647, %v2850_v43  ;;  %v3574_v55 = vsel %vm3573_vm15, 1, %v10343_v36  ;;  %v3596_v15 = vsel %vm3595_vm0, 1, %v10343_v36  ;;  %v5924_v1 = vadd.s32 4294967169, %v3667_v51 }
 0x1ba   : > { %v3566_v8 = vshrl.u32 %v3562_v26, 16  ;;  %v3576_v33 = vadd.s32 %v3574_v55, %v3572_v46  ;;  %v3588_v2 = vshrl.u32 %v3584_v44, 16  ;;  %v3598_v17 = vadd.s32 %v3596_v15, %v3594_v39 }
 0x1bb   : > { %v2854_v49 = vmul.f32 %v2853_v16, %v2851_v19  ;;  %v3663_v61 = vand.u32 2147483647, %v7061_v63  ;;  %v3673_v0 = vadd.s32 1, %v5924_v1  ;;  %v3568_v59 = vshrl.u32 %v3563_v9, 16  ;;  %v509_v9 = vpop.permute.xlu1 %508 }
 0x1bc   : > { %v3577_v13 = vadd.s32 %v3576_v33, %v3566_v8  ;;  %v3590_v27 = vshrl.u32 %v3585_v31, 16  ;;  %v3599_v29 = vadd.s32 %v3598_v17, %v3588_v2  ;;  %v2877_v34 = vadd.s32 3, %v2860_v52 }
 0x1bd   : > { %v2855_v62 = vxor.u32 2147483648, %v2854_v49  ;;  %v3547_v48 = vsel %vm3541_vm11, %v3544_v3, %v3546_v10  ;;  %vm3674_vm1 = vcmp.gt.s32.totalorder %v3673_v0, 0  ;;  %v7150_v26 = vadd.s32 %v3593_v25, %v3589_v40 }
 0x1be   : > { %v7148_v51 = vadd.s32 %v3577_v13, %v3568_v59  ;;  %v3600_v44 = vadd.s32 %v3599_v29, %v3590_v27  ;;  %v3675_v53 = vsel %vm3674_vm1, %v3673_v0, 0  ;;  %v3670_v31 = vand.u32 8388607, %v3663_v61 }
 0x1bf   : > { %v2856_v35 = vsel %vm2735_vm5, %v2855_v62, %v2854_v49  ;;  %v3677_v54 = vand.u32 31, %v3675_v53  ;;  %v7162_v52 = vmul.f32 %v376_v14, %v6386_v4  ;;  %v3601_v25 = vmul.u32 %v7081_v18, %v3547_v48 }
 0x1c0   : > { %v2859_v28 = vsel %vm7085_vm6, %v6829_v21, %v2856_v35  ;;  %vm3603_vm2 = vc.u32 %v7148_v51, %v7150_v26  ;;  %v3604_v3 = vadd.s32 1, %v3600_v44  ;;  %v7168_v10 = vmul.f32 %v376_v14, %v6388_v5 }
 0x1c1   : > { %v2861_v40 = vmul.f32 %v2859_v28, %v2859_v28  ;;  %v7165_v43 = vsub.s32 32, %v3677_v54  ;;  %v7170_v23 = vand.u32 3, %v2877_v34  ;;  %v7173_v24 = vmul.f32 %v509_v9, %v6390_v6 }
 0x1c2   : > { %v3605_v39 = vsel %vm3603_vm2, %v3604_v3, %v3600_v44  ;;  %v3671_v55 = vor.u32 8388608, %v3670_v31  ;;  %v7175_v15 = vshrl.u32 %v3675_v53, 5  ;;  %v3689_v49 = vshll.u32 %v10345_v38, %v3677_v54 }
 0x1c3   : > { %v2862_v16 = vmul.f32 -0.001358992, %v2861_v40  ;;  %v2869_v46 = vmul.f32 -0.00019511016, %v2861_v40  ;;  %v3606_v19 = vadd.s32 %v3605_v39, %v3601_v25  ;;  %v3684_v18 = vshrl.u32 %v10338_v42, %v7165_v43 }
 0x1c4   : > { %v3687_v1 = vshrl.u32 %v10345_v38, %v7165_v43  ;;  %v3690_v8 = vshrl.u32 %v10339_v30, %v7165_v43  ;;  %v3681_v0 = vshrl.u32 %v10337_v12, %v7165_v43  ;;  %v3683_v59 = vshll.u32 %v10337_v12, %v3677_v54 }
 0x1c5   : > { %v2863_v33 = vadd.f32 0.041655596, %v2862_v16  ;;  %v2870_v2 = vadd.f32 0.008332121, %v2869_v46  ;;  %v3607_v17 = vadd.s32 536870912, %v3606_v19  ;;  %v3686_v13 = vshll.u32 %v10338_v42, %v3677_v54 }
 0x1c6   : > { %v3693_v27 = vshrl.u32 %v10332_v11, %v7165_v43  ;;  %v3691_v48 = vor.u32 %v3690_v8, %v3689_v49  ;;  %v3680_v14 = vshll.u32 %v10333_v47, %v3677_v54  ;;  %v7193_v44 = vor.u32 %v3684_v18, %v3683_v59 }
 0x1c7   : > { %v2864_v29 = vmul.f32 %v2863_v33, %v2861_v40  ;;  %v2871_v62 = vmul.f32 %v2870_v2, %v2861_v40  ;;  %v7190_v34 = vshrl.u32 %v3607_v17, 30  ;;  %v7195_v53 = vor.u32 %v3687_v1, %v3686_v13 }
 0x1c8   : > { %v3692_v35 = vshll.u32 %v10339_v30, %v3677_v54  ;;  %v7199_v25 = vmul.f32 %v509_v9, %v6392_v7  ;;  %v7202_v16 = vor.u32 %v3681_v0, %v3680_v14  ;;  %vm3695_vm3 = vcmp.lt.s32.totalorder %v7175_v15, 1 }
 0x1c9   : > { %v2865_v31 = vadd.f32 -0.4999988, %v2864_v29  ;;  %v2872_v3 = vadd.f32 -0.16666654, %v2871_v62  ;;  %v3609_v39 = vshll.u32 %v7190_v34, 30  ;;  %vm3698_vm4 = vcmp.lt.s32.totalorder %v7175_v15, 4 }
 0x1ca   : > { %v3694_v46 = vor.u32 %v3693_v27, %v3692_v35  ;;  %vm2879_vm5 = vcmp.lt.s32.totalorder %v7170_v23, 2  ;;  %v3704_v54 = vsel %vm3698_vm4, %v3691_v48, 920167782  ;;  %vm2876_vm6 = vweird.f32 %v6829_v21 }
 0x1cb   : > { %v2866_v18 = vmul.f32 %v2865_v31, %v2861_v40  ;;  %v2873_v8 = vmul.f32 %v2872_v3, %v2861_v40  ;;  %v7207_v1 = vsub.s32 %v3606_v19, %v3609_v39  ;;  %vm2880_vm7 = vcmp.eq.s32.totalorder %v7170_v23, 0 }
 0x1cc   : > { %vm3697_vm8 = vcmp.lt.s32.totalorder %v7175_v15, 3  ;;  %v3707_v9 = vsel %vm3695_vm3, %v7193_v44, %v7195_v53  ;;  %v7218_v33 = vshll.u32 %v3671_v55, 8  ;;  %vm3696_vm10 = vcmp.lt.s32.totalorder %v7175_v15, 2 }
 0x1cd   : > { %v2867_v40 = vadd.f32 1.0, %v2866_v18  ;;  %v2874_v2 = vadd.f32 1.0, %v2873_v8  ;;  %vm3611_vm9 = vcmp.lt.s32.totalorder %v7207_v1, 0  ;;  %v3612_v19 = vsub.s32 0, %v7207_v1 }
 0x1ce   : > { %v3703_v17 = vsel %vm3695_vm3, %v7202_v16, %v7193_v44  ;;  %v3705_v49 = vsel %vm3697_vm8, %v7195_v53, %v3704_v54  ;;  %v3708_v55 = vsel %vm3698_vm4, %v3694_v46, 1326507024  ;;  %v3712_v14 = vand.u32 65535, %v7218_v33 }
 0x1cf   : > { %v2875_v0 = vmul.f32 %v2874_v2, %v2859_v28  ;;  %v2884_v59 = vxor.u32 2147483648, %v2867_v40  ;;  %v3613_v13 = vsel %vm3611_vm9, %v3612_v19, %v7207_v1  ;;  %v3709_v27 = vsel %vm3697_vm8, %v3691_v48, %v3708_v55 }
 0x1d0   : > { %v3614_v29 = vclz %v3613_v13  ;;  %v3710_v62 = vsel %vm3696_vm10, %v3707_v9, %v3709_v27  ;;  %v3713_v35 = vshrl.u32 %v7218_v33, 16  ;;  %v3706_v3 = vsel %vm3696_vm10, %v3703_v17, %v3705_v49 }
 0x1d1   : > { %v2881_v31 = vxor.u32 2147483648, %v2875_v0  ;;  %v3714_v39 = vand.u32 65535, %v3710_v62  ;;  %v3715_v28 = vshrl.u32 %v3710_v62, 16  ;;  %vm2883_vm11 = vcmp.eq.s32.totalorder %v7170_v23, 2 }
 0x1d2   : > { %v3602_v48 = vadd.s32 %v7150_v26, %v7148_v51  ;;  %v5922_v46 = vadd.s32 4294967294, %v3614_v29  ;;  %v582_v18 = vadd.f32 %v7173_v24, %v7162_v52  ;;  %v2885_v54 = vsel %vm2883_vm11, %v2884_v59, %v2875_v0 }
 0x1d3   : > { %v2882_v8 = vsel %vm2880_vm7, %v2867_v40, %v2881_v31  ;;  %v3717_v9 = vmul.u32 %v3715_v28, %v3712_v14  ;;  %v3718_v2 = vmul.u32 %v3714_v39, %v3713_v35  ;;  %v3736_v17 = vand.u32 65535, %v3706_v3 }
 0x1d4   : > { %v2886_v19 = vsel %vm2879_vm5, %v2882_v8, %v2885_v54  ;;  %vm5923_vm12 = vcmp.lt.s32.totalorder %v5922_v46, 0  ;;  %v3737_v49 = vshrl.u32 %v3706_v3, 16  ;;  %v3716_v26 = vmul.u32 %v3714_v39, %v3712_v14 }
 0x1d5   : > { %v2887_v55 = vsel %vm2876_vm6, nan, %v2886_v19  ;;  %v3617_v51 = vsel %vm5923_vm12, 0, %v5922_v46  ;;  %v3720_v13 = vshll.u32 %v3717_v9, 16  ;;  %v3679_v40 = vshrl.u32 %v10333_v47, %v7165_v43 }
 0x1d6   : > { %5691 = vst [vmem:[%s6717_s9 + $0x68] sm:$0xff] %v2887_v55  ;;  %v3618_v52 = vsub.s32 32, %v3617_v51  ;;  %v3622_v24 = vsub.s32 4294967266, %v3617_v51  ;;  %v3719_v0 = vmul.u32 %v3715_v28, %v3713_v35  ;;  %vm3510_vm13 = vcmp.lt.s32.totalorder %v6953_v32, 0 }
 0x1d7   : > { %v3619_v23 = vshll.u32 %v7207_v1, %v3617_v51  ;;  %v3722_v59 = vshll.u32 %v3718_v2, 16  ;;  %vm3724_vm14 = vc.u32 %v3716_v26, %v3720_v13  ;;  %v3726_v27 = vadd.s32 %v3720_v13, %v3716_v26  ;;  %v7266_v26 = vpop.permute.xlu0 %390 }
 0x1d8   : > { %v3620_v29 = vshrl.u32 %v3602_v48, %v3618_v52  ;;  %v3623_v21 = vadd.s32 127, %v3622_v24  ;;  %v3725_v62 = vsel %vm3724_vm14, 1, %v10343_v36  ;;  %v3739_v31 = vmul.u32 %v3737_v49, %v3712_v14 }
 0x1d9   : > { %v3727_v3 = vadd.s32 %v3725_v62, %v3719_v0  ;;  %vm3728_vm15 = vc.u32 %v3726_v27, %v3722_v59  ;;  %v3738_v39 = vmul.u32 %v3736_v17, %v3712_v14  ;;  %v3740_v46 = vmul.u32 %v3736_v17, %v3713_v35 }
 0x1da   : > { %vm7260_vm0 = vcmp.le.f32.partialorder %v3508_v22, 0.7853982  ;;  %v3621_v28 = vor.u32 %v3620_v29, %v3619_v23  ;;  %v3624_v1 = vshll.u32 %v3623_v21, 23  ;;  %v3729_v8 = vsel %vm3728_vm15, 1, %v10343_v36  ;;  %v669_v22 = vpop.permute.xlu2 %668 }
 0x1db   : > { %v3742_v54 = vshll.u32 %v3739_v31, 16  ;;  %v3632_v48 = vsub.s32 4, %v7190_v34  ;;  %v3721_v19 = vshrl.u32 %v3717_v9, 16  ;;  %v3731_v55 = vadd.s32 %v3729_v8, %v3727_v3 }
 0x1dc   : > { %v3741_v51 = vmul.u32 %v3737_v49, %v3713_v35  ;;  %v3625_v14 = vor.u32 4788187, %v3624_v1  ;;  %v3744_v17 = vshll.u32 %v3740_v46, 16  ;;  %v3699_v52 = vsel %vm3695_vm3, %v3679_v40, %v7202_v16 }
 0x1dd   : > { %vm3746_vm1 = vc.u32 %v3738_v39, %v3742_v54  ;;  %v3748_v13 = vadd.s32 %v3742_v54, %v3738_v39  ;;  %v3700_v24 = vsel %vm3698_vm4, %v7195_v53, 2102212464  ;;  %v3732_v0 = vadd.s32 %v3731_v55, %v3721_v19 }
 0x1de   : > { %v3747_v9 = vsel %vm3746_vm1, 1, %v10343_v36  ;;  %v3626_v23 = vand.u32 2147483647, %v3625_v14  ;;  %v3628_v35 = vcvt.s32.f32 %v3621_v28  ;;  %v3723_v59 = vshrl.u32 %v3718_v2, 16 }
 0x1df   : > { %v3749_v49 = vadd.s32 %v3747_v9, %v3741_v51  ;;  %vm3750_vm2 = vc.u32 %v3748_v13, %v3744_v17  ;;  %v583_v29 = vadd.f32 %v7199_v25, %v7168_v10  ;;  %v7278_v21 = vadd.f32 %v669_v22, %v582_v18  ;;  %v459_v51 = vpop.permute.xlu0 %458 }
 0x1e0   : > { %v3751_v27 = vsel %vm3750_vm2, 1, %v10343_v36  ;;  %v3629_v16 = vmul.f32 %v3628_v35, %v3626_v23  ;;  %v3633_v53 = vsel %vm3510_vm13, %v3632_v48, %v7190_v34  ;;  %v3743_v40 = vshrl.u32 %v3739_v31, 16 }
 0x1e1   : > { %v3753_v62 = vadd.s32 %v3751_v27, %v3749_v49  ;;  %v3701_v3 = vsel %vm3697_vm8, %v7193_v44, %v3700_v24  ;;  %v3733_v39 = vadd.s32 %v3732_v0, %v3723_v59  ;;  %v7286_v2 = vadd.f32 %v669_v22, %v583_v29 }
 0x1e2   : > { %v10315_v28 = vand.u32 2147483647, %v7278_v21  ;;  %v3630_v1 = vxor.u32 2147483648, %v3629_v16  ;;  %v3745_v10 = vshrl.u32 %v3740_v46, 16  ;;  %v4441_v18 = vand.u32 2139095040, %v7278_v21 }
 0x1e3   : > { %v3754_v25 = vadd.s32 %v3753_v62, %v3743_v40  ;;  %v3635_v8 = vsel %vm7260_vm0, 0, %v3633_v53  ;;  %v3752_v34 = vadd.s32 %v3748_v13, %v3744_v17  ;;  %v3702_v54 = vsel %vm3696_vm10, %v3699_v52, %v3701_v3 }
 0x1e4   : > { %v4445_v31 = vand.u32 8388607, %v10315_v28  ;;  %v3631_v44 = vsel %vm3510_vm13, %v3630_v1, %v3629_v16  ;;  %v4442_v19 = vshrl.u32 %v4441_v18, 23  ;;  %v4596_v55 = vand.u32 2139095040, %v7286_v2 }
 0x1e5   : > { %v3755_v48 = vadd.s32 %v3754_v25, %v3745_v10  ;;  %v7301_v46 = vsel %vm7260_vm0, %v6953_v32, %v3631_v44  ;;  %vm3758_vm3 = vc.u32 %v3733_v39, %v3752_v34  ;;  %v3652_v17 = vadd.s32 3, %v3635_v8 }
 0x1e6   : > { %v3636_v14 = vmul.f32 %v7301_v46, %v7301_v46  ;;  %v5939_v22 = vadd.s32 4294967169, %v4442_v19  ;;  %v397_v15 = vmul.f32 %v6351_v50, %v6386_v4  ;;  %v3756_v52 = vmul.u32 %v7218_v33, %v3702_v54 }
 0x1e7   : > { %v3759_v13 = vadd.s32 1, %v3755_v48  ;;  %v4446_v24 = vor.u32 8388608, %v4445_v31  ;;  %v4597_v0 = vshrl.u32 %v4596_v55, 23  ;;  %v7311_v49 = vmul.f32 %v6351_v50, %v6388_v5 }
 0x1e8   : > { %v3637_v43 = vmul.f32 -0.001358992, %v3636_v14  ;;  %v3644_v9 = vmul.f32 -0.00019511016, %v3636_v14  ;;  %v4448_v35 = vadd.s32 1, %v5939_v22  ;;  %v7315_v59 = vmul.f32 %v6694_v20, %v6386_v4 }
 0x1e9   : > { %v3760_v23 = vsel %vm3758_vm3, %v3759_v13, %v3755_v48  ;;  %v530_v27 = vmul.f32 %v459_v51, %v6390_v6  ;;  %v7318_v33 = vand.u32 3, %v3652_v17  ;;  %v7320_v3 = vshll.u32 %v4446_v24, 8 }
 0x1ea   : > { %v3761_v29 = vadd.s32 %v3760_v23, %v3756_v52  ;;  %v3638_v16 = vadd.f32 0.041655596, %v3637_v43  ;;  %v3645_v53 = vadd.f32 0.008332121, %v3644_v9  ;;  %vm4449_vm4 = vcmp.gt.s32.totalorder %v4448_v35, 0 }
 0x1eb   : > { %v4450_v62 = vsel %vm4449_vm4, %v4448_v35, 0  ;;  %v10314_v1 = vand.u32 2147483647, %v7286_v2  ;;  %v5942_v18 = vadd.s32 4294967169, %v4597_v0  ;;  %v7325_v8 = vmul.f32 %v6364_v56, %v6390_v6 }
 0x1ec   : > { %v3762_v40 = vadd.s32 536870912, %v3761_v29  ;;  %v3639_v50 = vmul.f32 %v3638_v16, %v3636_v14  ;;  %v3646_v10 = vmul.f32 %v3645_v53, %v3636_v14  ;;  %v4452_v25 = vand.u32 31, %v4450_v62 }
 0x1ed   : > { %v7329_v31 = vmul.f32 %v6364_v56, %v6392_v7  ;;  %v7332_v44 = vmul.f32 %v459_v51, %v6392_v7  ;;  %vm3665_vm5 = vcmp.lt.s32.totalorder %v7061_v63, 0  ;;  %vm3655_vm6 = vcmp.eq.s32.totalorder %v7318_v33, 0 }
 0x1ee   : > { %v3763_v54 = vshrl.u32 %v3762_v40, 30  ;;  %v3640_v48 = vadd.f32 -0.4999988, %v3639_v50  ;;  %v3647_v19 = vadd.f32 -0.16666654, %v3646_v10  ;;  %v4453_v55 = vsub.s32 32, %v4452_v25 }
 0x1ef   : > { %vm3658_vm7 = vcmp.eq.s32.totalorder %v7318_v33, 2  ;;  %vm7339_vm8 = vcmp.le.f32.partialorder %v3663_v61, 0.7853982  ;;  %v7343_v56 = vadd.s32 %v3752_v34, %v3733_v39  ;;  %v7347_v13 = vand.u32 8388607, %v10314_v1 }
 0x1f0   : > { %v3764_v51 = vshll.u32 %v3763_v54, 30  ;;  %v7349_v22 = vadd.f32 %v530_v27, %v397_v15  ;;  %v3641_v52 = vmul.f32 %v3640_v48, %v3636_v14  ;;  %v3648_v24 = vmul.f32 %v3647_v19, %v3636_v14 }
 0x1f1   : > { %vm3654_vm9 = vcmp.lt.s32.totalorder %v7318_v33, 2  ;;  %v7353_v0 = vand.u32 65535, %v7320_v3  ;;  %v7355_v61 = vadd.s32 1, %v5942_v18  ;;  %vm3651_vm10 = vweird.f32 %v6953_v32 }
 0x1f2   : > { %v3765_v39 = vsub.s32 %v3761_v29, %v3764_v51  ;;  %v3787_v34 = vsub.s32 4, %v3763_v54  ;;  %v7358_v43 = vshrl.u32 %v4450_v62, 5  ;;  %v4455_v9 = vshll.u32 %v10333_v47, %v4452_v25 }
 0x1f3   : > { %v3642_v23 = vadd.f32 1.0, %v3641_v52  ;;  %v3649_v15 = vadd.f32 1.0, %v3648_v24  ;;  %v4458_v35 = vshll.u32 %v10337_v12, %v4452_v25  ;;  %v4462_v14 = vshrl.u32 %v10345_v38, %v4453_v55 }
 0x1f4   : > { %vm3766_vm11 = vcmp.lt.s32.totalorder %v3765_v39, 0  ;;  %v3767_v27 = vsub.s32 0, %v3765_v39  ;;  %v4456_v16 = vshrl.u32 %v10337_v12, %v4453_v55  ;;  %v4459_v53 = vshrl.u32 %v10338_v42, %v4453_v55 }
 0x1f5   : > { %v3650_v40 = vmul.f32 %v3649_v15, %v7301_v46  ;;  %v3659_v29 = vxor.u32 2147483648, %v3642_v23  ;;  %v4454_v62 = vshrl.u32 %v10333_v47, %v4453_v55  ;;  %v4461_v50 = vshll.u32 %v10338_v42, %v4452_v25 }
 0x1f6   : > { %v3768_v10 = vsel %vm3766_vm11, %v3767_v27, %v3765_v39  ;;  %v3788_v18 = vsel %vm3665_vm5, %v3787_v34, %v3763_v54  ;;  %v4464_v48 = vshll.u32 %v10345_v38, %v4452_v25  ;;  %v4465_v19 = vshrl.u32 %v10339_v30, %v4453_v55 }
 0x1f7   : > { %v3656_v51 = vxor.u32 2147483648, %v3650_v40  ;;  %v3769_v52 = vclz %v3768_v10  ;;  %v4463_v24 = vor.u32 %v4462_v14, %v4461_v50  ;;  %v4468_v1 = vshrl.u32 %v10332_v11, %v4453_v55 }
 0x1f8   : > { %v4457_v28 = vor.u32 %v4456_v16, %v4455_v9  ;;  %v4460_v46 = vor.u32 %v4459_v53, %v4458_v35  ;;  %v4466_v15 = vor.u32 %v4465_v19, %v4464_v48  ;;  %v4467_v60 = vshll.u32 %v10339_v30, %v4452_v25 }
 0x1f9   : > { %v3657_v27 = vsel %vm3655_vm6, %v3642_v23, %v3656_v51  ;;  %v3660_v54 = vsel %vm3658_vm7, %v3659_v29, %v3650_v40  ;;  %v5925_v34 = vadd.s32 4294967294, %v3769_v52  ;;  %v3790_v57 = vsel %vm7339_vm8, 0, %v3788_v18 }
 0x1fa   : > { %v3661_v14 = vsel %vm3654_vm9, %v3657_v27, %v3660_v54  ;;  %v4469_v55 = vor.u32 %v4468_v1, %v4467_v60  ;;  %vm4470_vm12 = vcmp.lt.s32.totalorder %v7358_v43, 1  ;;  %vm4473_vm13 = vcmp.lt.s32.totalorder %v7358_v43, 4 }
 0x1fb   : > { %v3662_v25 = vsel %vm3651_vm10, nan, %v3661_v14  ;;  %vm5926_vm14 = vcmp.lt.s32.totalorder %v5925_v34, 0  ;;  %vm4471_vm15 = vcmp.lt.s32.totalorder %v7358_v43, 2  ;;  %v4475_v9 = vsel %vm4473_vm13, %v4463_v24, 2102212464 }
 0x1fc   : > { %v3772_v23 = vsel %vm5926_vm14, 0, %v5925_v34  ;;  %5696 = vst [vmem:[%s6717_s9 + $0x90] sm:$0xff] %v3662_v25  ;;  %vm4472_vm0 = vcmp.lt.s32.totalorder %v7358_v43, 3  ;;  %v4478_v60 = vsel %vm4470_vm12, %v4457_v28, %v4460_v46  ;;  %v4479_v33 = vsel %vm4473_vm13, %v4466_v15, 920167782 }
 0x1fd   : > { %v3773_v1 = vsub.s32 32, %v3772_v23  ;;  %v3777_v35 = vsub.s32 4294967266, %v3772_v23  ;;  %v4474_v32 = vsel %vm4470_vm12, %v4454_v62, %v4457_v28  ;;  %v4476_v16 = vsel %vm4472_vm0, %v4460_v46, %v4475_v9 }
 0x1fe   : > { %v3774_v53 = vshll.u32 %v3765_v39, %v3772_v23  ;;  %v4480_v40 = vsel %vm4472_vm0, %v4463_v24, %v4479_v33  ;;  %v4482_v29 = vsel %vm4470_vm12, %v4460_v46, %v4463_v24  ;;  %v4483_v50 = vsel %vm4473_vm13, %v4469_v55, 1326507024 }
 0x1ff   : > { %v3775_v10 = vshrl.u32 %v7343_v56, %v3773_v1  ;;  %v3778_v18 = vadd.s32 127, %v3777_v35  ;;  %v4481_v48 = vsel %vm4471_vm15, %v4478_v60, %v4480_v40  ;;  %v4484_v19 = vsel %vm4472_vm0, %v4466_v15, %v4483_v50 }
 0x200   : > { %v4485_v51 = vsel %vm4471_vm15, %v4482_v29, %v4484_v19  ;;  %v4511_v28 = vand.u32 65535, %v4481_v48  ;;  %v4512_v62 = vshrl.u32 %v4481_v48, 16  ;;  %vm4604_vm1 = vcmp.gt.s32.totalorder %v7355_v61, 0 }
 0x201   : > { %v3776_v39 = vor.u32 %v3775_v10, %v3774_v53  ;;  %v3779_v52 = vshll.u32 %v3778_v18, 23  ;;  %v4489_v24 = vand.u32 65535, %v4485_v51  ;;  %v4490_v46 = vshrl.u32 %v4485_v51, 16 }
 0x202   : > { %v7407_v27 = vadd.s32 3, %v3790_v57  ;;  %v7411_v56 = vsel %vm4471_vm15, %v4474_v32, %v4476_v16  ;;  %v4488_v54 = vshrl.u32 %v7320_v3, 16  ;;  %v4514_v15 = vmul.u32 %v4512_v62, %v7353_v0 }
 0x203   : > { %v3780_v34 = vor.u32 4788187, %v3779_v52  ;;  %v4492_v14 = vmul.u32 %v4490_v46, %v7353_v0  ;;  %v4513_v55 = vmul.u32 %v4511_v28, %v7353_v0  ;;  %v4605_v25 = vsel %vm4604_vm1, %v7355_v61, 0 }
 0x204   : > { %v4493_v9 = vmul.u32 %v4489_v24, %v4488_v54  ;;  %v4515_v23 = vmul.u32 %v4511_v28, %v4488_v54  ;;  %v4516_v60 = vmul.u32 %v4512_v62, %v4488_v54  ;;  %v4517_v57 = vshll.u32 %v4514_v15, 16 }
 0x205   : > { %v3781_v33 = vand.u32 2147483647, %v3780_v34  ;;  %v3783_v1 = vcvt.s32.f32 %v3776_v39  ;;  %v4491_v43 = vmul.u32 %v4489_v24, %v7353_v0  ;;  %v4495_v35 = vshll.u32 %v4492_v14, 16 }
 0x206   : > { %v4494_v32 = vmul.u32 %v4490_v46, %v4488_v54  ;;  %v4497_v16 = vshll.u32 %v4493_v9, 16  ;;  %v4518_v53 = vshrl.u32 %v4514_v15, 16  ;;  %vm4521_vm2 = vc.u32 %v4513_v55, %v4517_v57 }
 0x207   : > { %v3784_v40 = vmul.f32 %v3783_v1, %v3781_v33  ;;  %vm4499_vm3 = vc.u32 %v4491_v43, %v4495_v35  ;;  %v4501_v29 = vadd.s32 %v4495_v35, %v4491_v43  ;;  %v4522_v50 = vsel %vm4521_vm2, 1, %v10343_v36 }
 0x208   : > { %v4500_v61 = vsel %vm4499_vm3, 1, %v10343_v36  ;;  %v4519_v10 = vshll.u32 %v4515_v23, 16  ;;  %v4523_v18 = vadd.s32 %v4517_v57, %v4513_v55  ;;  %v4524_v48 = vadd.s32 %v4522_v50, %v4516_v60 }
 0x209   : > { %v3785_v19 = vxor.u32 2147483648, %v3784_v40  ;;  %v4502_v51 = vadd.s32 %v4500_v61, %v4494_v32  ;;  %vm4503_vm4 = vc.u32 %v4501_v29, %v4497_v16  ;;  %v4607_v28 = vand.u32 31, %v4605_v25 }
 0x20a   : > { %v4496_v0 = vshrl.u32 %v4492_v14, 16  ;;  %v4498_v62 = vshrl.u32 %v4493_v9, 16  ;;  %v4504_v39 = vsel %vm4503_vm4, 1, %v10343_v36  ;;  %vm4525_vm6 = vc.u32 %v4523_v18, %v4519_v10 }
 0x20b   : > { %v3786_v52 = vsel %vm3665_vm5, %v3785_v19, %v3784_v40  ;;  %v4506_v24 = vadd.s32 %v4504_v39, %v4502_v51  ;;  %v4526_v46 = vsel %vm4525_vm6, 1, %v10343_v36  ;;  %v7425_v54 = vsub.s32 32, %v4607_v28 }
 0x20c   : > { %v3789_v15 = vsel %vm7339_vm8, %v7061_v63, %v3786_v52  ;;  %v4520_v34 = vshrl.u32 %v4515_v23, 16  ;;  %v4528_v55 = vadd.s32 %v4526_v46, %v4524_v48  ;;  %v7430_v60 = vshrl.u32 %v4605_v25, 5 }
 0x20d   : > { %v3791_v14 = vmul.f32 %v3789_v15, %v3789_v15  ;;  %v4507_v9 = vadd.s32 %v4506_v24, %v4496_v0  ;;  %v7432_v57 = vadd.s32 %v4523_v18, %v4519_v10  ;;  %v4611_v33 = vshrl.u32 %v10337_v12, %v7425_v54 }
 0x20e   : > { %v4529_v1 = vadd.s32 %v4528_v55, %v4518_v53  ;;  %v4610_v43 = vshll.u32 %v10333_v47, %v4607_v28  ;;  %v4613_v35 = vshll.u32 %v10337_v12, %v4607_v28  ;;  %v4614_v17 = vshrl.u32 %v10338_v42, %v7425_v54 }
 0x20f   : > { %v3792_v32 = vmul.f32 -0.001358992, %v3791_v14  ;;  %v3799_v23 = vmul.f32 -0.00019511016, %v3791_v14  ;;  %v7440_v16 = vadd.s32 %v4507_v9, %v4498_v62  ;;  %v4616_v25 = vshll.u32 %v10338_v42, %v4607_v28 }
 0x210   : > { %v4530_v40 = vadd.s32 %v4529_v1, %v4520_v34  ;;  %v7443_v29 = vor.u32 %v4611_v33, %v4610_v43  ;;  %v7445_v50 = vor.u32 %v4614_v17, %v4613_v35  ;;  %v4617_v53 = vshrl.u32 %v10345_v38, %v7425_v54 }
 0x211   : > { %v3793_v61 = vadd.f32 0.041655596, %v3792_v32  ;;  %v3800_v10 = vadd.f32 0.008332121, %v3799_v23  ;;  %vm4533_vm5 = vc.u32 %v7440_v16, %v7432_v57  ;;  %v4619_v18 = vshll.u32 %v10345_v38, %v4607_v28 }
 0x212   : > { %v4534_v48 = vadd.s32 1, %v4530_v40  ;;  %v4620_v19 = vshrl.u32 %v10339_v30, %v7425_v54  ;;  %v4622_v51 = vshll.u32 %v10339_v30, %v4607_v28  ;;  %v4623_v0 = vshrl.u32 %v10332_v11, %v7425_v54 }
 0x213   : > { %v3794_v62 = vmul.f32 %v3793_v61, %v3791_v14  ;;  %v3801_v39 = vmul.f32 %v3800_v10, %v3791_v14  ;;  %v4531_v52 = vmul.u32 %v7320_v3, %v7411_v56  ;;  %vm4625_vm7 = vcmp.lt.s32.totalorder %v7430_v60, 1 }
 0x214   : > { %v4535_v24 = vsel %vm4533_vm5, %v4534_v48, %v4530_v40  ;;  %v4618_v46 = vor.u32 %v4617_v53, %v4616_v25  ;;  %v4621_v34 = vor.u32 %v4620_v19, %v4619_v18  ;;  %v4624_v55 = vor.u32 %v4623_v0, %v4622_v51 }
 0x215   : > { %v3795_v9 = vadd.f32 -0.4999988, %v3794_v62  ;;  %v3802_v33 = vadd.f32 -0.16666654, %v3801_v39  ;;  %v4536_v1 = vadd.s32 %v4535_v24, %v4531_v52  ;;  %vm4628_vm8 = vcmp.lt.s32.totalorder %v7430_v60, 4 }
 0x216   : > { %v3808_v28 = vand.u32 3, %v7407_v27  ;;  %v4601_v43 = vor.u32 8388608, %v7347_v13  ;;  %v4633_v3 = vsel %vm4625_vm7, %v7443_v29, %v7445_v50  ;;  %v4634_v56 = vsel %vm4628_vm8, %v4621_v34, 920167782 }
 0x217   : > { %v3796_v35 = vmul.f32 %v3795_v9, %v3791_v14  ;;  %v3803_v17 = vmul.f32 %v3802_v33, %v3791_v14  ;;  %v4537_v32 = vadd.s32 536870912, %v4536_v1  ;;  %vm4627_vm9 = vcmp.lt.s32.totalorder %v7430_v60, 3 }
 0x218   : > { %vm3806_vm10 = vweird.f32 %v7061_v63  ;;  %vm4626_vm11 = vcmp.lt.s32.totalorder %v7430_v60, 2  ;;  %v4635_v13 = vsel %vm4627_vm9, %v4618_v46, %v4634_v56  ;;  %v4637_v27 = vsel %vm4625_vm7, %v7445_v50, %v4618_v46 }
 0x219   : > { %v4638_v23 = vsel %vm4628_vm8, %v4624_v55, 1326507024  ;;  %v3797_v25 = vadd.f32 1.0, %v3796_v35  ;;  %v3804_v40 = vadd.f32 1.0, %v3803_v17  ;;  %v7479_v14 = vshrl.u32 %v4537_v32, 30 }
 0x21a   : > { %v4636_v53 = vsel %vm4626_vm11, %v4633_v3, %v4635_v13  ;;  %vm3809_vm12 = vcmp.lt.s32.totalorder %v3808_v28, 2  ;;  %v4639_v61 = vsel %vm4627_vm9, %v4621_v34, %v4638_v23  ;;  %v7485_v10 = vshll.u32 %v4601_v43, 8 }
 0x21b   : > { %v7489_v18 = vadd.f32 %v7332_v44, %v7311_v49  ;;  %v3805_v48 = vmul.f32 %v3804_v40, %v3789_v15  ;;  %vm3810_vm13 = vcmp.eq.s32.totalorder %v3808_v28, 0  ;;  %v3814_v19 = vxor.u32 2147483648, %v3797_v25  ;;  %v7500_v15 = vpop.permute.xlu1 %523 }
 0x21c   : > { %v4539_v51 = vshll.u32 %v7479_v14, 30  ;;  %vm3813_vm14 = vcmp.eq.s32.totalorder %v3808_v28, 2  ;;  %v4609_v0 = vshrl.u32 %v10333_v47, %v7425_v54  ;;  %v4640_v62 = vsel %vm4626_vm11, %v4637_v27, %v4639_v61 }
 0x21d   : > { %v4667_v39 = vshrl.u32 %v4636_v53, 16  ;;  %v3811_v52 = vxor.u32 2147483648, %v3805_v48  ;;  %v4630_v49 = vsel %vm4628_vm8, %v4618_v46, 2102212464  ;;  %v4666_v44 = vand.u32 65535, %v4636_v53 }
 0x21e   : > { %v7496_v24 = vsub.s32 %v4536_v1, %v4539_v51  ;;  %v4642_v34 = vand.u32 65535, %v7485_v10  ;;  %v4643_v55 = vshrl.u32 %v7485_v10, 16  ;;  %v4644_v9 = vand.u32 65535, %v4640_v62 }
 0x21f   : > { %v4645_v54 = vshrl.u32 %v4640_v62, 16  ;;  %v3812_v33 = vsel %vm3810_vm13, %v3797_v25, %v3811_v52  ;;  %v3815_v43 = vsel %vm3813_vm14, %v3814_v19, %v3805_v48  ;;  %v4532_v32 = vadd.s32 %v7432_v57, %v7440_v16 }
 0x220   : > { %vm4541_vm15 = vcmp.lt.s32.totalorder %v7496_v24, 0  ;;  %v4542_v1 = vsub.s32 0, %v7496_v24  ;;  %v3816_v3 = vsel %vm3809_vm12, %v3812_v33, %v3815_v43  ;;  %v4648_v56 = vmul.u32 %v4644_v9, %v4643_v55 }
 0x221   : > { %v4647_v46 = vmul.u32 %v4645_v54, %v4642_v34  ;;  %v4669_v35 = vmul.u32 %v4667_v39, %v4642_v34  ;;  %v3817_v17 = vsel %vm3806_vm10, nan, %v3816_v3  ;;  %v4670_v27 = vmul.u32 %v4666_v44, %v4643_v55 }
 0x222   : > { %v4543_v13 = vsel %vm4541_vm15, %v4542_v1, %v7496_v24  ;;  %5697 = vst [vmem:[%s6717_s9 + $0x98] sm:$0xff] %v3817_v17  ;;  %v4629_v25 = vsel %vm4625_vm7, %v4609_v0, %v7443_v29  ;;  %v4646_v28 = vmul.u32 %v4644_v9, %v4642_v34  ;;  %v4631_v53 = vsel %vm4627_vm9, %v7445_v50, %v4630_v49 }
 0x223   : > { %v4544_v23 = vclz %v4543_v13  ;;  %v4650_v40 = vshll.u32 %v4647_v46, 16  ;;  %v4649_v63 = vmul.u32 %v4645_v54, %v4643_v55  ;;  %v4652_v61 = vshll.u32 %v4648_v56, 16  ;;  %v619_v1 = vpop.permute.xlu1 %618 }
 0x224   : > { %v4668_v48 = vmul.u32 %v4666_v44, %v4642_v34  ;;  %v4672_v16 = vshll.u32 %v4669_v35, 16  ;;  %v4562_v51 = vsub.s32 4, %v7479_v14  ;;  %v4671_v52 = vmul.u32 %v4667_v39, %v4643_v55 }
 0x225   : > { %v5940_v19 = vadd.s32 4294967294, %v4544_v23  ;;  %vm4654_vm0 = vc.u32 %v4646_v28, %v4650_v40  ;;  %v4656_v57 = vadd.s32 %v4650_v40, %v4646_v28  ;;  %v4674_v33 = vshll.u32 %v4670_v27, 16 }
 0x226   : > { %v4655_v62 = vsel %vm4654_vm0, 1, %v10343_v36  ;;  %vm4676_vm3 = vc.u32 %v4668_v48, %v4672_v16  ;;  %v4678_v44 = vadd.s32 %v4672_v16, %v4668_v48  ;;  %v4651_v54 = vshrl.u32 %v4647_v46, 16 }
 0x227   : > { %vm5941_vm1 = vcmp.lt.s32.totalorder %v5940_v19, 0  ;;  %v4657_v29 = vadd.s32 %v4655_v62, %v4649_v63  ;;  %vm4658_vm2 = vc.u32 %v4656_v57, %v4652_v61  ;;  %v4677_v49 = vsel %vm4676_vm3, 1, %v10343_v36 }
 0x228   : > { %v4547_v0 = vsel %vm5941_vm1, 0, %v5940_v19  ;;  %v4659_v50 = vsel %vm4658_vm2, 1, %v10343_v36  ;;  %v4653_v17 = vshrl.u32 %v4648_v56, 16  ;;  %v4679_v39 = vadd.s32 %v4677_v49, %v4671_v52 }
 0x229   : > { %v4548_v34 = vsub.s32 32, %v4547_v0  ;;  %v4552_v9 = vsub.s32 4294967266, %v4547_v0  ;;  %v4661_v43 = vadd.s32 %v4659_v50, %v4657_v29  ;;  %v4549_v3 = vshll.u32 %v7496_v24, %v4547_v0 }
 0x22a   : > { %vm4680_vm4 = vc.u32 %v4678_v44, %v4674_v33  ;;  %v4673_v40 = vshrl.u32 %v4669_v35, 16  ;;  %v4675_v63 = vshrl.u32 %v4670_v27, 16  ;;  %v7527_v48 = vadd.f32 %v619_v1, %v7349_v22 }
 0x22b   : > { %v4550_v55 = vshrl.u32 %v4532_v32, %v4548_v34  ;;  %v4553_v13 = vadd.s32 127, %v4552_v9  ;;  %v4662_v23 = vadd.s32 %v4661_v43, %v4651_v54  ;;  %v4681_v28 = vsel %vm4680_vm4, 1, %v10343_v36 }
 0x22c   : > { %v4683_v61 = vadd.s32 %v4681_v28, %v4679_v39  ;;  %v7531_v24 = vadd.f32 %v7325_v8, %v7315_v59  ;;  %v7534_v32 = vadd.f32 %v619_v1, %v7489_v18  ;;  %v1338_v16 = vand.u32 2147483647, %v7527_v48 }
 0x22d   : > { %v4551_v19 = vor.u32 %v4550_v55, %v4549_v3  ;;  %v4554_v46 = vshll.u32 %v4553_v13, 23  ;;  %v4663_v57 = vadd.s32 %v4662_v23, %v4653_v17  ;;  %v1341_v35 = vand.u32 2139095040, %v7527_v48 }
 0x22e   : > { %v4684_v56 = vadd.s32 %v4683_v61, %v4673_v40  ;;  %vm4440_vm6 = vcmp.lt.s32.totalorder %v7278_v21, 0  ;;  %v4632_v22 = vsel %vm4626_vm11, %v4629_v25, %v4631_v53  ;;  %v4682_v62 = vadd.s32 %v4678_v44, %v4674_v33 }
 0x22f   : > { %v4555_v27 = vor.u32 4788187, %v4554_v46  ;;  %v4563_v59 = vsel %vm4440_vm6, %v4562_v51, %v7479_v14  ;;  %v1342_v52 = vshrl.u32 %v1341_v35, 23  ;;  %v1345_v18 = vand.u32 8388607, %v1338_v16 }
 0x230   : > { %v4685_v8 = vadd.s32 %v4684_v56, %v4675_v63  ;;  %v396_v29 = vmul.f32 %v6694_v20, %v6388_v5  ;;  %v4558_v50 = vcvt.s32.f32 %v4551_v19  ;;  %vm4688_vm5 = vc.u32 %v4663_v57, %v4682_v62 }
 0x231   : > { %v4556_v0 = vand.u32 2147483647, %v4555_v27  ;;  %v10362_v49 = vand.u32 2147483647, %v7278_v21  ;;  %v5879_v53 = vadd.s32 4294967169, %v1342_v52  ;;  %v1496_v14 = vand.u32 2139095040, %v7534_v32 }
 0x232   : > { %v4689_v25 = vadd.s32 1, %v4685_v8  ;;  %v4686_v44 = vmul.u32 %v7485_v10, %v4632_v22  ;;  %v7559_v20 = vadd.f32 %v7329_v31, %v396_v29  ;;  %v1346_v9 = vor.u32 8388608, %v1345_v18 }
 0x233   : > { %vm7550_vm7 = vcmp.le.f32.partialorder %v10362_v49, 0.7853982  ;;  %v4559_v51 = vmul.f32 %v4558_v50, %v4556_v0  ;;  %v1348_v54 = vadd.s32 1, %v5879_v53  ;;  %v1497_v43 = vshrl.u32 %v1496_v14, 23 }
 0x234   : > { %v4565_v33 = vsel %vm7550_vm7, 0, %v4563_v59  ;;  %v4690_v34 = vsel %vm4688_vm5, %v4689_v25, %v4685_v8  ;;  %v7568_v23 = vshll.u32 %v1346_v9, 8  ;;  %vm4595_vm9 = vcmp.lt.s32.totalorder %v7286_v2, 0 }
 0x235   : > { %v4560_v1 = vxor.u32 2147483648, %v4559_v51  ;;  %v4691_v3 = vadd.s32 %v4690_v34, %v4686_v44  ;;  %v4582_v17 = vadd.s32 3, %v4565_v33  ;;  %vm1349_vm8 = vcmp.gt.s32.totalorder %v1348_v54, 0 }
 0x236   : > { %v1350_v13 = vsel %vm1349_vm8, %v1348_v54, 0  ;;  %v5882_v28 = vadd.s32 4294967169, %v1497_v43  ;;  %v10318_v46 = vand.u32 2147483647, %v7534_v32  ;;  %v7576_v27 = vadd.s32 %v4682_v62, %v4663_v57 }
 0x237   : > { %v4561_v39 = vsel %vm4440_vm6, %v4560_v1, %v4559_v51  ;;  %v4692_v55 = vadd.s32 536870912, %v4691_v3  ;;  %v1352_v31 = vand.u32 31, %v1350_v13  ;;  %v7572_v61 = vand.u32 3, %v4582_v17 }
 0x238   : > { %v7566_v10 = vsel %vm7550_vm7, %v7278_v21, %v4561_v39  ;;  %v7578_v59 = vshrl.u32 %v1350_v13, 5  ;;  %v7581_v8 = vand.u32 65535, %v7568_v23  ;;  %v7584_v52 = vshrl.u32 %v7568_v23, 16 }
 0x239   : > { %v4566_v40 = vmul.f32 %v7566_v10, %v7566_v10  ;;  %v4693_v63 = vshrl.u32 %v4692_v55, 30  ;;  %v1353_v19 = vsub.s32 32, %v1352_v31  ;;  %v7586_v18 = vadd.s32 1, %v5882_v28 }
 0x23a   : > { %v1355_v49 = vshll.u32 %v10333_v47, %v1352_v31  ;;  %v1358_v62 = vshll.u32 %v10337_v12, %v1352_v31  ;;  %v1361_v34 = vshll.u32 %v10338_v42, %v1352_v31  ;;  %vm4585_vm11 = vcmp.eq.s32.totalorder %v7572_v61, 0 }
 0x23b   : > { %v4567_v56 = vmul.f32 -0.001358992, %v4566_v40  ;;  %v4574_v35 = vmul.f32 -0.00019511016, %v4566_v40  ;;  %v4694_v22 = vshll.u32 %v4693_v63, 30  ;;  %v4717_v60 = vsub.s32 4, %v4693_v63 }
 0x23c   : > { %v1356_v57 = vshrl.u32 %v10337_v12, %v1353_v19  ;;  %v1362_v25 = vshrl.u32 %v10345_v38, %v1353_v19  ;;  %v1354_v33 = vshrl.u32 %v10333_v47, %v1353_v19  ;;  %v1359_v44 = vshrl.u32 %v10338_v42, %v1353_v19 }
 0x23d   : > { %v4568_v29 = vadd.f32 0.041655596, %v4567_v56  ;;  %v4575_v0 = vadd.f32 0.008332121, %v4574_v35  ;;  %v7588_v50 = vsub.s32 %v4691_v3, %v4694_v22  ;;  %v1365_v9 = vshrl.u32 %v10339_v30, %v1353_v19 }
 0x23e   : > { %v1368_v3 = vshrl.u32 %v10332_v11, %v1353_v19  ;;  %vm4588_vm12 = vcmp.eq.s32.totalorder %v7572_v61, 2  ;;  %v7606_v39 = vsel %vm4595_vm9, %v4717_v60, %v4693_v63  ;;  %v1363_v55 = vor.u32 %v1362_v25, %v1361_v34  ;;  %v7611_v19 = vpop.permute.xlu0 %473 }
 0x23f   : > { %v4569_v53 = vmul.f32 %v4568_v29, %v4566_v40  ;;  %v4576_v14 = vmul.f32 %v4575_v0, %v4566_v40  ;;  %vm4696_vm10 = vcmp.lt.s32.totalorder %v7588_v50, 0  ;;  %v4697_v51 = vsub.s32 0, %v7588_v50 }
 0x240   : > { %v1364_v13 = vshll.u32 %v10345_v38, %v1352_v31  ;;  %vm4584_vm13 = vcmp.lt.s32.totalorder %v7572_v61, 2  ;;  %v1357_v35 = vor.u32 %v1356_v57, %v1355_v49  ;;  %v1367_v22 = vshll.u32 %v10339_v30, %v1352_v31 }
 0x241   : > { %v4570_v54 = vadd.f32 -0.4999988, %v4569_v53  ;;  %v4577_v43 = vadd.f32 -0.16666654, %v4576_v14  ;;  %v4698_v1 = vsel %vm4696_vm10, %v4697_v51, %v7588_v50  ;;  %vm4581_vm14 = vweird.f32 %v7278_v21 }
 0x242   : > { %v4699_v17 = vclz %v4698_v1  ;;  %v1360_v0 = vor.u32 %v1359_v44, %v1358_v62  ;;  %v1366_v53 = vor.u32 %v1365_v9, %v1364_v13  ;;  %vm1370_vm15 = vcmp.lt.s32.totalorder %v7578_v59, 1 }
 0x243   : > { %v4571_v28 = vmul.f32 %v4570_v54, %v4566_v40  ;;  %v4578_v56 = vmul.f32 %v4577_v43, %v4566_v40  ;;  %v1369_v25 = vor.u32 %v1368_v3, %v1367_v22  ;;  %vm1373_vm0 = vcmp.lt.s32.totalorder %v7578_v59, 4 }
 0x244   : > { %v5943_v29 = vadd.s32 4294967294, %v4699_v17  ;;  %v10365_v40 = vand.u32 2147483647, %v7286_v2  ;;  %vm1371_vm3 = vcmp.lt.s32.totalorder %v7578_v59, 2  ;;  %vm1372_vm4 = vcmp.lt.s32.totalorder %v7578_v59, 3 }
 0x245   : > { %v4572_v63 = vadd.f32 1.0, %v4571_v28  ;;  %v4579_v60 = vadd.f32 1.0, %v4578_v56  ;;  %v1375_v31 = vsel %vm1373_vm0, %v1363_v55, 2102212464  ;;  %v1374_v51 = vsel %vm1370_vm15, %v1354_v33, %v1357_v35 }
 0x246   : > { %vm7618_vm1 = vcmp.le.f32.partialorder %v10365_v40, 0.7853982  ;;  %vm5944_vm2 = vcmp.lt.s32.totalorder %v5943_v29, 0  ;;  %v1376_v9 = vsel %vm1372_vm4, %v1360_v0, %v1375_v31  ;;  %v1378_v54 = vsel %vm1370_vm15, %v1357_v35, %v1360_v0  ;;  %v7657_v31 = vpop.permute.xlu0 %488 }
 0x247   : > { %v4580_v57 = vmul.f32 %v4579_v60, %v7566_v10  ;;  %v4589_v62 = vxor.u32 2147483648, %v4572_v63  ;;  %v4702_v14 = vsel %vm5944_vm2, 0, %v5943_v29  ;;  %v1379_v3 = vsel %vm1373_vm0, %v1366_v53, 920167782 }
 0x248   : > { %v4703_v44 = vsub.s32 32, %v4702_v14  ;;  %v4707_v34 = vsub.s32 4294967266, %v4702_v14  ;;  %v4704_v1 = vshll.u32 %v7588_v50, %v4702_v14  ;;  %v1382_v10 = vsel %vm1370_vm15, %v1360_v0, %v1363_v55 }
 0x249   : > { %v4586_v43 = vxor.u32 2147483648, %v4580_v57  ;;  %v1380_v13 = vsel %vm1372_vm4, %v1363_v55, %v1379_v3  ;;  %v1383_v28 = vsel %vm1373_vm0, %v1369_v25, 1326507024  ;;  %v4590_v50 = vsel %vm4588_vm12, %v4589_v62, %v4580_v57 }
 0x24a   : > { %v4705_v17 = vshrl.u32 %v7576_v27, %v4703_v44  ;;  %v4708_v33 = vadd.s32 127, %v4707_v34  ;;  %v1381_v35 = vsel %vm1371_vm3, %v1378_v54, %v1380_v13  ;;  %v1384_v27 = vsel %vm1372_vm4, %v1366_v53, %v1383_v28 }
 0x24b   : > { %v4587_v56 = vsel %vm4585_vm11, %v4572_v63, %v4586_v43  ;;  %v1385_v0 = vsel %vm1371_vm3, %v1382_v10, %v1384_v27  ;;  %v1411_v40 = vand.u32 65535, %v1381_v35  ;;  %v1412_v62 = vshrl.u32 %v1381_v35, 16 }
 0x24c   : > { %v4591_v22 = vsel %vm4584_vm13, %v4587_v56, %v4590_v50  ;;  %v4706_v55 = vor.u32 %v4705_v17, %v4704_v1  ;;  %v4709_v29 = vshll.u32 %v4708_v33, 23  ;;  %v1389_v60 = vand.u32 65535, %v1385_v0 }
 0x24d   : > { %v4592_v63 = vsel %vm4581_vm14, nan, %v4591_v22  ;;  %v1390_v25 = vshrl.u32 %v1385_v0, 16  ;;  %v7662_v61 = vand.u32 8388607, %v10318_v46  ;;  %v4720_v53 = vsel %vm7618_vm1, 0, %v7606_v39 }
 0x24e   : > { %v4710_v57 = vor.u32 4788187, %v4709_v29  ;;  %5702 = vst [vmem:[%s6717_s9 + $0xc0] sm:$0xff] %v4592_v63  ;;  %v7669_v21 = vsel %vm1371_vm3, %v1374_v51, %v1376_v9  ;;  %v1393_v44 = vmul.u32 %v1389_v60, %v7584_v52  ;;  %v4713_v54 = vcvt.s32.f32 %v4706_v55 }
 0x24f   : > { %v1392_v14 = vmul.u32 %v1390_v25, %v7581_v8  ;;  %v1414_v43 = vmul.u32 %v1412_v62, %v7581_v8  ;;  %v1415_v1 = vmul.u32 %v1411_v40, %v7584_v52  ;;  %v1391_v3 = vmul.u32 %v1389_v60, %v7581_v8 }
 0x250   : > { %v4711_v34 = vand.u32 2147483647, %v4710_v57  ;;  %v1394_v10 = vmul.u32 %v1390_v25, %v7584_v52  ;;  %vm1504_vm6 = vcmp.gt.s32.totalorder %v7586_v18, 0  ;;  %v1397_v39 = vshll.u32 %v1393_v44, 16 }
 0x251   : > { %v1395_v17 = vshll.u32 %v1392_v14, 16  ;;  %v1413_v51 = vmul.u32 %v1411_v40, %v7581_v8  ;;  %v1417_v9 = vshll.u32 %v1414_v43, 16  ;;  %v1416_v13 = vmul.u32 %v1412_v62, %v7584_v52  ;;  %v7692_v40 = vpop.permute.xlu0 %503 }
 0x252   : > { %v4714_v59 = vmul.f32 %v4713_v54, %v4711_v34  ;;  %v1419_v28 = vshll.u32 %v1415_v1, 16  ;;  %v1505_v55 = vsel %vm1504_vm6, %v7586_v18, 0  ;;  %v1396_v63 = vshrl.u32 %v1392_v14, 16 }
 0x253   : > { %vm1399_vm5 = vc.u32 %v1391_v3, %v1395_v17  ;;  %v1401_v33 = vadd.s32 %v1395_v17, %v1391_v3  ;;  %vm1421_vm7 = vc.u32 %v1413_v51, %v1417_v9  ;;  %v1423_v35 = vadd.s32 %v1417_v9, %v1413_v51 }
 0x254   : > { %v4715_v56 = vxor.u32 2147483648, %v4714_v59  ;;  %v1400_v50 = vsel %vm1399_vm5, 1, %v10343_v36  ;;  %v1422_v22 = vsel %vm1421_vm7, 1, %v10343_v36  ;;  %v1418_v62 = vshrl.u32 %v1414_v43, 16 }
 0x255   : > { %v1402_v27 = vadd.s32 %v1400_v50, %v1394_v10  ;;  %vm1403_vm8 = vc.u32 %v1401_v33, %v1397_v39  ;;  %v1424_v52 = vadd.s32 %v1422_v22, %v1416_v13  ;;  %vm1425_vm10 = vc.u32 %v1423_v35, %v1419_v28 }
 0x256   : > { %v4716_v8 = vsel %vm4595_vm9, %v4715_v56, %v4714_v59  ;;  %v1404_v29 = vsel %vm1403_vm8, 1, %v10343_v36  ;;  %v1426_v25 = vsel %vm1425_vm10, 1, %v10343_v36  ;;  %v1507_v34 = vand.u32 31, %v1505_v55 }
 0x257   : > { %v4719_v0 = vsel %vm7618_vm1, %v7286_v2, %v4716_v8  ;;  %v1406_v60 = vadd.s32 %v1404_v29, %v1402_v27  ;;  %v1428_v18 = vadd.s32 %v1426_v25, %v1424_v52  ;;  %v1398_v54 = vshrl.u32 %v1393_v44, 16 }
 0x258   : > { %v4721_v57 = vmul.f32 %v4719_v0, %v4719_v0  ;;  %v1420_v10 = vshrl.u32 %v1415_v1, 16  ;;  %v1501_v17 = vor.u32 8388608, %v7662_v61  ;;  %v7695_v49 = vsub.s32 32, %v1507_v34 }
 0x259   : > { %v1407_v3 = vadd.s32 %v1406_v60, %v1396_v63  ;;  %v1429_v51 = vadd.s32 %v1428_v18, %v1418_v62  ;;  %v4737_v14 = vadd.s32 3, %v4720_v53  ;;  %v7699_v33 = vadd.s32 %v1423_v35, %v1419_v28 }
 0x25a   : > { %v4722_v59 = vmul.f32 -0.001358992, %v4721_v57  ;;  %v4729_v39 = vmul.f32 -0.00019511016, %v4721_v57  ;;  %v1431_v43 = vmul.u32 %v7568_v23, %v7669_v21  ;;  %v7703_v50 = vshrl.u32 %v1505_v55, 5 }
 0x25b   : > { %v7697_v9 = vadd.s32 %v1407_v3, %v1398_v54  ;;  %v1430_v44 = vadd.s32 %v1429_v51, %v1420_v10  ;;  %v1510_v61 = vshll.u32 %v10333_v47, %v1507_v34  ;;  %v1511_v53 = vshrl.u32 %v10337_v12, %v7695_v49  ;;  %v7723_v3 = vpop.permute.xlu0 %518 }
 0x25c   : > { %v4723_v13 = vadd.f32 0.041655596, %v4722_v59  ;;  %v4730_v56 = vadd.f32 0.008332121, %v4729_v39  ;;  %v1514_v1 = vshrl.u32 %v10338_v42, %v7695_v49  ;;  %v1517_v23 = vshrl.u32 %v10345_v38, %v7695_v49 }
 0x25d   : > { %vm1433_vm9 = vc.u32 %v7697_v9, %v7699_v33  ;;  %v1434_v27 = vadd.s32 1, %v1430_v44  ;;  %v1513_v21 = vshll.u32 %v10337_v12, %v1507_v34  ;;  %v1516_v22 = vshll.u32 %v10338_v42, %v1507_v34 }
 0x25e   : > { %v4724_v28 = vmul.f32 %v4723_v13, %v4721_v57  ;;  %v4731_v35 = vmul.f32 %v4730_v56, %v4721_v57  ;;  %v1519_v55 = vshll.u32 %v10345_v38, %v1507_v34  ;;  %v1520_v8 = vshrl.u32 %v10339_v30, %v7695_v49 }
 0x25f   : > { %v1435_v63 = vsel %vm1433_vm9, %v1434_v27, %v1430_v44  ;;  %v1512_v60 = vor.u32 %v1511_v53, %v1510_v61  ;;  %v7719_v62 = vor.u32 %v1514_v1, %v1513_v21  ;;  %v1523_v54 = vshrl.u32 %v10332_v11, %v7695_v49 }
 0x260   : > { %v4725_v29 = vadd.f32 -0.4999988, %v4724_v28  ;;  %v4732_v52 = vadd.f32 -0.16666654, %v4731_v35  ;;  %v1436_v25 = vadd.s32 %v1435_v63, %v1431_v43  ;;  %v1521_v18 = vor.u32 %v1520_v8, %v1519_v55 }
 0x261   : > { %v1518_v39 = vor.u32 %v1517_v23, %v1516_v22  ;;  %v1522_v51 = vshll.u32 %v10339_v30, %v1507_v34  ;;  %v4738_v13 = vand.u32 3, %v4737_v14  ;;  %v7726_v28 = vshll.u32 %v1501_v17, 8 }
 0x262   : > { %v4726_v10 = vmul.f32 %v4725_v29, %v4721_v57  ;;  %v4733_v59 = vmul.f32 %v4732_v52, %v4721_v57  ;;  %v1437_v56 = vadd.s32 536870912, %v1436_v25  ;;  %vm1528_vm11 = vcmp.lt.s32.totalorder %v7703_v50, 4 }
 0x263   : > { %v1524_v43 = vor.u32 %v1523_v54, %v1522_v51  ;;  %vm1525_vm12 = vcmp.lt.s32.totalorder %v7703_v50, 1  ;;  %vm1527_vm13 = vcmp.lt.s32.totalorder %v7703_v50, 3  ;;  %v1534_v57 = vsel %vm1528_vm11, %v1521_v18, 920167782 }
 0x264   : > { %v4727_v44 = vadd.f32 1.0, %v4726_v10  ;;  %v4734_v61 = vadd.f32 1.0, %v4733_v59  ;;  %v7729_v53 = vshrl.u32 %v1437_v56, 30  ;;  %v1533_v17 = vsel %vm1525_vm12, %v1512_v60, %v7719_v62 }
 0x265   : > { %v1535_v14 = vsel %vm1527_vm13, %v1518_v39, %v1534_v57  ;;  %vm4736_vm14 = vweird.f32 %v7286_v2  ;;  %vm4739_vm15 = vcmp.lt.s32.totalorder %v4738_v13, 2  ;;  %v1537_v27 = vsel %vm1525_vm12, %v7719_v62, %v1518_v39 }
 0x266   : > { %v4735_v1 = vmul.f32 %v4734_v61, %v4719_v0  ;;  %v4744_v34 = vxor.u32 2147483648, %v4727_v44  ;;  %v1439_v35 = vshll.u32 %v7729_v53, 30  ;;  %vm4740_vm0 = vcmp.eq.s32.totalorder %v4738_v13, 0  ;;  %v7758_v61 = vpop.permute.xlu0 %613 }
 0x267   : > { %vm1526_vm1 = vcmp.lt.s32.totalorder %v7703_v50, 2  ;;  %v1538_v0 = vsel %vm1528_vm11, %v1524_v43, 1326507024  ;;  %vm4743_vm2 = vcmp.eq.s32.totalorder %v4738_v13, 2  ;;  %v1542_v63 = vand.u32 65535, %v7726_v28 }
 0x268   : > { %v4741_v23 = vxor.u32 2147483648, %v4735_v1  ;;  %v1440_v21 = vsub.s32 %v1436_v25, %v1439_v35  ;;  %v1536_v22 = vsel %vm1526_vm1, %v1533_v17, %v1535_v14  ;;  %v1539_v55 = vsel %vm1527_vm13, %v1521_v18, %v1538_v0 }
 0x269   : > { %v4745_v29 = vsel %vm4743_vm2, %v4744_v34, %v4735_v1  ;;  %v1540_v52 = vsel %vm1526_vm1, %v1537_v27, %v1539_v55  ;;  %v1543_v59 = vshrl.u32 %v7726_v28, 16  ;;  %v1566_v56 = vand.u32 65535, %v1536_v22 }
 0x26a   : > { %v4742_v8 = vsel %vm4740_vm0, %v4727_v44, %v4741_v23  ;;  %vm1441_vm3 = vcmp.lt.s32.totalorder %v1440_v21, 0  ;;  %v1442_v10 = vsub.s32 0, %v1440_v21  ;;  %v1544_v51 = vand.u32 65535, %v1540_v52 }
 0x26b   : > { %v4746_v54 = vsel %vm4739_vm15, %v4742_v8, %v4745_v29  ;;  %v1545_v13 = vshrl.u32 %v1540_v52, 16  ;;  %v1509_v44 = vshrl.u32 %v10333_v47, %v7695_v49  ;;  %v1567_v43 = vshrl.u32 %v1536_v22, 16 }
 0x26c   : > { %v4747_v25 = vsel %vm4736_vm14, nan, %v4746_v54  ;;  %v1443_v18 = vsel %vm1441_vm3, %v1442_v10, %v1440_v21  ;;  %v1548_v34 = vmul.u32 %v1544_v51, %v1543_v59  ;;  %v1432_v17 = vadd.s32 %v7699_v33, %v7697_v9 }
 0x26d   : > { %5703 = vst [vmem:[%s6717_s9 + $0xc8] sm:$0xff] %v4747_v25  ;;  %v1444_v57 = vclz %v1443_v18  ;;  %v1547_v1 = vmul.u32 %v1545_v13, %v1542_v63  ;;  %v1529_v2 = vsel %vm1525_vm12, %v1509_v44, %v1512_v60  ;;  %v1530_v14 = vsel %vm1528_vm11, %v1518_v39, 2102212464 }
 0x26e   : > { %v7771_v35 = vadd.f32 %v7758_v61, %v7531_v24  ;;  %v1546_v23 = vmul.u32 %v1544_v51, %v1542_v63  ;;  %v1570_v0 = vmul.u32 %v1566_v56, %v1543_v59  ;;  %vm1340_vm4 = vcmp.lt.s32.totalorder %v7527_v48, 0 }
 0x26f   : > { %v5880_v27 = vadd.s32 4294967294, %v1444_v57  ;;  %v1550_v49 = vshll.u32 %v1547_v1, 16  ;;  %v1462_v22 = vsub.s32 4, %v7729_v53  ;;  %v1549_v55 = vmul.u32 %v1545_v13, %v1543_v59 }
 0x270   : > { %v1568_v9 = vmul.u32 %v1566_v56, %v1542_v63  ;;  %v1569_v33 = vmul.u32 %v1567_v43, %v1542_v63  ;;  %v1552_v60 = vshll.u32 %v1548_v34, 16  ;;  %v1571_v24 = vmul.u32 %v1567_v43, %v1543_v59 }
 0x271   : > { %vm5881_vm6 = vcmp.lt.s32.totalorder %v5880_v27, 0  ;;  %vm1554_vm5 = vc.u32 %v1546_v23, %v1550_v49  ;;  %v1556_v8 = vadd.s32 %v1550_v49, %v1546_v23  ;;  %v1574_v51 = vshll.u32 %v1570_v0, 16 }
 0x272   : > { %v1447_v39 = vsel %vm5881_vm6, 0, %v5880_v27  ;;  %v1555_v29 = vsel %vm1554_vm5, 1, %v10343_v36  ;;  %v1572_v52 = vshll.u32 %v1569_v33, 16  ;;  %v1551_v23 = vshrl.u32 %v1547_v1, 16 }
 0x273   : > { %v1448_v54 = vsub.s32 32, %v1447_v39  ;;  %v1452_v10 = vsub.s32 4294967266, %v1447_v39  ;;  %v1557_v25 = vadd.s32 %v1555_v29, %v1549_v55  ;;  %v1449_v18 = vshll.u32 %v1440_v21, %v1447_v39 }
 0x274   : > { %vm1558_vm7 = vc.u32 %v1556_v8, %v1552_v60  ;;  %vm1576_vm8 = vc.u32 %v1568_v9, %v1572_v52  ;;  %v1578_v44 = vadd.s32 %v1572_v52, %v1568_v9  ;;  %v1553_v46 = vshrl.u32 %v1548_v34, 16 }
 0x275   : > { %v1450_v13 = vshrl.u32 %v1432_v17, %v1448_v54  ;;  %v1453_v56 = vadd.s32 127, %v1452_v10  ;;  %v1559_v63 = vsel %vm1558_vm7, 1, %v10343_v36  ;;  %v1577_v57 = vsel %vm1576_vm8, 1, %v10343_v36 }
 0x276   : > { %v1561_v27 = vadd.s32 %v1559_v63, %v1557_v25  ;;  %v1579_v49 = vadd.s32 %v1577_v57, %v1571_v24  ;;  %vm1580_vm10 = vc.u32 %v1578_v44, %v1574_v51  ;;  %v1573_v21 = vshrl.u32 %v1569_v33, 16 }
 0x277   : > { %v1451_v59 = vor.u32 %v1450_v13, %v1449_v18  ;;  %v1454_v43 = vshll.u32 %v1453_v56, 23  ;;  %v1581_v55 = vsel %vm1580_vm10, 1, %v10343_v36  ;;  %v10319_v9 = vand.u32 2147483647, %v7771_v35 }
 0x278   : > { %v1562_v29 = vadd.s32 %v1561_v27, %v1551_v23  ;;  %v1583_v60 = vadd.s32 %v1581_v55, %v1579_v49  ;;  %v1463_v8 = vsel %vm1340_vm4, %v1462_v22, %v7729_v53  ;;  %v1531_v1 = vsel %vm1527_vm13, %v7719_v62, %v1530_v14 }
 0x279   : > { %v1455_v17 = vor.u32 4788187, %v1454_v43  ;;  %v1031_v39 = vand.u32 2139095040, %v7771_v35  ;;  %v1575_v34 = vshrl.u32 %v1570_v0, 16  ;;  %v1582_v52 = vadd.s32 %v1578_v44, %v1574_v51 }
 0x27a   : > { %v1563_v24 = vadd.s32 %v1562_v29, %v1553_v46  ;;  %v1584_v54 = vadd.s32 %v1583_v60, %v1573_v21  ;;  %v1458_v33 = vcvt.s32.f32 %v1451_v59  ;;  %v1035_v18 = vand.u32 8388607, %v10319_v9 }
 0x27b   : > { %v1456_v10 = vand.u32 2147483647, %v1455_v17  ;;  %v1032_v25 = vshrl.u32 %v1031_v39, 23  ;;  %v1532_v13 = vsel %vm1526_vm1, %v1529_v2, %v1531_v1  ;;  %v7793_v22 = vadd.f32 %v7758_v61, %v7559_v20 }
 0x27c   : > { %v1585_v53 = vadd.s32 %v1584_v54, %v1575_v34  ;;  %vm7797_vm9 = vcmp.le.f32.partialorder %v1338_v16, 0.7853982  ;;  %vm1588_vm11 = vc.u32 %v1563_v24, %v1582_v52  ;;  %v1586_v2 = vmul.u32 %v7726_v28, %v1532_v13 }
 0x27d   : > { %v1459_v62 = vmul.f32 %v1458_v33, %v1456_v10  ;;  %v5873_v14 = vadd.s32 4294967169, %v1032_v25  ;;  %v1465_v0 = vsel %vm7797_vm9, 0, %v1463_v8  ;;  %v1036_v44 = vor.u32 8388608, %v1035_v18 }
 0x27e   : > { %v1589_v51 = vadd.s32 1, %v1585_v53  ;;  %v1186_v61 = vand.u32 2139095040, %v7793_v22  ;;  %v1482_v23 = vadd.s32 3, %v1465_v0  ;;  %v7814_v8 = vadd.s32 %v1582_v52, %v1563_v24 }
 0x27f   : > { %v1460_v50 = vxor.u32 2147483648, %v1459_v62  ;;  %v1038_v56 = vadd.s32 1, %v5873_v14  ;;  %v7810_v28 = vshll.u32 %v1036_v44, 8  ;;  %vm1495_vm13 = vcmp.lt.s32.totalorder %v7534_v32, 0 }
 0x280   : > { %v1590_v20 = vsel %vm1588_vm11, %v1589_v51, %v1585_v53  ;;  %v1187_v55 = vshrl.u32 %v1186_v61, 23  ;;  %v7812_v17 = vand.u32 3, %v1482_v23  ;;  %vm1481_vm2 = vweird.f32 %v7527_v48 }
 0x281   : > { %v1461_v16 = vsel %vm1340_vm4, %v1460_v50, %v1459_v62  ;;  %v1591_v63 = vadd.s32 %v1590_v20, %v1586_v2  ;;  %vm1039_vm12 = vcmp.gt.s32.totalorder %v1038_v56, 0  ;;  %v7819_v33 = vand.u32 65535, %v7810_v28 }
 0x282   : > { %v1464_v57 = vsel %vm7797_vm9, %v7527_v48, %v1461_v16  ;;  %v1040_v27 = vsel %vm1039_vm12, %v1038_v56, 0  ;;  %v7825_v13 = vshrl.u32 %v7810_v28, 16  ;;  %v7827_v24 = vadd.s32 4294967169, %v1187_v55 }
 0x283   : > { %v1466_v49 = vmul.f32 %v1464_v57, %v1464_v57  ;;  %v1592_v59 = vadd.s32 536870912, %v1591_v63  ;;  %v1042_v43 = vand.u32 31, %v1040_v27  ;;  %v7821_v25 = vshrl.u32 %v1040_v27, 5 }
 0x284   : > { %vm1488_vm14 = vcmp.eq.s32.totalorder %v7812_v17, 2  ;;  %vm1485_vm0 = vcmp.eq.s32.totalorder %v7812_v17, 0  ;;  %vm1484_vm1 = vcmp.lt.s32.totalorder %v7812_v17, 2  ;;  %v10373_v48 = vand.u32 2147483647, %v7793_v22 }
 0x285   : > { %v1467_v29 = vmul.f32 -0.001358992, %v1466_v49  ;;  %v1474_v21 = vmul.f32 -0.00019511016, %v1466_v49  ;;  %v1593_v60 = vshrl.u32 %v1592_v59, 30  ;;  %v1043_v1 = vsub.s32 32, %v1042_v43 }
 0x286   : > { %v1045_v18 = vshll.u32 %v10333_v47, %v1042_v43  ;;  %v1048_v62 = vshll.u32 %v10337_v12, %v1042_v43  ;;  %v1051_v51 = vshll.u32 %v10338_v42, %v1042_v43  ;;  %v1054_v61 = vshll.u32 %v10345_v38, %v1042_v43 }
 0x287   : > { %v1468_v34 = vadd.f32 0.041655596, %v1467_v29  ;;  %v1475_v54 = vadd.f32 0.008332121, %v1474_v21  ;;  %v1594_v10 = vshll.u32 %v1593_v60, 30  ;;  %v1046_v14 = vshrl.u32 %v10337_v12, %v1043_v1 }
 0x288   : > { %v1049_v0 = vshrl.u32 %v10338_v42, %v1043_v1  ;;  %v1052_v50 = vshrl.u32 %v10345_v38, %v1043_v1  ;;  %v1617_v20 = vsub.s32 4, %v1593_v60  ;;  %v1055_v16 = vshrl.u32 %v10339_v30, %v1043_v1 }
 0x289   : > { %v1469_v52 = vmul.f32 %v1468_v34, %v1466_v49  ;;  %v1476_v53 = vmul.f32 %v1475_v54, %v1466_v49  ;;  %v7829_v46 = vsub.s32 %v1591_v63, %v1594_v10  ;;  %v1058_v63 = vshrl.u32 %v10332_v11, %v1043_v1 }
 0x28a   : > { %v1044_v55 = vshrl.u32 %v10333_v47, %v1043_v1  ;;  %v1047_v21 = vor.u32 %v1046_v14, %v1045_v18  ;;  %v1056_v34 = vor.u32 %v1055_v16, %v1054_v61  ;;  %v1057_v54 = vshll.u32 %v10339_v30, %v1042_v43 }
 0x28b   : > { %v1470_v2 = vadd.f32 -0.4999988, %v1469_v52  ;;  %v1477_v44 = vadd.f32 -0.16666654, %v1476_v53  ;;  %vm1596_vm15 = vcmp.lt.s32.totalorder %v7829_v46, 0  ;;  %v1597_v56 = vsub.s32 0, %v7829_v46 }
 0x28c   : > { %v1050_v53 = vor.u32 %v1049_v0, %v1048_v62  ;;  %v1053_v9 = vor.u32 %v1052_v50, %v1051_v51  ;;  %vm1060_vm3 = vcmp.lt.s32.totalorder %v7821_v25, 1  ;;  %vm1061_vm6 = vcmp.lt.s32.totalorder %v7821_v25, 2 }
 0x28d   : > { %v1471_v23 = vmul.f32 %v1470_v2, %v1466_v49  ;;  %v1478_v27 = vmul.f32 %v1477_v44, %v1466_v49  ;;  %v1598_v59 = vsel %vm1596_vm15, %v1597_v56, %v7829_v46  ;;  %v7850_v49 = vsel %vm1495_vm13, %v1617_v20, %v1593_v60 }
 0x28e   : > { %v1599_v29 = vclz %v1598_v59  ;;  %v1059_v2 = vor.u32 %v1058_v63, %v1057_v54  ;;  %v10370_v56 = vand.u32 2147483647, %v7534_v32  ;;  %vm1063_vm5 = vcmp.lt.s32.totalorder %v7821_v25, 4 }
 0x28f   : > { %v1472_v10 = vadd.f32 1.0, %v1471_v23  ;;  %v1479_v52 = vadd.f32 1.0, %v1478_v27  ;;  %vm1062_vm8 = vcmp.lt.s32.totalorder %v7821_v25, 3  ;;  %v1064_v43 = vsel %vm1060_vm3, %v1044_v55, %v1047_v21 }
 0x290   : > { %v5883_v39 = vadd.s32 4294967294, %v1599_v29  ;;  %vm7855_vm4 = vcmp.le.f32.partialorder %v10370_v56, 0.7853982  ;;  %v1065_v14 = vsel %vm1063_vm5, %v1053_v9, 2102212464  ;;  %v1068_v0 = vsel %vm1060_vm3, %v1047_v21, %v1050_v53 }
 0x291   : > { %v1480_v1 = vmul.f32 %v1479_v52, %v1464_v57  ;;  %v1489_v44 = vxor.u32 2147483648, %v1472_v10  ;;  %v1069_v57 = vsel %vm1063_vm5, %v1056_v34, 920167782  ;;  %v1072_v63 = vsel %vm1060_vm3, %v1050_v53, %v1053_v9 }
 0x292   : > { %vm5884_vm7 = vcmp.lt.s32.totalorder %v5883_v39, 0  ;;  %v1073_v23 = vsel %vm1063_vm5, %v1059_v2, 1326507024  ;;  %v1066_v17 = vsel %vm1062_vm8, %v1050_v53, %v1065_v14  ;;  %v7898_v56 = vand.u32 8388607, %v10373_v48 }
 0x293   : > { %v1486_v60 = vxor.u32 2147483648, %v1480_v1  ;;  %v1602_v62 = vsel %vm5884_vm7, 0, %v5883_v39  ;;  %v1490_v51 = vsel %vm1488_vm14, %v1489_v44, %v1480_v1  ;;  %v1070_v39 = vsel %vm1062_vm8, %v1053_v9, %v1069_v57 }
 0x294   : > { %v1603_v50 = vsub.s32 32, %v1602_v62  ;;  %v1604_v20 = vshll.u32 %v7829_v46, %v1602_v62  ;;  %v1607_v61 = vsub.s32 4294967266, %v1602_v62  ;;  %v1071_v55 = vsel %vm1061_vm6, %v1068_v0, %v1070_v39 }
 0x295   : > { %v1487_v16 = vsel %vm1485_vm0, %v1472_v10, %v1486_v60  ;;  %v1074_v21 = vsel %vm1062_vm8, %v1056_v34, %v1073_v23  ;;  %v1101_v54 = vand.u32 65535, %v1071_v55  ;;  %v1102_v9 = vshrl.u32 %v1071_v55, 16 }
 0x296   : > { %v1491_v27 = vsel %vm1484_vm1, %v1487_v16, %v1490_v51  ;;  %v1605_v59 = vshrl.u32 %v7814_v8, %v1603_v50  ;;  %v1608_v46 = vadd.s32 127, %v1607_v61  ;;  %v1075_v8 = vsel %vm1061_vm6, %v1072_v63, %v1074_v21 }
 0x297   : > { %v1492_v29 = vsel %vm1481_vm2, nan, %v1491_v27  ;;  %v1079_v2 = vand.u32 65535, %v1075_v8  ;;  %v1080_v1 = vshrl.u32 %v1075_v8, 16  ;;  %v1104_v44 = vmul.u32 %v1102_v9, %v7819_v33 }
 0x298   : > { %v1606_v10 = vor.u32 %v1605_v59, %v1604_v20  ;;  %v1609_v52 = vshll.u32 %v1608_v46, 23  ;;  %5682 = vst [vmem:[%s6717_s9 + $0x20] sm:$0xff] %v1492_v29  ;;  %v1620_v57 = vsel %vm7855_vm4, 0, %v7850_v49  ;;  %v1105_v60 = vmul.u32 %v1101_v54, %v7825_v13 }
 0x299   : > { %v1193_v53 = vadd.s32 1, %v7827_v24  ;;  %v7907_v62 = vsel %vm1061_vm6, %v1064_v43, %v1066_v17  ;;  %v1082_v14 = vmul.u32 %v1080_v1, %v7819_v33  ;;  %v1083_v0 = vmul.u32 %v1079_v2, %v7825_v13 }
 0x29a   : > { %v1610_v34 = vor.u32 4788187, %v1609_v52  ;;  %v1103_v51 = vmul.u32 %v1101_v54, %v7819_v33  ;;  %v1613_v20 = vcvt.s32.f32 %v1606_v10  ;;  %v1106_v61 = vmul.u32 %v1102_v9, %v7825_v13 }
 0x29b   : > { %v1107_v16 = vshll.u32 %v1104_v44, 16  ;;  %v1081_v49 = vmul.u32 %v1079_v2, %v7819_v33  ;;  %v1084_v39 = vmul.u32 %v1080_v1, %v7825_v13  ;;  %v1085_v24 = vshll.u32 %v1082_v14, 16 }
 0x29c   : > { %v1611_v50 = vand.u32 2147483647, %v1610_v34  ;;  %v1109_v63 = vshll.u32 %v1105_v60, 16  ;;  %v1087_v43 = vshll.u32 %v1083_v0, 16  ;;  %vm1194_vm11 = vcmp.gt.s32.totalorder %v1193_v53, 0 }
 0x29d   : > { %vm1111_vm10 = vc.u32 %v1103_v51, %v1107_v16  ;;  %v1113_v23 = vadd.s32 %v1107_v16, %v1103_v51  ;;  %vm1089_vm9 = vc.u32 %v1081_v49, %v1085_v24  ;;  %v1091_v27 = vadd.s32 %v1085_v24, %v1081_v49 }
 0x29e   : > { %v1614_v25 = vmul.f32 %v1613_v20, %v1611_v50  ;;  %v1112_v59 = vsel %vm1111_vm10, 1, %v10343_v36  ;;  %v1090_v55 = vsel %vm1089_vm9, 1, %v10343_v36  ;;  %v1108_v33 = vshrl.u32 %v1104_v44, 16 }
 0x29f   : > { %v1114_v29 = vadd.s32 %v1112_v59, %v1106_v61  ;;  %vm1115_vm12 = vc.u32 %v1113_v23, %v1109_v63  ;;  %v1092_v21 = vadd.s32 %v1090_v55, %v1084_v39  ;;  %vm1093_vm14 = vc.u32 %v1091_v27, %v1087_v43 }
 0x2a0   : > { %v1615_v46 = vxor.u32 2147483648, %v1614_v25  ;;  %v1116_v13 = vsel %vm1115_vm12, 1, %v10343_v36  ;;  %v1094_v9 = vsel %vm1093_vm14, 1, %v10343_v36  ;;  %v1195_v52 = vsel %vm1194_vm11, %v1193_v53, 0 }
 0x2a1   : > { %v1118_v10 = vadd.s32 %v1116_v13, %v1114_v29  ;;  %v1086_v8 = vshrl.u32 %v1082_v14, 16  ;;  %v1096_v2 = vadd.s32 %v1094_v9, %v1092_v21  ;;  %v1197_v1 = vand.u32 31, %v1195_v52 }
 0x2a2   : > { %v1616_v54 = vsel %vm1495_vm13, %v1615_v46, %v1614_v25  ;;  %v1110_v34 = vshrl.u32 %v1105_v60, 16  ;;  %v1191_v44 = vor.u32 8388608, %v7898_v56  ;;  %v1637_v50 = vadd.s32 3, %v1620_v57 }
 0x2a3   : > { %v1619_v17 = vsel %vm7855_vm4, %v7534_v32, %v1616_v54  ;;  %v1119_v51 = vadd.s32 %v1118_v10, %v1108_v33  ;;  %v1088_v20 = vshrl.u32 %v1083_v0, 16  ;;  %v1097_v61 = vadd.s32 %v1096_v2, %v1086_v8 }
 0x2a4   : > { %v1621_v48 = vmul.f32 %v1619_v17, %v1619_v17  ;;  %v7925_v16 = vsub.s32 32, %v1197_v1  ;;  %v1121_v18 = vmul.u32 %v7810_v28, %v7907_v62  ;;  %v7931_v14 = vadd.s32 %v1113_v23, %v1109_v63 }
 0x2a5   : > { %v1120_v53 = vadd.s32 %v1119_v51, %v1110_v34  ;;  %v7929_v24 = vadd.s32 %v1097_v61, %v1088_v20  ;;  %v7933_v25 = vshrl.u32 %v1195_v52, 5  ;;  %v1200_v28 = vshll.u32 %v10333_v47, %v1197_v1 }
 0x2a6   : > { %v1622_v49 = vmul.f32 -0.001358992, %v1621_v48  ;;  %v1629_v39 = vmul.f32 -0.00019511016, %v1621_v48  ;;  %v1201_v56 = vshrl.u32 %v10337_v12, %v7925_v16  ;;  %v1204_v43 = vshrl.u32 %v10338_v42, %v7925_v16 }
 0x2a7   : > { %v1124_v0 = vadd.s32 1, %v1120_v53  ;;  %vm1123_vm13 = vc.u32 %v7929_v24, %v7931_v14  ;;  %v1203_v62 = vshll.u32 %v10337_v12, %v1197_v1  ;;  %v1207_v63 = vshrl.u32 %v10345_v38, %v7925_v16 }
 0x2a8   : > { %v1623_v57 = vadd.f32 0.041655596, %v1622_v49  ;;  %v1630_v60 = vadd.f32 0.008332121, %v1629_v39  ;;  %v1206_v46 = vshll.u32 %v10338_v42, %v1197_v1  ;;  %v7946_v29 = vor.u32 %v1201_v56, %v1200_v28 }
 0x2a9   : > { %v1125_v59 = vsel %vm1123_vm13, %v1124_v0, %v1120_v53  ;;  %v1209_v21 = vshll.u32 %v10345_v38, %v1197_v1  ;;  %v1210_v33 = vshrl.u32 %v10339_v30, %v7925_v16  ;;  %v7951_v9 = vor.u32 %v1204_v43, %v1203_v62 }
 0x2aa   : > { %v1624_v23 = vmul.f32 %v1623_v57, %v1621_v48  ;;  %v1631_v27 = vmul.f32 %v1630_v60, %v1621_v48  ;;  %v1126_v55 = vadd.s32 %v1125_v59, %v1121_v18  ;;  %v1213_v10 = vshrl.u32 %v10332_v11, %v7925_v16 }
 0x2ab   : > { %v7955_v8 = vor.u32 %v1207_v63, %v1206_v46  ;;  %v1211_v2 = vor.u32 %v1210_v33, %v1209_v21  ;;  %v1212_v34 = vshll.u32 %v10339_v30, %v1197_v1  ;;  %v7960_v51 = vmul.f32 %v7266_v26, %v6386_v4 }
 0x2ac   : > { %v1625_v13 = vadd.f32 -0.4999988, %v1624_v23  ;;  %v1632_v54 = vadd.f32 -0.16666654, %v1631_v27  ;;  %v1127_v52 = vadd.s32 536870912, %v1126_v55  ;;  %v1638_v49 = vand.u32 3, %v1637_v50 }
 0x2ad   : > { %v1214_v53 = vor.u32 %v1213_v10, %v1212_v34  ;;  %vm1215_vm15 = vcmp.lt.s32.totalorder %v7933_v25, 1  ;;  %vm1218_vm0 = vcmp.lt.s32.totalorder %v7933_v25, 4  ;;  %vm1217_vm1 = vcmp.lt.s32.totalorder %v7933_v25, 3 }
 0x2ae   : > { %v1626_v20 = vmul.f32 %v1625_v13, %v1621_v48  ;;  %v1633_v61 = vmul.f32 %v1632_v54, %v1621_v48  ;;  %v7962_v39 = vshrl.u32 %v1127_v52, 30  ;;  %v1224_v1 = vsel %vm1218_vm0, %v1211_v2, 920167782 }
 0x2af   : > { %v1223_v48 = vsel %vm1215_vm15, %v7946_v29, %v7951_v9  ;;  %v1225_v50 = vsel %vm1217_vm1, %v7955_v8, %v1224_v1  ;;  %v7977_v60 = vshll.u32 %v1191_v44, 8  ;;  %vm1639_vm2 = vcmp.lt.s32.totalorder %v1638_v49, 2 }
 0x2b0   : > { %v1627_v18 = vadd.f32 1.0, %v1626_v20  ;;  %v1634_v56 = vadd.f32 1.0, %v1633_v61  ;;  %v1129_v57 = vshll.u32 %v7962_v39, 30  ;;  %v1227_v28 = vsel %vm1215_vm15, %v7951_v9, %v7955_v8 }
 0x2b1   : > { %vm1640_vm3 = vcmp.eq.s32.totalorder %v1638_v49, 0  ;;  %vm1216_vm4 = vcmp.lt.s32.totalorder %v7933_v25, 2  ;;  %v1228_v63 = vsel %vm1218_vm0, %v1214_v53, 1326507024  ;;  %vm1643_vm6 = vcmp.eq.s32.totalorder %v1638_v49, 2 }
 0x2b2   : > { %v1635_v0 = vmul.f32 %v1634_v56, %v1619_v17  ;;  %v1644_v43 = vxor.u32 2147483648, %v1627_v18  ;;  %v1130_v62 = vsub.s32 %v1126_v55, %v1129_v57  ;;  %v1226_v44 = vsel %vm1216_vm4, %v1223_v48, %v1225_v50 }
 0x2b3   : > { %v1229_v17 = vsel %vm1217_vm1, %v1211_v2, %v1228_v63  ;;  %v1232_v46 = vand.u32 65535, %v7977_v60  ;;  %vm1636_vm7 = vweird.f32 %v7534_v32  ;;  %v1233_v52 = vshrl.u32 %v7977_v60, 16 }
 0x2b4   : > { %v1641_v23 = vxor.u32 2147483648, %v1635_v0  ;;  %vm1131_vm5 = vcmp.lt.s32.totalorder %v1130_v62, 0  ;;  %v1132_v27 = vsub.s32 0, %v1130_v62  ;;  %v1230_v59 = vsel %vm1216_vm4, %v1227_v28, %v1229_v17 }
 0x2b5   : > { %v1645_v21 = vsel %vm1643_vm6, %v1644_v43, %v1635_v0  ;;  %v1234_v33 = vand.u32 65535, %v1230_v59  ;;  %v1235_v13 = vshrl.u32 %v1230_v59, 16  ;;  %v424_v2 = vmul.f32 %v7266_v26, %v6388_v5 }
 0x2b6   : > { %v1642_v55 = vsel %vm1640_vm3, %v1627_v18, %v1641_v23  ;;  %v1133_v10 = vsel %vm1131_vm5, %v1132_v27, %v1130_v62  ;;  %v556_v53 = vmul.f32 %v7500_v15, %v6390_v6  ;;  %v1199_v18 = vshrl.u32 %v10333_v47, %v7925_v16 }
 0x2b7   : > { %v1646_v54 = vsel %vm1639_vm2, %v1642_v55, %v1645_v21  ;;  %v1134_v20 = vclz %v1133_v10  ;;  %v1237_v61 = vmul.u32 %v1235_v13, %v1232_v46  ;;  %v1238_v56 = vmul.u32 %v1234_v33, %v1233_v52 }
 0x2b8   : > { %v1647_v34 = vsel %vm1636_vm7, nan, %v1646_v54  ;;  %v1256_v32 = vand.u32 65535, %v1226_v44  ;;  %v557_v49 = vmul.f32 %v7500_v15, %v6392_v7  ;;  %v1236_v57 = vmul.u32 %v1234_v33, %v1232_v46 }
 0x2b9   : > { %5683 = vst [vmem:[%s6717_s9 + $0x28] sm:$0xff] %v1647_v34  ;;  %v5874_v1 = vadd.s32 4294967294, %v1134_v20  ;;  %v1240_v48 = vshll.u32 %v1237_v61, 16  ;;  %v1122_v26 = vadd.s32 %v7931_v14, %v7929_v24  ;;  %v1219_v50 = vsel %vm1215_vm15, %v1199_v18, %v7946_v29 }
 0x2ba   : > { %v1239_v0 = vmul.u32 %v1235_v13, %v1233_v52  ;;  %v1257_v43 = vshrl.u32 %v1226_v44, 16  ;;  %v1242_v28 = vshll.u32 %v1238_v56, 16  ;;  %v1260_v17 = vmul.u32 %v1256_v32, %v1233_v52 }
 0x2bb   : > { %vm5875_vm8 = vcmp.lt.s32.totalorder %v5874_v1, 0  ;;  %vm1244_vm10 = vc.u32 %v1236_v57, %v1240_v48  ;;  %v1246_v16 = vadd.s32 %v1240_v48, %v1236_v57  ;;  %v1241_v55 = vshrl.u32 %v1237_v61, 16 }
 0x2bc   : > { %v1137_v63 = vsel %vm5875_vm8, 0, %v5874_v1  ;;  %v1245_v23 = vsel %vm1244_vm10, 1, %v10343_v36  ;;  %v1259_v15 = vmul.u32 %v1257_v43, %v1232_v46  ;;  %vm1030_vm9 = vcmp.lt.s32.totalorder %v7771_v35, 0 }
 0x2bd   : > { %v1138_v27 = vsub.s32 32, %v1137_v63  ;;  %v1142_v59 = vsub.s32 4294967266, %v1137_v63  ;;  %v1247_v21 = vadd.s32 %v1245_v23, %v1239_v0  ;;  %vm1248_vm11 = vc.u32 %v1246_v16, %v1242_v28 }
 0x2be   : > { %v1258_v24 = vmul.u32 %v1256_v32, %v1232_v46  ;;  %v1261_v14 = vmul.u32 %v1257_v43, %v1233_v52  ;;  %v1262_v29 = vshll.u32 %v1259_v15, 16  ;;  %v1139_v44 = vshll.u32 %v1130_v62, %v1137_v63  ;;  %v684_v46 = vpop.permute.xlu2 %683 }
 0x2bf   : > { %v1140_v33 = vshrl.u32 %v1122_v26, %v1138_v27  ;;  %v1143_v13 = vadd.s32 127, %v1142_v59  ;;  %v1249_v54 = vsel %vm1248_vm11, 1, %v10343_v36  ;;  %v1264_v34 = vshll.u32 %v1260_v17, 16 }
 0x2c0   : > { %v1251_v10 = vadd.s32 %v1249_v54, %v1247_v21  ;;  %vm1266_vm12 = vc.u32 %v1258_v24, %v1262_v29  ;;  %v1268_v20 = vadd.s32 %v1262_v29, %v1258_v24  ;;  %v1220_v61 = vsel %vm1218_vm0, %v7955_v8, 2102212464 }
 0x2c1   : > { %v1141_v18 = vor.u32 %v1140_v33, %v1139_v44  ;;  %v1144_v1 = vshll.u32 %v1143_v13, 23  ;;  %v1267_v57 = vsel %vm1266_vm12, 1, %v10343_v36  ;;  %v588_v62 = vadd.f32 %v556_v53, %v7960_v51 }
 0x2c2   : > { %v1252_v52 = vadd.s32 %v1251_v10, %v1241_v55  ;;  %v1269_v32 = vadd.s32 %v1267_v57, %v1261_v14  ;;  %vm1270_vm14 = vc.u32 %v1268_v20, %v1264_v34  ;;  %v1152_v26 = vsub.s32 4, %v7962_v39 }
 0x2c3   : > { %v1145_v48 = vor.u32 4788187, %v1144_v1  ;;  %v1243_v0 = vshrl.u32 %v1238_v56, 16  ;;  %v1271_v43 = vsel %vm1270_vm14, 1, %v10343_v36  ;;  %v1263_v28 = vshrl.u32 %v1259_v15, 16 }
 0x2c4   : > { %v1273_v16 = vadd.s32 %v1271_v43, %v1269_v32  ;;  %v589_v63 = vadd.f32 %v557_v49, %v424_v2  ;;  %v8020_v23 = vadd.f32 %v684_v46, %v588_v62  ;;  %v1148_v27 = vcvt.s32.f32 %v1141_v18 }
 0x2c5   : > { %v1146_v8 = vand.u32 2147483647, %v1145_v48  ;;  %v1221_v59 = vsel %vm1217_vm1, %v7951_v9, %v1220_v61  ;;  %v1253_v55 = vadd.s32 %v1252_v52, %v1243_v0  ;;  %v1265_v21 = vshrl.u32 %v1260_v17, 16 }
 0x2c6   : > { %v1274_v51 = vadd.s32 %v1273_v16, %v1263_v28  ;;  %v8025_v53 = vadd.f32 %v684_v46, %v589_v63  ;;  %v10321_v56 = vand.u32 2147483647, %v8020_v23  ;;  %v1153_v2 = vsel %vm1030_vm9, %v1152_v26, %v7962_v39 }
 0x2c7   : > { %v1149_v24 = vmul.f32 %v1148_v27, %v1146_v8  ;;  %v1272_v49 = vadd.s32 %v1268_v20, %v1264_v34  ;;  %v5371_v15 = vand.u32 2139095040, %v8020_v23  ;;  %v1222_v14 = vsel %vm1216_vm4, %v1219_v50, %v1221_v59 }
 0x2c8   : > { %v1275_v29 = vadd.s32 %v1274_v51, %v1265_v21  ;;  %v10374_v9 = vand.u32 2147483647, %v7771_v35  ;;  %v5375_v54 = vand.u32 8388607, %v10321_v56  ;;  %v5526_v39 = vand.u32 2139095040, %v8025_v53 }
 0x2c9   : > { %v1150_v17 = vxor.u32 2147483648, %v1149_v24  ;;  %vm1278_vm15 = vc.u32 %v1253_v55, %v1272_v49  ;;  %v5372_v44 = vshrl.u32 %v5371_v15, 23  ;;  %v1276_v25 = vmul.u32 %v7977_v60, %v1222_v14 }
 0x2ca   : > { %vm1029_vm13 = vcmp.le.f32.partialorder %v10374_v9, 0.7853982  ;;  %v1279_v13 = vadd.s32 1, %v1275_v29  ;;  %v8044_v34 = vmul.f32 %v6316_v37, %v6386_v4  ;;  %v8049_v52 = vmul.f32 %v6316_v37, %v6388_v5 }
 0x2cb   : > { %v1155_v33 = vsel %vm1029_vm13, 0, %v1153_v2  ;;  %v1151_v10 = vsel %vm1030_vm9, %v1150_v17, %v1149_v24  ;;  %v5957_v50 = vadd.s32 4294967169, %v5372_v44  ;;  %v8053_v32 = vmul.f32 %v6327_v41, %v6386_v4 }
 0x2cc   : > { %v1154_v20 = vsel %vm1029_vm13, %v7771_v35, %v1151_v10  ;;  %v1280_v18 = vsel %vm1278_vm15, %v1279_v13, %v1275_v29  ;;  %v1172_v61 = vadd.s32 3, %v1155_v33  ;;  %v5376_v60 = vor.u32 8388608, %v5375_v54 }
 0x2cd   : > { %v1156_v1 = vmul.f32 %v1154_v20, %v1154_v20  ;;  %v1281_v57 = vadd.s32 %v1280_v18, %v1276_v25  ;;  %v5378_v46 = vadd.s32 1, %v5957_v50  ;;  %v5527_v62 = vshrl.u32 %v5526_v39, 23 }
 0x2ce   : > { %v8057_v43 = vmul.f32 %v6327_v41, %v6388_v5  ;;  %v8061_v28 = vmul.f32 %v6368_v58, %v6390_v6  ;;  %v8065_v37 = vmul.f32 %v7611_v19, %v6390_v6  ;;  %v8067_v27 = vand.u32 3, %v1172_v61 }
 0x2cf   : > { %v1157_v48 = vmul.f32 -0.001358992, %v1156_v1  ;;  %v1164_v26 = vmul.f32 -0.00019511016, %v1156_v1  ;;  %v1282_v0 = vadd.s32 536870912, %v1281_v57  ;;  %vm5379_vm0 = vcmp.gt.s32.totalorder %v5378_v46, 0 }
 0x2d0   : > { %v5380_v16 = vsel %vm5379_vm0, %v5378_v46, 0  ;;  %v8069_v51 = vshll.u32 %v5376_v60, 8  ;;  %v10320_v41 = vand.u32 2147483647, %v8025_v53  ;;  %v5960_v24 = vadd.s32 4294967169, %v5527_v62 }
 0x2d1   : > { %v1158_v63 = vadd.f32 0.041655596, %v1157_v48  ;;  %v1165_v8 = vadd.f32 0.008332121, %v1164_v26  ;;  %v1283_v59 = vshrl.u32 %v1282_v0, 30  ;;  %v5382_v21 = vand.u32 31, %v5380_v16 }
 0x2d2   : > { %v8074_v2 = vmul.f32 %v7611_v19, %v6392_v7  ;;  %v10375_v9 = vand.u32 2147483647, %v7793_v22  ;;  %vm1185_vm2 = vcmp.lt.s32.totalorder %v7793_v22, 0  ;;  %vm1178_vm3 = vcmp.eq.s32.totalorder %v8067_v27, 2 }
 0x2d3   : > { %v1159_v15 = vmul.f32 %v1158_v63, %v1156_v1  ;;  %v1166_v14 = vmul.f32 %v1165_v8, %v1156_v1  ;;  %v1284_v29 = vshll.u32 %v1283_v59, 30  ;;  %v1307_v44 = vsub.s32 4, %v1283_v59 }
 0x2d4   : > { %vm8078_vm1 = vcmp.le.f32.partialorder %v10375_v9, 0.7853982  ;;  %v5383_v33 = vsub.s32 32, %v5382_v21  ;;  %v1277_v39 = vadd.s32 %v1272_v49, %v1253_v55  ;;  %vm1175_vm4 = vcmp.eq.s32.totalorder %v8067_v27, 0 }
 0x2d5   : > { %v1160_v13 = vadd.f32 -0.4999988, %v1159_v15  ;;  %v1167_v54 = vadd.f32 -0.16666654, %v1166_v14  ;;  %v1285_v19 = vsub.s32 %v1281_v57, %v1284_v29  ;;  %v8085_v10 = vshrl.u32 %v5380_v16, 5 }
 0x2d6   : > { %v8088_v25 = vand.u32 65535, %v8069_v51  ;;  %v8092_v50 = vand.u32 8388607, %v10320_v41  ;;  %v8094_v18 = vadd.s32 1, %v5960_v24  ;;  %vm1174_vm6 = vcmp.lt.s32.totalorder %v8067_v27, 2 }
 0x2d7   : > { %v1161_v61 = vmul.f32 %v1160_v13, %v1156_v1  ;;  %v1168_v46 = vmul.f32 %v1167_v54, %v1156_v1  ;;  %vm1286_vm5 = vcmp.lt.s32.totalorder %v1285_v19, 0  ;;  %v1287_v55 = vsub.s32 0, %v1285_v19 }
 0x2d8   : > { %vm1171_vm7 = vweird.f32 %v7771_v35  ;;  %v1308_v49 = vsel %vm1185_vm2, %v1307_v44, %v1283_v59  ;;  %v5385_v57 = vshll.u32 %v10333_v47, %v5382_v21  ;;  %v5386_v60 = vshrl.u32 %v10337_v12, %v5383_v33 }
 0x2d9   : > { %v5388_v62 = vshll.u32 %v10337_v12, %v5382_v21  ;;  %v1162_v48 = vadd.f32 1.0, %v1161_v61  ;;  %v1169_v26 = vadd.f32 1.0, %v1168_v46  ;;  %v1288_v0 = vsel %vm1286_vm5, %v1287_v55, %v1285_v19 }
 0x2da   : > { %v5389_v1 = vshrl.u32 %v10338_v42, %v5383_v33  ;;  %v1289_v16 = vclz %v1288_v0  ;;  %v5391_v63 = vshll.u32 %v10338_v42, %v5382_v21  ;;  %v5392_v8 = vshrl.u32 %v10345_v38, %v5383_v33 }
 0x2db   : > { %v5395_v24 = vshrl.u32 %v10339_v30, %v5383_v33  ;;  %v1170_v15 = vmul.f32 %v1169_v26, %v1154_v20  ;;  %v1179_v59 = vxor.u32 2147483648, %v1162_v48  ;;  %v5394_v14 = vshll.u32 %v10345_v38, %v5382_v21 }
 0x2dc   : > { %v5398_v29 = vshrl.u32 %v10332_v11, %v5383_v33  ;;  %v5877_v9 = vadd.s32 4294967294, %v1289_v16  ;;  %v1310_v44 = vsel %vm8078_vm1, 0, %v1308_v49  ;;  %v5384_v13 = vshrl.u32 %v10333_v47, %v5383_v33 }
 0x2dd   : > { %v5397_v54 = vshll.u32 %v10339_v30, %v5382_v21  ;;  %v1176_v61 = vxor.u32 2147483648, %v1170_v15  ;;  %v5387_v46 = vor.u32 %v5386_v60, %v5385_v57  ;;  %v5390_v55 = vor.u32 %v5389_v1, %v5388_v62 }
 0x2de   : > { %v5396_v0 = vor.u32 %v5395_v24, %v5394_v14  ;;  %v1180_v20 = vsel %vm1178_vm3, %v1179_v59, %v1170_v15  ;;  %vm5878_vm8 = vcmp.lt.s32.totalorder %v5877_v9, 0  ;;  %v5393_v26 = vor.u32 %v5392_v8, %v5391_v63 }
 0x2df   : > { %v5399_v41 = vor.u32 %v5398_v29, %v5397_v54  ;;  %v1177_v16 = vsel %vm1175_vm4, %v1162_v48, %v1176_v61  ;;  %v1292_v56 = vsel %vm5878_vm8, 0, %v5877_v9  ;;  %vm5400_vm10 = vcmp.lt.s32.totalorder %v8085_v10, 1 }
 0x2e0   : > { %vm5401_vm9 = vcmp.lt.s32.totalorder %v8085_v10, 2  ;;  %v1181_v21 = vsel %vm1174_vm6, %v1177_v16, %v1180_v20  ;;  %v1293_v33 = vsub.s32 32, %v1292_v56  ;;  %v1297_v49 = vsub.s32 4294967266, %v1292_v56 }
 0x2e1   : > { %vm5403_vm11 = vcmp.lt.s32.totalorder %v8085_v10, 4  ;;  %v1182_v57 = vsel %vm1171_vm7, nan, %v1181_v21  ;;  %vm5402_vm12 = vcmp.lt.s32.totalorder %v8085_v10, 3  ;;  %v5408_v60 = vsel %vm5400_vm10, %v5387_v46, %v5390_v55 }
 0x2e2   : > { %v5409_v62 = vsel %vm5403_vm11, %v5396_v0, 920167782  ;;  %v1294_v48 = vshll.u32 %v1285_v19, %v1292_v56  ;;  %v1295_v1 = vshrl.u32 %v1277_v39, %v1293_v33  ;;  %v1298_v63 = vadd.s32 127, %v1297_v49  ;;  %5680 = vst [vmem:[%s6717_s9 + $0x10] sm:$0xff] %v1182_v57 }
 0x2e3   : > { %v5410_v27 = vsel %vm5402_vm12, %v5393_v26, %v5409_v62  ;;  %v5405_v8 = vsel %vm5403_vm11, %v5393_v26, 2102212464  ;;  %v5412_v35 = vsel %vm5400_vm10, %v5390_v55, %v5393_v26  ;;  %v5413_v15 = vsel %vm5403_vm11, %v5399_v41, 1326507024 }
 0x2e4   : > { %v5411_v24 = vsel %vm5401_vm9, %v5408_v60, %v5410_v27  ;;  %v1296_v59 = vor.u32 %v1295_v1, %v1294_v48  ;;  %v1299_v14 = vshll.u32 %v1298_v63, 23  ;;  %v5414_v29 = vsel %vm5402_vm12, %v5396_v0, %v5413_v15 }
 0x2e5   : > { %v5441_v56 = vand.u32 65535, %v5411_v24  ;;  %v5404_v39 = vsel %vm5400_vm10, %v5384_v13, %v5387_v46  ;;  %v5415_v19 = vsel %vm5401_vm9, %v5412_v35, %v5414_v29  ;;  %v5418_v9 = vshrl.u32 %v8069_v51, 16 }
 0x2e6   : > { %v5442_v54 = vshrl.u32 %v5411_v24, 16  ;;  %v1300_v61 = vor.u32 4788187, %v1299_v14  ;;  %v5406_v20 = vsel %vm5402_vm12, %v5390_v55, %v5405_v8  ;;  %v5419_v41 = vand.u32 65535, %v5415_v19 }
 0x2e7   : > { %v5420_v26 = vshrl.u32 %v5415_v19, 16  ;;  %v1327_v16 = vadd.s32 3, %v1310_v44  ;;  %v5445_v0 = vmul.u32 %v5441_v56, %v5418_v9  ;;  %vm5534_vm14 = vcmp.gt.s32.totalorder %v8094_v18, 0 }
 0x2e8   : > { %v5444_v21 = vmul.u32 %v5442_v54, %v8088_v25  ;;  %v1301_v33 = vand.u32 2147483647, %v1300_v61  ;;  %v1303_v13 = vcvt.s32.f32 %v1296_v59  ;;  %v5423_v49 = vmul.u32 %v5419_v41, %v5418_v9 }
 0x2e9   : > { %v5422_v46 = vmul.u32 %v5420_v26, %v8088_v25  ;;  %v8148_v57 = vsel %vm5401_vm9, %v5404_v39, %v5406_v20  ;;  %v5443_v60 = vmul.u32 %v5441_v56, %v8088_v25  ;;  %v5446_v55 = vmul.u32 %v5442_v54, %v5418_v9 }
 0x2ea   : > { %v5447_v62 = vshll.u32 %v5444_v21, 16  ;;  %v1304_v48 = vmul.f32 %v1303_v13, %v1301_v33  ;;  %v5421_v44 = vmul.u32 %v5419_v41, %v8088_v25  ;;  %v5424_v1 = vmul.u32 %v5420_v26, %v5418_v9 }
 0x2eb   : > { %v5425_v63 = vshll.u32 %v5422_v46, 16  ;;  %v5427_v27 = vshll.u32 %v5423_v49, 16  ;;  %v5449_v8 = vshll.u32 %v5445_v0, 16  ;;  %v5535_v29 = vsel %vm5534_vm14, %v8094_v18, 0 }
 0x2ec   : > { %vm5451_vm13 = vc.u32 %v5443_v60, %v5447_v62  ;;  %v5453_v24 = vadd.s32 %v5447_v62, %v5443_v60  ;;  %v1305_v35 = vxor.u32 2147483648, %v1304_v48  ;;  %v5448_v54 = vshrl.u32 %v5444_v21, 16 }
 0x2ed   : > { %vm5429_vm15 = vc.u32 %v5421_v44, %v5425_v63  ;;  %v5431_v15 = vadd.s32 %v5425_v63, %v5421_v44  ;;  %v5452_v10 = vsel %vm5451_vm13, 1, %v10343_v36  ;;  %v5426_v41 = vshrl.u32 %v5422_v46, 16 }
 0x2ee   : > { %v5430_v59 = vsel %vm5429_vm15, 1, %v10343_v36  ;;  %v5454_v14 = vadd.s32 %v5452_v10, %v5446_v55  ;;  %vm5455_vm0 = vc.u32 %v5453_v24, %v5449_v8  ;;  %v1306_v25 = vsel %vm1185_vm2, %v1305_v35, %v1304_v48 }
 0x2ef   : > { %v5432_v56 = vadd.s32 %v5430_v59, %v5424_v1  ;;  %vm5433_vm3 = vc.u32 %v5431_v15, %v5427_v27  ;;  %v5456_v39 = vsel %vm5455_vm0, 1, %v10343_v36  ;;  %v1309_v19 = vsel %vm8078_vm1, %v7793_v22, %v1306_v25 }
 0x2f0   : > { %v5434_v9 = vsel %vm5433_vm3, 1, %v10343_v36  ;;  %v5458_v61 = vadd.s32 %v5456_v39, %v5454_v14  ;;  %v1311_v20 = vmul.f32 %v1309_v19, %v1309_v19  ;;  %v5537_v33 = vand.u32 31, %v5535_v29 }
 0x2f1   : > { %v5436_v26 = vadd.s32 %v5434_v9, %v5432_v56  ;;  %v5428_v18 = vshrl.u32 %v5423_v49, 16  ;;  %v5450_v13 = vshrl.u32 %v5445_v0, 16  ;;  %v5531_v55 = vor.u32 8388608, %v8092_v50 }
 0x2f2   : > { %v5459_v60 = vadd.s32 %v5458_v61, %v5448_v54  ;;  %v1312_v62 = vmul.f32 -0.001358992, %v1311_v20  ;;  %v1319_v48 = vmul.f32 -0.00019511016, %v1311_v20  ;;  %v8165_v1 = vsub.s32 32, %v5537_v33 }
 0x2f3   : > { %v5437_v44 = vadd.s32 %v5436_v26, %v5426_v41  ;;  %v8167_v17 = vand.u32 3, %v1327_v16  ;;  %v8169_v63 = vadd.s32 %v5453_v24, %v5449_v8  ;;  %v5461_v46 = vmul.u32 %v8069_v51, %v8148_v57 }
 0x2f4   : > { %v5460_v21 = vadd.s32 %v5459_v60, %v5450_v13  ;;  %v1313_v27 = vadd.f32 0.041655596, %v1312_v62  ;;  %v1320_v35 = vadd.f32 0.008332121, %v1319_v48  ;;  %v5540_v0 = vshll.u32 %v10333_v47, %v5537_v33 }
 0x2f5   : > { %v8173_v49 = vadd.s32 %v5437_v44, %v5428_v18  ;;  %v5541_v15 = vshrl.u32 %v10337_v12, %v8165_v1  ;;  %v5543_v10 = vshll.u32 %v10337_v12, %v5537_v33  ;;  %v5544_v16 = vshrl.u32 %v10338_v42, %v8165_v1 }
 0x2f6   : > { %v5464_v50 = vadd.s32 1, %v5460_v21  ;;  %v1314_v8 = vmul.f32 %v1313_v27, %v1311_v20  ;;  %v1321_v24 = vmul.f32 %v1320_v35, %v1311_v20  ;;  %v5547_v51 = vshrl.u32 %v10345_v38, %v8165_v1 }
 0x2f7   : > { %vm5463_vm1 = vc.u32 %v8173_v49, %v8169_v63  ;;  %v8185_v59 = vshrl.u32 %v5535_v29, 5  ;;  %v8187_v14 = vor.u32 %v5541_v15, %v5540_v0  ;;  %v5546_v25 = vshll.u32 %v10338_v42, %v5537_v33 }
 0x2f8   : > { %v5465_v57 = vsel %vm5463_vm1, %v5464_v50, %v5460_v21  ;;  %v1315_v56 = vadd.f32 -0.4999988, %v1314_v8  ;;  %v1322_v39 = vadd.f32 -0.16666654, %v1321_v24  ;;  %v8190_v54 = vor.u32 %v5544_v16, %v5543_v10 }
 0x2f9   : > { %v5466_v9 = vadd.s32 %v5465_v57, %v5461_v46  ;;  %v5549_v61 = vshll.u32 %v10345_v38, %v5537_v33  ;;  %v5550_v41 = vshrl.u32 %v10339_v30, %v8165_v1  ;;  %v5552_v26 = vshll.u32 %v10339_v30, %v5537_v33 }
 0x2fa   : > { %v5553_v29 = vshrl.u32 %v10332_v11, %v8165_v1  ;;  %v1316_v18 = vmul.f32 %v1315_v56, %v1311_v20  ;;  %v1323_v13 = vmul.f32 %v1322_v39, %v1311_v20  ;;  %v5548_v62 = vor.u32 %v5547_v51, %v5546_v25 }
 0x2fb   : > { %v5467_v60 = vadd.s32 536870912, %v5466_v9  ;;  %v5551_v48 = vor.u32 %v5550_v41, %v5549_v61  ;;  %vm5555_vm2 = vcmp.lt.s32.totalorder %v8185_v59, 1  ;;  %v8199_v21 = vshll.u32 %v5531_v55, 8 }
 0x2fc   : > { %v5554_v44 = vor.u32 %v5553_v29, %v5552_v26  ;;  %v1317_v46 = vadd.f32 1.0, %v1316_v18  ;;  %v1324_v27 = vadd.f32 1.0, %v1323_v13  ;;  %vm5558_vm4 = vcmp.lt.s32.totalorder %v8185_v59, 4 }
 0x2fd   : > { %v8201_v35 = vshrl.u32 %v5467_v60, 30  ;;  %vm5557_vm6 = vcmp.lt.s32.totalorder %v8185_v59, 3  ;;  %v5563_v20 = vsel %vm5555_vm2, %v8187_v14, %v8190_v54  ;;  %v5564_v33 = vsel %vm5558_vm4, %v5551_v48, 920167782 }
 0x2fe   : > { %v5568_v55 = vsel %vm5558_vm4, %v5554_v44, 1326507024  ;;  %v1325_v0 = vmul.f32 %v1324_v27, %v1309_v19  ;;  %v1334_v50 = vxor.u32 2147483648, %v1317_v46  ;;  %v5567_v10 = vsel %vm5555_vm2, %v8190_v54, %v5548_v62 }
 0x2ff   : > { %v5469_v15 = vshll.u32 %v8201_v35, 30  ;;  %vm1326_vm5 = vweird.f32 %v7793_v22  ;;  %vm1329_vm7 = vcmp.lt.s32.totalorder %v8167_v17, 2  ;;  %v5565_v16 = vsel %vm5557_vm6, %v5548_v62, %v5564_v33 }
 0x300   : > { %v5569_v8 = vsel %vm5557_vm6, %v5551_v48, %v5568_v55  ;;  %vm1330_vm8 = vcmp.eq.s32.totalorder %v8167_v17, 0  ;;  %v1331_v19 = vxor.u32 2147483648, %v1325_v0  ;;  %vm5556_vm10 = vcmp.lt.s32.totalorder %v8185_v59, 2 }
 0x301   : > { %v5470_v24 = vsub.s32 %v5466_v9, %v5469_v15  ;;  %vm1333_vm9 = vcmp.eq.s32.totalorder %v8167_v17, 2  ;;  %v5566_v51 = vsel %vm5556_vm10, %v5563_v20, %v5565_v16  ;;  %v5570_v57 = vsel %vm5556_vm10, %v5567_v10, %v5569_v8 }
 0x302   : > { %v5572_v25 = vand.u32 65535, %v8199_v21  ;;  %v1332_v56 = vsel %vm1330_vm8, %v1317_v46, %v1331_v19  ;;  %v1335_v39 = vsel %vm1333_vm9, %v1334_v50, %v1325_v0  ;;  %v5573_v9 = vshrl.u32 %v8199_v21, 16 }
 0x303   : > { %vm5471_vm11 = vcmp.lt.s32.totalorder %v5470_v24, 0  ;;  %v5472_v61 = vsub.s32 0, %v5470_v24  ;;  %v1336_v41 = vsel %vm1329_vm7, %v1332_v56, %v1335_v39  ;;  %v5574_v26 = vand.u32 65535, %v5570_v57 }
 0x304   : > { %v5575_v29 = vshrl.u32 %v5570_v57, 16  ;;  %v8234_v17 = vmul.f32 %v6368_v58, %v6392_v7  ;;  %v1337_v18 = vsel %vm1326_vm5, nan, %v1336_v41  ;;  %v5597_v60 = vshrl.u32 %v5566_v51, 16 }
 0x305   : > { %v5473_v13 = vsel %vm5471_vm11, %v5472_v61, %v5470_v24  ;;  %5681 = vst [vmem:[%s6717_s9 + $0x18] sm:$0xff] %v1337_v18  ;;  %v5578_v46 = vmul.u32 %v5574_v26, %v5573_v9  ;;  %v5596_v27 = vand.u32 65535, %v5566_v51  ;;  %v5462_v20 = vadd.s32 %v8169_v63, %v8173_v49  ;;  %v634_v61 = vpop.permute.xlu1 %633 }
 0x306   : > { %v5474_v48 = vclz %v5473_v13  ;;  %v5577_v44 = vmul.u32 %v5575_v29, %v5572_v25  ;;  %v5539_v33 = vshrl.u32 %v10333_v47, %v8165_v1  ;;  %v568_v58 = vadd.f32 %v8065_v37, %v8053_v32 }
 0x307   : > { %v569_v22 = vadd.f32 %v8074_v2, %v8057_v43  ;;  %v5560_v0 = vsel %vm5558_vm4, %v5548_v62, 2102212464  ;;  %v5576_v50 = vmul.u32 %v5574_v26, %v5572_v25  ;;  %v5492_v10 = vsub.s32 4, %v8201_v35 }
 0x308   : > { %v5958_v55 = vadd.s32 4294967294, %v5474_v48  ;;  %v5580_v15 = vshll.u32 %v5577_v44, 16  ;;  %v5579_v16 = vmul.u32 %v5575_v29, %v5573_v9  ;;  %v5582_v8 = vshll.u32 %v5578_v46, 16 }
 0x309   : > { %v5599_v63 = vmul.u32 %v5597_v60, %v5572_v25  ;;  %vm5370_vm12 = vcmp.lt.s32.totalorder %v8020_v23, 0  ;;  %v5598_v32 = vmul.u32 %v5596_v27, %v5572_v25  ;;  %v5600_v2 = vmul.u32 %v5596_v27, %v5573_v9 }
 0x30a   : > { %vm5959_vm14 = vcmp.lt.s32.totalorder %v5958_v55, 0  ;;  %vm5584_vm13 = vc.u32 %v5576_v50, %v5580_v15  ;;  %v5586_v1 = vadd.s32 %v5580_v15, %v5576_v50  ;;  %v5581_v51 = vshrl.u32 %v5577_v44, 16 }
 0x30b   : > { %v5477_v37 = vsel %vm5959_vm14, 0, %v5958_v55  ;;  %v5585_v43 = vsel %vm5584_vm13, 1, %v10343_v36  ;;  %v5602_v49 = vshll.u32 %v5599_v63, 16  ;;  %v5601_v39 = vmul.u32 %v5597_v60, %v5573_v9 }
 0x30c   : > { %v5478_v19 = vsub.s32 32, %v5477_v37  ;;  %v5482_v62 = vsub.s32 4294967266, %v5477_v37  ;;  %v5587_v57 = vadd.s32 %v5585_v43, %v5579_v16  ;;  %v5479_v56 = vshll.u32 %v5470_v24, %v5477_v37 }
 0x30d   : > { %vm5588_vm15 = vc.u32 %v5586_v1, %v5582_v8  ;;  %vm5606_vm0 = vc.u32 %v5598_v32, %v5602_v49  ;;  %v5604_v13 = vshll.u32 %v5600_v2, 16  ;;  %v5608_v48 = vadd.s32 %v5602_v49, %v5598_v32 }
 0x30e   : > { %v5480_v41 = vshrl.u32 %v5462_v20, %v5478_v19  ;;  %v5483_v26 = vadd.s32 127, %v5482_v62  ;;  %v5589_v29 = vsel %vm5588_vm15, 1, %v10343_v36  ;;  %v5607_v25 = vsel %vm5606_vm0, 1, %v10343_v36 }
 0x30f   : > { %v5591_v18 = vadd.s32 %v5589_v29, %v5587_v57  ;;  %v5609_v27 = vadd.s32 %v5607_v25, %v5601_v39  ;;  %v5559_v24 = vsel %vm5555_vm2, %v5539_v33, %v8187_v14  ;;  %v8257_v44 = vadd.f32 %v634_v61, %v568_v58 }
 0x310   : > { %v5481_v55 = vor.u32 %v5480_v41, %v5479_v56  ;;  %v5484_v50 = vshll.u32 %v5483_v26, 23  ;;  %v5561_v9 = vsel %vm5557_vm6, %v8190_v54, %v5560_v0  ;;  %vm5610_vm3 = vc.u32 %v5608_v48, %v5604_v13 }
 0x311   : > { %v5592_v60 = vadd.s32 %v5591_v18, %v5581_v51  ;;  %v8264_v20 = vadd.f32 %v8061_v28, %v8044_v34  ;;  %v5583_v16 = vshrl.u32 %v5578_v46, 16  ;;  %v5611_v8 = vsel %vm5610_vm3, 1, %v10343_v36 }
 0x312   : > { %v5485_v15 = vor.u32 4788187, %v5484_v50  ;;  %v2268_v1 = vand.u32 2147483647, %v8257_v44  ;;  %v5493_v14 = vsel %vm5370_vm12, %v5492_v10, %v8201_v35  ;;  %v5603_v33 = vshrl.u32 %v5599_v63, 16 }
 0x313   : > { %v5613_v58 = vadd.s32 %v5611_v8, %v5609_v27  ;;  %v2271_v54 = vand.u32 2139095040, %v8257_v44  ;;  %v5488_v32 = vcvt.s32.f32 %v5481_v55  ;;  %v5593_v37 = vadd.s32 %v5592_v60, %v5583_v16 }
 0x314   : > { %v5486_v0 = vand.u32 2147483647, %v5485_v15  ;;  %v5605_v43 = vshrl.u32 %v5600_v2, 16  ;;  %v8272_v28 = vadd.f32 %v634_v61, %v569_v22  ;;  %v2275_v49 = vand.u32 8388607, %v2268_v1 }
 0x315   : > { %v5614_v34 = vadd.s32 %v5613_v58, %v5603_v33  ;;  %v2272_v46 = vshrl.u32 %v2271_v54, 23  ;;  %v10378_v19 = vand.u32 2147483647, %v8020_v23  ;;  %v5612_v10 = vadd.s32 %v5608_v48, %v5604_v13 }
 0x316   : > { %v5489_v35 = vmul.f32 %v5488_v32, %v5486_v0  ;;  %v5562_v63 = vsel %vm5556_vm10, %v5559_v24, %v5561_v9  ;;  %v8286_v22 = vadd.f32 %v8234_v17, %v8049_v52  ;;  %v2276_v61 = vor.u32 8388608, %v2275_v49 }
 0x317   : > { %vm8278_vm1 = vcmp.le.f32.partialorder %v10378_v19, 0.7853982  ;;  %v5615_v51 = vadd.s32 %v5614_v34, %v5605_v43  ;;  %v5897_v2 = vadd.s32 4294967169, %v2272_v46  ;;  %vm5618_vm2 = vc.u32 %v5593_v37, %v5612_v10 }
 0x318   : > { %v5490_v57 = vxor.u32 2147483648, %v5489_v35  ;;  %v5495_v56 = vsel %vm8278_vm1, 0, %v5493_v14  ;;  %v2426_v26 = vand.u32 2139095040, %v8272_v28  ;;  %v5616_v29 = vmul.u32 %v8199_v21, %v5562_v63 }
 0x319   : > { %v5619_v39 = vadd.s32 1, %v5615_v51  ;;  %v2278_v41 = vadd.s32 1, %v5897_v2  ;;  %v5512_v18 = vadd.s32 3, %v5495_v56  ;;  %v8297_v55 = vshll.u32 %v2276_v61, 8 }
 0x31a   : > { %v5491_v59 = vsel %vm5370_vm12, %v5490_v57, %v5489_v35  ;;  %v2427_v50 = vshrl.u32 %v2426_v26, 23  ;;  %v8301_v21 = vmul.f32 %v6338_v45, %v6386_v4  ;;  %v8307_v58 = vadd.s32 %v5612_v10, %v5593_v37 }
 0x31b   : > { %v5494_v52 = vsel %vm8278_vm1, %v8020_v23, %v5491_v59  ;;  %v5620_v17 = vsel %vm5618_vm2, %v5619_v39, %v5615_v51  ;;  %vm2279_vm4 = vcmp.gt.s32.totalorder %v2278_v41, 0  ;;  %v8305_v14 = vand.u32 3, %v5512_v18 }
 0x31c   : > { %v5496_v25 = vmul.f32 %v5494_v52, %v5494_v52  ;;  %v5621_v13 = vadd.s32 %v5620_v17, %v5616_v29  ;;  %v2280_v48 = vsel %vm2279_vm4, %v2278_v41, 0  ;;  %v8310_v54 = vand.u32 65535, %v8297_v55 }
 0x31d   : > { %v2282_v27 = vand.u32 31, %v2280_v48  ;;  %v2423_v0 = vand.u32 2147483647, %v8272_v28  ;;  %v5900_v32 = vadd.s32 4294967169, %v2427_v50  ;;  %vm5525_vm6 = vcmp.lt.s32.totalorder %v8025_v53, 0 }
 0x31e   : > { %v5497_v24 = vmul.f32 -0.001358992, %v5496_v25  ;;  %v5504_v9 = vmul.f32 -0.00019511016, %v5496_v25  ;;  %v5622_v60 = vadd.s32 536870912, %v5621_v13  ;;  %v8314_v49 = vshrl.u32 %v2280_v48, 5 }
 0x31f   : > { %v8303_v15 = vsub.s32 32, %v2282_v27  ;;  %v2285_v19 = vshll.u32 %v10333_v47, %v2282_v27  ;;  %vm5518_vm5 = vcmp.eq.s32.totalorder %v8305_v14, 2  ;;  %v2288_v2 = vshll.u32 %v10337_v12, %v2282_v27 }
 0x320   : > { %v5498_v16 = vadd.f32 0.041655596, %v5497_v24  ;;  %v5505_v8 = vadd.f32 0.008332121, %v5504_v9  ;;  %v5623_v33 = vshrl.u32 %v5622_v60, 30  ;;  %vm5515_vm7 = vcmp.eq.s32.totalorder %v8305_v14, 0 }
 0x321   : > { %v2286_v62 = vshrl.u32 %v10337_v12, %v8303_v15  ;;  %v2289_v37 = vshrl.u32 %v10338_v42, %v8303_v15  ;;  %v2295_v35 = vshrl.u32 %v10339_v30, %v8303_v15  ;;  %v2291_v57 = vshll.u32 %v10338_v42, %v2282_v27 }
 0x322   : > { %v5499_v43 = vmul.f32 %v5498_v16, %v5496_v25  ;;  %v5506_v34 = vmul.f32 %v5505_v8, %v5496_v25  ;;  %v5624_v46 = vshll.u32 %v5623_v33, 30  ;;  %v2292_v56 = vshrl.u32 %v10345_v38, %v8303_v15 }
 0x323   : > { %v2294_v39 = vshll.u32 %v10345_v38, %v2282_v27  ;;  %v2298_v61 = vshrl.u32 %v10332_v11, %v8303_v15  ;;  %vm5514_vm8 = vcmp.lt.s32.totalorder %v8305_v14, 2  ;;  %vm5511_vm9 = vweird.f32 %v8020_v23 }
 0x324   : > { %v5500_v10 = vadd.f32 -0.4999988, %v5499_v43  ;;  %v5507_v63 = vadd.f32 -0.16666654, %v5506_v34  ;;  %v8324_v51 = vsub.s32 %v5621_v13, %v5624_v46  ;;  %v5647_v29 = vsub.s32 4, %v5623_v33 }
 0x325   : > { %v2287_v17 = vor.u32 %v2286_v62, %v2285_v19  ;;  %v2290_v18 = vor.u32 %v2289_v37, %v2288_v2  ;;  %v2296_v13 = vor.u32 %v2295_v35, %v2294_v39  ;;  %v2297_v9 = vshll.u32 %v10339_v30, %v2282_v27 }
 0x326   : > { %v5501_v41 = vmul.f32 %v5500_v10, %v5496_v25  ;;  %v5508_v26 = vmul.f32 %v5507_v63, %v5496_v25  ;;  %vm5626_vm10 = vcmp.lt.s32.totalorder %v8324_v51, 0  ;;  %v5627_v59 = vsub.s32 0, %v8324_v51 }
 0x327   : > { %v2293_v25 = vor.u32 %v2292_v56, %v2291_v57  ;;  %v2318_v16 = vshrl.u32 %v8297_v55, 16  ;;  %v8341_v8 = vadd.s32 1, %v5900_v32  ;;  %v10381_v46 = vand.u32 2147483647, %v8025_v53 }
 0x328   : > { %v5502_v48 = vadd.f32 1.0, %v5501_v41  ;;  %v5509_v50 = vadd.f32 1.0, %v5508_v26  ;;  %v5628_v24 = vsel %vm5626_vm10, %v5627_v59, %v8324_v51  ;;  %v2299_v62 = vor.u32 %v2298_v61, %v2297_v9 }
 0x329   : > { %v5629_v60 = vclz %v5628_v24  ;;  %vm8345_vm11 = vcmp.le.f32.partialorder %v10381_v46, 0.7853982  ;;  %vm2300_vm12 = vcmp.lt.s32.totalorder %v8314_v49, 1  ;;  %v8352_v27 = vsel %vm5525_vm6, %v5647_v29, %v5623_v33 }
 0x32a   : > { %v5510_v43 = vmul.f32 %v5509_v50, %v5494_v52  ;;  %v5519_v34 = vxor.u32 2147483648, %v5502_v48  ;;  %vm2303_vm14 = vcmp.lt.s32.totalorder %v8314_v49, 4  ;;  %v2308_v52 = vsel %vm2300_vm12, %v2287_v17, %v2290_v18 }
 0x32b   : > { %v5961_v37 = vadd.s32 4294967294, %v5629_v60  ;;  %vm2301_vm13 = vcmp.lt.s32.totalorder %v8314_v49, 2  ;;  %vm2302_vm15 = vcmp.lt.s32.totalorder %v8314_v49, 3  ;;  %v2309_v35 = vsel %vm2303_vm14, %v2296_v13, 920167782 }
 0x32c   : > { %v5516_v32 = vxor.u32 2147483648, %v5510_v43  ;;  %v5520_v10 = vsel %vm5518_vm5, %v5519_v34, %v5510_v43  ;;  %v2310_v33 = vsel %vm2302_vm15, %v2293_v25, %v2309_v35  ;;  %v2312_v63 = vsel %vm2300_vm12, %v2290_v18, %v2293_v25 }
 0x32d   : > { %vm5962_vm0 = vcmp.lt.s32.totalorder %v5961_v37, 0  ;;  %v2311_v56 = vsel %vm2301_vm13, %v2308_v52, %v2310_v33  ;;  %v2313_v39 = vsel %vm2303_vm14, %v2299_v62, 1326507024  ;;  %v2305_v59 = vsel %vm2303_vm14, %v2293_v25, 2102212464 }
 0x32e   : > { %v5517_v2 = vsel %vm5515_vm7, %v5502_v48, %v5516_v32  ;;  %v5632_v57 = vsel %vm5962_vm0, 0, %v5961_v37  ;;  %v2314_v48 = vsel %vm2302_vm15, %v2296_v13, %v2313_v39  ;;  %v2341_v50 = vand.u32 65535, %v2311_v56 }
 0x32f   : > { %v5521_v61 = vsel %vm5514_vm8, %v5517_v2, %v5520_v10  ;;  %v5633_v41 = vsub.s32 32, %v5632_v57  ;;  %v5637_v26 = vsub.s32 4294967266, %v5632_v57  ;;  %v2342_v24 = vshrl.u32 %v2311_v56, 16 }
 0x330   : > { %v5522_v29 = vsel %vm5511_vm9, nan, %v5521_v61  ;;  %v5634_v9 = vshll.u32 %v8324_v51, %v5632_v57  ;;  %v2315_v14 = vsel %vm2301_vm13, %v2312_v63, %v2314_v48  ;;  %v2284_v25 = vshrl.u32 %v10333_v47, %v8303_v15 }
 0x331   : > { %v5635_v60 = vshrl.u32 %v8307_v58, %v5633_v41  ;;  %v5638_v43 = vadd.s32 127, %v5637_v26  ;;  %5708 = vst [vmem:[%s6717_s9 + $0xf0] sm:$0xff] %v5522_v29  ;;  %v2319_v34 = vand.u32 65535, %v2315_v14  ;;  %v2320_v23 = vshrl.u32 %v2315_v14, 16 }
 0x332   : > { %v2344_v46 = vmul.u32 %v2342_v24, %v8310_v54  ;;  %v5650_v51 = vsel %vm8345_vm11, 0, %v8352_v27  ;;  %v2345_v37 = vmul.u32 %v2341_v50, %v2318_v16  ;;  %v2304_v58 = vsel %vm2300_vm12, %v2284_v25, %v2287_v17 }
 0x333   : > { %v5636_v62 = vor.u32 %v5635_v60, %v5634_v9  ;;  %v5639_v13 = vshll.u32 %v5638_v43, 23  ;;  %v2306_v52 = vsel %vm2302_vm15, %v2290_v18, %v2305_v59  ;;  %v2322_v32 = vmul.u32 %v2320_v23, %v8310_v54 }
 0x334   : > { %v2323_v15 = vmul.u32 %v2319_v34, %v2318_v16  ;;  %v2343_v10 = vmul.u32 %v2341_v50, %v8310_v54  ;;  %v2346_v33 = vmul.u32 %v2342_v24, %v2318_v16  ;;  %v2347_v63 = vshll.u32 %v2344_v46, 16 }
 0x335   : > { %v5640_v35 = vor.u32 4788187, %v5639_v13  ;;  %v5643_v2 = vcvt.s32.f32 %v5636_v62  ;;  %v2321_v57 = vmul.u32 %v2319_v34, %v8310_v54  ;;  %v2324_v56 = vmul.u32 %v2320_v23, %v2318_v16 }
 0x336   : > { %v2325_v27 = vshll.u32 %v2322_v32, 16  ;;  %v2327_v61 = vshll.u32 %v2323_v15, 16  ;;  %v2349_v41 = vshll.u32 %v2345_v37, 16  ;;  %vm2351_vm3 = vc.u32 %v2343_v10, %v2347_v63 }
 0x337   : > { %v5641_v39 = vand.u32 2147483647, %v5640_v35  ;;  %v2352_v18 = vsel %vm2351_vm3, 1, %v10343_v36  ;;  %v2353_v26 = vadd.s32 %v2347_v63, %v2343_v10  ;;  %vm2434_vm2 = vcmp.gt.s32.totalorder %v8341_v8, 0 }
 0x338   : > { %vm2329_vm1 = vc.u32 %v2321_v57, %v2325_v27  ;;  %v2331_v17 = vadd.s32 %v2325_v27, %v2321_v57  ;;  %v2354_v48 = vadd.s32 %v2352_v18, %v2346_v33  ;;  %v2348_v54 = vshrl.u32 %v2344_v46, 16 }
 0x339   : > { %v5644_v59 = vmul.f32 %v5643_v2, %v5641_v39  ;;  %v2330_v29 = vsel %vm2329_vm1, 1, %v10343_v36  ;;  %vm2355_vm5 = vc.u32 %v2353_v26, %v2349_v41  ;;  %v2435_v60 = vsel %vm2434_vm2, %v8341_v8, 0 }
 0x33a   : > { %v2332_v50 = vadd.s32 %v2330_v29, %v2324_v56  ;;  %vm2333_vm4 = vc.u32 %v2331_v17, %v2327_v61  ;;  %v2356_v9 = vsel %vm2355_vm5, 1, %v10343_v36  ;;  %v2326_v43 = vshrl.u32 %v2322_v32, 16 }
 0x33b   : > { %v5645_v16 = vxor.u32 2147483648, %v5644_v59  ;;  %v2334_v24 = vsel %vm2333_vm4, 1, %v10343_v36  ;;  %v2358_v25 = vadd.s32 %v2356_v9, %v2354_v48  ;;  %v2437_v34 = vand.u32 31, %v2435_v60 }
 0x33c   : > { %v2336_v14 = vadd.s32 %v2334_v24, %v2332_v50  ;;  %v2307_v62 = vsel %vm2301_vm13, %v2304_v58, %v2306_v52  ;;  %v2328_v13 = vshrl.u32 %v2323_v15, 16  ;;  %v2350_v46 = vshrl.u32 %v2345_v37, 16 }
 0x33d   : > { %v5646_v23 = vsel %vm5525_vm6, %v5645_v16, %v5644_v59  ;;  %v2359_v33 = vadd.s32 %v2358_v25, %v2348_v54  ;;  %v8412_v63 = vsub.s32 32, %v2437_v34  ;;  %v8416_v8 = vmul.f32 %v7657_v31, %v6390_v6 }
 0x33e   : > { %v5649_v35 = vsel %vm8345_vm11, %v8025_v53, %v5646_v23  ;;  %v2337_v10 = vadd.s32 %v2336_v14, %v2326_v43  ;;  %v5667_v2 = vadd.s32 3, %v5650_v51  ;;  %v2430_v49 = vand.u32 8388607, %v2423_v0 }
 0x33f   : > { %v5651_v32 = vmul.f32 %v5649_v35, %v5649_v35  ;;  %v8422_v37 = vadd.s32 %v2353_v26, %v2349_v41  ;;  %v2360_v52 = vadd.s32 %v2359_v33, %v2350_v46  ;;  %v2361_v19 = vmul.u32 %v8297_v55, %v2307_v62 }
 0x340   : > { %v8420_v58 = vadd.s32 %v2337_v10, %v2328_v13  ;;  %v8425_v56 = vshrl.u32 %v2435_v60, 5  ;;  %v2443_v27 = vshll.u32 %v10337_v12, %v2437_v34  ;;  %v2444_v39 = vshrl.u32 %v10338_v42, %v8412_v63 }
 0x341   : > { %v5652_v15 = vmul.f32 -0.001358992, %v5651_v32  ;;  %v5659_v57 = vmul.f32 -0.00019511016, %v5651_v32  ;;  %v2364_v51 = vadd.s32 1, %v2360_v52  ;;  %v2447_v61 = vshrl.u32 %v10345_v38, %v8412_v63 }
 0x342   : > { %vm2363_vm6 = vc.u32 %v8420_v58, %v8422_v37  ;;  %v2441_v55 = vshrl.u32 %v10337_v12, %v8412_v63  ;;  %v2446_v18 = vshll.u32 %v10338_v42, %v2437_v34  ;;  %v2449_v59 = vshll.u32 %v10345_v38, %v2437_v34 }
 0x343   : > { %v5653_v41 = vadd.f32 0.041655596, %v5652_v15  ;;  %v5660_v17 = vadd.f32 0.008332121, %v5659_v57  ;;  %v2365_v26 = vsel %vm2363_vm6, %v2364_v51, %v2360_v52  ;;  %v2450_v29 = vshrl.u32 %v10339_v30, %v8412_v63 }
 0x344   : > { %v2452_v48 = vshll.u32 %v10339_v30, %v2437_v34  ;;  %v2366_v16 = vadd.s32 %v2365_v26, %v2361_v19  ;;  %v2453_v24 = vshrl.u32 %v10332_v11, %v8412_v63  ;;  %v2440_v9 = vshll.u32 %v10333_v47, %v2437_v34 }
 0x345   : > { %v5654_v50 = vmul.f32 %v5653_v41, %v5651_v32  ;;  %v5661_v54 = vmul.f32 %v5660_v17, %v5651_v32  ;;  %v8444_v60 = vor.u32 %v2444_v39, %v2443_v27  ;;  %v2448_v43 = vor.u32 %v2447_v61, %v2446_v18 }
 0x346   : > { %v2451_v14 = vor.u32 %v2450_v29, %v2449_v59  ;;  %v2367_v62 = vadd.s32 536870912, %v2366_v16  ;;  %v2454_v13 = vor.u32 %v2453_v24, %v2452_v48  ;;  %v8448_v46 = vmul.f32 %v7657_v31, %v6392_v7 }
 0x347   : > { %v5655_v25 = vadd.f32 -0.4999988, %v5654_v50  ;;  %v5662_v23 = vadd.f32 -0.16666654, %v5661_v54  ;;  %v5668_v10 = vand.u32 3, %v5667_v2  ;;  %v2431_v33 = vor.u32 8388608, %v2430_v49  ;;  %v8481_v50 = vpop.permute.xlu0 %628 }
 0x348   : > { %v8450_v52 = vor.u32 %v2441_v55, %v2440_v9  ;;  %v8452_v57 = vshrl.u32 %v2367_v62, 30  ;;  %vm2458_vm7 = vcmp.lt.s32.totalorder %v8425_v56, 4  ;;  %vm2455_vm8 = vcmp.lt.s32.totalorder %v8425_v56, 1 }
 0x349   : > { %v5656_v19 = vmul.f32 %v5655_v25, %v5651_v32  ;;  %v5663_v15 = vmul.f32 %v5662_v23, %v5651_v32  ;;  %vm2457_vm10 = vcmp.lt.s32.totalorder %v8425_v56, 3  ;;  %v2464_v34 = vsel %vm2458_vm7, %v2451_v14, 920167782 }
 0x34a   : > { %v2468_v31 = vsel %vm2458_vm7, %v2454_v13, 1326507024  ;;  %v2369_v27 = vshll.u32 %v8452_v57, 30  ;;  %v2467_v32 = vsel %vm2455_vm8, %v8444_v60, %v2448_v43  ;;  %v2463_v51 = vsel %vm2455_vm8, %v8450_v52, %v8444_v60 }
 0x34b   : > { %v5657_v2 = vadd.f32 1.0, %v5656_v19  ;;  %v5664_v49 = vadd.f32 1.0, %v5663_v15  ;;  %v2465_v39 = vsel %vm2457_vm10, %v2448_v43, %v2464_v34  ;;  %v2469_v61 = vsel %vm2457_vm10, %v2451_v14, %v2468_v31 }
 0x34c   : > { %v8473_v41 = vshll.u32 %v2431_v33, 8  ;;  %v2370_v18 = vsub.s32 %v2366_v16, %v2369_v27  ;;  %vm2456_vm9 = vcmp.lt.s32.totalorder %v8425_v56, 2  ;;  %vm5666_vm11 = vweird.f32 %v8025_v53 }
 0x34d   : > { %v5665_v17 = vmul.f32 %v5664_v49, %v5649_v35  ;;  %v5674_v55 = vxor.u32 2147483648, %v5657_v2  ;;  %vm5669_vm12 = vcmp.lt.s32.totalorder %v5668_v10, 2  ;;  %vm5670_vm14 = vcmp.eq.s32.totalorder %v5668_v10, 0 }
 0x34e   : > { %v2470_v26 = vsel %vm2456_vm9, %v2467_v32, %v2469_v61  ;;  %vm2371_vm13 = vcmp.lt.s32.totalorder %v2370_v18, 0  ;;  %v2372_v29 = vsub.s32 0, %v2370_v18  ;;  %v2466_v48 = vsel %vm2456_vm9, %v2463_v51, %v2465_v39 }
 0x34f   : > { %v5671_v59 = vxor.u32 2147483648, %v5665_v17  ;;  %vm5673_vm15 = vcmp.eq.s32.totalorder %v5668_v10, 2  ;;  %v2472_v35 = vand.u32 65535, %v8473_v41  ;;  %v2474_v54 = vand.u32 65535, %v2470_v26 }
 0x350   : > { %v2475_v16 = vshrl.u32 %v2470_v26, 16  ;;  %v5675_v9 = vsel %vm5673_vm15, %v5674_v55, %v5665_v17  ;;  %v2373_v14 = vsel %vm2371_vm13, %v2372_v29, %v2370_v18  ;;  %v2473_v25 = vshrl.u32 %v8473_v41, 16 }
 0x351   : > { %v5672_v24 = vsel %vm5670_vm14, %v5657_v2, %v5671_v59  ;;  %v2374_v62 = vclz %v2373_v14  ;;  %v2497_v13 = vshrl.u32 %v2466_v48, 16  ;;  %v8488_v33 = vadd.f32 %v8481_v50, %v8264_v20 }
 0x352   : > { %v5676_v23 = vsel %vm5669_vm12, %v5672_v24, %v5675_v9  ;;  %v2477_v15 = vmul.u32 %v2475_v16, %v2472_v35  ;;  %v2478_v34 = vmul.u32 %v2474_v54, %v2473_v25  ;;  %v2496_v31 = vand.u32 65535, %v2466_v48 }
 0x353   : > { %v5677_v19 = vsel %vm5666_vm11, nan, %v5676_v23  ;;  %v2362_v2 = vadd.s32 %v8422_v37, %v8420_v58  ;;  %v5898_v49 = vadd.s32 4294967294, %v2374_v62  ;;  %v2439_v10 = vshrl.u32 %v10333_v47, %v8412_v63 }
 0x354   : > { %5709 = vst [vmem:[%s6717_s9 + $0xf8] sm:$0xff] %v5677_v19  ;;  %v2460_v27 = vsel %vm2458_vm7, %v2448_v43, 2102212464  ;;  %v2392_v20 = vsub.s32 4, %v8452_v57  ;;  %v2476_v32 = vmul.u32 %v2474_v54, %v2472_v35  ;;  %v2479_v51 = vmul.u32 %v2475_v16, %v2473_v25 }
 0x355   : > { %v2480_v53 = vshll.u32 %v2477_v15, 16  ;;  %vm2270_vm0 = vcmp.lt.s32.totalorder %v8257_v44, 0  ;;  %vm5899_vm3 = vcmp.lt.s32.totalorder %v5898_v49, 0  ;;  %v2481_v39 = vshrl.u32 %v2477_v15, 16 }
 0x356   : > { %v2482_v61 = vshll.u32 %v2478_v34, 16  ;;  %v2499_v17 = vmul.u32 %v2497_v13, %v2472_v35  ;;  %v2377_v55 = vsel %vm5899_vm3, 0, %v5898_v49  ;;  %v2500_v37 = vmul.u32 %v2496_v31, %v2473_v25 }
 0x357   : > { %vm2484_vm1 = vc.u32 %v2476_v32, %v2480_v53  ;;  %v2486_v58 = vadd.s32 %v2480_v53, %v2476_v32  ;;  %v2378_v26 = vsub.s32 32, %v2377_v55  ;;  %v2382_v63 = vsub.s32 4294967266, %v2377_v55 }
 0x358   : > { %v2485_v59 = vsel %vm2484_vm1, 1, %v10343_v36  ;;  %v2498_v43 = vmul.u32 %v2496_v31, %v2472_v35  ;;  %v2501_v48 = vmul.u32 %v2497_v13, %v2473_v25  ;;  %v2502_v54 = vshll.u32 %v2499_v17, 16 }
 0x359   : > { %v2487_v29 = vadd.s32 %v2485_v59, %v2479_v51  ;;  %vm2488_vm2 = vc.u32 %v2486_v58, %v2482_v61  ;;  %v2379_v16 = vshll.u32 %v2370_v18, %v2377_v55  ;;  %v2380_v24 = vshrl.u32 %v2362_v2, %v2378_v26 }
 0x35a   : > { %v2383_v9 = vadd.s32 127, %v2382_v63  ;;  %v2489_v14 = vsel %vm2488_vm2, 1, %v10343_v36  ;;  %v2504_v62 = vshll.u32 %v2500_v37, 16  ;;  %vm2506_vm4 = vc.u32 %v2498_v43, %v2502_v54 }
 0x35b   : > { %v2491_v23 = vadd.s32 %v2489_v14, %v2487_v29  ;;  %v2508_v19 = vadd.s32 %v2502_v54, %v2498_v43  ;;  %v2381_v15 = vor.u32 %v2380_v24, %v2379_v16  ;;  %v2459_v32 = vsel %vm2455_vm8, %v2439_v10, %v8450_v52 }
 0x35c   : > { %v2384_v49 = vshll.u32 %v2383_v9, 23  ;;  %v2507_v35 = vsel %vm2506_vm4, 1, %v10343_v36  ;;  %v1958_v18 = vand.u32 2147483647, %v8488_v33  ;;  %v2461_v2 = vsel %vm2457_vm10, %v8444_v60, %v2460_v27 }
 0x35d   : > { %v2492_v31 = vadd.s32 %v2491_v23, %v2481_v39  ;;  %v2509_v25 = vadd.s32 %v2507_v35, %v2501_v48  ;;  %vm2510_vm5 = vc.u32 %v2508_v19, %v2504_v62  ;;  %v2483_v51 = vshrl.u32 %v2478_v34, 16 }
 0x35e   : > { %v2385_v13 = vor.u32 4788187, %v2384_v49  ;;  %v2511_v53 = vsel %vm2510_vm5, 1, %v10343_v36  ;;  %v2393_v61 = vsel %vm2270_vm0, %v2392_v20, %v8452_v57  ;;  %v2503_v52 = vshrl.u32 %v2499_v17, 16 }
 0x35f   : > { %v2513_v10 = vadd.s32 %v2511_v53, %v2509_v25  ;;  %v1961_v39 = vand.u32 2139095040, %v8488_v33  ;;  %v2388_v58 = vcvt.s32.f32 %v2381_v15  ;;  %v2493_v26 = vadd.s32 %v2492_v31, %v2483_v51 }
 0x360   : > { %v2386_v55 = vand.u32 2147483647, %v2385_v13  ;;  %v8518_v63 = vadd.f32 %v8481_v50, %v8286_v22  ;;  %v2505_v59 = vshrl.u32 %v2500_v37, 16  ;;  %v1965_v27 = vand.u32 8388607, %v1958_v18  ;;  %v10386_v13 = vld [vmem:[#allocation7_spill] sm:$0xff] }
 0x361   : > { %v2514_v60 = vadd.s32 %v2513_v10, %v2503_v52  ;;  %v1962_v34 = vshrl.u32 %v1961_v39, 23  ;;  %v410_v57 = vmul.f32 %v6338_v45, %v6388_v5  ;;  %vm8526_vm6 = vcmp.le.f32.partialorder %v2268_v1, 0.7853982 }
 0x362   : > { %v2389_v17 = vmul.f32 %v2388_v58, %v2386_v55  ;;  %v2512_v43 = vadd.s32 %v2508_v19, %v2504_v62  ;;  %v2395_v22 = vsel %vm8526_vm6, 0, %v2393_v61  ;;  %v2462_v50 = vsel %vm2456_vm9, %v2459_v32, %v2461_v2 }
 0x363   : > { %v2515_v37 = vadd.s32 %v2514_v60, %v2505_v59  ;;  %v5891_v29 = vadd.s32 4294967169, %v1962_v34  ;;  %v8536_v45 = vadd.f32 %v8416_v8, %v8301_v21  ;;  %v8539_v1 = vadd.f32 %v8448_v46, %v410_v57 }
 0x364   : > { %v2390_v48 = vxor.u32 2147483648, %v2389_v17  ;;  %vm2518_vm7 = vc.u32 %v2493_v26, %v2512_v43  ;;  %v1966_v16 = vor.u32 8388608, %v1965_v27  ;;  %v2116_v9 = vand.u32 2139095040, %v8518_v63 }
 0x365   : > { %v2519_v54 = vadd.s32 1, %v2515_v37  ;;  %v1968_v24 = vadd.s32 1, %v5891_v29  ;;  %v2516_v14 = vmul.u32 %v8473_v41, %v2462_v50  ;;  %v2412_v8 = vadd.s32 3, %v2395_v22 }
 0x366   : > { %v2391_v56 = vsel %vm2270_vm0, %v2390_v48, %v2389_v17  ;;  %v8548_v49 = vshll.u32 %v1966_v16, 8  ;;  %v2117_v32 = vshrl.u32 %v2116_v9, 23  ;;  %v8552_v41 = vmul.f32 %v10386_v13, %v6386_v4 }
 0x367   : > { %v2394_v23 = vsel %vm8526_vm6, %v8257_v44, %v2391_v56  ;;  %v2520_v62 = vsel %vm2518_vm7, %v2519_v54, %v2515_v37  ;;  %vm1969_vm8 = vcmp.gt.s32.totalorder %v1968_v24, 0  ;;  %v8556_v61 = vand.u32 3, %v2412_v8 }
 0x368   : > { %v2396_v21 = vmul.f32 %v2394_v23, %v2394_v23  ;;  %v2521_v46 = vadd.s32 %v2520_v62, %v2516_v14  ;;  %v1970_v19 = vsel %vm1969_vm8, %v1968_v24, 0  ;;  %v8558_v10 = vadd.s32 %v2512_v43, %v2493_v26 }
 0x369   : > { %v1972_v15 = vand.u32 31, %v1970_v19  ;;  %v8561_v39 = vand.u32 65535, %v8548_v49  ;;  %v2113_v55 = vand.u32 2147483647, %v8518_v63  ;;  %v5894_v58 = vadd.s32 4294967169, %v2117_v32 }
 0x36a   : > { %v2397_v35 = vmul.f32 -0.001358992, %v2396_v21  ;;  %v2404_v31 = vmul.f32 -0.00019511016, %v2396_v21  ;;  %v2522_v25 = vadd.s32 536870912, %v2521_v46  ;;  %vm2425_vm10 = vcmp.lt.s32.totalorder %v8272_v28, 0 }
 0x36b   : > { %v8554_v2 = vsub.s32 32, %v1972_v15  ;;  %v8565_v27 = vshrl.u32 %v1970_v19, 5  ;;  %v1975_v57 = vshll.u32 %v10333_v47, %v1972_v15  ;;  %vm2418_vm9 = vcmp.eq.s32.totalorder %v8556_v61, 2 }
 0x36c   : > { %v2398_v51 = vadd.f32 0.041655596, %v2397_v35  ;;  %v2405_v53 = vadd.f32 0.008332121, %v2404_v31  ;;  %v2523_v52 = vshrl.u32 %v2522_v25, 30  ;;  %v1978_v37 = vshll.u32 %v10337_v12, %v1972_v15 }
 0x36d   : > { %v1976_v20 = vshrl.u32 %v10337_v12, %v8554_v2  ;;  %v1979_v26 = vshrl.u32 %v10338_v42, %v8554_v2  ;;  %v1985_v17 = vshrl.u32 %v10339_v30, %v8554_v2  ;;  %vm2415_vm11 = vcmp.eq.s32.totalorder %v8556_v61, 0 }
 0x36e   : > { %v2399_v59 = vmul.f32 %v2398_v51, %v2396_v21  ;;  %v2406_v60 = vmul.f32 %v2405_v53, %v2396_v21  ;;  %v2524_v34 = vshll.u32 %v2523_v52, 30  ;;  %v1981_v29 = vshll.u32 %v10338_v42, %v1972_v15 }
 0x36f   : > { %v1982_v48 = vshrl.u32 %v10345_v38, %v8554_v2  ;;  %v1984_v54 = vshll.u32 %v10345_v38, %v1972_v15  ;;  %v1988_v16 = vshrl.u32 %v10332_v11, %v8554_v2  ;;  %vm2414_vm12 = vcmp.lt.s32.totalorder %v8556_v61, 2 }
 0x370   : > { %v2400_v43 = vadd.f32 -0.4999988, %v2399_v59  ;;  %v2407_v22 = vadd.f32 -0.16666654, %v2406_v60  ;;  %v8575_v50 = vsub.s32 %v2521_v46, %v2524_v34  ;;  %vm2411_vm13 = vweird.f32 %v8257_v44 }
 0x371   : > { %v2547_v14 = vsub.s32 4, %v2523_v52  ;;  %v1977_v62 = vor.u32 %v1976_v20, %v1975_v57  ;;  %v1980_v8 = vor.u32 %v1979_v26, %v1978_v37  ;;  %v1986_v46 = vor.u32 %v1985_v17, %v1984_v54 }
 0x372   : > { %v2401_v24 = vmul.f32 %v2400_v43, %v2396_v21  ;;  %v2408_v9 = vmul.f32 %v2407_v22, %v2396_v21  ;;  %vm2526_vm14 = vcmp.lt.s32.totalorder %v8575_v50, 0  ;;  %v2527_v56 = vsub.s32 0, %v8575_v50 }
 0x373   : > { %v1987_v31 = vshll.u32 %v10339_v30, %v1972_v15  ;;  %v1983_v21 = vor.u32 %v1982_v48, %v1981_v29  ;;  %v2008_v51 = vshrl.u32 %v8548_v49, 16  ;;  %v8592_v53 = vadd.s32 1, %v5894_v58 }
 0x374   : > { %v2402_v19 = vadd.f32 1.0, %v2401_v24  ;;  %v2409_v32 = vadd.f32 1.0, %v2408_v9  ;;  %v2528_v35 = vsel %vm2526_vm14, %v2527_v56, %v8575_v50  ;;  %vm8596_vm15 = vcmp.le.f32.partialorder %v2423_v0, 0.7853982 }
 0x375   : > { %v2529_v25 = vclz %v2528_v35  ;;  %v1989_v57 = vor.u32 %v1988_v16, %v1987_v31  ;;  %vm1990_vm0 = vcmp.lt.s32.totalorder %v8565_v27, 1  ;;  %v8603_v15 = vsel %vm2425_vm10, %v2547_v14, %v2523_v52 }
 0x376   : > { %v2410_v59 = vmul.f32 %v2409_v32, %v2394_v23  ;;  %v2419_v60 = vxor.u32 2147483648, %v2402_v19  ;;  %vm1993_vm3 = vcmp.lt.s32.totalorder %v8565_v27, 4  ;;  %v1998_v23 = vsel %vm1990_vm0, %v1977_v62, %v1980_v8 }
 0x377   : > { %v5901_v20 = vadd.s32 4294967294, %v2529_v25  ;;  %vm1991_vm1 = vcmp.lt.s32.totalorder %v8565_v27, 2  ;;  %vm1992_vm2 = vcmp.lt.s32.totalorder %v8565_v27, 3  ;;  %v1999_v0 = vsel %vm1993_vm3, %v1986_v46, 920167782 }
 0x378   : > { %v2416_v58 = vxor.u32 2147483648, %v2410_v59  ;;  %v2420_v26 = vsel %vm2418_vm9, %v2419_v60, %v2410_v59  ;;  %v2000_v52 = vsel %vm1992_vm2, %v1983_v21, %v1999_v0  ;;  %v2002_v17 = vsel %vm1990_vm0, %v1980_v8, %v1983_v21 }
 0x379   : > { %vm5902_vm4 = vcmp.lt.s32.totalorder %v5901_v20, 0  ;;  %v2001_v37 = vsel %vm1991_vm1, %v1998_v23, %v2000_v52  ;;  %v2003_v29 = vsel %vm1993_vm3, %v1989_v57, 1326507024  ;;  %v1995_v24 = vsel %vm1993_vm3, %v1983_v21, 2102212464 }
 0x37a   : > { %v2417_v43 = vsel %vm2415_vm11, %v2402_v19, %v2416_v58  ;;  %v2532_v22 = vsel %vm5902_vm4, 0, %v5901_v20  ;;  %v2004_v56 = vsel %vm1992_vm2, %v1986_v46, %v2003_v29  ;;  %v2031_v14 = vand.u32 65535, %v2001_v37 }
 0x37b   : > { %v2421_v48 = vsel %vm2414_vm12, %v2417_v43, %v2420_v26  ;;  %v2533_v54 = vsub.s32 32, %v2532_v22  ;;  %v2537_v16 = vsub.s32 4294967266, %v2532_v22  ;;  %v2032_v19 = vshrl.u32 %v2001_v37, 16 }
 0x37c   : > { %v2422_v9 = vsel %vm2411_vm13, nan, %v2421_v48  ;;  %v2534_v32 = vshll.u32 %v8575_v50, %v2532_v22  ;;  %v2005_v61 = vsel %vm1991_vm1, %v2002_v17, %v2004_v56  ;;  %v1974_v25 = vshrl.u32 %v10333_v47, %v8554_v2 }
 0x37d   : > { %v2535_v35 = vshrl.u32 %v8558_v10, %v2533_v54  ;;  %v2538_v31 = vadd.s32 127, %v2537_v16  ;;  %5688 = vst [vmem:[%s6717_s9 + $0x50] sm:$0xff] %v2422_v9  ;;  %v2009_v21 = vand.u32 65535, %v2005_v61  ;;  %v2010_v44 = vshrl.u32 %v2005_v61, 16 }
 0x37e   : > { %v2034_v59 = vmul.u32 %v2032_v19, %v8561_v39  ;;  %v2550_v50 = vsel %vm8596_vm15, 0, %v8603_v15  ;;  %v2035_v57 = vmul.u32 %v2031_v14, %v2008_v51  ;;  %v1994_v10 = vsel %vm1990_vm0, %v1974_v25, %v1977_v62 }
 0x37f   : > { %v2536_v60 = vor.u32 %v2535_v35, %v2534_v32  ;;  %v2539_v46 = vshll.u32 %v2538_v31, 23  ;;  %v1996_v20 = vsel %vm1992_vm2, %v1980_v8, %v1995_v24  ;;  %v2012_v23 = vmul.u32 %v2010_v44, %v8561_v39 }
 0x380   : > { %v2013_v2 = vmul.u32 %v2009_v21, %v2008_v51  ;;  %v2033_v0 = vmul.u32 %v2031_v14, %v8561_v39  ;;  %v2036_v26 = vmul.u32 %v2032_v19, %v2008_v51  ;;  %v2037_v52 = vshll.u32 %v2034_v59, 16 }
 0x381   : > { %v2540_v58 = vor.u32 4788187, %v2539_v46  ;;  %v2543_v17 = vcvt.s32.f32 %v2536_v60  ;;  %v2011_v43 = vmul.u32 %v2009_v21, %v8561_v39  ;;  %v2014_v22 = vmul.u32 %v2010_v44, %v2008_v51 }
 0x382   : > { %v2015_v15 = vshll.u32 %v2012_v23, 16  ;;  %v2017_v29 = vshll.u32 %v2013_v2, 16  ;;  %v2039_v48 = vshll.u32 %v2035_v57, 16  ;;  %vm2041_vm5 = vc.u32 %v2033_v0, %v2037_v52 }
 0x383   : > { %v2541_v37 = vand.u32 2147483647, %v2540_v58  ;;  %v2042_v8 = vsel %vm2041_vm5, 1, %v10343_v36  ;;  %v2043_v54 = vadd.s32 %v2037_v52, %v2033_v0  ;;  %vm2124_vm7 = vcmp.gt.s32.totalorder %v8592_v53, 0 }
 0x384   : > { %vm2019_vm6 = vc.u32 %v2011_v43, %v2015_v15  ;;  %v2021_v62 = vadd.s32 %v2015_v15, %v2011_v43  ;;  %v2044_v9 = vadd.s32 %v2042_v8, %v2036_v26  ;;  %v2038_v39 = vshrl.u32 %v2034_v59, 16 }
 0x385   : > { %v2544_v16 = vmul.f32 %v2543_v17, %v2541_v37  ;;  %v2020_v24 = vsel %vm2019_vm6, 1, %v10343_v36  ;;  %vm2045_vm9 = vc.u32 %v2043_v54, %v2039_v48  ;;  %v2125_v32 = vsel %vm2124_vm7, %v8592_v53, 0  ;;  %v10389_v53 = vld [vmem:[#allocation9_spill] sm:$0xff] }
 0x386   : > { %v2022_v56 = vadd.s32 %v2020_v24, %v2014_v22  ;;  %vm2023_vm8 = vc.u32 %v2021_v62, %v2017_v29  ;;  %v2046_v19 = vsel %vm2045_vm9, 1, %v10343_v36  ;;  %v2016_v35 = vshrl.u32 %v2012_v23, 16 }
 0x387   : > { %v2545_v51 = vxor.u32 2147483648, %v2544_v16  ;;  %v2024_v14 = vsel %vm2023_vm8, 1, %v10343_v36  ;;  %v2048_v61 = vadd.s32 %v2046_v19, %v2044_v9  ;;  %v2127_v25 = vand.u32 31, %v2125_v32 }
 0x388   : > { %v2026_v31 = vadd.s32 %v2024_v14, %v2022_v56  ;;  %v1997_v44 = vsel %vm1991_vm1, %v1994_v10, %v1996_v20  ;;  %v2018_v60 = vshrl.u32 %v2013_v2, 16  ;;  %v2040_v59 = vshrl.u32 %v2035_v57, 16 }
 0x389   : > { %v2546_v21 = vsel %vm2425_vm10, %v2545_v51, %v2544_v16  ;;  %v2049_v0 = vadd.s32 %v2048_v61, %v2038_v39  ;;  %v8663_v26 = vsub.s32 32, %v2127_v25  ;;  %v8667_v23 = vmul.f32 %v10389_v53, %v6390_v6 }
 0x38a   : > { %v2549_v46 = vsel %vm8596_vm15, %v8272_v28, %v2546_v21  ;;  %v2027_v58 = vadd.s32 %v2026_v31, %v2016_v35  ;;  %v2567_v17 = vadd.s32 3, %v2550_v50  ;;  %v2120_v27 = vand.u32 8388607, %v2113_v55 }
 0x38b   : > { %v2551_v52 = vmul.f32 %v2549_v46, %v2549_v46  ;;  %v8673_v57 = vadd.s32 %v2043_v54, %v2039_v48  ;;  %v2050_v20 = vadd.s32 %v2049_v0, %v2040_v59  ;;  %v2051_v34 = vmul.u32 %v8548_v49, %v1997_v44 }
 0x38c   : > { %v8671_v10 = vadd.s32 %v2027_v58, %v2018_v60  ;;  %v8676_v22 = vshrl.u32 %v2125_v32, 5  ;;  %v2133_v15 = vshll.u32 %v10337_v12, %v2127_v25  ;;  %v2134_v37 = vshrl.u32 %v10338_v42, %v8663_v26 }
 0x38d   : > { %v2552_v2 = vmul.f32 -0.001358992, %v2551_v52  ;;  %v2559_v43 = vmul.f32 -0.00019511016, %v2551_v52  ;;  %v2054_v50 = vadd.s32 1, %v2050_v20  ;;  %v2137_v29 = vshrl.u32 %v10345_v38, %v8663_v26 }
 0x38e   : > { %vm2053_vm10 = vc.u32 %v8671_v10, %v8673_v57  ;;  %v2131_v49 = vshrl.u32 %v10337_v12, %v8663_v26  ;;  %v2136_v8 = vshll.u32 %v10338_v42, %v2127_v25  ;;  %v2139_v16 = vshll.u32 %v10345_v38, %v2127_v25 }
 0x38f   : > { %v2553_v48 = vadd.f32 0.041655596, %v2552_v2  ;;  %v2560_v62 = vadd.f32 0.008332121, %v2559_v43  ;;  %v2055_v54 = vsel %vm2053_vm10, %v2054_v50, %v2050_v20  ;;  %v2140_v24 = vshrl.u32 %v10339_v30, %v8663_v26 }
 0x390   : > { %v2142_v9 = vshll.u32 %v10339_v30, %v2127_v25  ;;  %v2056_v51 = vadd.s32 %v2055_v54, %v2051_v34  ;;  %v2143_v14 = vshrl.u32 %v10332_v11, %v8663_v26  ;;  %v2130_v19 = vshll.u32 %v10333_v47, %v2127_v25 }
 0x391   : > { %v2554_v56 = vmul.f32 %v2553_v48, %v2551_v52  ;;  %v2561_v39 = vmul.f32 %v2560_v62, %v2551_v52  ;;  %v8695_v32 = vor.u32 %v2134_v37, %v2133_v15  ;;  %v2138_v35 = vor.u32 %v2137_v29, %v2136_v8 }
 0x392   : > { %v2141_v31 = vor.u32 %v2140_v24, %v2139_v16  ;;  %v2057_v44 = vadd.s32 536870912, %v2056_v51  ;;  %v2144_v60 = vor.u32 %v2143_v14, %v2142_v9  ;;  %v8699_v59 = vmul.f32 %v10389_v53, %v6392_v7 }
 0x393   : > { %v2555_v61 = vadd.f32 -0.4999988, %v2554_v56  ;;  %v2562_v21 = vadd.f32 -0.16666654, %v2561_v39  ;;  %v2568_v58 = vand.u32 3, %v2567_v17  ;;  %v2121_v0 = vor.u32 8388608, %v2120_v27  ;;  %v8732_v56 = vpop.permute.xlu1 %648 }
 0x394   : > { %v8701_v20 = vor.u32 %v2131_v49, %v2130_v19  ;;  %v8703_v43 = vshrl.u32 %v2057_v44, 30  ;;  %vm2148_vm11 = vcmp.lt.s32.totalorder %v8676_v22, 4  ;;  %vm2145_vm12 = vcmp.lt.s32.totalorder %v8676_v22, 1 }
 0x395   : > { %v2556_v34 = vmul.f32 %v2555_v61, %v2551_v52  ;;  %v2563_v2 = vmul.f32 %v2562_v21, %v2551_v52  ;;  %vm2147_vm14 = vcmp.lt.s32.totalorder %v8676_v22, 3  ;;  %v2154_v25 = vsel %vm2148_vm11, %v2141_v31, 920167782 }
 0x396   : > { %v2158_v53 = vsel %vm2148_vm11, %v2144_v60, 1326507024  ;;  %v2059_v15 = vshll.u32 %v8703_v43, 30  ;;  %v2157_v52 = vsel %vm2145_vm12, %v8695_v32, %v2138_v35  ;;  %v2153_v50 = vsel %vm2145_vm12, %v8701_v20, %v8695_v32 }
 0x397   : > { %v2557_v17 = vadd.f32 1.0, %v2556_v34  ;;  %v2564_v27 = vadd.f32 1.0, %v2563_v2  ;;  %v2155_v37 = vsel %vm2147_vm14, %v2138_v35, %v2154_v25  ;;  %v2159_v29 = vsel %vm2147_vm14, %v2141_v31, %v2158_v53 }
 0x398   : > { %v8724_v48 = vshll.u32 %v2121_v0, 8  ;;  %v2060_v8 = vsub.s32 %v2056_v51, %v2059_v15  ;;  %vm2146_vm13 = vcmp.lt.s32.totalorder %v8676_v22, 2  ;;  %vm2566_vm15 = vweird.f32 %v8272_v28 }
 0x399   : > { %v2565_v62 = vmul.f32 %v2564_v27, %v2549_v46  ;;  %v2574_v49 = vxor.u32 2147483648, %v2557_v17  ;;  %vm2569_vm0 = vcmp.lt.s32.totalorder %v2568_v58, 2  ;;  %vm2570_vm3 = vcmp.eq.s32.totalorder %v2568_v58, 0 }
 0x39a   : > { %v2160_v54 = vsel %vm2146_vm13, %v2157_v52, %v2159_v29  ;;  %vm2061_vm1 = vcmp.lt.s32.totalorder %v2060_v8, 0  ;;  %v2062_v24 = vsub.s32 0, %v2060_v8  ;;  %v2156_v9 = vsel %vm2146_vm13, %v2153_v50, %v2155_v37 }
 0x39b   : > { %v2571_v16 = vxor.u32 2147483648, %v2565_v62  ;;  %vm2573_vm2 = vcmp.eq.s32.totalorder %v2568_v58, 2  ;;  %v2162_v46 = vand.u32 65535, %v8724_v48  ;;  %v2164_v39 = vand.u32 65535, %v2160_v54 }
 0x39c   : > { %v2165_v51 = vshrl.u32 %v2160_v54, 16  ;;  %v2575_v19 = vsel %vm2573_vm2, %v2574_v49, %v2565_v62  ;;  %v2063_v31 = vsel %vm2061_vm1, %v2062_v24, %v2060_v8  ;;  %v2163_v61 = vshrl.u32 %v8724_v48, 16 }
 0x39d   : > { %v2572_v14 = vsel %vm2570_vm3, %v2557_v17, %v2571_v16  ;;  %v2064_v44 = vclz %v2063_v31  ;;  %v2187_v60 = vshrl.u32 %v2156_v9, 16  ;;  %v8739_v0 = vadd.f32 %v8732_v56, %v8536_v45 }
 0x39e   : > { %v2576_v21 = vsel %vm2569_vm0, %v2572_v14, %v2575_v19  ;;  %v2167_v2 = vmul.u32 %v2165_v51, %v2162_v46  ;;  %v2168_v25 = vmul.u32 %v2164_v39, %v2163_v61  ;;  %v2186_v53 = vand.u32 65535, %v2156_v9 }
 0x39f   : > { %v2577_v34 = vsel %vm2566_vm15, nan, %v2576_v21  ;;  %v2052_v17 = vadd.s32 %v8673_v57, %v8671_v10  ;;  %v5892_v27 = vadd.s32 4294967294, %v2064_v44  ;;  %v2129_v58 = vshrl.u32 %v10333_v47, %v8663_v26 }
 0x3a0   : > { %5689 = vst [vmem:[%s6717_s9 + $0x58] sm:$0xff] %v2577_v34  ;;  %v2150_v15 = vsel %vm2148_vm11, %v2138_v35, 2102212464  ;;  %v2082_v45 = vsub.s32 4, %v8703_v43  ;;  %v2166_v52 = vmul.u32 %v2164_v39, %v2162_v46  ;;  %v2169_v50 = vmul.u32 %v2165_v51, %v2163_v61 }
 0x3a1   : > { %v2170_v28 = vshll.u32 %v2167_v2, 16  ;;  %vm1960_vm4 = vcmp.lt.s32.totalorder %v8488_v33, 0  ;;  %vm5893_vm5 = vcmp.lt.s32.totalorder %v5892_v27, 0  ;;  %v2171_v37 = vshrl.u32 %v2167_v2, 16 }
 0x3a2   : > { %v2172_v29 = vshll.u32 %v2168_v25, 16  ;;  %v2189_v62 = vmul.u32 %v2187_v60, %v2162_v46  ;;  %v2067_v49 = vsel %vm5893_vm5, 0, %v5892_v27  ;;  %v2190_v57 = vmul.u32 %v2186_v53, %v2163_v61 }
 0x3a3   : > { %vm2174_vm6 = vc.u32 %v2166_v52, %v2170_v28  ;;  %v2176_v10 = vadd.s32 %v2170_v28, %v2166_v52  ;;  %v2068_v54 = vsub.s32 32, %v2067_v49  ;;  %v2072_v26 = vsub.s32 4294967266, %v2067_v49 }
 0x3a4   : > { %v2175_v16 = vsel %vm2174_vm6, 1, %v10343_v36  ;;  %v2188_v35 = vmul.u32 %v2186_v53, %v2162_v46  ;;  %v2191_v9 = vmul.u32 %v2187_v60, %v2163_v61  ;;  %v2192_v39 = vshll.u32 %v2189_v62, 16 }
 0x3a5   : > { %v2177_v24 = vadd.s32 %v2175_v16, %v2169_v50  ;;  %vm2178_vm7 = vc.u32 %v2176_v10, %v2172_v29  ;;  %v2069_v51 = vshll.u32 %v2060_v8, %v2067_v49  ;;  %v2070_v14 = vshrl.u32 %v2052_v17, %v2068_v54 }
 0x3a6   : > { %v2073_v19 = vadd.s32 127, %v2072_v26  ;;  %v2179_v31 = vsel %vm2178_vm7, 1, %v10343_v36  ;;  %v2194_v44 = vshll.u32 %v2190_v57, 16  ;;  %vm2196_vm8 = vc.u32 %v2188_v35, %v2192_v39 }
 0x3a7   : > { %v2181_v21 = vadd.s32 %v2179_v31, %v2177_v24  ;;  %v2198_v34 = vadd.s32 %v2192_v39, %v2188_v35  ;;  %v2071_v2 = vor.u32 %v2070_v14, %v2069_v51  ;;  %v2149_v52 = vsel %vm2145_vm12, %v2129_v58, %v8701_v20 }
 0x3a8   : > { %v2074_v27 = vshll.u32 %v2073_v19, 23  ;;  %v2197_v46 = vsel %vm2196_vm8, 1, %v10343_v36  ;;  %v3198_v8 = vand.u32 2147483647, %v8739_v0  ;;  %v2151_v17 = vsel %vm2147_vm14, %v8695_v32, %v2150_v15 }
 0x3a9   : > { %v2182_v53 = vadd.s32 %v2181_v21, %v2171_v37  ;;  %v2199_v61 = vadd.s32 %v2197_v46, %v2191_v9  ;;  %vm2200_vm9 = vc.u32 %v2198_v34, %v2194_v44  ;;  %v2173_v50 = vshrl.u32 %v2168_v25, 16 }
 0x3aa   : > { %v2075_v60 = vor.u32 4788187, %v2074_v27  ;;  %v2201_v28 = vsel %vm2200_vm9, 1, %v10343_v36  ;;  %v2083_v29 = vsel %vm1960_vm4, %v2082_v45, %v8703_v43  ;;  %v2193_v20 = vshrl.u32 %v2189_v62, 16 }
 0x3ab   : > { %v2203_v58 = vadd.s32 %v2201_v28, %v2199_v61  ;;  %v3201_v37 = vand.u32 2139095040, %v8739_v0  ;;  %v2078_v10 = vcvt.s32.f32 %v2071_v2  ;;  %v2183_v54 = vadd.s32 %v2182_v53, %v2173_v50 }
 0x3ac   : > { %v2076_v49 = vand.u32 2147483647, %v2075_v60  ;;  %v8769_v26 = vadd.f32 %v8732_v56, %v8539_v1  ;;  %v2195_v16 = vshrl.u32 %v2190_v57, 16  ;;  %v3205_v15 = vand.u32 8388607, %v3198_v8  ;;  %v10392_v60 = vld [vmem:[#allocation5_spill] sm:$0xff] }
 0x3ad   : > { %v2204_v32 = vadd.s32 %v2203_v58, %v2193_v20  ;;  %v3202_v25 = vshrl.u32 %v3201_v37, 23  ;;  %v408_v43 = vmul.f32 %v10386_v13, %v6388_v5  ;;  %vm8777_vm10 = vcmp.le.f32.partialorder %v1958_v18, 0.7853982 }
 0x3ae   : > { %v2079_v62 = vmul.f32 %v2078_v10, %v2076_v49  ;;  %v2202_v35 = vadd.s32 %v2198_v34, %v2194_v44  ;;  %v2085_v1 = vsel %vm8777_vm10, 0, %v2083_v29  ;;  %v2152_v56 = vsel %vm2146_vm13, %v2149_v52, %v2151_v17 }
 0x3af   : > { %v2205_v57 = vadd.s32 %v2204_v32, %v2195_v16  ;;  %v5915_v24 = vadd.s32 4294967169, %v3202_v25  ;;  %v8787_v13 = vadd.f32 %v8667_v23, %v8552_v41  ;;  %v8790_v18 = vadd.f32 %v8699_v59, %v408_v43 }
 0x3b0   : > { %v2080_v9 = vxor.u32 2147483648, %v2079_v62  ;;  %vm2208_vm11 = vc.u32 %v2183_v54, %v2202_v35  ;;  %v3206_v51 = vor.u32 8388608, %v3205_v15  ;;  %v3356_v19 = vand.u32 2139095040, %v8769_v26 }
 0x3b1   : > { %v2209_v39 = vadd.s32 1, %v2205_v57  ;;  %v3208_v14 = vadd.s32 1, %v5915_v24  ;;  %v2206_v31 = vmul.u32 %v8724_v48, %v2152_v56  ;;  %v2102_v23 = vadd.s32 3, %v2085_v1 }
 0x3b2   : > { %v2081_v22 = vsel %vm1960_vm4, %v2080_v9, %v2079_v62  ;;  %v8799_v27 = vshll.u32 %v3206_v51, 8  ;;  %v3357_v52 = vshrl.u32 %v3356_v19, 23  ;;  %v8803_v48 = vmul.f32 %v10392_v60, %v6386_v4 }
 0x3b3   : > { %v2084_v21 = vsel %vm8777_vm10, %v8488_v33, %v2081_v22  ;;  %v2210_v44 = vsel %vm2208_vm11, %v2209_v39, %v2205_v57  ;;  %vm3209_vm12 = vcmp.gt.s32.totalorder %v3208_v14, 0  ;;  %v8807_v29 = vand.u32 3, %v2102_v23 }
 0x3b4   : > { %v2086_v41 = vmul.f32 %v2084_v21, %v2084_v21  ;;  %v2211_v59 = vadd.s32 %v2210_v44, %v2206_v31  ;;  %v3210_v34 = vsel %vm3209_vm12, %v3208_v14, 0  ;;  %v8809_v58 = vadd.s32 %v2202_v35, %v2183_v54 }
 0x3b5   : > { %v3212_v2 = vand.u32 31, %v3210_v34  ;;  %v8812_v37 = vand.u32 65535, %v8799_v27  ;;  %v3353_v49 = vand.u32 2147483647, %v8769_v26  ;;  %v5918_v10 = vadd.s32 4294967169, %v3357_v52 }
 0x3b6   : > { %v2087_v46 = vmul.f32 -0.001358992, %v2086_v41  ;;  %v2094_v53 = vmul.f32 -0.00019511016, %v2086_v41  ;;  %v2212_v61 = vadd.s32 536870912, %v2211_v59  ;;  %vm2115_vm14 = vcmp.lt.s32.totalorder %v8518_v63, 0 }
 0x3b7   : > { %v8805_v17 = vsub.s32 32, %v3212_v2  ;;  %v8816_v15 = vshrl.u32 %v3210_v34, 5  ;;  %v3215_v43 = vshll.u32 %v10333_v47, %v3212_v2  ;;  %vm2108_vm13 = vcmp.eq.s32.totalorder %v8807_v29, 2 }
 0x3b8   : > { %v2088_v50 = vadd.f32 0.041655596, %v2087_v46  ;;  %v2095_v28 = vadd.f32 0.008332121, %v2094_v53  ;;  %v2213_v20 = vshrl.u32 %v2212_v61, 30  ;;  %v3218_v57 = vshll.u32 %v10337_v12, %v3212_v2 }
 0x3b9   : > { %v3216_v45 = vshrl.u32 %v10337_v12, %v8805_v17  ;;  %v3219_v54 = vshrl.u32 %v10338_v42, %v8805_v17  ;;  %v3225_v62 = vshrl.u32 %v10339_v30, %v8805_v17  ;;  %vm2105_vm15 = vcmp.eq.s32.totalorder %v8807_v29, 0 }
 0x3ba   : > { %v2089_v16 = vmul.f32 %v2088_v50, %v2086_v41  ;;  %v2096_v32 = vmul.f32 %v2095_v28, %v2086_v41  ;;  %v2214_v25 = vshll.u32 %v2213_v20, 30  ;;  %v3221_v24 = vshll.u32 %v10338_v42, %v3212_v2 }
 0x3bb   : > { %v3222_v9 = vshrl.u32 %v10345_v38, %v8805_v17  ;;  %v3224_v39 = vshll.u32 %v10345_v38, %v3212_v2  ;;  %v3228_v51 = vshrl.u32 %v10332_v11, %v8805_v17  ;;  %vm2104_vm0 = vcmp.lt.s32.totalorder %v8807_v29, 2 }
 0x3bc   : > { %v2090_v35 = vadd.f32 -0.4999988, %v2089_v16  ;;  %v2097_v1 = vadd.f32 -0.16666654, %v2096_v32  ;;  %v8826_v56 = vsub.s32 %v2211_v59, %v2214_v25  ;;  %vm2101_vm1 = vweird.f32 %v8488_v33 }
 0x3bd   : > { %v2237_v31 = vsub.s32 4, %v2213_v20  ;;  %v3217_v44 = vor.u32 %v3216_v45, %v3215_v43  ;;  %v3220_v23 = vor.u32 %v3219_v54, %v3218_v57  ;;  %v3226_v59 = vor.u32 %v3225_v62, %v3224_v39 }
 0x3be   : > { %v2091_v14 = vmul.f32 %v2090_v35, %v2086_v41  ;;  %v2098_v19 = vmul.f32 %v2097_v1, %v2086_v41  ;;  %vm2216_vm3 = vcmp.lt.s32.totalorder %v8826_v56, 0  ;;  %v2217_v22 = vsub.s32 0, %v8826_v56 }
 0x3bf   : > { %v3227_v53 = vshll.u32 %v10339_v30, %v3212_v2  ;;  %v3223_v41 = vor.u32 %v3222_v9, %v3221_v24  ;;  %v3248_v50 = vshrl.u32 %v8799_v27, 16  ;;  %v8843_v28 = vadd.s32 1, %v5918_v10 }
 0x3c0   : > { %v2092_v34 = vadd.f32 1.0, %v2091_v14  ;;  %v2099_v52 = vadd.f32 1.0, %v2098_v19  ;;  %v2218_v46 = vsel %vm2216_vm3, %v2217_v22, %v8826_v56  ;;  %vm8847_vm2 = vcmp.le.f32.partialorder %v2113_v55, 0.7853982 }
 0x3c1   : > { %v2219_v61 = vclz %v2218_v46  ;;  %v3229_v43 = vor.u32 %v3228_v51, %v3227_v53  ;;  %vm3230_vm4 = vcmp.lt.s32.totalorder %v8816_v15, 1  ;;  %v8854_v2 = vsel %vm2115_vm14, %v2237_v31, %v2213_v20 }
 0x3c2   : > { %v2100_v16 = vmul.f32 %v2099_v52, %v2084_v21  ;;  %v2109_v32 = vxor.u32 2147483648, %v2092_v34  ;;  %vm3233_vm5 = vcmp.lt.s32.totalorder %v8816_v15, 4  ;;  %v3238_v21 = vsel %vm3230_vm4, %v3217_v44, %v3220_v23 }
 0x3c3   : > { %v5895_v45 = vadd.s32 4294967294, %v2219_v61  ;;  %vm3231_vm6 = vcmp.lt.s32.totalorder %v8816_v15, 2  ;;  %vm3232_vm7 = vcmp.lt.s32.totalorder %v8816_v15, 3  ;;  %v3239_v55 = vsel %vm3233_vm5, %v3226_v59, 920167782 }
 0x3c4   : > { %v2106_v10 = vxor.u32 2147483648, %v2100_v16  ;;  %v2110_v54 = vsel %vm2108_vm13, %v2109_v32, %v2100_v16  ;;  %v3240_v20 = vsel %vm3232_vm7, %v3223_v41, %v3239_v55  ;;  %v3242_v62 = vsel %vm3230_vm4, %v3220_v23, %v3223_v41 }
 0x3c5   : > { %vm5896_vm8 = vcmp.lt.s32.totalorder %v5895_v45, 0  ;;  %v3241_v57 = vsel %vm3231_vm6, %v3238_v21, %v3240_v20  ;;  %v3243_v24 = vsel %vm3233_vm5, %v3229_v43, 1326507024  ;;  %v3235_v14 = vsel %vm3233_vm5, %v3223_v41, 2102212464 }
 0x3c6   : > { %v2107_v35 = vsel %vm2105_vm15, %v2092_v34, %v2106_v10  ;;  %v2222_v1 = vsel %vm5896_vm8, 0, %v5895_v45  ;;  %v3244_v22 = vsel %vm3232_vm7, %v3226_v59, %v3243_v24  ;;  %v3271_v31 = vand.u32 65535, %v3241_v57 }
 0x3c7   : > { %v2111_v9 = vsel %vm2104_vm0, %v2107_v35, %v2110_v54  ;;  %v2223_v39 = vsub.s32 32, %v2222_v1  ;;  %v2227_v51 = vsub.s32 4294967266, %v2222_v1  ;;  %v3272_v34 = vshrl.u32 %v3241_v57, 16 }
 0x3c8   : > { %v2112_v19 = vsel %vm2101_vm1, nan, %v2111_v9  ;;  %v2224_v52 = vshll.u32 %v8826_v56, %v2222_v1  ;;  %v3245_v29 = vsel %vm3231_vm6, %v3242_v62, %v3244_v22  ;;  %v3214_v61 = vshrl.u32 %v10333_v47, %v8805_v17 }
 0x3c9   : > { %v2225_v46 = vshrl.u32 %v8809_v58, %v2223_v39  ;;  %v2228_v53 = vadd.s32 127, %v2227_v51  ;;  %5686 = vst [vmem:[%s6717_s9 + $0x40] sm:$0xff] %v2112_v19  ;;  %v3249_v41 = vand.u32 65535, %v3245_v29  ;;  %v3250_v33 = vshrl.u32 %v3245_v29, 16 }
 0x3ca   : > { %v3274_v16 = vmul.u32 %v3272_v34, %v8812_v37  ;;  %v2240_v56 = vsel %vm8847_vm2, 0, %v8854_v2  ;;  %v3275_v43 = vmul.u32 %v3271_v31, %v3248_v50  ;;  %v3234_v58 = vsel %vm3230_vm4, %v3214_v61, %v3217_v44 }
 0x3cb   : > { %v2226_v32 = vor.u32 %v2225_v46, %v2224_v52  ;;  %v2229_v59 = vshll.u32 %v2228_v53, 23  ;;  %v3236_v45 = vsel %vm3232_vm7, %v3220_v23, %v3235_v14  ;;  %v3252_v21 = vmul.u32 %v3250_v33, %v8812_v37 }
 0x3cc   : > { %v3253_v17 = vmul.u32 %v3249_v41, %v3248_v50  ;;  %v3273_v55 = vmul.u32 %v3271_v31, %v8812_v37  ;;  %v3276_v54 = vmul.u32 %v3272_v34, %v3248_v50  ;;  %v3277_v20 = vshll.u32 %v3274_v16, 16 }
 0x3cd   : > { %v2230_v10 = vor.u32 4788187, %v2229_v59  ;;  %v2233_v62 = vcvt.s32.f32 %v2226_v32  ;;  %v3251_v35 = vmul.u32 %v3249_v41, %v8812_v37  ;;  %v3254_v1 = vmul.u32 %v3250_v33, %v3248_v50 }
 0x3ce   : > { %v3255_v2 = vshll.u32 %v3252_v21, 16  ;;  %v3257_v24 = vshll.u32 %v3253_v17, 16  ;;  %v3279_v9 = vshll.u32 %v3275_v43, 16  ;;  %vm3281_vm9 = vc.u32 %v3273_v55, %v3277_v20 }
 0x3cf   : > { %v2231_v57 = vand.u32 2147483647, %v2230_v10  ;;  %v3282_v23 = vsel %vm3281_vm9, 1, %v10343_v36  ;;  %v3283_v39 = vadd.s32 %v3277_v20, %v3273_v55  ;;  %vm3364_vm11 = vcmp.gt.s32.totalorder %v8843_v28, 0 }
 0x3d0   : > { %vm3259_vm10 = vc.u32 %v3251_v35, %v3255_v2  ;;  %v3261_v44 = vadd.s32 %v3255_v2, %v3251_v35  ;;  %v3284_v19 = vadd.s32 %v3282_v23, %v3276_v54  ;;  %v3278_v37 = vshrl.u32 %v3274_v16, 16 }
 0x3d1   : > { %v2234_v51 = vmul.f32 %v2233_v62, %v2231_v57  ;;  %v3260_v14 = vsel %vm3259_vm10, 1, %v10343_v36  ;;  %vm3285_vm13 = vc.u32 %v3283_v39, %v3279_v9  ;;  %v3365_v52 = vsel %vm3364_vm11, %v8843_v28, 0 }
 0x3d2   : > { %v3262_v22 = vadd.s32 %v3260_v14, %v3254_v1  ;;  %vm3263_vm12 = vc.u32 %v3261_v44, %v3257_v24  ;;  %v3286_v34 = vsel %vm3285_vm13, 1, %v10343_v36  ;;  %v3256_v46 = vshrl.u32 %v3252_v21, 16 }
 0x3d3   : > { %v2235_v50 = vxor.u32 2147483648, %v2234_v51  ;;  %v3264_v31 = vsel %vm3263_vm12, 1, %v10343_v36  ;;  %v3288_v29 = vadd.s32 %v3286_v34, %v3284_v19  ;;  %v3367_v61 = vand.u32 31, %v3365_v52 }
 0x3d4   : > { %v3266_v53 = vadd.s32 %v3264_v31, %v3262_v22  ;;  %v3237_v33 = vsel %vm3231_vm6, %v3234_v58, %v3236_v45  ;;  %v3258_v32 = vshrl.u32 %v3253_v17, 16  ;;  %v3280_v16 = vshrl.u32 %v3275_v43, 16 }
 0x3d5   : > { %v2236_v41 = vsel %vm2115_vm14, %v2235_v50, %v2234_v51  ;;  %v3289_v55 = vadd.s32 %v3288_v29, %v3278_v37  ;;  %v8914_v54 = vsub.s32 32, %v3367_v61  ;;  %v8918_v28 = vmul.f32 %v7692_v40, %v6390_v6 }
 0x3d6   : > { %v2239_v59 = vsel %vm8847_vm2, %v8518_v63, %v2236_v41  ;;  %v3267_v10 = vadd.s32 %v3266_v53, %v3256_v46  ;;  %v2257_v20 = vadd.s32 3, %v2240_v56  ;;  %v3360_v15 = vand.u32 8388607, %v3353_v49 }
 0x3d7   : > { %v2241_v21 = vmul.f32 %v2239_v59, %v2239_v59  ;;  %v8924_v43 = vadd.s32 %v3283_v39, %v3279_v9  ;;  %v3290_v45 = vadd.s32 %v3289_v55, %v3280_v16  ;;  %v3291_v25 = vmul.u32 %v8799_v27, %v3237_v33 }
 0x3d8   : > { %v8922_v58 = vadd.s32 %v3267_v10, %v3258_v32  ;;  %v8927_v35 = vshrl.u32 %v3365_v52, 5  ;;  %v3373_v1 = vshll.u32 %v10337_v12, %v3367_v61  ;;  %v3374_v2 = vshrl.u32 %v10338_v42, %v8914_v54 }
 0x3d9   : > { %v2242_v17 = vmul.f32 -0.001358992, %v2241_v21  ;;  %v2249_v62 = vmul.f32 -0.00019511016, %v2241_v21  ;;  %v3294_v56 = vadd.s32 1, %v3290_v45  ;;  %v3377_v57 = vshrl.u32 %v10345_v38, %v8914_v54 }
 0x3da   : > { %vm3293_vm14 = vc.u32 %v8922_v58, %v8924_v43  ;;  %v3371_v27 = vshrl.u32 %v10337_v12, %v8914_v54  ;;  %v3376_v44 = vshll.u32 %v10338_v42, %v3367_v61  ;;  %v3379_v39 = vshll.u32 %v10345_v38, %v3367_v61 }
 0x3db   : > { %v2243_v24 = vadd.f32 0.041655596, %v2242_v17  ;;  %v2250_v9 = vadd.f32 0.008332121, %v2249_v62  ;;  %v3295_v23 = vsel %vm3293_vm14, %v3294_v56, %v3290_v45  ;;  %v3380_v51 = vshrl.u32 %v10339_v30, %v8914_v54 }
 0x3dc   : > { %v3382_v14 = vshll.u32 %v10339_v30, %v3367_v61  ;;  %v3296_v37 = vadd.s32 %v3295_v23, %v3291_v25  ;;  %v3383_v50 = vshrl.u32 %v10332_v11, %v8914_v54  ;;  %v3370_v31 = vshll.u32 %v10333_v47, %v3367_v61 }
 0x3dd   : > { %v2244_v19 = vmul.f32 %v2243_v24, %v2241_v21  ;;  %v2251_v22 = vmul.f32 %v2250_v9, %v2241_v21  ;;  %v8946_v34 = vor.u32 %v3374_v2, %v3373_v1  ;;  %v3378_v52 = vor.u32 %v3377_v57, %v3376_v44 }
 0x3de   : > { %v3381_v46 = vor.u32 %v3380_v51, %v3379_v39  ;;  %v3297_v41 = vadd.s32 536870912, %v3296_v37  ;;  %v3384_v33 = vor.u32 %v3383_v50, %v3382_v14  ;;  %v8950_v32 = vmul.f32 %v7692_v40, %v6392_v7 }
 0x3df   : > { %v2245_v53 = vadd.f32 -0.4999988, %v2244_v19  ;;  %v2252_v29 = vadd.f32 -0.16666654, %v2251_v22  ;;  %v2258_v16 = vand.u32 3, %v2257_v20  ;;  %v3361_v10 = vor.u32 8388608, %v3360_v15 }
 0x3e0   : > { %v8952_v55 = vor.u32 %v3371_v27, %v3370_v31  ;;  %v8954_v17 = vshrl.u32 %v3297_v41, 30  ;;  %vm3388_vm15 = vcmp.lt.s32.totalorder %v8927_v35, 4  ;;  %vm3385_vm0 = vcmp.lt.s32.totalorder %v8927_v35, 1 }
 0x3e1   : > { %v2246_v45 = vmul.f32 %v2245_v53, %v2241_v21  ;;  %v2253_v25 = vmul.f32 %v2252_v29, %v2241_v21  ;;  %vm3387_vm3 = vcmp.lt.s32.totalorder %v8927_v35, 3  ;;  %v3394_v61 = vsel %vm3388_vm15, %v3381_v46, 920167782 }
 0x3e2   : > { %v3398_v40 = vsel %vm3388_vm15, %v3384_v33, 1326507024  ;;  %v3299_v62 = vshll.u32 %v8954_v17, 30  ;;  %v3397_v21 = vsel %vm3385_vm0, %v8946_v34, %v3378_v52  ;;  %v3393_v1 = vsel %vm3385_vm0, %v8952_v55, %v8946_v34  ;;  %v644_v33 = vpop.permute.xlu0 %643 }
 0x3e3   : > { %v2247_v20 = vadd.f32 1.0, %v2246_v45  ;;  %v2254_v15 = vadd.f32 1.0, %v2253_v25  ;;  %v3395_v56 = vsel %vm3387_vm3, %v3378_v52, %v3394_v61  ;;  %v3399_v2 = vsel %vm3387_vm3, %v3381_v46, %v3398_v40 }
 0x3e4   : > { %v8975_v57 = vshll.u32 %v3361_v10, 8  ;;  %v3300_v27 = vsub.s32 %v3296_v37, %v3299_v62  ;;  %vm3386_vm1 = vcmp.lt.s32.totalorder %v8927_v35, 2  ;;  %vm2256_vm2 = vweird.f32 %v8518_v63 }
 0x3e5   : > { %v2255_v24 = vmul.f32 %v2254_v15, %v2239_v59  ;;  %v2264_v9 = vxor.u32 2147483648, %v2247_v20  ;;  %vm2259_vm4 = vcmp.lt.s32.totalorder %v2258_v16, 2  ;;  %vm2260_vm5 = vcmp.eq.s32.totalorder %v2258_v16, 0 }
 0x3e6   : > { %v3400_v44 = vsel %vm3386_vm1, %v3397_v21, %v3399_v2  ;;  %vm3301_vm6 = vcmp.lt.s32.totalorder %v3300_v27, 0  ;;  %v3302_v39 = vsub.s32 0, %v3300_v27  ;;  %v3396_v51 = vsel %vm3386_vm1, %v3393_v1, %v3395_v56 }
 0x3e7   : > { %v2261_v23 = vxor.u32 2147483648, %v2255_v24  ;;  %vm2263_vm7 = vcmp.eq.s32.totalorder %v2258_v16, 2  ;;  %v3402_v59 = vand.u32 65535, %v8975_v57  ;;  %v3404_v14 = vand.u32 65535, %v3400_v44 }
 0x3e8   : > { %v3405_v19 = vshrl.u32 %v3400_v44, 16  ;;  %v2265_v37 = vsel %vm2263_vm7, %v2264_v9, %v2255_v24  ;;  %v3303_v50 = vsel %vm3301_vm6, %v3302_v39, %v3300_v27  ;;  %v3403_v31 = vshrl.u32 %v8975_v57, 16 }
 0x3e9   : > { %v2262_v22 = vsel %vm2260_vm5, %v2247_v20, %v2261_v23  ;;  %v3304_v53 = vclz %v3303_v50  ;;  %v3369_v29 = vshrl.u32 %v10333_v47, %v8914_v54  ;;  %v3427_v41 = vshrl.u32 %v3396_v51, 16 }
 0x3ea   : > { %v2266_v46 = vsel %vm2259_vm4, %v2262_v22, %v2265_v37  ;;  %v3407_v10 = vmul.u32 %v3405_v19, %v3402_v59  ;;  %v3408_v45 = vmul.u32 %v3404_v14, %v3403_v31  ;;  %v3426_v25 = vand.u32 65535, %v3396_v51 }
 0x3eb   : > { %v2267_v16 = vsel %vm2256_vm2, nan, %v2266_v46  ;;  %v3292_v61 = vadd.s32 %v8924_v43, %v8922_v58  ;;  %v5916_v40 = vadd.s32 4294967294, %v3304_v53  ;;  %v3322_v20 = vsub.s32 4, %v8954_v17 }
 0x3ec   : > { %5687 = vst [vmem:[%s6717_s9 + $0x48] sm:$0xff] %v2267_v16  ;;  %v3390_v15 = vsel %vm3388_vm15, %v3378_v52, 2102212464  ;;  %v3406_v62 = vmul.u32 %v3404_v14, %v3402_v59  ;;  %v3409_v54 = vmul.u32 %v3405_v19, %v3403_v31  ;;  %v3410_v21 = vshll.u32 %v3407_v10, 16 }
 0x3ed   : > { %v8996_v1 = vadd.f32 %v644_v33, %v8787_v13  ;;  %vm3200_vm8 = vcmp.lt.s32.totalorder %v8739_v0, 0  ;;  %vm5917_vm9 = vcmp.lt.s32.totalorder %v5916_v40, 0  ;;  %v3411_v63 = vshrl.u32 %v3407_v10, 16 }
 0x3ee   : > { %v3412_v56 = vshll.u32 %v3408_v45, 16  ;;  %v3429_v2 = vmul.u32 %v3427_v41, %v3402_v59  ;;  %v3307_v24 = vsel %vm5917_vm9, 0, %v5916_v40  ;;  %vm3414_vm10 = vc.u32 %v3406_v62, %v3410_v21 }
 0x3ef   : > { %v3416_v58 = vadd.s32 %v3410_v21, %v3406_v62  ;;  %v3430_v43 = vmul.u32 %v3426_v25, %v3403_v31  ;;  %v3308_v9 = vsub.s32 32, %v3307_v24  ;;  %v3312_v44 = vsub.s32 4294967266, %v3307_v24 }
 0x3f0   : > { %v3415_v52 = vsel %vm3414_vm10, 1, %v10343_v36  ;;  %v3428_v23 = vmul.u32 %v3426_v25, %v3402_v59  ;;  %v3431_v51 = vmul.u32 %v3427_v41, %v3403_v31  ;;  %v3432_v13 = vshll.u32 %v3429_v2, 16 }
 0x3f1   : > { %v3417_v39 = vadd.s32 %v3415_v52, %v3409_v54  ;;  %vm3418_vm11 = vc.u32 %v3416_v58, %v3412_v56  ;;  %v3309_v14 = vshll.u32 %v3300_v27, %v3307_v24  ;;  %v3310_v19 = vshrl.u32 %v3292_v61, %v3308_v9 }
 0x3f2   : > { %v3313_v22 = vadd.s32 127, %v3312_v44  ;;  %v3419_v37 = vsel %vm3418_vm11, 1, %v10343_v36  ;;  %v3434_v46 = vshll.u32 %v3430_v43, 16  ;;  %vm3436_vm12 = vc.u32 %v3428_v23, %v3432_v13 }
 0x3f3   : > { %v3421_v50 = vadd.s32 %v3419_v37, %v3417_v39  ;;  %v3438_v53 = vadd.s32 %v3432_v13, %v3428_v23  ;;  %v3311_v16 = vor.u32 %v3310_v19, %v3309_v14  ;;  %v3389_v40 = vsel %vm3385_vm0, %v3369_v29, %v8952_v55 }
 0x3f4   : > { %v3314_v10 = vshll.u32 %v3313_v22, 23  ;;  %v3437_v59 = vsel %vm3436_vm12, 1, %v10343_v36  ;;  %v3391_v27 = vsel %vm3387_vm3, %v8946_v34, %v3390_v15  ;;  %v3413_v61 = vshrl.u32 %v3408_v45, 16 }
 0x3f5   : > { %v3422_v31 = vadd.s32 %v3421_v50, %v3411_v63  ;;  %v3439_v41 = vadd.s32 %v3437_v59, %v3431_v51  ;;  %vm3440_vm13 = vc.u32 %v3438_v53, %v3434_v46  ;;  %v2888_v54 = vand.u32 2147483647, %v8996_v1 }
 0x3f6   : > { %v3315_v25 = vor.u32 4788187, %v3314_v10  ;;  %v3441_v62 = vsel %vm3440_vm13, 1, %v10343_v36  ;;  %v3323_v21 = vsel %vm3200_vm8, %v3322_v20, %v8954_v17  ;;  %v3433_v55 = vshrl.u32 %v3429_v2, 16 }
 0x3f7   : > { %v3443_v29 = vadd.s32 %v3441_v62, %v3439_v41  ;;  %v2891_v56 = vand.u32 2139095040, %v8996_v1  ;;  %v3318_v58 = vcvt.s32.f32 %v3311_v16  ;;  %v3423_v34 = vadd.s32 %v3422_v31, %v3413_v61  ;;  %v10397_v31 = vld [vmem:[#allocation8_spill] sm:$0xff] }
 0x3f8   : > { %v3316_v24 = vand.u32 2147483647, %v3315_v25  ;;  %v2895_v15 = vand.u32 8388607, %v2888_v54  ;;  %v3435_v63 = vshrl.u32 %v3430_v43, 16  ;;  %v9017_v9 = vadd.f32 %v644_v33, %v8790_v18 }
 0x3f9   : > { %v3444_v45 = vadd.s32 %v3443_v29, %v3433_v55  ;;  %v2892_v44 = vshrl.u32 %v2891_v56, 23  ;;  %v416_v52 = vmul.f32 %v10392_v60, %v6388_v5  ;;  %vm9023_vm14 = vcmp.le.f32.partialorder %v3198_v8, 0.7853982 }
 0x3fa   : > { %v3319_v20 = vmul.f32 %v3318_v58, %v3316_v24  ;;  %v3442_v2 = vadd.s32 %v3438_v53, %v3434_v46  ;;  %v3392_v23 = vsel %vm3386_vm1, %v3389_v40, %v3391_v27  ;;  %v9031_v18 = vadd.f32 %v8918_v28, %v8803_v48 }
 0x3fb   : > { %v3445_v43 = vadd.s32 %v3444_v45, %v3435_v63  ;;  %v5909_v39 = vadd.s32 4294967169, %v2892_v44  ;;  %v3325_v60 = vsel %vm9023_vm14, 0, %v3323_v21  ;;  %v2896_v8 = vor.u32 8388608, %v2895_v15 }
 0x3fc   : > { %v3320_v33 = vxor.u32 2147483648, %v3319_v20  ;;  %vm3448_vm15 = vc.u32 %v3423_v34, %v3442_v2  ;;  %v3046_v14 = vand.u32 2139095040, %v9017_v9  ;;  %v9037_v19 = vadd.f32 %v8950_v32, %v416_v52 }
 0x3fd   : > { %v3449_v51 = vadd.s32 1, %v3445_v43  ;;  %v2898_v13 = vadd.s32 1, %v5909_v39  ;;  %v3446_v22 = vmul.u32 %v8975_v57, %v3392_v23  ;;  %v3342_v50 = vadd.s32 3, %v3325_v60 }
 0x3fe   : > { %v3321_v35 = vsel %vm3200_vm8, %v3320_v33, %v3319_v20  ;;  %v9045_v10 = vshll.u32 %v2896_v8, 8  ;;  %v3047_v32 = vshrl.u32 %v3046_v14, 23  ;;  %v9049_v57 = vmul.f32 %v10397_v31, %v6386_v4 }
 0x3ff   : > { %v3324_v48 = vsel %vm9023_vm14, %v8739_v0, %v3321_v35  ;;  %v3450_v28 = vsel %vm3448_vm15, %v3449_v51, %v3445_v43  ;;  %vm2899_vm0 = vcmp.gt.s32.totalorder %v2898_v13, 0  ;;  %v9053_v62 = vand.u32 3, %v3342_v50 }
 0x400   : > { %v3326_v37 = vmul.f32 %v3324_v48, %v3324_v48  ;;  %v3451_v46 = vadd.s32 %v3450_v28, %v3446_v22  ;;  %v2900_v53 = vsel %vm2899_vm0, %v2898_v13, 0  ;;  %v9055_v55 = vadd.s32 %v3442_v2, %v3423_v34 }
 0x401   : > { %v2902_v16 = vand.u32 31, %v2900_v53  ;;  %v9058_v29 = vand.u32 65535, %v9045_v10  ;;  %v3043_v56 = vand.u32 2147483647, %v9017_v9  ;;  %v5912_v24 = vadd.s32 4294967169, %v3047_v32 }
 0x402   : > { %v3327_v40 = vmul.f32 -0.001358992, %v3326_v37  ;;  %v3334_v59 = vmul.f32 -0.00019511016, %v3326_v37  ;;  %v3452_v27 = vadd.s32 536870912, %v3451_v46  ;;  %vm3355_vm3 = vcmp.lt.s32.totalorder %v8769_v26, 0 }
 0x403   : > { %v9051_v41 = vsub.s32 32, %v2902_v16  ;;  %v9062_v45 = vshrl.u32 %v2900_v53, 5  ;;  %v2905_v44 = vshll.u32 %v10333_v47, %v2902_v16  ;;  %vm3348_vm1 = vcmp.eq.s32.totalorder %v9053_v62, 2 }
 0x404   : > { %v3328_v25 = vadd.f32 0.041655596, %v3327_v40  ;;  %v3335_v61 = vadd.f32 0.008332121, %v3334_v59  ;;  %v3453_v21 = vshrl.u32 %v3452_v27, 30  ;;  %v2908_v43 = vshll.u32 %v10337_v12, %v2902_v16 }
 0x405   : > { %v2906_v52 = vshrl.u32 %v10337_v12, %v9051_v41  ;;  %v2909_v34 = vshrl.u32 %v10338_v42, %v9051_v41  ;;  %v2915_v17 = vshrl.u32 %v10339_v30, %v9051_v41  ;;  %vm3345_vm2 = vcmp.eq.s32.totalorder %v9053_v62, 0 }
 0x406   : > { %v3329_v58 = vmul.f32 %v3328_v25, %v3326_v37  ;;  %v3336_v15 = vmul.f32 %v3335_v61, %v3326_v37  ;;  %v3454_v63 = vshll.u32 %v3453_v21, 30  ;;  %v2911_v39 = vshll.u32 %v10338_v42, %v2902_v16 }
 0x407   : > { %v2912_v33 = vshrl.u32 %v10345_v38, %v9051_v41  ;;  %v2914_v60 = vshll.u32 %v10345_v38, %v2902_v16  ;;  %v2918_v8 = vshrl.u32 %v10332_v11, %v9051_v41  ;;  %vm3344_vm4 = vcmp.lt.s32.totalorder %v9053_v62, 2 }
 0x408   : > { %v3330_v20 = vadd.f32 -0.4999988, %v3329_v58  ;;  %v3337_v2 = vadd.f32 -0.16666654, %v3336_v15  ;;  %v9072_v23 = vsub.s32 %v3451_v46, %v3454_v63  ;;  %vm3341_vm6 = vweird.f32 %v8739_v0 }
 0x409   : > { %v3477_v35 = vsub.s32 4, %v3453_v21  ;;  %v2907_v22 = vor.u32 %v2906_v52, %v2905_v44  ;;  %v2910_v28 = vor.u32 %v2909_v34, %v2908_v43  ;;  %v2916_v50 = vor.u32 %v2915_v17, %v2914_v60 }
 0x40a   : > { %v3331_v51 = vmul.f32 %v3330_v20, %v3326_v37  ;;  %v3338_v13 = vmul.f32 %v3337_v2, %v3326_v37  ;;  %vm3456_vm5 = vcmp.lt.s32.totalorder %v9072_v23, 0  ;;  %v3457_v14 = vsub.s32 0, %v9072_v23 }
 0x40b   : > { %v2917_v40 = vshll.u32 %v10339_v30, %v2902_v16  ;;  %v2913_v37 = vor.u32 %v2912_v33, %v2911_v39  ;;  %v2938_v27 = vshrl.u32 %v9045_v10, 16  ;;  %v9089_v25 = vadd.s32 1, %v5912_v24 }
 0x40c   : > { %v3332_v46 = vadd.f32 1.0, %v3331_v51  ;;  %v3339_v53 = vadd.f32 1.0, %v3338_v13  ;;  %v3458_v32 = vsel %vm3456_vm5, %v3457_v14, %v9072_v23  ;;  %vm9093_vm7 = vcmp.le.f32.partialorder %v3353_v49, 0.7853982 }
 0x40d   : > { %v3459_v59 = vclz %v3458_v32  ;;  %v2919_v63 = vor.u32 %v2918_v8, %v2917_v40  ;;  %vm2920_vm8 = vcmp.lt.s32.totalorder %v9062_v45, 1  ;;  %v9100_v16 = vsel %vm3355_vm3, %v3477_v35, %v3453_v21 }
 0x40e   : > { %v3340_v61 = vmul.f32 %v3339_v53, %v3324_v48  ;;  %v3349_v58 = vxor.u32 2147483648, %v3332_v46  ;;  %vm2923_vm9 = vcmp.lt.s32.totalorder %v9062_v45, 4  ;;  %v2928_v48 = vsel %vm2920_vm8, %v2907_v22, %v2910_v28 }
 0x40f   : > { %v5919_v44 = vadd.s32 4294967294, %v3459_v59  ;;  %vm2921_vm10 = vcmp.lt.s32.totalorder %v9062_v45, 2  ;;  %vm2922_vm11 = vcmp.lt.s32.totalorder %v9062_v45, 3  ;;  %v2929_v49 = vsel %vm2923_vm9, %v2916_v50, 920167782 }
 0x410   : > { %v3346_v24 = vxor.u32 2147483648, %v3340_v61  ;;  %v3350_v52 = vsel %vm3348_vm1, %v3349_v58, %v3340_v61  ;;  %v2930_v21 = vsel %vm2922_vm11, %v2913_v37, %v2929_v49  ;;  %v2932_v34 = vsel %vm2920_vm8, %v2910_v28, %v2913_v37 }
 0x411   : > { %vm5920_vm12 = vcmp.lt.s32.totalorder %v5919_v44, 0  ;;  %v2931_v2 = vsel %vm2921_vm10, %v2928_v48, %v2930_v21  ;;  %v2933_v43 = vsel %vm2923_vm9, %v2919_v63, 1326507024  ;;  %v2925_v8 = vsel %vm2923_vm9, %v2913_v37, 2102212464 }
 0x412   : > { %v3347_v17 = vsel %vm3345_vm2, %v3332_v46, %v3346_v24  ;;  %v3462_v20 = vsel %vm5920_vm12, 0, %v5919_v44  ;;  %v2934_v13 = vsel %vm2922_vm11, %v2916_v50, %v2933_v43  ;;  %v2961_v14 = vand.u32 65535, %v2931_v2 }
 0x413   : > { %v3351_v39 = vsel %vm3344_vm4, %v3347_v17, %v3350_v52  ;;  %v3463_v33 = vsub.s32 32, %v3462_v20  ;;  %v3467_v60 = vsub.s32 4294967266, %v3462_v20  ;;  %v2962_v35 = vshrl.u32 %v2931_v2, 16 }
 0x414   : > { %v3352_v51 = vsel %vm3341_vm6, nan, %v3351_v39  ;;  %v3464_v46 = vshll.u32 %v9072_v23, %v3462_v20  ;;  %v2935_v62 = vsel %vm2921_vm10, %v2932_v34, %v2934_v13  ;;  %v2904_v40 = vshrl.u32 %v10333_v47, %v9051_v41 }
 0x415   : > { %v3465_v53 = vshrl.u32 %v9055_v55, %v3463_v33  ;;  %v3468_v32 = vadd.s32 127, %v3467_v60  ;;  %5694 = vst [vmem:[%s6717_s9 + $0x80] sm:$0xff] %v3352_v51  ;;  %v2939_v59 = vand.u32 65535, %v2935_v62  ;;  %v2940_v0 = vshrl.u32 %v2935_v62, 16 }
 0x416   : > { %v2964_v37 = vmul.u32 %v2962_v35, %v9058_v29  ;;  %v3480_v23 = vsel %vm9093_vm7, 0, %v9100_v16  ;;  %v2965_v58 = vmul.u32 %v2961_v14, %v2938_v27  ;;  %v2924_v55 = vsel %vm2920_vm8, %v2904_v40, %v2907_v22 }
 0x417   : > { %v3466_v61 = vor.u32 %v3465_v53, %v3464_v46  ;;  %v3469_v50 = vshll.u32 %v3468_v32, 23  ;;  %v2926_v63 = vsel %vm2922_vm11, %v2910_v28, %v2925_v8  ;;  %v2942_v44 = vmul.u32 %v2940_v0, %v9058_v29 }
 0x418   : > { %v2943_v41 = vmul.u32 %v2939_v59, %v2938_v27  ;;  %v2963_v24 = vmul.u32 %v2961_v14, %v9058_v29  ;;  %v2966_v49 = vmul.u32 %v2962_v35, %v2938_v27  ;;  %v2967_v52 = vshll.u32 %v2964_v37, 16 }
 0x419   : > { %v3470_v48 = vor.u32 4788187, %v3469_v50  ;;  %v3473_v21 = vcvt.s32.f32 %v3466_v61  ;;  %v2941_v34 = vmul.u32 %v2939_v59, %v9058_v29  ;;  %v2944_v17 = vmul.u32 %v2940_v0, %v2938_v27 }
 0x41a   : > { %v2945_v16 = vshll.u32 %v2942_v44, 16  ;;  %v2947_v2 = vshll.u32 %v2943_v41, 16  ;;  %v2969_v43 = vshll.u32 %v2965_v58, 16  ;;  %vm2971_vm13 = vc.u32 %v2963_v24, %v2967_v52 }
 0x41b   : > { %v3471_v20 = vand.u32 2147483647, %v3470_v48  ;;  %v2972_v28 = vsel %vm2971_vm13, 1, %v10343_v36  ;;  %v2973_v39 = vadd.s32 %v2967_v52, %v2963_v24  ;;  %vm3054_vm15 = vcmp.gt.s32.totalorder %v9089_v25, 0 }
 0x41c   : > { %vm2949_vm14 = vc.u32 %v2941_v34, %v2945_v16  ;;  %v2951_v22 = vadd.s32 %v2945_v16, %v2941_v34  ;;  %v2974_v8 = vadd.s32 %v2972_v28, %v2966_v49  ;;  %v2968_v29 = vshrl.u32 %v2964_v37, 16 }
 0x41d   : > { %v3474_v33 = vmul.f32 %v3473_v21, %v3471_v20  ;;  %v2950_v60 = vsel %vm2949_vm14, 1, %v10343_v36  ;;  %vm2975_vm1 = vc.u32 %v2973_v39, %v2969_v43  ;;  %v3055_v35 = vsel %vm3054_vm15, %v9089_v25, 0  ;;  %v10400_v25 = vld [vmem:[#allocation11_spill] sm:$0xff] }
 0x41e   : > { %v2952_v51 = vadd.s32 %v2950_v60, %v2944_v17  ;;  %vm2953_vm0 = vc.u32 %v2951_v22, %v2947_v2  ;;  %v2976_v14 = vsel %vm2975_vm1, 1, %v10343_v36  ;;  %v2946_v46 = vshrl.u32 %v2942_v44, 16 }
 0x41f   : > { %v3475_v27 = vxor.u32 2147483648, %v3474_v33  ;;  %v2954_v13 = vsel %vm2953_vm0, 1, %v10343_v36  ;;  %v2978_v32 = vadd.s32 %v2976_v14, %v2974_v8  ;;  %v3057_v62 = vand.u32 31, %v3055_v35 }
 0x420   : > { %v2956_v53 = vadd.s32 %v2954_v13, %v2952_v51  ;;  %v2927_v59 = vsel %vm2921_vm10, %v2924_v55, %v2926_v63  ;;  %v2948_v0 = vshrl.u32 %v2943_v41, 16  ;;  %v2970_v37 = vshrl.u32 %v2965_v58, 16 }
 0x421   : > { %v3476_v40 = vsel %vm3355_vm3, %v3475_v27, %v3474_v33  ;;  %v2979_v48 = vadd.s32 %v2978_v32, %v2968_v29  ;;  %v9160_v24 = vsub.s32 32, %v3057_v62  ;;  %v9164_v44 = vmul.f32 %v10400_v25, %v6390_v6 }
 0x422   : > { %v3479_v61 = vsel %vm9093_vm7, %v8769_v26, %v3476_v40  ;;  %v2957_v50 = vadd.s32 %v2956_v53, %v2946_v46  ;;  %v3497_v52 = vadd.s32 3, %v3480_v23  ;;  %v3050_v45 = vand.u32 8388607, %v3043_v56 }
 0x423   : > { %v3481_v49 = vmul.f32 %v3479_v61, %v3479_v61  ;;  %v9170_v58 = vadd.s32 %v2973_v39, %v2969_v43  ;;  %v2980_v63 = vadd.s32 %v2979_v48, %v2970_v37  ;;  %v2981_v15 = vmul.u32 %v9045_v10, %v2927_v59 }
 0x424   : > { %v9168_v55 = vadd.s32 %v2957_v50, %v2948_v0  ;;  %v9173_v34 = vshrl.u32 %v3055_v35, 5  ;;  %v3063_v17 = vshll.u32 %v10337_v12, %v3057_v62  ;;  %v3064_v16 = vshrl.u32 %v10338_v42, %v9160_v24 }
 0x425   : > { %v3482_v41 = vmul.f32 -0.001358992, %v3481_v49  ;;  %v3489_v21 = vmul.f32 -0.00019511016, %v3481_v49  ;;  %v2984_v23 = vadd.s32 1, %v2980_v63  ;;  %v3067_v20 = vshrl.u32 %v10345_v38, %v9160_v24 }
 0x426   : > { %vm2983_vm3 = vc.u32 %v9168_v55, %v9170_v58  ;;  %v3061_v10 = vshrl.u32 %v10337_v12, %v9160_v24  ;;  %v3066_v22 = vshll.u32 %v10338_v42, %v3057_v62  ;;  %v3069_v39 = vshll.u32 %v10345_v38, %v3057_v62 }
 0x427   : > { %v3483_v2 = vadd.f32 0.041655596, %v3482_v41  ;;  %v3490_v43 = vadd.f32 0.008332121, %v3489_v21  ;;  %v2985_v28 = vsel %vm2983_vm3, %v2984_v23, %v2980_v63  ;;  %v3070_v33 = vshrl.u32 %v10339_v30, %v9160_v24 }
 0x428   : > { %v3072_v60 = vshll.u32 %v10339_v30, %v3057_v62  ;;  %v2986_v29 = vadd.s32 %v2985_v28, %v2981_v15  ;;  %v3073_v27 = vshrl.u32 %v10332_v11, %v9160_v24  ;;  %v3060_v13 = vshll.u32 %v10333_v47, %v3057_v62 }
 0x429   : > { %v3484_v8 = vmul.f32 %v3483_v2, %v3481_v49  ;;  %v3491_v51 = vmul.f32 %v3490_v43, %v3481_v49  ;;  %v9192_v14 = vor.u32 %v3064_v16, %v3063_v17  ;;  %v3068_v35 = vor.u32 %v3067_v20, %v3066_v22 }
 0x42a   : > { %v3071_v46 = vor.u32 %v3070_v33, %v3069_v39  ;;  %v2987_v40 = vadd.s32 536870912, %v2986_v29  ;;  %v3074_v59 = vor.u32 %v3073_v27, %v3072_v60  ;;  %v9196_v0 = vmul.f32 %v10400_v25, %v6392_v7  ;;  %v9229_v60 = vpop.permute.xlu1 %663 }
 0x42b   : > { %v3485_v53 = vadd.f32 -0.4999988, %v3484_v8  ;;  %v3492_v32 = vadd.f32 -0.16666654, %v3491_v51  ;;  %v3498_v37 = vand.u32 3, %v3497_v52  ;;  %v3051_v50 = vor.u32 8388608, %v3050_v45 }
 0x42c   : > { %v9198_v48 = vor.u32 %v3061_v10, %v3060_v13  ;;  %v9200_v41 = vshrl.u32 %v2987_v40, 30  ;;  %vm3078_vm2 = vcmp.lt.s32.totalorder %v9173_v34, 4  ;;  %vm3075_vm4 = vcmp.lt.s32.totalorder %v9173_v34, 1 }
 0x42d   : > { %v3486_v63 = vmul.f32 %v3485_v53, %v3481_v49  ;;  %v3493_v15 = vmul.f32 %v3492_v32, %v3481_v49  ;;  %vm3077_vm5 = vcmp.lt.s32.totalorder %v9173_v34, 3  ;;  %v3084_v62 = vsel %vm3078_vm2, %v3071_v46, 920167782 }
 0x42e   : > { %v3088_v25 = vsel %vm3078_vm2, %v3074_v59, 1326507024  ;;  %v2989_v21 = vshll.u32 %v9200_v41, 30  ;;  %v3087_v49 = vsel %vm3075_vm4, %v9192_v14, %v3068_v35  ;;  %v3083_v17 = vsel %vm3075_vm4, %v9198_v48, %v9192_v14 }
 0x42f   : > { %v3487_v52 = vadd.f32 1.0, %v3486_v63  ;;  %v3494_v45 = vadd.f32 1.0, %v3493_v15  ;;  %v3085_v23 = vsel %vm3077_vm5, %v3068_v35, %v3084_v62  ;;  %v3089_v16 = vsel %vm3077_vm5, %v3071_v46, %v3088_v25 }
 0x430   : > { %v9221_v20 = vshll.u32 %v3051_v50, 8  ;;  %v2990_v10 = vsub.s32 %v2986_v29, %v2989_v21  ;;  %vm3076_vm6 = vcmp.lt.s32.totalorder %v9173_v34, 2  ;;  %vm3496_vm7 = vweird.f32 %v8769_v26 }
 0x431   : > { %v3495_v2 = vmul.f32 %v3494_v45, %v3479_v61  ;;  %v3504_v43 = vxor.u32 2147483648, %v3487_v52  ;;  %vm3499_vm8 = vcmp.lt.s32.totalorder %v3498_v37, 2  ;;  %vm3500_vm9 = vcmp.eq.s32.totalorder %v3498_v37, 0 }
 0x432   : > { %v3090_v22 = vsel %vm3076_vm6, %v3087_v49, %v3089_v16  ;;  %vm2991_vm10 = vcmp.lt.s32.totalorder %v2990_v10, 0  ;;  %v2992_v39 = vsub.s32 0, %v2990_v10  ;;  %v3086_v33 = vsel %vm3076_vm6, %v3083_v17, %v3085_v23 }
 0x433   : > { %v3501_v28 = vxor.u32 2147483648, %v3495_v2  ;;  %vm3503_vm11 = vcmp.eq.s32.totalorder %v3498_v37, 2  ;;  %v3092_v61 = vand.u32 65535, %v9221_v20  ;;  %v3094_v8 = vand.u32 65535, %v3090_v22 }
 0x434   : > { %v3095_v51 = vshrl.u32 %v3090_v22, 16  ;;  %v3505_v27 = vsel %vm3503_vm11, %v3504_v43, %v3495_v2  ;;  %v2993_v13 = vsel %vm2991_vm10, %v2992_v39, %v2990_v10  ;;  %v3093_v46 = vshrl.u32 %v9221_v20, 16 }
 0x435   : > { %v3502_v29 = vsel %vm3500_vm9, %v3487_v52, %v3501_v28  ;;  %v2994_v32 = vclz %v2993_v13  ;;  %v3117_v40 = vshrl.u32 %v3086_v33, 16  ;;  %v9236_v59 = vadd.f32 %v9229_v60, %v9031_v18 }
 0x436   : > { %v3506_v53 = vsel %vm3499_vm8, %v3502_v29, %v3505_v27  ;;  %v3097_v63 = vmul.u32 %v3095_v51, %v3092_v61  ;;  %v3098_v15 = vmul.u32 %v3094_v8, %v3093_v46  ;;  %v3116_v62 = vand.u32 65535, %v3086_v33 }
 0x437   : > { %v3507_v50 = vsel %vm3496_vm7, nan, %v3506_v53  ;;  %v2982_v25 = vadd.s32 %v9170_v58, %v9168_v55  ;;  %v5910_v52 = vadd.s32 4294967294, %v2994_v32  ;;  %v3059_v37 = vshrl.u32 %v10333_v47, %v9160_v24 }
 0x438   : > { %5695 = vst [vmem:[%s6717_s9 + $0x88] sm:$0xff] %v3507_v50  ;;  %v3080_v45 = vsel %vm3078_vm2, %v3068_v35, 2102212464  ;;  %v3012_v18 = vsub.s32 4, %v9200_v41  ;;  %v3096_v21 = vmul.u32 %v3094_v8, %v3092_v61  ;;  %v3099_v49 = vmul.u32 %v3095_v51, %v3093_v46 }
 0x439   : > { %v3100_v26 = vshll.u32 %v3097_v63, 16  ;;  %vm2890_vm12 = vcmp.lt.s32.totalorder %v8996_v1, 0  ;;  %vm5911_vm13 = vcmp.lt.s32.totalorder %v5910_v52, 0  ;;  %v3101_v17 = vshrl.u32 %v3097_v63, 16 }
 0x43a   : > { %v3102_v23 = vshll.u32 %v3098_v15, 16  ;;  %v3119_v16 = vmul.u32 %v3117_v40, %v3092_v61  ;;  %v2997_v2 = vsel %vm5911_vm13, 0, %v5910_v52  ;;  %v3120_v58 = vmul.u32 %v3116_v62, %v3093_v46 }
 0x43b   : > { %vm3104_vm14 = vc.u32 %v3096_v21, %v3100_v26  ;;  %v3106_v55 = vadd.s32 %v3100_v26, %v3096_v21  ;;  %v2998_v43 = vsub.s32 32, %v2997_v2  ;;  %v3002_v24 = vsub.s32 4294967266, %v2997_v2 }
 0x43c   : > { %v3105_v22 = vsel %vm3104_vm14, 1, %v10343_v36  ;;  %v3118_v35 = vmul.u32 %v3116_v62, %v3092_v61  ;;  %v3121_v39 = vmul.u32 %v3117_v40, %v3093_v46  ;;  %v3122_v33 = vshll.u32 %v3119_v16, 16 }
 0x43d   : > { %v3107_v28 = vadd.s32 %v3105_v22, %v3099_v49  ;;  %vm3108_vm15 = vc.u32 %v3106_v55, %v3102_v23  ;;  %v2999_v8 = vshll.u32 %v2990_v10, %v2997_v2  ;;  %v3000_v51 = vshrl.u32 %v2982_v25, %v2998_v43 }
 0x43e   : > { %v3003_v29 = vadd.s32 127, %v3002_v24  ;;  %v3109_v27 = vsel %vm3108_vm15, 1, %v10343_v36  ;;  %v3124_v53 = vshll.u32 %v3120_v58, 16  ;;  %vm3126_vm0 = vc.u32 %v3118_v35, %v3122_v33 }
 0x43f   : > { %v3111_v13 = vadd.s32 %v3109_v27, %v3107_v28  ;;  %v3128_v32 = vadd.s32 %v3122_v33, %v3118_v35  ;;  %v3001_v50 = vor.u32 %v3000_v51, %v2999_v8  ;;  %v3079_v52 = vsel %vm3075_vm4, %v3059_v37, %v9198_v48 }
 0x440   : > { %v3004_v63 = vshll.u32 %v3003_v29, 23  ;;  %v3127_v61 = vsel %vm3126_vm0, 1, %v10343_v36  ;;  %v4128_v10 = vand.u32 2147483647, %v9236_v59  ;;  %v3081_v25 = vsel %vm3077_vm5, %v9192_v14, %v3080_v45 }
 0x441   : > { %v3112_v62 = vadd.s32 %v3111_v13, %v3101_v17  ;;  %v3129_v46 = vadd.s32 %v3127_v61, %v3121_v39  ;;  %vm3130_vm1 = vc.u32 %v3128_v32, %v3124_v53  ;;  %v3103_v21 = vshrl.u32 %v3098_v15, 16 }
 0x442   : > { %v3005_v40 = vor.u32 4788187, %v3004_v63  ;;  %v3131_v49 = vsel %vm3130_vm1, 1, %v10343_v36  ;;  %v3013_v26 = vsel %vm2890_vm12, %v3012_v18, %v9200_v41  ;;  %v3123_v48 = vshrl.u32 %v3119_v16, 16 }
 0x443   : > { %v3133_v37 = vadd.s32 %v3131_v49, %v3129_v46  ;;  %v4131_v17 = vand.u32 2139095040, %v9236_v59  ;;  %v3008_v2 = vcvt.s32.f32 %v3001_v50  ;;  %v3113_v55 = vadd.s32 %v3112_v62, %v3103_v21 }
 0x444   : > { %v3006_v23 = vand.u32 2147483647, %v3005_v40  ;;  %v9266_v43 = vadd.f32 %v9229_v60, %v9037_v19  ;;  %v3125_v24 = vshrl.u32 %v3120_v58, 16  ;;  %v4135_v45 = vand.u32 8388607, %v4128_v10 }
 0x445   : > { %v3134_v14 = vadd.s32 %v3133_v37, %v3123_v48  ;;  %v4132_v15 = vshrl.u32 %v4131_v17, 23  ;;  %v414_v41 = vmul.f32 %v10397_v31, %v6388_v5  ;;  %vm9274_vm3 = vcmp.le.f32.partialorder %v2888_v54, 0.7853982 }
 0x446   : > { %v3009_v16 = vmul.f32 %v3008_v2, %v3006_v23  ;;  %v3132_v22 = vadd.s32 %v3128_v32, %v3124_v53  ;;  %v3015_v19 = vsel %vm9274_vm3, 0, %v3013_v26  ;;  %v3082_v60 = vsel %vm3076_vm6, %v3079_v52, %v3081_v25 }
 0x447   : > { %v3135_v58 = vadd.s32 %v3134_v14, %v3125_v24  ;;  %v5933_v35 = vadd.s32 4294967169, %v4132_v15  ;;  %v9284_v31 = vadd.f32 %v9164_v44, %v9049_v57  ;;  %v9287_v54 = vadd.f32 %v9196_v0, %v414_v41 }
 0x448   : > { %v3010_v28 = vxor.u32 2147483648, %v3009_v16  ;;  %vm3138_vm2 = vc.u32 %v3113_v55, %v3132_v22  ;;  %v4136_v33 = vor.u32 8388608, %v4135_v45  ;;  %v4286_v51 = vand.u32 2139095040, %v9266_v43 }
 0x449   : > { %v3139_v39 = vadd.s32 1, %v3135_v58  ;;  %v4138_v8 = vadd.s32 1, %v5933_v35  ;;  %v3136_v29 = vmul.u32 %v9221_v20, %v3082_v60  ;;  %v3032_v44 = vadd.s32 3, %v3015_v19 }
 0x44a   : > { %v3011_v34 = vsel %vm2890_vm12, %v3010_v28, %v3009_v16  ;;  %v9296_v50 = vshll.u32 %v4136_v33, 8  ;;  %v4287_v63 = vshrl.u32 %v4286_v51, 23  ;;  %v9302_v49 = vadd.s32 %v3132_v22, %v3113_v55 }
 0x44b   : > { %v3014_v27 = vsel %vm9274_vm3, %v8996_v1, %v3011_v34  ;;  %v3140_v13 = vsel %vm3138_vm2, %v3139_v39, %v3135_v58  ;;  %vm4139_vm4 = vcmp.gt.s32.totalorder %v4138_v8, 0  ;;  %v9300_v25 = vand.u32 3, %v3032_v44 }
 0x44c   : > { %v3016_v57 = vmul.f32 %v3014_v27, %v3014_v27  ;;  %v3141_v0 = vadd.s32 %v3140_v13, %v3136_v29  ;;  %v4140_v53 = vsel %vm4139_vm4, %v4138_v8, 0  ;;  %v9305_v26 = vand.u32 65535, %v9296_v50 }
 0x44d   : > { %v4142_v32 = vand.u32 31, %v4140_v53  ;;  %v4283_v48 = vand.u32 2147483647, %v9266_v43  ;;  %v5936_v37 = vadd.s32 4294967169, %v4287_v63  ;;  %vm3045_vm5 = vcmp.lt.s32.totalorder %v9017_v9, 0 }
 0x44e   : > { %v3017_v52 = vmul.f32 -0.001358992, %v3016_v57  ;;  %v3024_v61 = vmul.f32 -0.00019511016, %v3016_v57  ;;  %v3142_v62 = vadd.s32 536870912, %v3141_v0  ;;  %v9309_v24 = vshrl.u32 %v4140_v53, 5 }
 0x44f   : > { %v9298_v46 = vsub.s32 32, %v4142_v32  ;;  %v4145_v14 = vshll.u32 %v10333_v47, %v4142_v32  ;;  %vm3038_vm6 = vcmp.eq.s32.totalorder %v9300_v25, 2  ;;  %v4148_v22 = vshll.u32 %v10337_v12, %v4142_v32 }
 0x450   : > { %v3018_v20 = vadd.f32 0.041655596, %v3017_v52  ;;  %v3025_v40 = vadd.f32 0.008332121, %v3024_v61  ;;  %v3143_v21 = vshrl.u32 %v3142_v62, 30  ;;  %vm3035_vm7 = vcmp.eq.s32.totalorder %v9300_v25, 0 }
 0x451   : > { %v4146_v15 = vshrl.u32 %v10337_v12, %v9298_v46  ;;  %v4149_v55 = vshrl.u32 %v10338_v42, %v9298_v46  ;;  %v4155_v45 = vshrl.u32 %v10339_v30, %v9298_v46  ;;  %v4151_v19 = vshll.u32 %v10338_v42, %v4142_v32 }
 0x452   : > { %v3019_v17 = vmul.f32 %v3018_v20, %v3016_v57  ;;  %v3026_v23 = vmul.f32 %v3025_v40, %v3016_v57  ;;  %v3144_v2 = vshll.u32 %v3143_v21, 30  ;;  %v4152_v60 = vshrl.u32 %v10345_v38, %v9298_v46 }
 0x453   : > { %v4154_v58 = vshll.u32 %v10345_v38, %v4142_v32  ;;  %v4158_v35 = vshrl.u32 %v10332_v11, %v9298_v46  ;;  %vm3034_vm8 = vcmp.lt.s32.totalorder %v9300_v25, 2  ;;  %vm3031_vm10 = vweird.f32 %v8996_v1 }
 0x454   : > { %v3020_v41 = vadd.f32 -0.4999988, %v3019_v17  ;;  %v3027_v18 = vadd.f32 -0.16666654, %v3026_v23  ;;  %v9319_v16 = vsub.s32 %v3141_v0, %v3144_v2  ;;  %v3167_v8 = vsub.s32 4, %v3143_v21 }
 0x455   : > { %v4147_v51 = vor.u32 %v4146_v15, %v4145_v14  ;;  %v4150_v34 = vor.u32 %v4149_v55, %v4148_v22  ;;  %v4156_v29 = vor.u32 %v4155_v45, %v4154_v58  ;;  %v4157_v53 = vshll.u32 %v10339_v30, %v4142_v32 }
 0x456   : > { %v3021_v28 = vmul.f32 %v3020_v41, %v3016_v57  ;;  %v3028_v39 = vmul.f32 %v3027_v18, %v3016_v57  ;;  %vm3146_vm9 = vcmp.lt.s32.totalorder %v9319_v16, 0  ;;  %v3147_v33 = vsub.s32 0, %v9319_v16 }
 0x457   : > { %v4153_v57 = vor.u32 %v4152_v60, %v4151_v19  ;;  %v4178_v52 = vshrl.u32 %v9296_v50, 16  ;;  %v9336_v61 = vadd.s32 1, %v5936_v37  ;;  %vm9340_vm11 = vcmp.le.f32.partialorder %v3043_v56, 0.7853982 }
 0x458   : > { %v3022_v13 = vadd.f32 1.0, %v3021_v28  ;;  %v3029_v44 = vadd.f32 1.0, %v3028_v39  ;;  %v3148_v0 = vsel %vm3146_vm9, %v3147_v33, %v9319_v16  ;;  %v4159_v17 = vor.u32 %v4158_v35, %v4157_v53 }
 0x459   : > { %v3149_v63 = vclz %v3148_v0  ;;  %vm4160_vm12 = vcmp.lt.s32.totalorder %v9309_v24, 1  ;;  %v9347_v32 = vsel %vm3045_vm5, %v3167_v8, %v3143_v21  ;;  %vm4163_vm13 = vcmp.lt.s32.totalorder %v9309_v24, 4 }
 0x45a   : > { %v3030_v62 = vmul.f32 %v3029_v44, %v3014_v27  ;;  %v3039_v20 = vxor.u32 2147483648, %v3022_v13  ;;  %v4168_v27 = vsel %vm4160_vm12, %v4147_v51, %v4150_v34  ;;  %vm4161_vm14 = vcmp.lt.s32.totalorder %v9309_v24, 2 }
 0x45b   : > { %v5913_v23 = vadd.s32 4294967294, %v3149_v63  ;;  %vm4162_vm15 = vcmp.lt.s32.totalorder %v9309_v24, 3  ;;  %v4169_v56 = vsel %vm4163_vm13, %v4156_v29, 920167782  ;;  %v4172_v14 = vsel %vm4160_vm12, %v4150_v34, %v4153_v57 }
 0x45c   : > { %v3036_v37 = vxor.u32 2147483648, %v3030_v62  ;;  %v3040_v2 = vsel %vm3038_vm6, %v3039_v20, %v3030_v62  ;;  %v4170_v21 = vsel %vm4162_vm15, %v4153_v57, %v4169_v56  ;;  %v4173_v41 = vsel %vm4163_vm13, %v4159_v17, 1326507024 }
 0x45d   : > { %vm5914_vm0 = vcmp.lt.s32.totalorder %v5913_v23, 0  ;;  %v4171_v45 = vsel %vm4161_vm14, %v4168_v27, %v4170_v21  ;;  %v4165_v60 = vsel %vm4163_vm13, %v4153_v57, 2102212464  ;;  %v4174_v35 = vsel %vm4162_vm15, %v4156_v29, %v4173_v41 }
 0x45e   : > { %v3037_v15 = vsel %vm3035_vm7, %v3022_v13, %v3036_v37  ;;  %v3152_v55 = vsel %vm5914_vm0, 0, %v5913_v23  ;;  %v4201_v28 = vand.u32 65535, %v4171_v45  ;;  %v4202_v39 = vshrl.u32 %v4171_v45, 16 }
 0x45f   : > { %v3041_v18 = vsel %vm3034_vm8, %v3037_v15, %v3040_v2  ;;  %v3153_v22 = vsub.s32 32, %v3152_v55  ;;  %v3157_v19 = vsub.s32 4294967266, %v3152_v55  ;;  %v3154_v33 = vshll.u32 %v9319_v16, %v3152_v55 }
 0x460   : > { %v3042_v58 = vsel %vm3031_vm10, nan, %v3041_v18  ;;  %v4175_v25 = vsel %vm4161_vm14, %v4172_v14, %v4174_v35  ;;  %v4144_v44 = vshrl.u32 %v10333_v47, %v9298_v46  ;;  %v4204_v53 = vmul.u32 %v4202_v39, %v9305_v26 }
 0x461   : > { %v3155_v8 = vshrl.u32 %v9302_v49, %v3153_v22  ;;  %v3158_v13 = vadd.s32 127, %v3157_v19  ;;  %5692 = vst [vmem:[%s6717_s9 + $0x70] sm:$0xff] %v3042_v58  ;;  %v4179_v0 = vand.u32 65535, %v4175_v25  ;;  %v4180_v1 = vshrl.u32 %v4175_v25, 16 }
 0x462   : > { %v3170_v16 = vsel %vm9340_vm11, 0, %v9347_v32  ;;  %v4205_v57 = vmul.u32 %v4201_v28, %v4178_v52  ;;  %v4164_v49 = vsel %vm4160_vm12, %v4144_v44, %v4147_v51  ;;  %v4166_v62 = vsel %vm4162_vm15, %v4150_v34, %v4165_v60 }
 0x463   : > { %v3156_v63 = vor.u32 %v3155_v8, %v3154_v33  ;;  %v3159_v29 = vshll.u32 %v3158_v13, 23  ;;  %v4182_v20 = vmul.u32 %v4180_v1, %v9305_v26  ;;  %v4183_v46 = vmul.u32 %v4179_v0, %v4178_v52 }
 0x464   : > { %v4203_v23 = vmul.u32 %v4201_v28, %v9305_v26  ;;  %v4206_v27 = vmul.u32 %v4202_v39, %v4178_v52  ;;  %v4207_v37 = vshll.u32 %v4204_v53, 16  ;;  %v4181_v2 = vmul.u32 %v4179_v0, %v9305_v26 }
 0x465   : > { %v3160_v17 = vor.u32 4788187, %v3159_v29  ;;  %v3163_v56 = vcvt.s32.f32 %v3156_v63  ;;  %v4184_v21 = vmul.u32 %v4180_v1, %v4178_v52  ;;  %v4185_v32 = vshll.u32 %v4182_v20, 16 }
 0x466   : > { %v4187_v15 = vshll.u32 %v4183_v46, 16  ;;  %v4209_v55 = vshll.u32 %v4205_v57, 16  ;;  %vm4211_vm1 = vc.u32 %v4203_v23, %v4207_v37  ;;  %v4213_v45 = vadd.s32 %v4207_v37, %v4203_v23 }
 0x467   : > { %v3161_v14 = vand.u32 2147483647, %v3160_v17  ;;  %vm4189_vm3 = vc.u32 %v4181_v2, %v4185_v32  ;;  %v4191_v51 = vadd.s32 %v4185_v32, %v4181_v2  ;;  %v4212_v34 = vsel %vm4211_vm1, 1, %v10343_v36 }
 0x468   : > { %v4190_v18 = vsel %vm4189_vm3, 1, %v10343_v36  ;;  %v4214_v22 = vadd.s32 %v4212_v34, %v4206_v27  ;;  %vm4294_vm2 = vcmp.gt.s32.totalorder %v9336_v61, 0  ;;  %v4208_v26 = vshrl.u32 %v4204_v53, 16 }
 0x469   : > { %v3164_v41 = vmul.f32 %v3163_v56, %v3161_v14  ;;  %v4192_v19 = vadd.s32 %v4190_v18, %v4184_v21  ;;  %vm4193_vm4 = vc.u32 %v4191_v51, %v4187_v15  ;;  %vm4215_vm6 = vc.u32 %v4213_v45, %v4209_v55 }
 0x46a   : > { %v4194_v60 = vsel %vm4193_vm4, 1, %v10343_v36  ;;  %v4216_v58 = vsel %vm4215_vm6, 1, %v10343_v36  ;;  %v4295_v35 = vsel %vm4294_vm2, %v9336_v61, 0  ;;  %v4186_v28 = vshrl.u32 %v4182_v20, 16 }
 0x46b   : > { %v3165_v52 = vxor.u32 2147483648, %v3164_v41  ;;  %v4196_v39 = vadd.s32 %v4194_v60, %v4192_v19  ;;  %v4218_v33 = vadd.s32 %v4216_v58, %v4214_v22  ;;  %v4297_v8 = vand.u32 31, %v4295_v35 }
 0x46c   : > { %v4167_v25 = vsel %vm4161_vm14, %v4164_v49, %v4166_v62  ;;  %v4188_v44 = vshrl.u32 %v4183_v46, 16  ;;  %v4210_v0 = vshrl.u32 %v4205_v57, 16  ;;  %v3187_v20 = vadd.s32 3, %v3170_v16 }
 0x46d   : > { %v3166_v13 = vsel %vm3045_vm5, %v3165_v52, %v3164_v41  ;;  %v4197_v53 = vadd.s32 %v4196_v39, %v4186_v28  ;;  %v4219_v63 = vadd.s32 %v4218_v33, %v4208_v26  ;;  %v9407_v29 = vsub.s32 32, %v4297_v8 }
 0x46e   : > { %v3169_v1 = vsel %vm9340_vm11, %v9017_v9, %v3166_v13  ;;  %v4290_v17 = vand.u32 8388607, %v4283_v48  ;;  %v9413_v27 = vadd.s32 %v4213_v45, %v4209_v55  ;;  %v4221_v57 = vmul.u32 %v9296_v50, %v4167_v25 }
 0x46f   : > { %v3171_v61 = vmul.f32 %v3169_v1, %v3169_v1  ;;  %v9411_v23 = vadd.s32 %v4197_v53, %v4188_v44  ;;  %v4220_v24 = vadd.s32 %v4219_v63, %v4210_v0  ;;  %v9416_v40 = vshrl.u32 %v4295_v35, 5 }
 0x470   : > { %v4303_v46 = vshll.u32 %v10337_v12, %v4297_v8  ;;  %v4304_v37 = vshrl.u32 %v10338_v42, %v9407_v29  ;;  %v4307_v56 = vshrl.u32 %v10345_v38, %v9407_v29  ;;  %v4301_v50 = vshrl.u32 %v10337_v12, %v9407_v29 }
 0x471   : > { %v3172_v49 = vmul.f32 -0.001358992, %v3171_v61  ;;  %v3179_v62 = vmul.f32 -0.00019511016, %v3171_v61  ;;  %vm4223_vm5 = vc.u32 %v9411_v23, %v9413_v27  ;;  %v4224_v16 = vadd.s32 1, %v4220_v24 }
 0x472   : > { %v4306_v32 = vshll.u32 %v10338_v42, %v4297_v8  ;;  %v4309_v15 = vshll.u32 %v10345_v38, %v4297_v8  ;;  %v4310_v55 = vshrl.u32 %v10339_v30, %v9407_v29  ;;  %v4312_v51 = vshll.u32 %v10339_v30, %v4297_v8 }
 0x473   : > { %v3173_v2 = vadd.f32 0.041655596, %v3172_v49  ;;  %v3180_v21 = vadd.f32 0.008332121, %v3179_v62  ;;  %v4225_v14 = vsel %vm4223_vm5, %v4224_v16, %v4220_v24  ;;  %v4313_v18 = vshrl.u32 %v10332_v11, %v9407_v29 }
 0x474   : > { %v4226_v41 = vadd.s32 %v4225_v14, %v4221_v57  ;;  %v4300_v22 = vshll.u32 %v10333_v47, %v4297_v8  ;;  %v9435_v19 = vor.u32 %v4304_v37, %v4303_v46  ;;  %v4308_v26 = vor.u32 %v4307_v56, %v4306_v32 }
 0x475   : > { %v3174_v34 = vmul.f32 %v3173_v2, %v3171_v61  ;;  %v3181_v45 = vmul.f32 %v3180_v21, %v3171_v61  ;;  %v4311_v52 = vor.u32 %v4310_v55, %v4309_v15  ;;  %v4314_v28 = vor.u32 %v4313_v18, %v4312_v51 }
 0x476   : > { %v4227_v35 = vadd.s32 536870912, %v4226_v41  ;;  %v3188_v39 = vand.u32 3, %v3187_v20  ;;  %v4291_v33 = vor.u32 8388608, %v4290_v17  ;;  %v9437_v13 = vor.u32 %v4301_v50, %v4300_v22 }
 0x477   : > { %v3175_v60 = vadd.f32 -0.4999988, %v3174_v34  ;;  %v3182_v58 = vadd.f32 -0.16666654, %v3181_v45  ;;  %vm4318_vm7 = vcmp.lt.s32.totalorder %v9416_v40, 4  ;;  %vm4315_vm8 = vcmp.lt.s32.totalorder %v9416_v40, 1 }
 0x478   : > { %v9439_v0 = vshrl.u32 %v4227_v35, 30  ;;  %vm4317_vm9 = vcmp.lt.s32.totalorder %v9416_v40, 3  ;;  %v4324_v8 = vsel %vm4318_vm7, %v4311_v52, 920167782  ;;  %v4328_v53 = vsel %vm4318_vm7, %v4314_v28, 1326507024 }
 0x479   : > { %v3176_v25 = vmul.f32 %v3175_v60, %v3171_v61  ;;  %v3183_v44 = vmul.f32 %v3182_v58, %v3171_v61  ;;  %v4327_v61 = vsel %vm4315_vm8, %v9435_v19, %v4308_v26  ;;  %v4323_v24 = vsel %vm4315_vm8, %v9437_v13, %v9435_v19 }
 0x47a   : > { %v4229_v17 = vshll.u32 %v9439_v0, 30  ;;  %v4325_v57 = vsel %vm4317_vm9, %v4308_v26, %v4324_v8  ;;  %v4329_v49 = vsel %vm4317_vm9, %v4311_v52, %v4328_v53  ;;  %v9460_v62 = vshll.u32 %v4291_v33, 8  ;;  %v659_v52 = vpop.permute.xlu0 %658 }
 0x47b   : > { %v3177_v63 = vadd.f32 1.0, %v3176_v25  ;;  %v3184_v20 = vadd.f32 1.0, %v3183_v44  ;;  %vm4316_vm10 = vcmp.lt.s32.totalorder %v9416_v40, 2  ;;  %vm3186_vm11 = vweird.f32 %v9017_v9  ;;  %v10407_v40 = vld [vmem:[#allocation6_spill] sm:$0xff] }
 0x47c   : > { %v4230_v37 = vsub.s32 %v4226_v41, %v4229_v17  ;;  %vm3189_vm12 = vcmp.lt.s32.totalorder %v3188_v39, 2  ;;  %vm3190_vm13 = vcmp.eq.s32.totalorder %v3188_v39, 0  ;;  %v4330_v56 = vsel %vm4316_vm10, %v4327_v61, %v4329_v49 }
 0x47d   : > { %v3185_v46 = vmul.f32 %v3184_v20, %v3169_v1  ;;  %v3194_v16 = vxor.u32 2147483648, %v3177_v63  ;;  %v4326_v50 = vsel %vm4316_vm10, %v4323_v24, %v4325_v57  ;;  %vm3193_vm15 = vcmp.eq.s32.totalorder %v3188_v39, 2 }
 0x47e   : > { %vm4231_vm14 = vcmp.lt.s32.totalorder %v4230_v37, 0  ;;  %v4232_v21 = vsub.s32 0, %v4230_v37  ;;  %v4332_v1 = vand.u32 65535, %v9460_v62  ;;  %v4334_v32 = vand.u32 65535, %v4330_v56 }
 0x47f   : > { %v3191_v2 = vxor.u32 2147483648, %v3185_v46  ;;  %v4335_v14 = vshrl.u32 %v4330_v56, 16  ;;  %v3195_v55 = vsel %vm3193_vm15, %v3194_v16, %v3185_v46  ;;  %v4333_v34 = vshrl.u32 %v9460_v62, 16 }
 0x480   : > { %v4233_v51 = vsel %vm4231_vm14, %v4232_v21, %v4230_v37  ;;  %v4299_v18 = vshrl.u32 %v10333_v47, %v9407_v29  ;;  %v4357_v22 = vshrl.u32 %v4326_v50, 16  ;;  %v4356_v28 = vand.u32 65535, %v4326_v50 }
 0x481   : > { %v3192_v15 = vsel %vm3190_vm13, %v3177_v63, %v3191_v2  ;;  %v4234_v41 = vclz %v4233_v51  ;;  %v4337_v58 = vmul.u32 %v4335_v14, %v4332_v1  ;;  %v4338_v35 = vmul.u32 %v4334_v32, %v4333_v34 }
 0x482   : > { %v3196_v45 = vsel %vm3189_vm12, %v3192_v15, %v3195_v55  ;;  %v4222_v39 = vadd.s32 %v9413_v27, %v9411_v23  ;;  %v4252_v25 = vsub.s32 4, %v9439_v0  ;;  %v4320_v44 = vsel %vm4318_vm7, %v4308_v26, 2102212464 }
 0x483   : > { %v3197_v60 = vsel %vm3186_vm11, nan, %v3196_v45  ;;  %v5934_v33 = vadd.s32 4294967294, %v4234_v41  ;;  %v4336_v8 = vmul.u32 %v4334_v32, %v4332_v1  ;;  %v4339_v29 = vmul.u32 %v4335_v14, %v4333_v34 }
 0x484   : > { %5693 = vst [vmem:[%s6717_s9 + $0x78] sm:$0xff] %v3197_v60  ;;  %v4340_v53 = vshll.u32 %v4337_v58, 16  ;;  %v9481_v63 = vadd.f32 %v659_v52, %v9284_v31  ;;  %vm4130_vm0 = vcmp.lt.s32.totalorder %v9236_v59, 0  ;;  %v4341_v9 = vshrl.u32 %v4337_v58, 16 }
 0x485   : > { %vm5935_vm1 = vcmp.lt.s32.totalorder %v5934_v33, 0  ;;  %v4342_v20 = vshll.u32 %v4338_v35, 16  ;;  %v4359_v17 = vmul.u32 %v4357_v22, %v4332_v1  ;;  %v4360_v27 = vmul.u32 %v4356_v28, %v4333_v34 }
 0x486   : > { %v4237_v61 = vsel %vm5935_vm1, 0, %v5934_v33  ;;  %vm4344_vm3 = vc.u32 %v4336_v8, %v4340_v53  ;;  %v4346_v23 = vadd.s32 %v4340_v53, %v4336_v8  ;;  %v4358_v49 = vmul.u32 %v4356_v28, %v4332_v1 }
 0x487   : > { %v4238_v24 = vsub.s32 32, %v4237_v61  ;;  %v4242_v57 = vsub.s32 4294967266, %v4237_v61  ;;  %v4345_v26 = vsel %vm4344_vm3, 1, %v10343_v36  ;;  %v4361_v16 = vmul.u32 %v4357_v22, %v4333_v34 }
 0x488   : > { %v4347_v46 = vadd.s32 %v4345_v26, %v4339_v29  ;;  %vm4348_vm2 = vc.u32 %v4346_v23, %v4342_v20  ;;  %v4362_v31 = vshll.u32 %v4359_v17, 16  ;;  %v4239_v56 = vshll.u32 %v4230_v37, %v4237_v61 }
 0x489   : > { %v4240_v2 = vshrl.u32 %v4222_v39, %v4238_v24  ;;  %v4243_v21 = vadd.s32 127, %v4242_v57  ;;  %v4349_v50 = vsel %vm4348_vm2, 1, %v10343_v36  ;;  %v4364_v14 = vshll.u32 %v4360_v27, 16 }
 0x48a   : > { %v4351_v32 = vadd.s32 %v4349_v50, %v4347_v46  ;;  %vm4366_vm4 = vc.u32 %v4358_v49, %v4362_v31  ;;  %v4368_v15 = vadd.s32 %v4362_v31, %v4358_v49  ;;  %v4319_v45 = vsel %vm4315_vm8, %v4299_v18, %v9437_v13 }
 0x48b   : > { %v4241_v55 = vor.u32 %v4240_v2, %v4239_v56  ;;  %v4244_v51 = vshll.u32 %v4243_v21, 23  ;;  %v4367_v1 = vsel %vm4366_vm4, 1, %v10343_v36  ;;  %v4321_v37 = vsel %vm4317_vm9, %v9435_v19, %v4320_v44 }
 0x48c   : > { %v4352_v34 = vadd.s32 %v4351_v32, %v4341_v9  ;;  %v4369_v41 = vadd.s32 %v4367_v1, %v4361_v16  ;;  %vm4370_vm6 = vc.u32 %v4368_v15, %v4364_v14  ;;  %v4343_v60 = vshrl.u32 %v4338_v35, 16 }
 0x48d   : > { %v4245_v22 = vor.u32 4788187, %v4244_v51  ;;  %v4371_v58 = vsel %vm4370_vm6, 1, %v10343_v36  ;;  %v3818_v28 = vand.u32 2147483647, %v9481_v63  ;;  %v4253_v39 = vsel %vm4130_vm0, %v4252_v25, %v9439_v0  ;;  %v10408_v51 = vld [vmem:[#allocation10_spill] sm:$0xff] }
 0x48e   : > { %v4363_v13 = vshrl.u32 %v4359_v17, 16  ;;  %v4373_v18 = vadd.s32 %v4371_v58, %v4369_v41  ;;  %v3821_v33 = vand.u32 2139095040, %v9481_v63  ;;  %v4248_v29 = vcvt.s32.f32 %v4241_v55  ;;  %v10409_v41 = vld [vmem:[#allocation12_spill] sm:$0xff] }
 0x48f   : > { %v4246_v8 = vand.u32 2147483647, %v4245_v22  ;;  %v4353_v19 = vadd.s32 %v4352_v34, %v4343_v60  ;;  %v4365_v44 = vshrl.u32 %v4360_v27, 16  ;;  %v9500_v9 = vadd.f32 %v659_v52, %v9287_v54 }
 0x490   : > { %v4374_v53 = vadd.s32 %v4373_v18, %v4363_v13  ;;  %v3822_v35 = vshrl.u32 %v3821_v33, 23  ;;  %v3825_v20 = vand.u32 8388607, %v3818_v28  ;;  %v4372_v23 = vadd.s32 %v4368_v15, %v4364_v14 }
 0x491   : > { %v4249_v61 = vmul.f32 %v4248_v29, %v4246_v8  ;;  %vm9506_vm5 = vcmp.le.f32.partialorder %v4128_v10, 0.7853982  ;;  %v4322_v25 = vsel %vm4316_vm10, %v4319_v45, %v4321_v37  ;;  %v3976_v49 = vand.u32 2139095040, %v9500_v9 }
 0x492   : > { %v4375_v17 = vadd.s32 %v4374_v53, %v4365_v44  ;;  %v5927_v27 = vadd.s32 4294967169, %v3822_v35  ;;  %v4255_v54 = vsel %vm9506_vm5, 0, %v4253_v39  ;;  %vm4378_vm7 = vc.u32 %v4353_v19, %v4372_v23 }
 0x493   : > { %v4250_v24 = vxor.u32 2147483648, %v4249_v61  ;;  %v3826_v57 = vor.u32 8388608, %v3825_v20  ;;  %v4376_v46 = vmul.u32 %v9460_v62, %v4322_v25  ;;  %v9520_v16 = vmul.f32 %v10407_v40, %v6386_v4 }
 0x494   : > { %v4379_v52 = vadd.s32 1, %v4375_v17  ;;  %v3828_v26 = vadd.s32 1, %v5927_v27  ;;  %v4272_v21 = vadd.s32 3, %v4255_v54  ;;  %v9531_v62 = vmul.f32 %v10407_v40, %v6388_v5 }
 0x495   : > { %v4251_v10 = vsel %vm4130_vm0, %v4250_v24, %v4249_v61  ;;  %v9533_v15 = vshll.u32 %v3826_v57, 8  ;;  %v3977_v55 = vshrl.u32 %v3976_v49, 23  ;;  %v9537_v45 = vmul.f32 %v10408_v51, %v6386_v4 }
 0x496   : > { %v9525_v31 = vsel %vm9506_vm5, %v9236_v59, %v4251_v10  ;;  %v4380_v56 = vsel %vm4378_vm7, %v4379_v52, %v4375_v17  ;;  %vm3829_vm8 = vcmp.gt.s32.totalorder %v3828_v26, 0  ;;  %v9541_v22 = vmul.f32 %v10409_v41, %v6390_v6 }
 0x497   : > { %v4256_v2 = vmul.f32 %v9525_v31, %v9525_v31  ;;  %v4381_v50 = vadd.s32 %v4380_v56, %v4376_v46  ;;  %v3830_v32 = vsel %vm3829_vm8, %v3828_v26, 0  ;;  %v9545_v60 = vmul.f32 %v10409_v41, %v6392_v7 }
 0x498   : > { %v3832_v14 = vand.u32 31, %v3830_v32  ;;  %v9549_v58 = vmul.f32 %v7723_v3, %v6390_v6  ;;  %v9553_v18 = vand.u32 3, %v4272_v21  ;;  %v9555_v8 = vadd.s32 %v4372_v23, %v4353_v19 }
 0x499   : > { %v4257_v1 = vmul.f32 -0.001358992, %v4256_v2  ;;  %v4264_v37 = vmul.f32 -0.00019511016, %v4256_v2  ;;  %v4382_v34 = vadd.s32 536870912, %v4381_v50  ;;  %v9558_v29 = vand.u32 65535, %v9533_v15 }
 0x49a   : > { %v9551_v39 = vsub.s32 32, %v3832_v14  ;;  %v3973_v44 = vand.u32 2147483647, %v9500_v9  ;;  %v5930_v53 = vadd.s32 4294967169, %v3977_v55  ;;  %vm4285_vm9 = vcmp.lt.s32.totalorder %v9266_v43, 0 }
 0x49b   : > { %v4258_v13 = vadd.f32 0.041655596, %v4257_v1  ;;  %v4265_v4 = vadd.f32 0.008332121, %v4264_v37  ;;  %v4383_v33 = vshrl.u32 %v4382_v34, 30  ;;  %v9562_v61 = vshrl.u32 %v3830_v32, 5 }
 0x49c   : > { %v3835_v0 = vshll.u32 %v10333_v47, %v3832_v14  ;;  %v3836_v25 = vshrl.u32 %v10337_v12, %v9551_v39  ;;  %v3839_v19 = vshrl.u32 %v10338_v42, %v9551_v39  ;;  %v3845_v23 = vshrl.u32 %v10339_v30, %v9551_v39 }
 0x49d   : > { %v4259_v35 = vmul.f32 %v4258_v13, %v4256_v2  ;;  %v4266_v20 = vmul.f32 %v4265_v4, %v4256_v2  ;;  %v4384_v6 = vshll.u32 %v4383_v33, 30  ;;  %vm4278_vm10 = vcmp.eq.s32.totalorder %v9553_v18, 2 }
 0x49e   : > { %v3838_v54 = vshll.u32 %v10337_v12, %v3832_v14  ;;  %vm4275_vm11 = vcmp.eq.s32.totalorder %v9553_v18, 0  ;;  %v3841_v52 = vshll.u32 %v10338_v42, %v3832_v14  ;;  %v3842_v57 = vshrl.u32 %v10345_v38, %v9551_v39 }
 0x49f   : > { %v4260_v17 = vadd.f32 -0.4999988, %v4259_v35  ;;  %v4267_v27 = vadd.f32 -0.16666654, %v4266_v20  ;;  %v9572_v24 = vsub.s32 %v4381_v50, %v4384_v6  ;;  %v3844_v26 = vshll.u32 %v10345_v38, %v3832_v14 }
 0x4a0   : > { %v3848_v49 = vshrl.u32 %v10332_v11, %v9551_v39  ;;  %vm4274_vm12 = vcmp.lt.s32.totalorder %v9553_v18, 2  ;;  %vm4271_vm14 = vweird.f32 %v9236_v59  ;;  %v4407_v56 = vsub.s32 4, %v4383_v33 }
 0x4a1   : > { %v4261_v10 = vmul.f32 %v4260_v17, %v4256_v2  ;;  %v4268_v46 = vmul.f32 %v4267_v27, %v4256_v2  ;;  %vm4386_vm13 = vcmp.lt.s32.totalorder %v9572_v24, 0  ;;  %v4387_v40 = vsub.s32 0, %v9572_v24 }
 0x4a2   : > { %v3837_v21 = vor.u32 %v3836_v25, %v3835_v0  ;;  %v3840_v50 = vor.u32 %v3839_v19, %v3838_v54  ;;  %v3846_v32 = vor.u32 %v3845_v23, %v3844_v26  ;;  %v3847_v34 = vshll.u32 %v10339_v30, %v3832_v14 }
 0x4a3   : > { %v4262_v55 = vadd.f32 1.0, %v4261_v10  ;;  %v4269_v1 = vadd.f32 1.0, %v4268_v46  ;;  %v4388_v37 = vsel %vm4386_vm13, %v4387_v40, %v9572_v24  ;;  %v3843_v2 = vor.u32 %v3842_v57, %v3841_v52 }
 0x4a4   : > { %v4389_v41 = vclz %v4388_v37  ;;  %v3868_v13 = vshrl.u32 %v9533_v15, 16  ;;  %v9589_v4 = vadd.s32 1, %v5930_v53  ;;  %vm9594_vm15 = vcmp.le.f32.partialorder %v4283_v48, 0.7853982 }
 0x4a5   : > { %v4270_v35 = vmul.f32 %v4269_v1, %v9525_v31  ;;  %v4279_v20 = vxor.u32 2147483648, %v4262_v55  ;;  %v3849_v0 = vor.u32 %v3848_v49, %v3847_v34  ;;  %vm3850_vm0 = vcmp.lt.s32.totalorder %v9562_v61, 1 }
 0x4a6   : > { %v5937_v25 = vadd.s32 4294967294, %v4389_v41  ;;  %v9601_v14 = vsel %vm4285_vm9, %v4407_v56, %v4383_v33  ;;  %vm3853_vm1 = vcmp.lt.s32.totalorder %v9562_v61, 4  ;;  %v3858_v31 = vsel %vm3850_vm0, %v3837_v21, %v3840_v50 }
 0x4a7   : > { %v4276_v53 = vxor.u32 2147483648, %v4270_v35  ;;  %vm3851_vm3 = vcmp.lt.s32.totalorder %v9562_v61, 2  ;;  %vm3852_vm2 = vcmp.lt.s32.totalorder %v9562_v61, 3  ;;  %v3859_v48 = vsel %vm3853_vm1, %v3846_v32, 920167782 }
 0x4a8   : > { %v4280_v19 = vsel %vm4278_vm10, %v4279_v20, %v4270_v35  ;;  %vm5938_vm4 = vcmp.lt.s32.totalorder %v5937_v25, 0  ;;  %v3860_v33 = vsel %vm3852_vm2, %v3843_v2, %v3859_v48  ;;  %v3862_v23 = vsel %vm3850_vm0, %v3840_v50, %v3843_v2 }
 0x4a9   : > { %v4277_v17 = vsel %vm4275_vm11, %v4262_v55, %v4276_v53  ;;  %v4392_v27 = vsel %vm5938_vm4, 0, %v5937_v25  ;;  %v3861_v54 = vsel %vm3851_vm3, %v3858_v31, %v3860_v33  ;;  %v3863_v52 = vsel %vm3853_vm1, %v3849_v0, 1326507024 }
 0x4aa   : > { %v4281_v57 = vsel %vm4274_vm12, %v4277_v17, %v4280_v19  ;;  %v4393_v26 = vsub.s32 32, %v4392_v27  ;;  %v4397_v49 = vsub.s32 4294967266, %v4392_v27  ;;  %v3855_v10 = vsel %vm3853_vm1, %v3843_v2, 2102212464 }
 0x4ab   : > { %v4282_v46 = vsel %vm4271_vm14, nan, %v4281_v57  ;;  %v3864_v40 = vsel %vm3852_vm2, %v3846_v32, %v3863_v52  ;;  %v3891_v56 = vand.u32 65535, %v3861_v54  ;;  %v3892_v55 = vshrl.u32 %v3861_v54, 16 }
 0x4ac   : > { %v4394_v1 = vshll.u32 %v9572_v24, %v4392_v27  ;;  %v4395_v37 = vshrl.u32 %v9555_v8, %v4393_v26  ;;  %v4398_v34 = vadd.s32 127, %v4397_v49  ;;  %5700 = vst [vmem:[%s6717_s9 + $0xb0] sm:$0xff] %v4282_v46  ;;  %v3865_v18 = vsel %vm3851_vm3, %v3862_v23, %v3864_v40 }
 0x4ad   : > { %v3834_v41 = vshrl.u32 %v10333_v47, %v9551_v39  ;;  %v3869_v2 = vand.u32 65535, %v3865_v18  ;;  %v3870_v59 = vshrl.u32 %v3865_v18, 16  ;;  %v3894_v35 = vmul.u32 %v3892_v55, %v9558_v29 }
 0x4ae   : > { %v4396_v20 = vor.u32 %v4395_v37, %v4394_v1  ;;  %v4399_v32 = vshll.u32 %v4398_v34, 23  ;;  %v4410_v24 = vsel %vm9594_vm15, 0, %v9601_v14  ;;  %v3895_v0 = vmul.u32 %v3891_v56, %v3868_v13 }
 0x4af   : > { %v3854_v8 = vsel %vm3850_vm0, %v3834_v41, %v3837_v21  ;;  %v3856_v25 = vsel %vm3852_vm2, %v3840_v50, %v3855_v10  ;;  %v3872_v31 = vmul.u32 %v3870_v59, %v9558_v29  ;;  %v3873_v39 = vmul.u32 %v3869_v2, %v3868_v13 }
 0x4b0   : > { %v4400_v53 = vor.u32 4788187, %v4399_v32  ;;  %v3893_v48 = vmul.u32 %v3891_v56, %v9558_v29  ;;  %v3896_v19 = vmul.u32 %v3892_v55, %v3868_v13  ;;  %v3897_v33 = vshll.u32 %v3894_v35, 16 }
 0x4b1   : > { %v4403_v23 = vcvt.s32.f32 %v4396_v20  ;;  %v3871_v17 = vmul.u32 %v3869_v2, %v9558_v29  ;;  %v3874_v27 = vmul.u32 %v3870_v59, %v3868_v13  ;;  %v3875_v14 = vshll.u32 %v3872_v31, 16 }
 0x4b2   : > { %v4401_v54 = vand.u32 2147483647, %v4400_v53  ;;  %v3877_v52 = vshll.u32 %v3873_v39, 16  ;;  %v3899_v57 = vshll.u32 %v3895_v0, 16  ;;  %vm3901_vm6 = vc.u32 %v3893_v48, %v3897_v33 }
 0x4b3   : > { %vm3879_vm5 = vc.u32 %v3871_v17, %v3875_v14  ;;  %v3881_v21 = vadd.s32 %v3875_v14, %v3871_v17  ;;  %v3902_v50 = vsel %vm3901_vm6, 1, %v10343_v36  ;;  %v3903_v26 = vadd.s32 %v3897_v33, %v3893_v48 }
 0x4b4   : > { %v4404_v49 = vmul.f32 %v4403_v23, %v4401_v54  ;;  %v3880_v10 = vsel %vm3879_vm5, 1, %v10343_v36  ;;  %v3904_v46 = vadd.s32 %v3902_v50, %v3896_v19  ;;  %vm3984_vm7 = vcmp.gt.s32.totalorder %v9589_v4, 0 }
 0x4b5   : > { %v3882_v40 = vadd.s32 %v3880_v10, %v3874_v27  ;;  %vm3883_vm8 = vc.u32 %v3881_v21, %v3877_v52  ;;  %v3898_v29 = vshrl.u32 %v3894_v35, 16  ;;  %vm3905_vm10 = vc.u32 %v3903_v26, %v3899_v57 }
 0x4b6   : > { %v4405_v13 = vxor.u32 2147483648, %v4404_v49  ;;  %v3884_v56 = vsel %vm3883_vm8, 1, %v10343_v36  ;;  %v3906_v55 = vsel %vm3905_vm10, 1, %v10343_v36  ;;  %v3985_v1 = vsel %vm3984_vm7, %v9589_v4, 0 }
 0x4b7   : > { %v3876_v37 = vshrl.u32 %v3872_v31, 16  ;;  %v3886_v34 = vadd.s32 %v3884_v56, %v3882_v40  ;;  %v3908_v18 = vadd.s32 %v3906_v55, %v3904_v46  ;;  %v3987_v41 = vand.u32 31, %v3985_v1 }
 0x4b8   : > { %v4406_v2 = vsel %vm4285_vm9, %v4405_v13, %v4404_v49  ;;  %v3857_v59 = vsel %vm3851_vm3, %v3854_v8, %v3856_v25  ;;  %v3878_v20 = vshrl.u32 %v3873_v39, 16  ;;  %v3900_v35 = vshrl.u32 %v3895_v0, 16 }
 0x4b9   : > { %v4409_v32 = vsel %vm9594_vm15, %v9266_v43, %v4406_v2  ;;  %v3887_v53 = vadd.s32 %v3886_v34, %v3876_v37  ;;  %v3909_v48 = vadd.s32 %v3908_v18, %v3898_v29  ;;  %v9661_v19 = vsub.s32 32, %v3987_v41 }
 0x4ba   : > { %v9665_v4 = vmul.f32 %v7723_v3, %v6392_v7  ;;  %v4411_v31 = vmul.f32 %v4409_v32, %v4409_v32  ;;  %v4427_v33 = vadd.s32 3, %v4410_v24  ;;  %v3980_v61 = vand.u32 8388607, %v3973_v44 }
 0x4bb   : > { %v9669_v8 = vadd.s32 %v3887_v53, %v3878_v20  ;;  %v9671_v0 = vadd.s32 %v3903_v26, %v3899_v57  ;;  %v3910_v25 = vadd.s32 %v3909_v48, %v3900_v35  ;;  %v3911_v6 = vmul.u32 %v9533_v15, %v3857_v59 }
 0x4bc   : > { %v4412_v39 = vmul.f32 -0.001358992, %v4411_v31  ;;  %v4419_v23 = vmul.f32 -0.00019511016, %v4411_v31  ;;  %v9674_v17 = vshrl.u32 %v3985_v1, 5  ;;  %v3993_v27 = vshll.u32 %v10337_v12, %v3987_v41 }
 0x4bd   : > { %vm3913_vm9 = vc.u32 %v9669_v8, %v9671_v0  ;;  %v3914_v7 = vadd.s32 1, %v3910_v25  ;;  %v3994_v3 = vshrl.u32 %v10338_v42, %v9661_v19  ;;  %v3997_v24 = vshrl.u32 %v10345_v38, %v9661_v19 }
 0x4be   : > { %v4413_v14 = vadd.f32 0.041655596, %v4412_v39  ;;  %v4420_v54 = vadd.f32 0.008332121, %v4419_v23  ;;  %v3991_v15 = vshrl.u32 %v10337_v12, %v9661_v19  ;;  %v3996_v52 = vshll.u32 %v10338_v42, %v3987_v41 }
 0x4bf   : > { %v3915_v57 = vsel %vm3913_vm9, %v3914_v7, %v3910_v25  ;;  %v3999_v21 = vshll.u32 %v10345_v38, %v3987_v41  ;;  %v4000_v50 = vshrl.u32 %v10339_v30, %v9661_v19  ;;  %v4002_v26 = vshll.u32 %v10339_v30, %v3987_v41 }
 0x4c0   : > { %v4414_v49 = vmul.f32 %v4413_v14, %v4411_v31  ;;  %v4421_v10 = vmul.f32 %v4420_v54, %v4411_v31  ;;  %v3916_v46 = vadd.s32 %v3915_v57, %v3911_v6  ;;  %v4003_v40 = vshrl.u32 %v10332_v11, %v9661_v19 }
 0x4c1   : > { %v3990_v29 = vshll.u32 %v10333_v47, %v3987_v41  ;;  %v9693_v13 = vor.u32 %v3994_v3, %v3993_v27  ;;  %v3998_v56 = vor.u32 %v3997_v24, %v3996_v52  ;;  %v4001_v55 = vor.u32 %v4000_v50, %v3999_v21 }
 0x4c2   : > { %v4415_v1 = vadd.f32 -0.4999988, %v4414_v49  ;;  %v4422_v37 = vadd.f32 -0.16666654, %v4421_v10  ;;  %v3917_v34 = vadd.s32 536870912, %v3916_v46  ;;  %v4004_v18 = vor.u32 %v4003_v40, %v4002_v26 }
 0x4c3   : > { %v4428_v2 = vand.u32 3, %v4427_v33  ;;  %v3981_v59 = vor.u32 8388608, %v3980_v61  ;;  %v9695_v20 = vor.u32 %v3991_v15, %v3990_v29  ;;  %v586_v35 = vadd.f32 %v9549_v58, %v9520_v16 }
 0x4c4   : > { %v4416_v53 = vmul.f32 %v4415_v1, %v4411_v31  ;;  %v4423_v48 = vmul.f32 %v4422_v37, %v4411_v31  ;;  %v9699_v25 = vshrl.u32 %v3917_v34, 30  ;;  %vm4008_vm11 = vcmp.lt.s32.totalorder %v9674_v17, 4 }
 0x4c5   : > { %vm4426_vm12 = vweird.f32 %v9266_v43  ;;  %vm4005_vm13 = vcmp.lt.s32.totalorder %v9674_v17, 1  ;;  %vm4007_vm14 = vcmp.lt.s32.totalorder %v9674_v17, 3  ;;  %v4014_v41 = vsel %vm4008_vm11, %v4001_v55, 920167782 }
 0x4c6   : > { %v4018_v33 = vsel %vm4008_vm11, %v4004_v18, 1326507024  ;;  %v4417_v61 = vadd.f32 1.0, %v4416_v53  ;;  %v4424_v16 = vadd.f32 1.0, %v4423_v48  ;;  %v3919_v58 = vshll.u32 %v9699_v25, 30 }
 0x4c7   : > { %v4017_v31 = vsel %vm4005_vm13, %v9693_v13, %v3998_v56  ;;  %v4013_v6 = vsel %vm4005_vm13, %v9695_v20, %v9693_v13  ;;  %v4015_v39 = vsel %vm4007_vm14, %v3998_v56, %v4014_v41  ;;  %v4019_v23 = vsel %vm4007_vm14, %v4001_v55, %v4018_v33 }
 0x4c8   : > { %v9721_v27 = vshll.u32 %v3981_v59, 8  ;;  %v4425_v7 = vmul.f32 %v4424_v16, %v4409_v32  ;;  %v4434_v3 = vxor.u32 2147483648, %v4417_v61  ;;  %v3920_v24 = vsub.s32 %v3916_v46, %v3919_v58  ;;  %v9732_v32 = vpop.permute.xlu1 %678 }
 0x4c9   : > { %vm4006_vm15 = vcmp.lt.s32.totalorder %v9674_v17, 2  ;;  %vm4429_vm0 = vcmp.lt.s32.totalorder %v4428_v2, 2  ;;  %vm4430_vm1 = vcmp.eq.s32.totalorder %v4428_v2, 0  ;;  %v9728_v54 = vadd.f32 %v9665_v4, %v9531_v62 }
 0x4ca   : > { %v4020_v14 = vsel %vm4006_vm15, %v4017_v31, %v4019_v23  ;;  %v4431_v15 = vxor.u32 2147483648, %v4425_v7  ;;  %vm3921_vm3 = vcmp.lt.s32.totalorder %v3920_v24, 0  ;;  %v3922_v52 = vsub.s32 0, %v3920_v24 }
 0x4cb   : > { %v4016_v57 = vsel %vm4006_vm15, %v4013_v6, %v4015_v39  ;;  %vm4433_vm2 = vcmp.eq.s32.totalorder %v4428_v2, 2  ;;  %v4022_v21 = vand.u32 65535, %v9721_v27  ;;  %v4024_v50 = vand.u32 65535, %v4020_v14 }
 0x4cc   : > { %v4025_v26 = vshrl.u32 %v4020_v14, 16  ;;  %v4432_v49 = vsel %vm4430_vm1, %v4417_v61, %v4431_v15  ;;  %v4435_v10 = vsel %vm4433_vm2, %v4434_v3, %v4425_v7  ;;  %v3923_v46 = vsel %vm3921_vm3, %v3922_v52, %v3920_v24 }
 0x4cd   : > { %v4023_v62 = vshrl.u32 %v9721_v27, 16  ;;  %v4436_v4 = vsel %vm4429_vm0, %v4432_v49, %v4435_v10  ;;  %v3924_v40 = vclz %v3923_v46  ;;  %v4047_v29 = vshrl.u32 %v4016_v57, 16 }
 0x4ce   : > { %v9738_v55 = vadd.f32 %v9732_v32, %v586_v35  ;;  %v4437_v1 = vsel %vm4426_vm12, nan, %v4436_v4  ;;  %v4027_v37 = vmul.u32 %v4025_v26, %v4022_v21  ;;  %v4046_v18 = vand.u32 65535, %v4016_v57 }
 0x4cf   : > { %v4028_v34 = vmul.u32 %v4024_v50, %v4023_v62  ;;  %5701 = vst [vmem:[%s6717_s9 + $0xb8] sm:$0xff] %v4437_v1  ;;  %v3912_v59 = vadd.s32 %v9671_v0, %v9669_v8  ;;  %v5928_v53 = vadd.s32 4294967294, %v3924_v40  ;;  %v3989_v2 = vshrl.u32 %v10333_v47, %v9661_v19 }
 0x4d0   : > { %v4010_v48 = vsel %vm4008_vm11, %v3998_v56, 2102212464  ;;  %v3942_v35 = vsub.s32 4, %v9699_v25  ;;  %v4026_v41 = vmul.u32 %v4024_v50, %v4022_v21  ;;  %v4029_v33 = vmul.u32 %v4025_v26, %v4023_v62 }
 0x4d1   : > { %v4030_v43 = vshll.u32 %v4027_v37, 16  ;;  %vm3820_vm4 = vcmp.lt.s32.totalorder %v9481_v63, 0  ;;  %vm5929_vm6 = vcmp.lt.s32.totalorder %v5928_v53, 0  ;;  %v4031_v61 = vshrl.u32 %v4027_v37, 16 }
 0x4d2   : > { %v4032_v16 = vshll.u32 %v4028_v34, 16  ;;  %v4049_v58 = vmul.u32 %v4047_v29, %v4022_v21  ;;  %v3927_v31 = vsel %vm5929_vm6, 0, %v5928_v53  ;;  %v4050_v0 = vmul.u32 %v4046_v18, %v4023_v62 }
 0x4d3   : > { %vm4034_vm5 = vc.u32 %v4026_v41, %v4030_v43  ;;  %v4036_v8 = vadd.s32 %v4030_v43, %v4026_v41  ;;  %v3928_v6 = vsub.s32 32, %v3927_v31  ;;  %v3932_v19 = vsub.s32 4294967266, %v3927_v31 }
 0x4d4   : > { %v4035_v39 = vsel %vm4034_vm5, 1, %v10343_v36  ;;  %v4048_v56 = vmul.u32 %v4046_v18, %v4022_v21  ;;  %v4051_v7 = vmul.u32 %v4047_v29, %v4023_v62  ;;  %v4052_v3 = vshll.u32 %v4049_v58, 16 }
 0x4d5   : > { %v4037_v23 = vadd.s32 %v4035_v39, %v4029_v33  ;;  %vm4038_vm7 = vc.u32 %v4036_v8, %v4032_v16  ;;  %v3929_v14 = vshll.u32 %v3920_v24, %v3927_v31  ;;  %v3930_v15 = vshrl.u32 %v3912_v59, %v3928_v6 }
 0x4d6   : > { %v3933_v52 = vadd.s32 127, %v3932_v19  ;;  %v4039_v57 = vsel %vm4038_vm7, 1, %v10343_v36  ;;  %v4054_v26 = vshll.u32 %v4050_v0, 16  ;;  %vm4056_vm8 = vc.u32 %v4048_v56, %v4052_v3 }
 0x4d7   : > { %v4041_v50 = vadd.s32 %v4039_v57, %v4037_v23  ;;  %v4058_v49 = vadd.s32 %v4052_v3, %v4048_v56  ;;  %v3931_v10 = vor.u32 %v3930_v15, %v3929_v14  ;;  %v4009_v4 = vsel %vm4005_vm13, %v3989_v2, %v9695_v20 }
 0x4d8   : > { %v3934_v46 = vshll.u32 %v3933_v52, 23  ;;  %v4057_v21 = vsel %vm4056_vm8, 1, %v10343_v36  ;;  %v5058_v24 = vand.u32 2147483647, %v9738_v55  ;;  %v4011_v1 = vsel %vm4007_vm14, %v9693_v13, %v4010_v48 }
 0x4d9   : > { %v4042_v40 = vadd.s32 %v4041_v50, %v4031_v61  ;;  %v4059_v62 = vadd.s32 %v4057_v21, %v4051_v7  ;;  %vm4060_vm10 = vc.u32 %v4058_v49, %v4054_v26  ;;  %v4033_v37 = vshrl.u32 %v4028_v34, 16 }
 0x4da   : > { %v3935_v29 = vor.u32 4788187, %v3934_v46  ;;  %v4061_v18 = vsel %vm4060_vm10, 1, %v10343_v36  ;;  %v3943_v59 = vsel %vm3820_vm4, %v3942_v35, %v9699_v25  ;;  %v4053_v20 = vshrl.u32 %v4049_v58, 16 }
 0x4db   : > { %v4063_v53 = vadd.s32 %v4061_v18, %v4059_v62  ;;  %v5061_v2 = vand.u32 2139095040, %v9738_v55  ;;  %v3938_v33 = vcvt.s32.f32 %v3931_v10  ;;  %v4043_v43 = vadd.s32 %v4042_v40, %v4033_v37 }
 0x4dc   : > { %v3936_v41 = vand.u32 2147483647, %v3935_v29  ;;  %v9768_v61 = vadd.f32 %v9732_v32, %v9728_v54  ;;  %v4055_v16 = vshrl.u32 %v4050_v0, 16  ;;  %v5065_v48 = vand.u32 8388607, %v5058_v24 }
 0x4dd   : > { %v4064_v13 = vadd.s32 %v4063_v53, %v4053_v20  ;;  %v5062_v34 = vshrl.u32 %v5061_v2, 23  ;;  %v420_v25 = vmul.f32 %v10408_v51, %v6388_v5  ;;  %vm9776_vm9 = vcmp.le.f32.partialorder %v3818_v28, 0.7853982 }
 0x4de   : > { %v3939_v58 = vmul.f32 %v3938_v33, %v3936_v41  ;;  %v4062_v31 = vadd.s32 %v4058_v49, %v4054_v26  ;;  %v3945_v54 = vsel %vm9776_vm9, 0, %v3943_v59  ;;  %v4012_v32 = vsel %vm4006_vm15, %v4009_v4, %v4011_v1 }
 0x4df   : > { %v4065_v8 = vadd.s32 %v4064_v13, %v4055_v16  ;;  %v5951_v0 = vadd.s32 4294967169, %v5062_v34  ;;  %v9786_v5 = vadd.f32 %v9541_v22, %v9537_v45  ;;  %v9789_v28 = vadd.f32 %v9545_v60, %v420_v25 }
 0x4e0   : > { %v3940_v6 = vxor.u32 2147483648, %v3939_v58  ;;  %vm4068_vm11 = vc.u32 %v4043_v43, %v4062_v31  ;;  %v5066_v19 = vor.u32 8388608, %v5065_v48  ;;  %v5216_v56 = vand.u32 2139095040, %v9768_v61 }
 0x4e1   : > { %v4069_v51 = vadd.s32 1, %v4065_v8  ;;  %v5068_v39 = vadd.s32 1, %v5951_v0  ;;  %v4066_v23 = vmul.u32 %v9721_v27, %v4012_v32  ;;  %v3962_v22 = vadd.s32 3, %v3945_v54 }
 0x4e2   : > { %v3941_v17 = vsel %vm3820_vm4, %v3940_v6, %v3939_v58  ;;  %v9798_v52 = vshll.u32 %v5066_v19, 8  ;;  %v5217_v57 = vshrl.u32 %v5216_v56, 23  ;;  %v9804_v40 = vadd.s32 %v4062_v31, %v4043_v43 }
 0x4e3   : > { %v3944_v7 = vsel %vm9776_vm9, %v9481_v63, %v3941_v17  ;;  %v4070_v3 = vsel %vm4068_vm11, %v4069_v51, %v4065_v8  ;;  %vm5069_vm12 = vcmp.gt.s32.totalorder %v5068_v39, 0  ;;  %v9802_v4 = vand.u32 3, %v3962_v22 }
 0x4e4   : > { %v3946_v45 = vmul.f32 %v3944_v7, %v3944_v7  ;;  %v4071_v60 = vadd.s32 %v4070_v3, %v4066_v23  ;;  %v5070_v14 = vsel %vm5069_vm12, %v5068_v39, 0  ;;  %v9807_v62 = vand.u32 65535, %v9798_v52 }
 0x4e5   : > { %v5072_v15 = vand.u32 31, %v5070_v14  ;;  %v5213_v29 = vand.u32 2147483647, %v9768_v61  ;;  %v5954_v1 = vadd.s32 4294967169, %v5217_v57  ;;  %vm3975_vm13 = vcmp.lt.s32.totalorder %v9500_v9, 0 }
 0x4e6   : > { %v3947_v50 = vmul.f32 -0.001358992, %v3946_v45  ;;  %v3954_v26 = vmul.f32 -0.00019511016, %v3946_v45  ;;  %v4072_v49 = vadd.s32 536870912, %v4071_v60  ;;  %v9811_v20 = vshrl.u32 %v5070_v14, 5 }
 0x4e7   : > { %v9800_v10 = vsub.s32 32, %v5072_v15  ;;  %v5075_v53 = vshll.u32 %v10333_v47, %v5072_v15  ;;  %vm3968_vm14 = vcmp.eq.s32.totalorder %v9802_v4, 2  ;;  %v5078_v34 = vshll.u32 %v10337_v12, %v5072_v15 }
 0x4e8   : > { %v3948_v27 = vadd.f32 0.041655596, %v3947_v50  ;;  %v3955_v46 = vadd.f32 0.008332121, %v3954_v26  ;;  %v4073_v21 = vshrl.u32 %v4072_v49, 30  ;;  %vm3965_vm15 = vcmp.eq.s32.totalorder %v9802_v4, 0 }
 0x4e9   : > { %v5076_v2 = vshrl.u32 %v10337_v12, %v9800_v10  ;;  %v5079_v41 = vshrl.u32 %v10338_v42, %v9800_v10  ;;  %v5085_v33 = vshrl.u32 %v10339_v30, %v9800_v10  ;;  %v5081_v48 = vshll.u32 %v10338_v42, %v5072_v15 }
 0x4ea   : > { %v3949_v37 = vmul.f32 %v3948_v27, %v3946_v45  ;;  %v3956_v18 = vmul.f32 %v3955_v46, %v3946_v45  ;;  %v4074_v59 = vshll.u32 %v4073_v21, 30  ;;  %v5082_v25 = vshrl.u32 %v10345_v38, %v9800_v10 }
 0x4eb   : > { %v5084_v35 = vshll.u32 %v10345_v38, %v5072_v15  ;;  %v5088_v58 = vshrl.u32 %v10332_v11, %v9800_v10  ;;  %vm3964_vm0 = vcmp.lt.s32.totalorder %v9802_v4, 2  ;;  %vm3961_vm3 = vweird.f32 %v9481_v63 }
 0x4ec   : > { %v3950_v43 = vadd.f32 -0.4999988, %v3949_v37  ;;  %v3957_v16 = vadd.f32 -0.16666654, %v3956_v18  ;;  %v9821_v13 = vsub.s32 %v4071_v60, %v4074_v59  ;;  %v4097_v8 = vsub.s32 4, %v4073_v21 }
 0x4ed   : > { %v5077_v0 = vor.u32 %v5076_v2, %v5075_v53  ;;  %v5080_v6 = vor.u32 %v5079_v41, %v5078_v34  ;;  %v5086_v51 = vor.u32 %v5085_v33, %v5084_v35  ;;  %v5087_v17 = vshll.u32 %v10339_v30, %v5072_v15 }
 0x4ee   : > { %v3951_v31 = vmul.f32 %v3950_v43, %v3946_v45  ;;  %v3958_v54 = vmul.f32 %v3957_v16, %v3946_v45  ;;  %vm4076_vm1 = vcmp.lt.s32.totalorder %v9821_v13, 0  ;;  %v4077_v32 = vsub.s32 0, %v9821_v13 }
 0x4ef   : > { %v5083_v3 = vor.u32 %v5082_v25, %v5081_v48  ;;  %v5108_v45 = vshrl.u32 %v9798_v52, 16  ;;  %v9838_v22 = vadd.s32 1, %v5954_v1  ;;  %vm9842_vm2 = vcmp.le.f32.partialorder %v3973_v44, 0.7853982 }
 0x4f0   : > { %v3952_v19 = vadd.f32 1.0, %v3951_v31  ;;  %v3959_v39 = vadd.f32 1.0, %v3958_v54  ;;  %v4078_v56 = vsel %vm4076_vm1, %v4077_v32, %v9821_v13  ;;  %v5089_v50 = vor.u32 %v5088_v58, %v5087_v17 }
 0x4f1   : > { %v4079_v23 = vclz %v4078_v56  ;;  %vm5090_vm4 = vcmp.lt.s32.totalorder %v9811_v20, 1  ;;  %v9849_v15 = vsel %vm3975_vm13, %v4097_v8, %v4073_v21  ;;  %vm5093_vm6 = vcmp.lt.s32.totalorder %v9811_v20, 4 }
 0x4f2   : > { %v3960_v60 = vmul.f32 %v3959_v39, %v3944_v7  ;;  %v3969_v14 = vxor.u32 2147483648, %v3952_v19  ;;  %v5098_v7 = vsel %vm5090_vm4, %v5077_v0, %v5080_v6  ;;  %vm5091_vm5 = vcmp.lt.s32.totalorder %v9811_v20, 2 }
 0x4f3   : > { %v5931_v26 = vadd.s32 4294967294, %v4079_v23  ;;  %vm5092_vm7 = vcmp.lt.s32.totalorder %v9811_v20, 3  ;;  %v5099_v44 = vsel %vm5093_vm6, %v5086_v51, 920167782  ;;  %v5102_v21 = vsel %vm5090_vm4, %v5080_v6, %v5083_v3 }
 0x4f4   : > { %v3966_v49 = vxor.u32 2147483648, %v3960_v60  ;;  %v3970_v27 = vsel %vm3968_vm14, %v3969_v14, %v3960_v60  ;;  %v5100_v46 = vsel %vm5092_vm7, %v5083_v3, %v5099_v44  ;;  %v5103_v59 = vsel %vm5093_vm6, %v5089_v50, 1326507024 }
 0x4f5   : > { %vm5932_vm8 = vcmp.lt.s32.totalorder %v5931_v26, 0  ;;  %v5101_v18 = vsel %vm5091_vm5, %v5098_v7, %v5100_v46  ;;  %v5095_v33 = vsel %vm5093_vm6, %v5083_v3, 2102212464  ;;  %v5104_v16 = vsel %vm5092_vm7, %v5086_v51, %v5103_v59 }
 0x4f6   : > { %v3967_v1 = vsel %vm3965_vm15, %v3952_v19, %v3966_v49  ;;  %v4082_v37 = vsel %vm5932_vm8, 0, %v5931_v26  ;;  %v5131_v34 = vand.u32 65535, %v5101_v18  ;;  %v5132_v48 = vshrl.u32 %v5101_v18, 16 }
 0x4f7   : > { %v3971_v53 = vsel %vm3964_vm0, %v3967_v1, %v3970_v27  ;;  %v4083_v2 = vsub.s32 32, %v4082_v37  ;;  %v4087_v41 = vsub.s32 4294967266, %v4082_v37  ;;  %v4084_v25 = vshll.u32 %v9821_v13, %v4082_v37 }
 0x4f8   : > { %v3972_v43 = vsel %vm3961_vm3, nan, %v3971_v53  ;;  %v5105_v4 = vsel %vm5091_vm5, %v5102_v21, %v5104_v16  ;;  %v5074_v31 = vshrl.u32 %v10333_v47, %v9800_v10  ;;  %v5134_v32 = vmul.u32 %v5132_v48, %v9807_v62 }
 0x4f9   : > { %v4085_v35 = vshrl.u32 %v9804_v40, %v4083_v2  ;;  %v4088_v58 = vadd.s32 127, %v4087_v41  ;;  %5698 = vst [vmem:[%s6717_s9 + $0xa0] sm:$0xff] %v3972_v43  ;;  %v5109_v54 = vand.u32 65535, %v5105_v4  ;;  %v5110_v63 = vshrl.u32 %v5105_v4, 16 }
 0x4fa   : > { %v4100_v13 = vsel %vm9842_vm2, 0, %v9849_v15  ;;  %v5135_v19 = vmul.u32 %v5131_v34, %v5108_v45  ;;  %v5094_v40 = vsel %vm5090_vm4, %v5074_v31, %v5077_v0  ;;  %v5096_v39 = vsel %vm5092_vm7, %v5080_v6, %v5095_v33 }
 0x4fb   : > { %v4086_v8 = vor.u32 %v4085_v35, %v4084_v25  ;;  %v4089_v51 = vshll.u32 %v4088_v58, 23  ;;  %v5112_v56 = vmul.u32 %v5110_v63, %v9807_v62  ;;  %v5113_v10 = vmul.u32 %v5109_v54, %v5108_v45 }
 0x4fc   : > { %v5133_v23 = vmul.u32 %v5131_v34, %v9807_v62  ;;  %v5136_v3 = vmul.u32 %v5132_v48, %v5108_v45  ;;  %v5137_v60 = vshll.u32 %v5134_v32, 16  ;;  %v5111_v50 = vmul.u32 %v5109_v54, %v9807_v62 }
 0x4fd   : > { %v4090_v17 = vor.u32 4788187, %v4089_v51  ;;  %v4093_v14 = vcvt.s32.f32 %v4086_v8  ;;  %v5114_v26 = vmul.u32 %v5110_v63, %v5108_v45  ;;  %v5115_v15 = vshll.u32 %v5112_v56, 16 }
 0x4fe   : > { %v5117_v49 = vshll.u32 %v5113_v10, 16  ;;  %v5139_v44 = vshll.u32 %v5135_v19, 16  ;;  %vm5141_vm10 = vc.u32 %v5133_v23, %v5137_v60  ;;  %v5143_v27 = vadd.s32 %v5137_v60, %v5133_v23 }
 0x4ff   : > { %v4091_v7 = vand.u32 2147483647, %v4090_v17  ;;  %vm5119_vm9 = vc.u32 %v5111_v50, %v5115_v15  ;;  %v5121_v0 = vadd.s32 %v5115_v15, %v5111_v50  ;;  %v5142_v6 = vsel %vm5141_vm10, 1, %v10343_v36 }
 0x500   : > { %v5120_v21 = vsel %vm5119_vm9, 1, %v10343_v36  ;;  %v5144_v1 = vadd.s32 %v5142_v6, %v5136_v3  ;;  %vm5224_vm11 = vcmp.gt.s32.totalorder %v9838_v22, 0  ;;  %v5138_v62 = vshrl.u32 %v5134_v32, 16 }
 0x501   : > { %v4094_v46 = vmul.f32 %v4093_v14, %v4091_v7  ;;  %v5122_v37 = vadd.s32 %v5120_v21, %v5114_v26  ;;  %vm5123_vm12 = vc.u32 %v5121_v0, %v5117_v49  ;;  %vm5145_vm14 = vc.u32 %v5143_v27, %v5139_v44 }
 0x502   : > { %v5124_v18 = vsel %vm5123_vm12, 1, %v10343_v36  ;;  %v5146_v59 = vsel %vm5145_vm14, 1, %v10343_v36  ;;  %v5225_v53 = vsel %vm5224_vm11, %v9838_v22, 0  ;;  %v5116_v2 = vshrl.u32 %v5112_v56, 16 }
 0x503   : > { %v4095_v45 = vxor.u32 2147483648, %v4094_v46  ;;  %v5126_v41 = vadd.s32 %v5124_v18, %v5122_v37  ;;  %v5148_v33 = vadd.s32 %v5146_v59, %v5144_v1  ;;  %v5227_v43 = vand.u32 31, %v5225_v53 }
 0x504   : > { %v5097_v34 = vsel %vm5091_vm5, %v5094_v40, %v5096_v39  ;;  %v5118_v48 = vshrl.u32 %v5113_v10, 16  ;;  %v5140_v25 = vshrl.u32 %v5135_v19, 16  ;;  %v4117_v54 = vadd.s32 3, %v4100_v13 }
 0x505   : > { %v4096_v16 = vsel %vm3975_vm13, %v4095_v45, %v4094_v46  ;;  %v5127_v58 = vadd.s32 %v5126_v41, %v5116_v2  ;;  %v5149_v4 = vadd.s32 %v5148_v33, %v5138_v62  ;;  %v9909_v31 = vsub.s32 32, %v5227_v43 }
 0x506   : > { %v4099_v35 = vsel %vm9842_vm2, %v9500_v9, %v4096_v16  ;;  %v5220_v63 = vand.u32 8388607, %v5213_v29  ;;  %v9915_v8 = vadd.s32 %v5143_v27, %v5139_v44  ;;  %v5151_v51 = vmul.u32 %v9798_v52, %v5097_v34 }
 0x507   : > { %v4101_v22 = vmul.f32 %v4099_v35, %v4099_v35  ;;  %v9913_v32 = vadd.s32 %v5127_v58, %v5118_v48  ;;  %v5150_v20 = vadd.s32 %v5149_v4, %v5140_v25  ;;  %v9918_v57 = vshrl.u32 %v5225_v53, 5 }
 0x508   : > { %v5233_v39 = vshll.u32 %v10337_v12, %v5227_v43  ;;  %v5234_v56 = vshrl.u32 %v10338_v42, %v9909_v31  ;;  %v5237_v10 = vshrl.u32 %v10345_v38, %v9909_v31  ;;  %v5231_v52 = vshrl.u32 %v10337_v12, %v9909_v31 }
 0x509   : > { %v4102_v19 = vmul.f32 -0.001358992, %v4101_v22  ;;  %v4109_v40 = vmul.f32 -0.00019511016, %v4101_v22  ;;  %vm5153_vm13 = vc.u32 %v9913_v32, %v9915_v8  ;;  %v5154_v13 = vadd.s32 1, %v5150_v20 }
 0x50a   : > { %v5236_v3 = vshll.u32 %v10338_v42, %v5227_v43  ;;  %v5239_v14 = vshll.u32 %v10345_v38, %v5227_v43  ;;  %v5240_v50 = vshrl.u32 %v10339_v30, %v9909_v31  ;;  %v5242_v26 = vshll.u32 %v10339_v30, %v5227_v43 }
 0x50b   : > { %v4103_v17 = vadd.f32 0.041655596, %v4102_v19  ;;  %v4110_v23 = vadd.f32 0.008332121, %v4109_v40  ;;  %v5155_v60 = vsel %vm5153_vm13, %v5154_v13, %v5150_v20  ;;  %v5243_v44 = vshrl.u32 %v10332_v11, %v9909_v31 }
 0x50c   : > { %v5156_v49 = vadd.s32 %v5155_v60, %v5151_v51  ;;  %v5230_v0 = vshll.u32 %v10333_v47, %v5227_v43  ;;  %v9937_v6 = vor.u32 %v5234_v56, %v5233_v39  ;;  %v5238_v27 = vor.u32 %v5237_v10, %v5236_v3 }
 0x50d   : > { %v4104_v15 = vmul.f32 %v4103_v17, %v4101_v22  ;;  %v4111_v7 = vmul.f32 %v4110_v23, %v4101_v22  ;;  %v5241_v46 = vor.u32 %v5240_v50, %v5239_v14  ;;  %v5244_v62 = vor.u32 %v5243_v44, %v5242_v26 }
 0x50e   : > { %v5157_v37 = vadd.s32 536870912, %v5156_v49  ;;  %v4118_v45 = vand.u32 3, %v4117_v54  ;;  %v5221_v18 = vor.u32 8388608, %v5220_v63  ;;  %v9939_v59 = vor.u32 %v5231_v52, %v5230_v0 }
 0x50f   : > { %v4105_v21 = vadd.f32 -0.4999988, %v4104_v15  ;;  %v4112_v1 = vadd.f32 -0.16666654, %v4111_v7  ;;  %vm5248_vm15 = vcmp.lt.s32.totalorder %v9918_v57, 4  ;;  %vm5245_vm0 = vcmp.lt.s32.totalorder %v9918_v57, 1  ;;  %v674_v15 = vpop.permute.xlu0 %673 }
 0x510   : > { %v9941_v41 = vshrl.u32 %v5157_v37, 30  ;;  %vm5247_vm1 = vcmp.lt.s32.totalorder %v9918_v57, 3  ;;  %v5254_v33 = vsel %vm5248_vm15, %v5241_v46, 920167782  ;;  %v5258_v43 = vsel %vm5248_vm15, %v5244_v62, 1326507024 }
 0x511   : > { %v4106_v53 = vmul.f32 %v4105_v21, %v4101_v22  ;;  %v4113_v2 = vmul.f32 %v4112_v1, %v4101_v22  ;;  %v5257_v25 = vsel %vm5245_vm0, %v9937_v6, %v5238_v27  ;;  %v5253_v58 = vsel %vm5245_vm0, %v9939_v59, %v9937_v6 }
 0x512   : > { %v5159_v48 = vshll.u32 %v9941_v41, 30  ;;  %v5255_v4 = vsel %vm5247_vm1, %v5238_v27, %v5254_v33  ;;  %v5259_v22 = vsel %vm5247_vm1, %v5241_v46, %v5258_v43  ;;  %v9962_v54 = vshll.u32 %v5221_v18, 8 }
 0x513   : > { %v4107_v16 = vadd.f32 1.0, %v4106_v53  ;;  %v4114_v34 = vadd.f32 1.0, %v4113_v2  ;;  %vm5246_vm3 = vcmp.lt.s32.totalorder %v9918_v57, 2  ;;  %vm4116_vm2 = vweird.f32 %v9500_v9 }
 0x514   : > { %v5160_v51 = vsub.s32 %v5156_v49, %v5159_v48  ;;  %vm4119_vm4 = vcmp.lt.s32.totalorder %v4118_v45, 2  ;;  %vm4120_vm6 = vcmp.eq.s32.totalorder %v4118_v45, 0  ;;  %v5260_v19 = vsel %vm5246_vm3, %v5257_v25, %v5259_v22 }
 0x515   : > { %v4115_v63 = vmul.f32 %v4114_v34, %v4099_v35  ;;  %v4124_v20 = vxor.u32 2147483648, %v4107_v16  ;;  %v5256_v13 = vsel %vm5246_vm3, %v5253_v58, %v5255_v4  ;;  %vm4123_vm7 = vcmp.eq.s32.totalorder %v4118_v45, 2 }
 0x516   : > { %vm5161_vm5 = vcmp.lt.s32.totalorder %v5160_v51, 0  ;;  %v5162_v39 = vsub.s32 0, %v5160_v51  ;;  %v5262_v35 = vand.u32 65535, %v9962_v54  ;;  %v5264_v56 = vand.u32 65535, %v5260_v19 }
 0x517   : > { %v4121_v40 = vxor.u32 2147483648, %v4115_v63  ;;  %v5265_v10 = vshrl.u32 %v5260_v19, 16  ;;  %v4125_v23 = vsel %vm4123_vm7, %v4124_v20, %v4115_v63  ;;  %v5263_v3 = vshrl.u32 %v9962_v54, 16 }
 0x518   : > { %v5163_v52 = vsel %vm5161_vm5, %v5162_v39, %v5160_v51  ;;  %v5229_v50 = vshrl.u32 %v10333_v47, %v9909_v31  ;;  %v5287_v26 = vshrl.u32 %v5256_v13, 16  ;;  %v5286_v0 = vand.u32 65535, %v5256_v13 }
 0x519   : > { %v4122_v17 = vsel %vm4120_vm6, %v4107_v16, %v4121_v40  ;;  %v5164_v14 = vclz %v5163_v52  ;;  %v5267_v49 = vmul.u32 %v5265_v10, %v5262_v35  ;;  %v5268_v44 = vmul.u32 %v5264_v56, %v5263_v3 }
 0x51a   : > { %v4126_v60 = vsel %vm4119_vm4, %v4122_v17, %v4125_v23  ;;  %v5152_v46 = vadd.s32 %v9915_v8, %v9913_v32  ;;  %v5182_v1 = vsub.s32 4, %v9941_v41  ;;  %v5250_v37 = vsel %vm5248_vm15, %v5238_v27, 2102212464 }
 0x51b   : > { %v4127_v7 = vsel %vm4116_vm2, nan, %v4126_v60  ;;  %v5952_v21 = vadd.s32 4294967294, %v5164_v14  ;;  %v5266_v62 = vmul.u32 %v5264_v56, %v5262_v35  ;;  %v5269_v31 = vmul.u32 %v5265_v10, %v5263_v3 }
 0x51c   : > { %5699 = vst [vmem:[%s6717_s9 + $0xa8] sm:$0xff] %v4127_v7  ;;  %v5270_v45 = vshll.u32 %v5267_v49, 16  ;;  %v9983_v18 = vadd.f32 %v674_v15, %v9786_v5  ;;  %vm5060_vm8 = vcmp.lt.s32.totalorder %v9738_v55, 0  ;;  %v5271_v9 = vshrl.u32 %v5267_v49, 16 }
 0x51d   : > { %vm5953_vm10 = vcmp.lt.s32.totalorder %v5952_v21, 0  ;;  %v5272_v53 = vshll.u32 %v5268_v44, 16  ;;  %v5289_v2 = vmul.u32 %v5287_v26, %v5262_v35  ;;  %v5290_v8 = vmul.u32 %v5286_v0, %v5263_v3 }
 0x51e   : > { %v5167_v33 = vsel %vm5953_vm10, 0, %v5952_v21  ;;  %vm5274_vm9 = vc.u32 %v5266_v62, %v5270_v45  ;;  %v5276_v32 = vadd.s32 %v5270_v45, %v5266_v62  ;;  %v5288_v34 = vmul.u32 %v5286_v0, %v5262_v35 }
 0x51f   : > { %v5168_v43 = vsub.s32 32, %v5167_v33  ;;  %v5172_v16 = vsub.s32 4294967266, %v5167_v33  ;;  %v5275_v27 = vsel %vm5274_vm9, 1, %v10343_v36  ;;  %v5291_v25 = vmul.u32 %v5287_v26, %v5263_v3 }
 0x520   : > { %v5277_v48 = vadd.s32 %v5275_v27, %v5269_v31  ;;  %vm5278_vm11 = vc.u32 %v5276_v32, %v5272_v53  ;;  %v5292_v5 = vshll.u32 %v5289_v2, 16  ;;  %v5169_v58 = vshll.u32 %v5160_v51, %v5167_v33 }
 0x521   : > { %v5170_v4 = vshrl.u32 %v5152_v46, %v5168_v43  ;;  %v5173_v22 = vadd.s32 127, %v5172_v16  ;;  %v5279_v63 = vsel %vm5278_vm11, 1, %v10343_v36  ;;  %v5294_v19 = vshll.u32 %v5290_v8, 16 }
 0x522   : > { %v5281_v20 = vadd.s32 %v5279_v63, %v5277_v48  ;;  %vm5296_vm12 = vc.u32 %v5288_v34, %v5292_v5  ;;  %v5298_v40 = vadd.s32 %v5292_v5, %v5288_v34  ;;  %v5249_v56 = vsel %vm5245_vm0, %v5229_v50, %v9939_v59 }
 0x523   : > { %v5171_v39 = vor.u32 %v5170_v4, %v5169_v58  ;;  %v5174_v13 = vshll.u32 %v5173_v22, 23  ;;  %v5297_v35 = vsel %vm5296_vm12, 1, %v10343_v36  ;;  %v5251_v51 = vsel %vm5247_vm1, %v9937_v6, %v5250_v37 }
 0x524   : > { %v5282_v10 = vadd.s32 %v5281_v20, %v5271_v9  ;;  %v5299_v17 = vadd.s32 %v5297_v35, %v5291_v25  ;;  %vm5300_vm14 = vc.u32 %v5298_v40, %v5294_v19  ;;  %v5273_v52 = vshrl.u32 %v5268_v44, 16 }
 0x525   : > { %v5175_v23 = vor.u32 4788187, %v5174_v13  ;;  %v5301_v3 = vsel %vm5300_vm14, 1, %v10343_v36  ;;  %v4748_v60 = vand.u32 2147483647, %v9983_v18  ;;  %v5183_v14 = vsel %vm5060_vm8, %v5182_v1, %v9941_v41 }
 0x526   : > { %v5293_v59 = vshrl.u32 %v5289_v2, 16  ;;  %v5303_v50 = vadd.s32 %v5301_v3, %v5299_v17  ;;  %v4751_v26 = vand.u32 2139095040, %v9983_v18  ;;  %v5178_v49 = vcvt.s32.f32 %v5171_v39 }
 0x527   : > { %v5176_v7 = vand.u32 2147483647, %v5175_v23  ;;  %v5283_v6 = vadd.s32 %v5282_v10, %v5273_v52  ;;  %v5295_v0 = vshrl.u32 %v5290_v8, 16  ;;  %v10002_v21 = vadd.f32 %v674_v15, %v9789_v28 }
 0x528   : > { %v5304_v46 = vadd.s32 %v5303_v50, %v5293_v59  ;;  %v4752_v44 = vshrl.u32 %v4751_v26, 23  ;;  %v4755_v37 = vand.u32 8388607, %v4748_v60  ;;  %v5302_v31 = vadd.s32 %v5298_v40, %v5294_v19 }
 0x529   : > { %v5179_v62 = vmul.f32 %v5178_v49, %v5176_v7  ;;  %vm10008_vm13 = vcmp.le.f32.partialorder %v5058_v24, 0.7853982  ;;  %v5252_v1 = vsel %vm5246_vm3, %v5249_v56, %v5251_v51  ;;  %v4906_v32 = vand.u32 2139095040, %v10002_v21 }
 0x52a   : > { %v5305_v45 = vadd.s32 %v5304_v46, %v5295_v0  ;;  %v5945_v9 = vadd.s32 4294967169, %v4752_v44  ;;  %v5185_v28 = vsel %vm10008_vm13, 0, %v5183_v14  ;;  %vm5308_vm15 = vc.u32 %v5283_v6, %v5302_v31 }
 0x52b   : > { %v5180_v53 = vxor.u32 2147483648, %v5179_v62  ;;  %v4756_v2 = vor.u32 8388608, %v4755_v37  ;;  %v5306_v8 = vmul.u32 %v9962_v54, %v5252_v1  ;;  %v5202_v27 = vadd.s32 3, %v5185_v28 }
 0x52c   : > { %v5309_v15 = vadd.s32 1, %v5305_v45  ;;  %v4758_v33 = vadd.s32 1, %v5945_v9  ;;  %v4907_v58 = vshrl.u32 %v4906_v32, 23  ;;  %v10029_v13 = vadd.s32 %v5302_v31, %v5283_v6 }
 0x52d   : > { %v5181_v24 = vsel %vm5060_vm8, %v5180_v53, %v5179_v62  ;;  %v10023_v5 = vshll.u32 %v4756_v2, 8  ;;  %v10027_v40 = vand.u32 3, %v5202_v27  ;;  %v4903_v35 = vand.u32 2147483647, %v10002_v21 }
 0x52e   : > { %v5184_v57 = vsel %vm10008_vm13, %v9738_v55, %v5181_v24  ;;  %v5310_v43 = vsel %vm5308_vm15, %v5309_v15, %v5305_v45  ;;  %vm4759_vm0 = vcmp.gt.s32.totalorder %v4758_v33, 0  ;;  %v5948_v51 = vadd.s32 4294967169, %v4907_v58 }
 0x52f   : > { %v5186_v16 = vmul.f32 %v5184_v57, %v5184_v57  ;;  %v5311_v34 = vadd.s32 %v5310_v43, %v5306_v8  ;;  %v4760_v48 = vsel %vm4759_vm0, %v4758_v33, 0  ;;  %v10032_v56 = vand.u32 65535, %v10023_v5 }
 0x530   : > { %v4762_v25 = vand.u32 31, %v4760_v48  ;;  %vm5215_vm1 = vcmp.lt.s32.totalorder %v9768_v61, 0  ;;  %v10036_v52 = vshrl.u32 %v4760_v48, 5  ;;  %vm5208_vm3 = vcmp.eq.s32.totalorder %v10027_v40, 2 }
 0x531   : > { %v5187_v4 = vmul.f32 -0.001358992, %v5186_v16  ;;  %v5194_v22 = vmul.f32 -0.00019511016, %v5186_v16  ;;  %v5312_v63 = vadd.s32 536870912, %v5311_v34  ;;  %vm5205_vm2 = vcmp.eq.s32.totalorder %v10027_v40, 0 }
 0x532   : > { %v10025_v20 = vsub.s32 32, %v4762_v25  ;;  %v4765_v3 = vshll.u32 %v10333_v47, %v4762_v25  ;;  %v4768_v6 = vshll.u32 %v10337_v12, %v4762_v25  ;;  %v4771_v0 = vshll.u32 %v10338_v42, %v4762_v25 }
 0x533   : > { %v5188_v54 = vadd.f32 0.041655596, %v5187_v4  ;;  %v5195_v19 = vadd.f32 0.008332121, %v5194_v22  ;;  %v5313_v39 = vshrl.u32 %v5312_v63, 30  ;;  %v4774_v44 = vshll.u32 %v10345_v38, %v4762_v25 }
 0x534   : > { %v4766_v14 = vshrl.u32 %v10337_v12, %v10025_v20  ;;  %v4769_v59 = vshrl.u32 %v10338_v42, %v10025_v20  ;;  %v4775_v50 = vshrl.u32 %v10339_v30, %v10025_v20  ;;  %v4772_v46 = vshrl.u32 %v10345_v38, %v10025_v20 }
 0x535   : > { %v5189_v10 = vmul.f32 %v5188_v54, %v5186_v16  ;;  %v5196_v17 = vmul.f32 %v5195_v19, %v5186_v16  ;;  %v5314_v23 = vshll.u32 %v5313_v39, 30  ;;  %v4778_v37 = vshrl.u32 %v10332_v11, %v10025_v20 }
 0x536   : > { %vm5204_vm4 = vcmp.lt.s32.totalorder %v10027_v40, 2  ;;  %vm5201_vm5 = vweird.f32 %v9738_v55  ;;  %v5337_v1 = vsub.s32 4, %v5313_v39  ;;  %v4767_v45 = vor.u32 %v4766_v14, %v4765_v3 }
 0x537   : > { %v5190_v26 = vadd.f32 -0.4999988, %v5189_v10  ;;  %v5197_v7 = vadd.f32 -0.16666654, %v5196_v17  ;;  %v10046_v49 = vsub.s32 %v5311_v34, %v5314_v23  ;;  %v4770_v9 = vor.u32 %v4769_v59, %v4768_v6 }
 0x538   : > { %v4776_v53 = vor.u32 %v4775_v50, %v4774_v44  ;;  %v4777_v33 = vshll.u32 %v10339_v30, %v4762_v25  ;;  %v4773_v24 = vor.u32 %v4772_v46, %v4771_v0  ;;  %v4798_v8 = vshrl.u32 %v10023_v5, 16 }
 0x539   : > { %v5191_v62 = vmul.f32 %v5190_v26, %v5186_v16  ;;  %v5198_v31 = vmul.f32 %v5197_v7, %v5186_v16  ;;  %vm5316_vm6 = vcmp.lt.s32.totalorder %v10046_v49, 0  ;;  %v5317_v41 = vsub.s32 0, %v10046_v49 }
 0x53a   : > { %v10063_v43 = vadd.s32 1, %v5948_v51  ;;  %vm10067_vm7 = vcmp.le.f32.partialorder %v5213_v29, 0.7853982  ;;  %v4779_v48 = vor.u32 %v4778_v37, %v4777_v33  ;;  %vm4780_vm8 = vcmp.lt.s32.totalorder %v10036_v52, 1 }
 0x53b   : > { %v5192_v28 = vadd.f32 1.0, %v5191_v62  ;;  %v5199_v15 = vadd.f32 1.0, %v5198_v31  ;;  %v5318_v2 = vsel %vm5316_vm6, %v5317_v41, %v10046_v49  ;;  %v10074_v25 = vsel %vm5215_vm1, %v5337_v1, %v5313_v39 }
 0x53c   : > { %v5319_v32 = vclz %v5318_v2  ;;  %vm4783_vm10 = vcmp.lt.s32.totalorder %v10036_v52, 4  ;;  %vm4781_vm9 = vcmp.lt.s32.totalorder %v10036_v52, 2  ;;  %vm4782_vm11 = vcmp.lt.s32.totalorder %v10036_v52, 3 }
 0x53d   : > { %v5200_v16 = vmul.f32 %v5199_v15, %v5184_v57  ;;  %v5209_v27 = vxor.u32 2147483648, %v5192_v28  ;;  %v4788_v57 = vsel %vm4780_vm8, %v4767_v45, %v4770_v9  ;;  %v4789_v29 = vsel %vm4783_vm10, %v4776_v53, 920167782 }
 0x53e   : > { %v5955_v58 = vadd.s32 4294967294, %v5319_v32  ;;  %v4790_v63 = vsel %vm4782_vm11, %v4773_v24, %v4789_v29  ;;  %v4792_v54 = vsel %vm4780_vm8, %v4770_v9, %v4773_v24  ;;  %v4793_v10 = vsel %vm4783_vm10, %v4779_v48, 1326507024 }
 0x53f   : > { %v5206_v4 = vxor.u32 2147483648, %v5200_v16  ;;  %v5210_v22 = vsel %vm5208_vm3, %v5209_v27, %v5200_v16  ;;  %v4791_v51 = vsel %vm4781_vm9, %v4788_v57, %v4790_v63  ;;  %v4785_v14 = vsel %vm4783_vm10, %v4773_v24, 2102212464 }
 0x540   : > { %vm5956_vm12 = vcmp.lt.s32.totalorder %v5955_v58, 0  ;;  %v4794_v50 = vsel %vm4782_vm11, %v4776_v53, %v4793_v10  ;;  %v4821_v26 = vand.u32 65535, %v4791_v51  ;;  %v4822_v7 = vshrl.u32 %v4791_v51, 16 }
 0x541   : > { %v5207_v19 = vsel %vm5205_vm2, %v5192_v28, %v5206_v4  ;;  %v5322_v39 = vsel %vm5956_vm12, 0, %v5955_v58  ;;  %v4795_v40 = vsel %vm4781_vm9, %v4792_v54, %v4794_v50  ;;  %v4764_v44 = vshrl.u32 %v10333_v47, %v10025_v20 }
 0x542   : > { %v5211_v17 = vsel %vm5204_vm4, %v5207_v19, %v5210_v22  ;;  %v5323_v23 = vsub.s32 32, %v5322_v39  ;;  %v5327_v3 = vsub.s32 4294967266, %v5322_v39  ;;  %v5324_v6 = vshll.u32 %v10046_v49, %v5322_v39 }
 0x543   : > { %v5212_v59 = vsel %vm5201_vm5, nan, %v5211_v17  ;;  %v4799_v37 = vand.u32 65535, %v4795_v40  ;;  %v4800_v55 = vshrl.u32 %v4795_v40, 16  ;;  %v4824_v62 = vmul.u32 %v4822_v7, %v10032_v56 }
 0x544   : > { %v5325_v0 = vshrl.u32 %v10029_v13, %v5323_v23  ;;  %v5328_v46 = vadd.s32 127, %v5327_v3  ;;  %5706 = vst [vmem:[%s6717_s9 + $0xe0] sm:$0xff] %v5212_v59  ;;  %v5340_v49 = vsel %vm10067_vm7, 0, %v10074_v25  ;;  %v4825_v1 = vmul.u32 %v4821_v26, %v4798_v8 }
 0x545   : > { %v4784_v13 = vsel %vm4780_vm8, %v4764_v44, %v4767_v45  ;;  %v4786_v53 = vsel %vm4782_vm11, %v4770_v9, %v4785_v14  ;;  %v4802_v28 = vmul.u32 %v4800_v55, %v10032_v56  ;;  %v4803_v20 = vmul.u32 %v4799_v37, %v4798_v8 }
 0x546   : > { %v5326_v31 = vor.u32 %v5325_v0, %v5324_v6  ;;  %v5329_v41 = vshll.u32 %v5328_v46, 23  ;;  %v4823_v2 = vmul.u32 %v4821_v26, %v10032_v56  ;;  %v4826_v33 = vmul.u32 %v4822_v7, %v4798_v8 }
 0x547   : > { %v4827_v32 = vshll.u32 %v4824_v62, 16  ;;  %v4801_v16 = vmul.u32 %v4799_v37, %v10032_v56  ;;  %v4804_v27 = vmul.u32 %v4800_v55, %v4798_v8  ;;  %v4805_v48 = vshll.u32 %v4802_v28, 16 }
 0x548   : > { %v5330_v15 = vor.u32 4788187, %v5329_v41  ;;  %v5333_v24 = vcvt.s32.f32 %v5326_v31  ;;  %v4807_v25 = vshll.u32 %v4803_v20, 16  ;;  %v4829_v57 = vshll.u32 %v4825_v1, 16 }
 0x549   : > { %vm4831_vm14 = vc.u32 %v4823_v2, %v4827_v32  ;;  %vm4809_vm13 = vc.u32 %v4801_v16, %v4805_v48  ;;  %v4811_v45 = vadd.s32 %v4805_v48, %v4801_v16  ;;  %v4833_v4 = vadd.s32 %v4827_v32, %v4823_v2 }
 0x54a   : > { %v5331_v58 = vand.u32 2147483647, %v5330_v15  ;;  %v4832_v9 = vsel %vm4831_vm14, 1, %v10343_v36  ;;  %v4810_v22 = vsel %vm4809_vm13, 1, %v10343_v36  ;;  %vm4914_vm15 = vcmp.gt.s32.totalorder %v10063_v43, 0 }
 0x54b   : > { %v4834_v63 = vadd.s32 %v4832_v9, %v4826_v33  ;;  %v4812_v54 = vadd.s32 %v4810_v22, %v4804_v27  ;;  %vm4813_vm0 = vc.u32 %v4811_v45, %v4807_v25  ;;  %v4828_v56 = vshrl.u32 %v4824_v62, 16 }
 0x54c   : > { %v5334_v29 = vmul.f32 %v5333_v24, %v5331_v58  ;;  %vm4835_vm3 = vc.u32 %v4833_v4, %v4829_v57  ;;  %v4814_v19 = vsel %vm4813_vm0, 1, %v10343_v36  ;;  %v4915_v51 = vsel %vm4914_vm15, %v10063_v43, 0 }
 0x54d   : > { %v4836_v39 = vsel %vm4835_vm3, 1, %v10343_v36  ;;  %v4806_v10 = vshrl.u32 %v4802_v28, 16  ;;  %v4816_v17 = vadd.s32 %v4814_v19, %v4812_v54  ;;  %v4917_v3 = vand.u32 31, %v4915_v51 }
 0x54e   : > { %v5335_v8 = vxor.u32 2147483648, %v5334_v29  ;;  %v4838_v23 = vadd.s32 %v4836_v39, %v4834_v63  ;;  %v4787_v59 = vsel %vm4781_vm9, %v4784_v13, %v4786_v53  ;;  %v4808_v50 = vshrl.u32 %v4803_v20, 16 }
 0x54f   : > { %v4830_v26 = vshrl.u32 %v4825_v1, 16  ;;  %v4817_v6 = vadd.s32 %v4816_v17, %v4806_v10  ;;  %v10134_v46 = vsub.s32 32, %v4917_v3  ;;  %v5357_v40 = vadd.s32 3, %v5340_v49 }
 0x550   : > { %v5336_v14 = vsel %vm5215_vm1, %v5335_v8, %v5334_v29  ;;  %v4839_v0 = vadd.s32 %v4838_v23, %v4828_v56  ;;  %v4910_v44 = vand.u32 8388607, %v4903_v35  ;;  %v10140_v55 = vadd.s32 %v4833_v4, %v4829_v57 }
 0x551   : > { %v5339_v7 = vsel %vm10067_vm7, %v9768_v61, %v5336_v14  ;;  %v10138_v37 = vadd.s32 %v4817_v6, %v4808_v50  ;;  %v4841_v62 = vmul.u32 %v10023_v5, %v4787_v59  ;;  %v10143_v34 = vshrl.u32 %v4915_v51, 5 }
 0x552   : > { %v5341_v43 = vmul.f32 %v5339_v7, %v5339_v7  ;;  %v4840_v52 = vadd.s32 %v4839_v0, %v4830_v26  ;;  %v4923_v1 = vshll.u32 %v10337_v12, %v4917_v3  ;;  %v4924_v13 = vshrl.u32 %v10338_v42, %v10134_v46 }
 0x553   : > { %vm4843_vm1 = vc.u32 %v10138_v37, %v10140_v55  ;;  %v4927_v53 = vshrl.u32 %v10345_v38, %v10134_v46  ;;  %v4921_v5 = vshrl.u32 %v10337_v12, %v10134_v46  ;;  %v4926_v15 = vshll.u32 %v10338_v42, %v4917_v3 }
 0x554   : > { %v5342_v31 = vmul.f32 -0.001358992, %v5341_v43  ;;  %v5349_v41 = vmul.f32 -0.00019511016, %v5341_v43  ;;  %v4844_v49 = vadd.s32 1, %v4840_v52  ;;  %v4929_v33 = vshll.u32 %v10345_v38, %v4917_v3 }
 0x555   : > { %v4930_v32 = vshrl.u32 %v10339_v30, %v10134_v46  ;;  %v4932_v24 = vshll.u32 %v10339_v30, %v4917_v3  ;;  %v4933_v58 = vshrl.u32 %v10332_v11, %v10134_v46  ;;  %v4920_v25 = vshll.u32 %v10333_v47, %v4917_v3 }
 0x556   : > { %v5343_v28 = vadd.f32 0.041655596, %v5342_v31  ;;  %v5350_v20 = vadd.f32 0.008332121, %v5349_v41  ;;  %v4845_v2 = vsel %vm4843_vm1, %v4844_v49, %v4840_v52  ;;  %v10162_v57 = vor.u32 %v4924_v13, %v4923_v1 }
 0x557   : > { %v4846_v48 = vadd.s32 %v4845_v2, %v4841_v62  ;;  %v10164_v12 = vor.u32 %v4927_v53, %v4926_v15  ;;  %v4931_v42 = vor.u32 %v4930_v32, %v4929_v33  ;;  %v4934_v4 = vor.u32 %v4933_v58, %v4932_v24 }
 0x558   : > { %v5344_v16 = vmul.f32 %v5343_v28, %v5341_v43  ;;  %v5351_v27 = vmul.f32 %v5350_v20, %v5341_v43  ;;  %v5358_v29 = vand.u32 3, %v5357_v40  ;;  %v4911_v22 = vor.u32 8388608, %v4910_v44 }
 0x559   : > { %v4847_v9 = vadd.s32 536870912, %v4846_v48  ;;  %v10166_v30 = vor.u32 %v4921_v5, %v4920_v25  ;;  %vm4938_vm2 = vcmp.lt.s32.totalorder %v10143_v34, 4  ;;  %vm4935_vm4 = vcmp.lt.s32.totalorder %v10143_v34, 1 }
 0x55a   : > { %v5345_v45 = vadd.f32 -0.4999988, %v5344_v16  ;;  %v5352_v38 = vadd.f32 -0.16666654, %v5351_v27  ;;  %vm4937_vm6 = vcmp.lt.s32.totalorder %v10143_v34, 3  ;;  %v4947_v10 = vsel %vm4935_vm4, %v10162_v57, %v10164_v12 }
 0x55b   : > { %v10168_v56 = vshrl.u32 %v4847_v9, 30  ;;  %v4944_v11 = vsel %vm4938_vm2, %v4931_v42, 920167782  ;;  %v4948_v8 = vsel %vm4938_vm2, %v4934_v4, 1326507024  ;;  %v4943_v17 = vsel %vm4935_vm4, %v10166_v30, %v10162_v57 }
 0x55c   : > { %v5346_v63 = vmul.f32 %v5345_v45, %v5341_v43  ;;  %v5353_v54 = vmul.f32 %v5352_v38, %v5341_v43  ;;  %v4945_v23 = vsel %vm4937_vm6, %v10164_v12, %v4944_v11  ;;  %v4949_v3 = vsel %vm4937_vm6, %v4931_v42, %v4948_v8 }
 0x55d   : > { %v4849_v51 = vshll.u32 %v10168_v56, 30  ;;  %v10191_v14 = vshll.u32 %v4911_v22, 8  ;;  %vm4936_vm5 = vcmp.lt.s32.totalorder %v10143_v34, 2  ;;  %vm5359_vm7 = vcmp.lt.s32.totalorder %v5358_v29, 2 }
 0x55e   : > { %v5347_v19 = vadd.f32 1.0, %v5346_v63  ;;  %v5354_v39 = vadd.f32 1.0, %v5353_v54  ;;  %vm5360_vm8 = vcmp.eq.s32.totalorder %v5358_v29, 0  ;;  %v4950_v6 = vsel %vm4936_vm5, %v4947_v10, %v4949_v3 }
 0x55f   : > { %v4850_v26 = vsub.s32 %v4846_v48, %v4849_v51  ;;  %v4946_v40 = vsel %vm4936_vm5, %v4943_v17, %v4945_v23  ;;  %vm5363_vm9 = vcmp.eq.s32.totalorder %v5358_v29, 2  ;;  %v4952_v44 = vand.u32 65535, %v10191_v14 }
 0x560   : > { %v5355_v59 = vmul.f32 %v5354_v39, %v5339_v7  ;;  %v5364_v50 = vxor.u32 2147483648, %v5347_v19  ;;  %v4954_v7 = vand.u32 65535, %v4950_v6  ;;  %v4955_v52 = vshrl.u32 %v4950_v6, 16 }
 0x561   : > { %vm4851_vm10 = vcmp.lt.s32.totalorder %v4850_v26, 0  ;;  %v4852_v43 = vsub.s32 0, %v4850_v26  ;;  %v4953_v1 = vshrl.u32 %v10191_v14, 16  ;;  %vm5356_vm11 = vweird.f32 %v9768_v61 }
 0x562   : > { %v5361_v0 = vxor.u32 2147483648, %v5355_v59  ;;  %v5365_v31 = vsel %vm5363_vm9, %v5364_v50, %v5355_v59  ;;  %v4977_v53 = vshrl.u32 %v4946_v40, 16  ;;  %v4957_v20 = vmul.u32 %v4955_v52, %v4952_v44 }
 0x563   : > { %v4853_v41 = vsel %vm4851_vm10, %v4852_v43, %v4850_v26  ;;  %v4958_v5 = vmul.u32 %v4954_v7, %v4953_v1  ;;  %v4976_v15 = vand.u32 65535, %v4946_v40  ;;  %v4842_v33 = vadd.s32 %v10140_v55, %v10138_v37 }
 0x564   : > { %v5362_v62 = vsel %vm5360_vm8, %v5347_v19, %v5361_v0  ;;  %v4854_v13 = vclz %v4853_v41  ;;  %v4956_v32 = vmul.u32 %v4954_v7, %v4952_v44  ;;  %v4959_v24 = vmul.u32 %v4955_v52, %v4953_v1 }
 0x565   : > { %v5366_v49 = vsel %vm5359_vm7, %v5362_v62, %v5365_v31  ;;  %v4960_v16 = vshll.u32 %v4957_v20, 16  ;;  %v4961_v27 = vshrl.u32 %v4957_v20, 16  ;;  %v4962_v48 = vshll.u32 %v4958_v5, 16 }
 0x566   : > { %v5367_v28 = vsel %vm5356_vm11, nan, %v5366_v49  ;;  %v5946_v2 = vadd.s32 4294967294, %v4854_v13  ;;  %v4979_v61 = vmul.u32 %v4977_v53, %v4952_v44  ;;  %v4980_v42 = vmul.u32 %v4976_v15, %v4953_v1 }
 0x567   : > { %5707 = vst [vmem:[%s6717_s9 + $0xe8] sm:$0xff] %v5367_v28  ;;  %vm4964_vm14 = vc.u32 %v4956_v32, %v4960_v16  ;;  %v4966_v25 = vadd.s32 %v4960_v16, %v4956_v32  ;;  %v4978_v4 = vmul.u32 %v4976_v15, %v4952_v44  ;;  %v4981_v22 = vmul.u32 %v4977_v53, %v4953_v1 }
 0x568   : > { %vm5947_vm12 = vcmp.lt.s32.totalorder %v5946_v2, 0  ;;  %v4965_v9 = vsel %vm4964_vm14, 1, %v10343_v36  ;;  %v4982_v37 = vshll.u32 %v4979_v61, 16  ;;  %v4984_v19 = vshll.u32 %v4980_v42, 16 }
 0x569   : > { %v4857_v58 = vsel %vm5947_vm12, 0, %v5946_v2  ;;  %v4967_v29 = vadd.s32 %v4965_v9, %v4959_v24  ;;  %vm4968_vm13 = vc.u32 %v4966_v25, %v4962_v48  ;;  %v4919_v17 = vshrl.u32 %v10333_v47, %v10134_v46 }
 0x56a   : > { %v4858_v45 = vsub.s32 32, %v4857_v58  ;;  %v4862_v38 = vsub.s32 4294967266, %v4857_v58  ;;  %v4859_v55 = vshll.u32 %v4850_v26, %v4857_v58  ;;  %v4969_v11 = vsel %vm4968_vm13, 1, %v10343_v36 }
 0x56b   : > { %v4971_v8 = vadd.s32 %v4969_v11, %v4967_v29  ;;  %vm4986_vm15 = vc.u32 %v4978_v4, %v4982_v37  ;;  %v4988_v39 = vadd.s32 %v4982_v37, %v4978_v4  ;;  %v4940_v3 = vsel %vm4938_vm2, %v10164_v12, 2102212464 }
 0x56c   : > { %v4860_v63 = vshrl.u32 %v4842_v33, %v4858_v45  ;;  %v4863_v54 = vadd.s32 127, %v4862_v38  ;;  %v4987_v23 = vsel %vm4986_vm15, 1, %v10343_v36  ;;  %v4963_v6 = vshrl.u32 %v4958_v5, 16 }
 0x56d   : > { %v4972_v59 = vadd.s32 %v4971_v8, %v4961_v27  ;;  %v4989_v50 = vadd.s32 %v4987_v23, %v4981_v22  ;;  %vm4990_vm0 = vc.u32 %v4988_v39, %v4984_v19  ;;  %v4939_v43 = vsel %vm4935_vm4, %v4919_v17, %v10166_v30 }
 0x56e   : > { %v4861_v51 = vor.u32 %v4860_v63, %v4859_v55  ;;  %v4864_v10 = vshll.u32 %v4863_v54, 23  ;;  %v4991_v0 = vsel %vm4990_vm0, 1, %v10343_v36  ;;  %v4983_v40 = vshrl.u32 %v4979_v61, 16 }
 0x56f   : > { %v4993_v44 = vadd.s32 %v4991_v0, %v4989_v50  ;;  %v4941_v7 = vsel %vm4937_vm6, %v10162_v57, %v4940_v3  ;;  %v4973_v12 = vadd.s32 %v4972_v59, %v4963_v6  ;;  %v4985_v52 = vshrl.u32 %v4980_v42, 16 }
 0x570   : > { %v4865_v26 = vor.u32 4788187, %v4864_v10  ;;  %v4868_v46 = vcvt.s32.f32 %v4861_v51  ;;  %v4992_v41 = vadd.s32 %v4988_v39, %v4984_v19  ;;  %v4942_v36 = vsel %vm4936_vm5, %v4939_v43, %v4941_v7 }
 0x571   : > { %v4994_v62 = vadd.s32 %v4993_v44, %v4983_v40  ;;  %vm4750_vm1 = vcmp.lt.s32.totalorder %v9983_v18, 0  ;;  %vm10225_vm2 = vcmp.le.f32.partialorder %v4748_v60, 0.7853982  ;;  %v4996_v53 = vmul.u32 %v10191_v14, %v4942_v36 }
 0x572   : > { %v4866_v47 = vand.u32 2147483647, %v4865_v26  ;;  %vm4998_vm3 = vc.u32 %v4973_v12, %v4992_v41  ;;  %v4872_v28 = vsub.s32 4, %v10168_v56  ;;  %vm4891_vm6 = vweird.f32 %v9983_v18 }
 0x573   : > { %v4995_v1 = vadd.s32 %v4994_v62, %v4985_v52  ;;  %v4997_v23 = vadd.s32 %v4992_v41, %v4973_v12  ;;  %vm4905_vm9 = vcmp.lt.s32.totalorder %v10002_v21, 0  ;;  %vm4904_vm11 = vcmp.le.f32.partialorder %v4903_v35, 0.7853982 }
 0x574   : > { %v4869_v31 = vmul.f32 %v4868_v46, %v4866_v47  ;;  %v4873_v60 = vsel %vm4750_vm1, %v4872_v28, %v10168_v56  ;;  %vm5046_vm15 = vweird.f32 %v10002_v21 }
 0x575   : > { %v4999_v30 = vadd.s32 1, %v4995_v1  ;;  %v4875_v14 = vsel %vm10225_vm2, 0, %v4873_v60 }
 0x576   : > { %v4870_v49 = vxor.u32 2147483648, %v4869_v31  ;;  %v4892_v38 = vadd.s32 3, %v4875_v14 }
 0x577   : > { %v5000_v20 = vsel %vm4998_vm3, %v4999_v30, %v4995_v1 }
 0x578   : > { %v4871_v57 = vsel %vm4750_vm1, %v4870_v49, %v4869_v31  ;;  %v5001_v15 = vadd.s32 %v5000_v20, %v4996_v53  ;;  %v4893_v55 = vand.u32 3, %v4892_v38 }
 0x579   : > { %v4874_v34 = vsel %vm10225_vm2, %v9983_v18, %v4871_v57 }
 0x57a   : > { %v4876_v5 = vmul.f32 %v4874_v34, %v4874_v34  ;;  %v5002_v32 = vadd.s32 536870912, %v5001_v15  ;;  %vm4895_vm5 = vcmp.eq.s32.totalorder %v4893_v55, 0  ;;  %vm4898_vm7 = vcmp.eq.s32.totalorder %v4893_v55, 2 }
 0x57b   : > { %vm4894_vm10 = vcmp.lt.s32.totalorder %v4893_v55, 2 }
 0x57c   : > { %v4877_v2 = vmul.f32 -0.001358992, %v4876_v5  ;;  %v4884_v33 = vmul.f32 -0.00019511016, %v4876_v5  ;;  %v5003_v27 = vshrl.u32 %v5002_v32, 30 }
 0x57e   : > { %v4878_v24 = vadd.f32 0.041655596, %v4877_v2  ;;  %v4885_v16 = vadd.f32 0.008332121, %v4884_v33  ;;  %v5004_v58 = vshll.u32 %v5003_v27, 30  ;;  %v5027_v52 = vsub.s32 4, %v5003_v27 }
 0x580   : > { %v4879_v48 = vmul.f32 %v4878_v24, %v4876_v5  ;;  %v4886_v61 = vmul.f32 %v4885_v16, %v4876_v5  ;;  %v5005_v45 = vsub.s32 %v5001_v15, %v5004_v58  ;;  %v5028_v1 = vsel %vm4905_vm9, %v5027_v52, %v5003_v27 }
 0x581   : > { %v5030_v13 = vsel %vm4904_vm11, 0, %v5028_v1 }
 0x582   : > { %v4880_v25 = vadd.f32 -0.4999988, %v4879_v48  ;;  %v4887_v42 = vadd.f32 -0.16666654, %v4886_v61  ;;  %vm5006_vm4 = vcmp.lt.s32.totalorder %v5005_v45, 0  ;;  %v5007_v29 = vsub.s32 0, %v5005_v45 }
 0x583   : > { %v5047_v20 = vadd.s32 3, %v5030_v13 }
 0x584   : > { %v4881_v9 = vmul.f32 %v4880_v25, %v4876_v5  ;;  %v4888_v4 = vmul.f32 %v4887_v42, %v4876_v5  ;;  %v5008_v56 = vsel %vm5006_vm4, %v5007_v29, %v5005_v45 }
 0x585   : > { %v5009_v63 = vclz %v5008_v56  ;;  %v5048_v33 = vand.u32 3, %v5047_v20 }
 0x586   : > { %v4882_v22 = vadd.f32 1.0, %v4881_v9  ;;  %v4889_v37 = vadd.f32 1.0, %v4888_v4 }
 0x587   : > { %v5949_v8 = vadd.s32 4294967294, %v5009_v63  ;;  %vm5050_vm12 = vcmp.eq.s32.totalorder %v5048_v33, 0  ;;  %vm5053_vm14 = vcmp.eq.s32.totalorder %v5048_v33, 2  ;;  %vm5049_vm13 = vcmp.lt.s32.totalorder %v5048_v33, 2 }
 0x588   : > { %v4890_v54 = vmul.f32 %v4889_v37, %v4874_v34  ;;  %v4899_v11 = vxor.u32 2147483648, %v4882_v22 }
 0x589   : > { %vm5950_vm8 = vcmp.lt.s32.totalorder %v5949_v8, 0 }
 0x58a   : > { %v4896_v19 = vxor.u32 2147483648, %v4890_v54  ;;  %v4900_v51 = vsel %vm4898_vm7, %v4899_v11, %v4890_v54  ;;  %v5012_v10 = vsel %vm5950_vm8, 0, %v5949_v8 }
 0x58b   : > { %v5013_v3 = vsub.s32 32, %v5012_v10  ;;  %v5017_v59 = vsub.s32 4294967266, %v5012_v10  ;;  %v5014_v26 = vshll.u32 %v5005_v45, %v5012_v10 }
 0x58c   : > { %v4897_v39 = vsel %vm4895_vm5, %v4882_v22, %v4896_v19 }
 0x58d   : > { %v4901_v17 = vsel %vm4894_vm10, %v4897_v39, %v4900_v51  ;;  %v5015_v6 = vshrl.u32 %v4997_v23, %v5013_v3  ;;  %v5018_v0 = vadd.s32 127, %v5017_v59 }
 0x58e   : > { %v4902_v50 = vsel %vm4891_vm6, nan, %v4901_v17 }
 0x58f   : > { %5704 = vst [vmem:[%s6717_s9 + $0xd0] sm:$0xff] %v4902_v50  ;;  %v5016_v43 = vor.u32 %v5015_v6, %v5014_v26  ;;  %v5019_v40 = vshll.u32 %v5018_v0, 23 }
 0x591   : > { %v5020_v18 = vor.u32 4788187, %v5019_v40  ;;  %v5023_v47 = vcvt.s32.f32 %v5016_v43 }
 0x593   : > { %v5021_v44 = vand.u32 2147483647, %v5020_v18 }
 0x595   : > { %v5024_v46 = vmul.f32 %v5023_v47, %v5021_v44 }
 0x597   : > { %v5025_v7 = vxor.u32 2147483648, %v5024_v46 }
 0x599   : > { %v5026_v12 = vsel %vm4905_vm9, %v5025_v7, %v5024_v46 }
 0x59a   : > { %v5029_v62 = vsel %vm4904_vm11, %v10002_v21, %v5026_v12 }
 0x59b   : > { %v5031_v31 = vmul.f32 %v5029_v62, %v5029_v62 }
 0x59d   : > { %v5032_v41 = vmul.f32 -0.001358992, %v5031_v31  ;;  %v5039_v36 = vmul.f32 -0.00019511016, %v5031_v31 }
 0x59f   : > { %v5033_v49 = vadd.f32 0.041655596, %v5032_v41  ;;  %v5040_v30 = vadd.f32 0.008332121, %v5039_v36 }
 0x5a1   : > { %v5034_v57 = vmul.f32 %v5033_v49, %v5031_v31  ;;  %v5041_v53 = vmul.f32 %v5040_v30, %v5031_v31 }
 0x5a3   : > { %v5035_v28 = vadd.f32 -0.4999988, %v5034_v57  ;;  %v5042_v34 = vadd.f32 -0.16666654, %v5041_v53 }
 0x5a5   : > { %v5036_v5 = vmul.f32 %v5035_v28, %v5031_v31  ;;  %v5043_v35 = vmul.f32 %v5042_v34, %v5031_v31 }
 0x5a7   : > { %v5037_v15 = vadd.f32 1.0, %v5036_v5  ;;  %v5044_v2 = vadd.f32 1.0, %v5043_v35 }
 0x5a9   : > { %v5045_v32 = vmul.f32 %v5044_v2, %v5029_v62  ;;  %v5054_v60 = vxor.u32 2147483648, %v5037_v15 }
 0x5ab   : > { %v5051_v24 = vxor.u32 2147483648, %v5045_v32  ;;  %v5055_v27 = vsel %vm5053_vm14, %v5054_v60, %v5045_v32 }
 0x5ad   : > { %v5052_v16 = vsel %vm5050_vm12, %v5037_v15, %v5051_v24 }
 0x5ae   : > { %v5056_v14 = vsel %vm5049_vm13, %v5052_v16, %v5055_v27 }
 0x5af   : > { %v5057_v48 = vsel %vm5046_vm15, nan, %v5056_v14 }
 0x5b0   : > { %5705 = vst [vmem:[%s6717_s9 + $0xd8] sm:$0xff] %v5057_v48 }
 0x5b1   : > { %6063 = shalt.err (!%p6060_p3)
}
 0x5b2   : > { %s6123_s7 = smov 256   ;;  %s6124_s8 = smov 16  }
 0x5b3   : > { %5969 = dma.vmem_to_hbm [thread:$0]  (%p6190_p4), %s5729_s14, 4096, %s5731_s21, %s5711_s18, %s6123_s7, %s6123_s7, %s6124_s8  }
 0x5b4 PF: > { %p5975_p5 = scmp.ge.s32.totalorder %s6114_s20, 2  ;;  %s5745_s9 = sand.u32 1, %s6094_s15  }
 0x5b5   : > { %s5746_s10 = scalar_lea.sflag [#allocation3], %s5745_s9 }
 0x5b6   : > { %p5972_p6 = pnand %p5975_p5, %p6197_p8 }
 0x5b8   : > { %p5973_p7 = pneg %p5972_p6 }
 0x5ba   : > { %6089 = dma.done.wait (%p5973_p7), %s5746_s10, 4096  }
 0x5bb   : > { %6091 = vsyncadd (%p5973_p7), %s5746_s10, 4294963200  ;;  %s17_s20 = sadd.s32 1, %s6114_s20   ;;  %s10422_s15 = smov %s6098_s16 }
 0x5bc   : > { %p14_p9 = scmp.ge.s32.totalorder %s17_s20, 4   ;;  %s10423_s16 = smov %s6102_s17 }
 0x5bd   : > { %s10424_s17 = smov %s6203_s28  ;;  %s10425_s18 = smov %s6110_s19 }
 0x5be   : > { %s10426_s19 = smov %s10428_s23  ;;  %16 = sbr.rel (!%p14_p9) target bundleno = 4 (0x4), region = 81 }
 0x5c3   :  { %5752 = vsyncpa [#allocation3], 1 }
 0x5c4   :  { %5754 = vsyncpa [#allocation3 + $0x1], 1 }

</bundles_post_ra>
